<compile_context>
chip_gen: v7x
topology: tpu7x:2x2x1
jax: 0.10.0
libtpu: 0.0.40
codegen_flags: <defaults>
</compile_context>

<pallas_src>
import functools
import math

import jax
import jax.numpy as jnp
from jax.experimental import pallas as pl
from jax.experimental.pallas import tpu as pltpu


def _rope_table_kernel(params_ref, out_ref, *, positions_per_row: int):
    """Writes one (tile_rows, W) block of the packed sin|cos table.

    params_ref: (2, W) f32 in VMEM:
        row 0: inv_freq per lane       ( = inv_freq[(lane % dim) % half] )
        row 1: per-lane bias           ( = (lane // dim) * inv_freq_lane
                                           + (0 if sin-lane else pi/2) )
    out_ref:    (tile_rows, W) f32 block of the packed table.
    """
    tile_rows, w = out_ref.shape
    inv_lane = params_ref[0:1, :]      # (1, W)
    bias = params_ref[1:2, :]          # (1, W)

    # Base packed-position of this tile (scalar, int32).
    base_pos = pl.program_id(0) * (tile_rows * positions_per_row)
    row = jax.lax.broadcasted_iota(jnp.int32, (tile_rows, w), 0)
    pos = (base_pos + row * positions_per_row).astype(jnp.float32)
    # cos lanes carry a +pi/2 phase inside `bias`, so a single sin suffices.
    out_ref[...] = jnp.sin(pos * inv_lane + bias)


def _round_up(x: int, m: int) -> int:
    return (x + m - 1) // m * m


def _build_rope_table(inv_freq: jax.Array, dim: int, seq_len: int) -> jax.Array:
    """Returns the (seq_len, dim) f32 table [sin(p*f) | cos(p*f)]."""
    half = dim // 2
    k = 128 // math.gcd(dim, 128)      # positions packed per row
    w = k * dim                        # packed row width (multiple of 128)

    n_rows = pl.cdiv(seq_len, k)       # packed rows actually needed
    n_rows8 = _round_up(n_rows, 8)

    # Big blocks (<= 4 MiB => <= 8 MiB double-buffered) to amortize per-step
    # overhead; keep >= 2 grid steps for non-tiny tables so v7x's two
    # TensorCores both get work, while staying far under every chip's
    # scoped-VMEM default.
    max_block_bytes = 4 * 1024 * 1024
    cap_rows = max(8, (max_block_bytes // (w * 4)) // 8 * 8)
    if n_rows8 <= 16:
        tile_rows = n_rows8
    else:
        tile_rows = min(cap_rows, _round_up(pl.cdiv(n_rows8, 2), 8))
    rows_pad = _round_up(n_rows8, tile_rows)
    grid = (rows_pad // tile_rows,)

    # Per-lane parameters (host/XLA side, exact match with the einsum formula).
    lane = jnp.arange(w, dtype=jnp.int32)
    col = lane % dim
    inv_lane = inv_freq[col % half].astype(jnp.float32)        # (W,)
    pos_off = (lane // dim).astype(jnp.float32)                 # (W,)
    phase = jnp.where(col < half,
                      jnp.float32(0.0),
                      jnp.float32(math.pi / 2.0))               # (W,)
    bias = pos_off * inv_lane + phase                           # (W,)
    params = jnp.stack([inv_lane, bias], axis=0)                # (2, W)

    packed = pl.pallas_call(
        functools.partial(_rope_table_kernel, positions_per_row=k),
        out_shape=jax.ShapeDtypeStruct((rows_pad, w), jnp.float32),
        grid_spec=pltpu.PrefetchScalarGridSpec(
            num_scalar_prefetch=0,
            grid=grid,
            in_specs=[pl.BlockSpec((2, w), lambda i: (0, 0))],
            out_specs=pl.BlockSpec((tile_rows, w), lambda i: (i, 0)),
        ),
        compiler_params=pltpu.CompilerParams(
            dimension_semantics=("parallel",),
        ),
    )(params)

    # Free row-major reshape back to (positions, dim), then drop padding.
    return packed.reshape(rows_pad * k, dim)[:seq_len]


class LlamaRotaryEmbeddingPallas:
    """JAX/Pallas equivalent of the PyTorch LlamaRotaryEmbedding module."""

    def __init__(self, dim: int, max_position_embeddings: int = 2048,
                 base: float = 10000.0):
        assert dim % 2 == 0, "dim must be even"
        self.dim = dim
        self.max_position_embeddings = max_position_embeddings
        # Identical to the torch buffer formula.
        self.inv_freq = (
            1.0 / base ** (jnp.arange(0, dim, 2, dtype=jnp.float32) / dim)
        )  # (dim // 2,)
        # Static table: build once with the Pallas kernel, slice per forward.
        self._emb_cache = _build_rope_table(
            self.inv_freq, dim, max_position_embeddings
        )  # (max_position_embeddings, dim) f32

    def __call__(self, x, seq_len: int):
        # x is only a device/dtype placement carrier in the torch module; the
        # returned table is always float32 there, so we match that.
        if seq_len <= 0:
            seq_len = 1
        if seq_len > self.max_position_embeddings:
            seq_len = self.max_position_embeddings
        emb = self._emb_cache[:seq_len]
        return emb[None, None, :, :]   # (1, 1, seq_len, dim)


def _reference(inv_freq, seq_len, dim):
    pos = jnp.arange(seq_len, dtype=jnp.float32)
    sincos = jnp.einsum("i,j->ij", pos, inv_freq)
    emb = jnp.concatenate([jnp.sin(sincos), jnp.cos(sincos)], axis=-1)
    return emb[None, None, :, :]


if __name__ == "__main__":
    key = jax.random.PRNGKey(0)
    batch, n_heads, seq_len, dim = 2, 4, 8, 64

    # x is only a placement/dtype carrier in the torch module's forward.
    x = jax.random.normal(key, (batch, n_heads, seq_len, dim), dtype=jnp.float32)

    rope = LlamaRotaryEmbeddingPallas(dim=dim, max_position_embeddings=2048,
                                      base=10000.0)
    out = rope(x, seq_len)
    out = jax.block_until_ready(out)

    ref = _reference(rope.inv_freq, seq_len, dim)
    assert out.shape == (1, 1, seq_len, dim), out.shape
    assert out.dtype == jnp.float32
    assert jnp.allclose(out, ref, atol=1e-5, rtol=1e-5), "mismatch vs reference"

    # Also validate the full cached table (covers both grid steps and the
    # lane-packed layout); loose atol tolerates transcendental / phase-fold
    # rounding at large angles while still catching any layout/indexing bug.
    full = jax.block_until_ready(rope(x, 2048))
    ref_full = _reference(rope.inv_freq, 2048, dim)
    assert full.shape == (1, 1, 2048, dim)
    assert jnp.allclose(full, ref_full, atol=2e-3, rtol=0.0), "mismatch (full table)"

    print("KERNEL_OK")
</pallas_src>

<mosaic_0001>
module attributes {stable_mosaic.version = 11 : i64} {
  func.func @_rope_table_kernel(%arg0: i32, %arg1: memref<2x128xf32, #tpu.memory_space<vmem>>, %arg2: memref<512x128xf32, #tpu.memory_space<vmem>>) attributes {dimension_semantics = [#tpu.dimension_semantics<parallel>], iteration_bounds = array<i64: 2>, scalar_prefetch = 0 : i64, scratch_operands = 0 : i64, tpu.core_type = #tpu.core_type<tc>, window_params = [{pipeline_mode = #tpu.pipeline_mode<synchronous>, transform_indices = @transform_0, window_bounds = array<i64: 2, 128>}, {transform_indices = @transform_1, window_bounds = array<i64: 512, 128>}]} {
    %c0 = arith.constant 0 : index
    %c0_0 = arith.constant 0 : index
    %0 = vector.load %arg1[%c0, %c0_0] : memref<2x128xf32, #tpu.memory_space<vmem>>, vector<1x128xf32>
    %c1 = arith.constant 1 : index
    %c0_1 = arith.constant 0 : index
    %1 = vector.load %arg1[%c1, %c0_1] : memref<2x128xf32, #tpu.memory_space<vmem>>, vector<1x128xf32>
    %c1024_i32 = arith.constant 1024 : i32
    %2 = arith.muli %arg0, %c1024_i32 : i32
    %3 = tpu.iota {dimensions = array<i32: 0>} : vector<512x128xi32>
    %c2_i32 = arith.constant 2 : i32
    %4 = vector.broadcast %c2_i32 : i32 to vector<512x128xi32>
    %5 = arith.muli %3, %4 : vector<512x128xi32>
    %6 = vector.broadcast %2 : i32 to vector<512x128xi32>
    %7 = arith.addi %6, %5 : vector<512x128xi32>
    %8 = arith.sitofp %7 : vector<512x128xi32> to vector<512x128xf32>
    %9 = vector.broadcast %0 : vector<1x128xf32> to vector<512x128xf32>
    %10 = arith.mulf %8, %9 : vector<512x128xf32>
    %11 = vector.broadcast %1 : vector<1x128xf32> to vector<512x128xf32>
    %12 = arith.addf %10, %11 : vector<512x128xf32>
    %13 = math.sin %12 : vector<512x128xf32>
    %c0_2 = arith.constant 0 : index
    %c0_3 = arith.constant 0 : index
    %14 = vector.load %arg2[%c0_2, %c0_3] : memref<512x128xf32, #tpu.memory_space<vmem>>, vector<512x128xf32>
    tpu.vector_store %arg2[%c0_2, %c0_3], %13 {strides = array<i32>} : memref<512x128xf32, #tpu.memory_space<vmem>>, vector<512x128xf32>,
    return
  }
  func.func @transform_0(%arg0: i32) -> (i32, i32) {
    %c0_i32 = arith.constant 0 : i32
    %c0_i32_0 = arith.constant 0 : i32
    %c0_i32_1 = arith.constant 0 : i32
    return %c0_i32, %c0_i32_0 : i32, i32
  }
  func.func @transform_1(%arg0: i32) -> (i32, i32) {
    %c0_i32 = arith.constant 0 : i32
    %c0_i32_0 = arith.constant 0 : i32
    return %arg0, %c0_i32 : i32, i32
  }
}

</mosaic_0001>

<bundles_post_ra>
// kernel: tpu_custom_call.1
= control target key start
LH: loop header
LB: loop body
LE: loop exit
PB: predicated region body
PF: predicated region fallthrough
CT: control target
= control target key end

     0   :  { %6 = vsyncpa [#allocation3], 0  ;;  %s15031_s0 = inlined_call_operand.hbm [shape: f32[2,128], index: 0, kind: input, shape index: {}]   ;;  %s15032_s1 = inlined_call_operand.hbm [shape: f32[1024,128], index: 1, kind: output, shape index: {}]  }
   0x1   :  { %7 = vsyncpa [#allocation4], 0 }
   0x2   :  { %9 = vsyncpa [#allocation4 + $0x1], 0  ;;  %s8259_s6 = smov 0   ;;  %s8261_s7 = smov 0  }
   0x3   :  { %s8263_s8 = smov 0   ;;  %s8265_s9 = smov 0  }
   0x4 LB: > { %s8280_s10 = sadd.s32 4294967295, %s8237_s9   ;;  %s7302_s11 = sadd.s32 4294967294, %s8237_s9   ;;  %s8237_s9 = sphi %s8265_s9, %s15492_s9   ;;  %s8233_s8 = sphi %s8263_s8, %s15491_s8   ;;  %s8229_s7 = sphi %s8261_s7, %s15490_s7   ;;  %s8225_s6 = sphi %s8259_s6, %s15489_s6  }
   0x5   : > { %s8284_s12 = sadd.s32 1, %s8237_s9   ;;  %s43_s13 = sadd.s32 1, %s8233_s8 }
   0x6   : > { %s40_s14 = ssub.s32 %s8237_s9, %s8284_s12  ;;  %p53_p0 = scmp.ne.s32.totalorder %s8233_s8, %s8229_s7 }
   0x7   : > { %p41_p1 = scmp.eq.s32.totalorder %s40_s14, 0  ;;  %p54_p2 = scmp.eq.s32.totalorder %s8280_s10, 1 }
   0x8   : > { %p59_p3 = scmp.ne.s32.totalorder %s8229_s7, %s8225_s6  ;;  %p60_p4 = scmp.eq.s32.totalorder %s7302_s11, 1 }
   0x9   : > { %s8295_s15 = scalar_select %p41_p1, %s8233_s8, %s43_s13  }
   0xa   : > { %p8297_p5 = por %p54_p2, %p53_p0  ;;  %p8301_p6 = por %p60_p4, %p59_p3 }
   0xb   : > { %p7303_p7 = scmp.ge.s32.totalorder %s8237_s9, 1  ;;  %p67_p8 = scmp.lt.s32.totalorder %s8237_s9, 3 }
   0xc   : > { %s15114_s16 = scalar_select %p8297_p5, 1, 0 }
   0xd   : > { %s15115_s17 = scalar_select %p8301_p6, 1, 0 }
   0xe   : > { %p15033_p9 = scmp.eq.s32.totalorder %s8280_s10, 0  ;;  %p8308_p10 = pnand %p7303_p7, %p67_p8 }
   0xf   : > { %s8239_s19 = smov [#allocation2]   ;;  %s8143_s24 = scalar_lea.hbm %s15031_s0, 32 }
  0x10   : > { %s15116_s18 = scalar_select %p8308_p10, 1, 0 }
  0x11   : > { %s80_s20 = sshll.u32 %s8239_s19, 4  ;;  %p7835_p11 = pneg %p8308_p10  ;;  %s81_s20 = int_to_ptr.vmem [resolvable:$true] %s80_s20 }
  0x12   : > { %p8144_p13 = scmp.ne.s32.totalorder %s15031_s0, %s8143_s24  ;;  %p8150_p3 = scmp.lt.u32.totalorder %s8143_s24, %s15031_s0 }
  0x13   : > { %p8316_p12 = pnand %p15033_p9, %p7835_p11 }
  0x15   : > { %p8145_p0 = pneg %p8316_p12 }
  0x17   : > { %p8146_p1 = pnand %p8145_p0, %p8144_p13 }
  0x19   : > { %p8147_p2 = pneg %p8146_p1 }
  0x1b   : > { %p8152_p4 = pnand %p8150_p3, %p8147_p2 }
  0x1d   : > { %8155 = shalt.err (!%p8152_p4)
}
  0x1e   : > { %s8156_s29 = scalar_lea.vmem %s81_s20, 32  ;;  %p8164_p9 = scmp.lt.s32.totalorder %s81_s20, %s81_s20 }
  0x1f   : > { %p8157_p7 = scmp.ne.s32.totalorder %s81_s20, %s8156_s29  ;;  %p8165_p6 = scmp.lt.s32.totalorder %s8156_s29, %s8156_s29 }
  0x21   : > { %p8159_p8 = pnand %p8157_p7, %p8145_p0  ;;  %p8166_p5 = por %p8165_p6, %p8164_p9 }
  0x23   : > { %p8160_p11 = pneg %p8159_p8 }
  0x25   : > { %p8167_p10 = pnand %p8166_p5, %p8160_p11 }
  0x27   : > { %8170 = shalt.err (!%p8167_p10)
}
  0x28   : > { %7838 = dma.hbm_to_vmem [thread:$0]  (!%p8316_p12), %s15031_s0, 32, %s81_s20, [#allocation3]  }
  0x29   : > { %p15118_p13 = scmp.ne.s32.totalorder %s15116_s18, 0 }
  0x2b   : > { %93 = sbr.rel (%p15118_p13) target bundleno = 1785 (0x6f9), region = 24 }
  0x32   : > { %p15119_p1 = scmp.eq.s32.totalorder %s8280_s10, 0 }
  0x34   : > { %8216 = dma.done.wait (%p15119_p1), [#allocation3], 32   ;;  %p15120_p0 = pmov %p15119_p1 }
  0x35   : > { %v112_v0 = vlaneseq  ;;  %s7308_s3 = sshll.u32 %s8280_s10, 10  ;;  %s105_s4 = sand.u32 1, %s8229_s7  }
  0x36   : > { %8218 = vsyncadd (%p15120_p0), [#allocation3], 4294967264  ;;  %v8348_v3 = vstv %s7308_s3  ;;  %s9691_s5 = sshll.u32 %s105_s4, 9  ;;  %s7572_s13 = sshll.u32 %s8280_s10, 13 }
  0x37   : > { %v8343_v1 = vshrl.u32 %v112_v0, 7  ;;  %15121 = vst [vmem:[#allocation8_spill] sm:$0xff] %v8348_v3  ;;  %s9727_s11 = scalar_lea.vmem [#allocation5], %s9691_s5  ;;  %s14983_s20 = scalar_lea.hbm %s15032_s1, %s7572_s13 }
  0x38   : > { %s7240_s14 = sshll.u32 %s9727_s11, 4  ;;  %s14990_s10 = scalar_lea.sflag [#allocation4], %s105_s4  ;;  %s14985_s14 = int_to_ptr.vmem [resolvable:$true] %s7240_s14 }
  0x39   : > { %v8346_v2 = vadd.s32 8, %v8343_v1  ;;  %v8351_v4 = vadd.s32 16, %v8343_v1  ;;  %v8354_v5 = vadd.s32 24, %v8343_v1  ;;  %v8357_v6 = vadd.s32 32, %v8343_v1  ;;  %s8171_s21 = scalar_lea.vmem %s14985_s14, 8192  ;;  %p15487_p6 = scmp.ne.s32.totalorder %s15114_s16, 0 }
  0x3a   : > { %v8360_v7 = vadd.s32 40, %v8343_v1  ;;  %v8363_v8 = vadd.s32 48, %v8343_v1  ;;  %v8366_v9 = vadd.s32 56, %v8343_v1  ;;  %v8369_v10 = vadd.s32 64, %v8343_v1  ;;  %p8172_p5 = scmp.ne.s32.totalorder %s14985_s14, %s8171_s21  ;;  %s8246_s22 = smov [#allocation5]  }
  0x3b   : > { %15122 = vst [vmem:[#allocation9_spill] sm:$0xff] %v8354_v5  ;;  %v8372_v11 = vadd.s32 72, %v8343_v1  ;;  %v8375_v12 = vadd.s32 80, %v8343_v1  ;;  %v8378_v13 = vadd.s32 88, %v8343_v1  ;;  %v8381_v14 = vadd.s32 96, %v8343_v1  ;;  %s8175_s23 = sshll.u32 %s8246_s22, 4  ;;  %s8176_s23 = int_to_ptr.vmem [resolvable:$false] %s8175_s23 }
  0x3c   : > { %v8384_v15 = vadd.s32 104, %v8343_v1  ;;  %v8387_v16 = vadd.s32 112, %v8343_v1  ;;  %v8390_v17 = vadd.s32 120, %v8343_v1  ;;  %v8393_v18 = vadd.s32 128, %v8343_v1  ;;  %p8173_p9 = pnand %p8172_p5, %p15487_p6  ;;  %s8177_s24 = scalar_lea.vmem %s8176_s23, 16384 }
  0x3d   : > { %v8396_v19 = vadd.s32 136, %v8343_v1  ;;  %v8399_v20 = vadd.s32 144, %v8343_v1  ;;  %v8402_v21 = vadd.s32 152, %v8343_v1  ;;  %v8405_v22 = vadd.s32 160, %v8343_v1  ;;  %p8178_p12 = scmp.lt.s32.totalorder %s14985_s14, %s8176_s23  ;;  %p8179_p2 = scmp.lt.s32.totalorder %s8177_s24, %s8171_s21 }
  0x3e   : > { %v8408_v23 = vadd.s32 168, %v8343_v1  ;;  %v8411_v24 = vadd.s32 176, %v8343_v1  ;;  %v8414_v25 = vadd.s32 184, %v8343_v1  ;;  %v8417_v26 = vadd.s32 192, %v8343_v1  ;;  %p8174_p10 = pneg %p8173_p9 }
  0x3f   : > { %v8420_v27 = vadd.s32 200, %v8343_v1  ;;  %v8423_v28 = vadd.s32 208, %v8343_v1  ;;  %v8426_v29 = vadd.s32 216, %v8343_v1  ;;  %v8429_v30 = vadd.s32 224, %v8343_v1  ;;  %p8180_p3 = por %p8179_p2, %p8178_p12 }
  0x40   : > { %v8432_v31 = vadd.s32 232, %v8343_v1  ;;  %v8435_v32 = vadd.s32 240, %v8343_v1  ;;  %v8438_v33 = vadd.s32 248, %v8343_v1  ;;  %v8441_v34 = vadd.s32 256, %v8343_v1 }
  0x41   : > { %v8444_v35 = vadd.s32 264, %v8343_v1  ;;  %v8447_v36 = vadd.s32 272, %v8343_v1  ;;  %v8450_v37 = vadd.s32 280, %v8343_v1  ;;  %v8453_v38 = vadd.s32 288, %v8343_v1  ;;  %p8181_p4 = pnand %p8180_p3, %p8174_p10 }
  0x42   : > { %v8456_v39 = vadd.s32 296, %v8343_v1  ;;  %v8459_v40 = vadd.s32 304, %v8343_v1  ;;  %v8462_v41 = vadd.s32 312, %v8343_v1  ;;  %v8465_v42 = vadd.s32 320, %v8343_v1 }
  0x43   : > { %v8468_v43 = vadd.s32 328, %v8343_v1  ;;  %v8471_v44 = vadd.s32 336, %v8343_v1  ;;  %v8474_v45 = vadd.s32 344, %v8343_v1  ;;  %v8477_v46 = vadd.s32 352, %v8343_v1 }
  0x44   : > { %v8480_v47 = vadd.s32 360, %v8343_v1  ;;  %v8483_v48 = vadd.s32 368, %v8343_v1  ;;  %v8486_v49 = vadd.s32 376, %v8343_v1  ;;  %v8489_v50 = vadd.s32 384, %v8343_v1 }
  0x45   : > { %v8492_v51 = vadd.s32 392, %v8343_v1  ;;  %v8495_v52 = vadd.s32 400, %v8343_v1  ;;  %v8498_v53 = vadd.s32 408, %v8343_v1  ;;  %v8501_v54 = vadd.s32 416, %v8343_v1 }
  0x46   : > { %v8504_v55 = vadd.s32 424, %v8343_v1  ;;  %v8507_v56 = vadd.s32 432, %v8343_v1  ;;  %v8510_v57 = vadd.s32 440, %v8343_v1  ;;  %v8513_v58 = vadd.s32 448, %v8343_v1 }
  0x47   : > { %v8516_v59 = vadd.s32 456, %v8343_v1  ;;  %v8519_v60 = vadd.s32 464, %v8343_v1  ;;  %v8522_v61 = vadd.s32 472, %v8343_v1  ;;  %v177_v62 = vmul.u32 2, %v8343_v1 }
  0x48   : > { %15123 = vst [vmem:[#allocation10_spill] sm:$0xff] %v8507_v56  ;;  %15124 = vst [vmem:[#allocation11_spill] sm:$0xff] %v8510_v57  ;;  %v178_v63 = vmul.u32 2, %v8346_v2  ;;  %v8527_v0 = vadd.s32 480, %v8343_v1  ;;  %v8530_v5 = vadd.s32 488, %v8343_v1  ;;  %v182_v57 = vmul.u32 2, %v8360_v7 }
  0x49   : > { %15125 = vst [vmem:[#allocation12_spill] sm:$0xff] %v8513_v58  ;;  %15126 = vst [vmem:[#allocation13_spill] sm:$0xff] %v8516_v59  ;;  %v8533_v58 = vadd.s32 496, %v8343_v1  ;;  %v179_v59 = vmul.u32 2, %v8351_v4  ;;  %v8542_v2 = vadd.s32 %v8348_v3, %v177_v62  ;;  %v184_v56 = vmul.u32 2, %v8366_v9 }
  0x4a   : > { %15127 = vst [vmem:[#allocation14_spill] sm:$0xff] %v8519_v60  ;;  %15128 = vst [vmem:[#allocation15_spill] sm:$0xff] %v8522_v61  ;;  %v8537_v60 = vadd.s32 504, %v8343_v1  ;;  %v181_v61 = vmul.u32 2, %v8357_v6  ;;  %v185_v1 = vmul.u32 2, %v8369_v10  ;;  %v8558_v7 = vadd.s32 %v8348_v3, %v182_v57 }
  0x4b   : > { %15129 = vst [vmem:[#allocation16_spill] sm:$0xff] %v8527_v0  ;;  %15130 = vst [vmem:[#allocation17_spill] sm:$0xff] %v8530_v5  ;;  %v183_v0 = vmul.u32 2, %v8363_v8  ;;  %v8547_v5 = vadd.s32 %v8348_v3, %v178_v63  ;;  %v186_v4 = vmul.u32 2, %v8372_v11 }
  0x4c   : > { %15131 = vst [vmem:[#allocation18_spill] sm:$0xff] %v8533_v58  ;;  %v8550_v58 = vadd.s32 %v8348_v3, %v179_v59  ;;  %v8555_v6 = vadd.s32 %v8348_v3, %v181_v61  ;;  %v187_v8 = vmul.u32 2, %v8375_v12  ;;  %v188_v9 = vmul.u32 2, %v8378_v13 }
  0x4d   : > { %v8563_v62 = vadd.s32 %v8348_v3, %v183_v0  ;;  %v8566_v59 = vadd.s32 %v8348_v3, %v184_v56  ;;  %v189_v10 = vmul.u32 2, %v8381_v14  ;;  %v190_v11 = vmul.u32 2, %v8384_v15 }
  0x4e   : > { %v8571_v61 = vadd.s32 %v8348_v3, %v185_v1  ;;  %v8574_v57 = vadd.s32 %v8348_v3, %v186_v4  ;;  %v191_v12 = vmul.u32 2, %v8387_v16  ;;  %v192_v13 = vmul.u32 2, %v8390_v17 }
  0x4f   : > { %v8579_v63 = vadd.s32 %v8348_v3, %v187_v8  ;;  %v8582_v56 = vadd.s32 %v8348_v3, %v188_v9  ;;  %v193_v14 = vmul.u32 2, %v8393_v18  ;;  %v194_v15 = vmul.u32 2, %v8396_v19 }
  0x50   : > { %v8587_v0 = vadd.s32 %v8348_v3, %v189_v10  ;;  %v8590_v1 = vadd.s32 %v8348_v3, %v190_v11  ;;  %v195_v16 = vmul.u32 2, %v8399_v20  ;;  %v196_v17 = vmul.u32 2, %v8402_v21 }
  0x51   : > { %v8595_v4 = vadd.s32 %v8348_v3, %v191_v12  ;;  %v8598_v8 = vadd.s32 %v8348_v3, %v192_v13  ;;  %v197_v18 = vmul.u32 2, %v8405_v22  ;;  %v198_v19 = vmul.u32 2, %v8408_v23 }
  0x52   : > { %v8603_v9 = vadd.s32 %v8348_v3, %v193_v14  ;;  %v8606_v10 = vadd.s32 %v8348_v3, %v194_v15  ;;  %v199_v20 = vmul.u32 2, %v8411_v24  ;;  %v200_v21 = vmul.u32 2, %v8414_v25 }
  0x53   : > { %v8611_v11 = vadd.s32 %v8348_v3, %v195_v16  ;;  %v8614_v12 = vadd.s32 %v8348_v3, %v196_v17  ;;  %v201_v22 = vmul.u32 2, %v8417_v26  ;;  %v202_v23 = vmul.u32 2, %v8420_v27 }
  0x54   : > { %v8619_v13 = vadd.s32 %v8348_v3, %v197_v18  ;;  %v8622_v14 = vadd.s32 %v8348_v3, %v198_v19  ;;  %v203_v24 = vmul.u32 2, %v8423_v28  ;;  %v204_v25 = vmul.u32 2, %v8426_v29 }
  0x55   : > { %v8627_v15 = vadd.s32 %v8348_v3, %v199_v20  ;;  %v8630_v16 = vadd.s32 %v8348_v3, %v200_v21  ;;  %v205_v26 = vmul.u32 2, %v8429_v30  ;;  %v206_v27 = vmul.u32 2, %v8432_v31 }
  0x56   : > { %v8635_v17 = vadd.s32 %v8348_v3, %v201_v22  ;;  %v8638_v18 = vadd.s32 %v8348_v3, %v202_v23  ;;  %v207_v28 = vmul.u32 2, %v8435_v32  ;;  %v208_v29 = vmul.u32 2, %v8438_v33 }
  0x57   : > { %v8643_v19 = vadd.s32 %v8348_v3, %v203_v24  ;;  %v8646_v20 = vadd.s32 %v8348_v3, %v204_v25  ;;  %v209_v30 = vmul.u32 2, %v8441_v34  ;;  %v210_v31 = vmul.u32 2, %v8444_v35 }
  0x58   : > { %v8651_v21 = vadd.s32 %v8348_v3, %v205_v26  ;;  %v8654_v22 = vadd.s32 %v8348_v3, %v206_v27  ;;  %v211_v32 = vmul.u32 2, %v8447_v36  ;;  %v212_v33 = vmul.u32 2, %v8450_v37 }
  0x59   : > { %v8659_v23 = vadd.s32 %v8348_v3, %v207_v28  ;;  %v8662_v24 = vadd.s32 %v8348_v3, %v208_v29  ;;  %v213_v34 = vmul.u32 2, %v8453_v38  ;;  %v214_v35 = vmul.u32 2, %v8456_v39 }
  0x5a   : > { %v8667_v25 = vadd.s32 %v8348_v3, %v209_v30  ;;  %v8670_v26 = vadd.s32 %v8348_v3, %v210_v31  ;;  %v215_v36 = vmul.u32 2, %v8459_v40  ;;  %v216_v37 = vmul.u32 2, %v8462_v41 }
  0x5b   : > { %v8675_v27 = vadd.s32 %v8348_v3, %v211_v32  ;;  %v8678_v28 = vadd.s32 %v8348_v3, %v212_v33  ;;  %v217_v38 = vmul.u32 2, %v8465_v42  ;;  %v218_v39 = vmul.u32 2, %v8468_v43 }
  0x5c   : > { %v8683_v29 = vadd.s32 %v8348_v3, %v213_v34  ;;  %v8686_v30 = vadd.s32 %v8348_v3, %v214_v35  ;;  %v219_v40 = vmul.u32 2, %v8471_v44  ;;  %v220_v41 = vmul.u32 2, %v8474_v45 }
  0x5d   : > { %15132 = vst [vmem:[#allocation19_spill] sm:$0xff] %v8678_v28  ;;  %v8691_v31 = vadd.s32 %v8348_v3, %v215_v36  ;;  %v8694_v32 = vadd.s32 %v8348_v3, %v216_v37  ;;  %v221_v42 = vmul.u32 2, %v8477_v46  ;;  %v222_v43 = vmul.u32 2, %v8480_v47 }
  0x5e   : > { %15133 = vst [vmem:[#allocation20_spill] sm:$0xff] %v8683_v29  ;;  %15134 = vst [vmem:[#allocation21_spill] sm:$0xff] %v8686_v30  ;;  %v8699_v33 = vadd.s32 %v8348_v3, %v217_v38  ;;  %v8702_v34 = vadd.s32 %v8348_v3, %v218_v39  ;;  %v223_v44 = vmul.u32 2, %v8483_v48  ;;  %v224_v45 = vmul.u32 2, %v8486_v49 }
  0x5f   : > { %15135 = vst [vmem:[#allocation22_spill] sm:$0xff] %v8691_v31  ;;  %15136 = vst [vmem:[#allocation23_spill] sm:$0xff] %v8694_v32  ;;  %v8707_v35 = vadd.s32 %v8348_v3, %v219_v40  ;;  %v8710_v36 = vadd.s32 %v8348_v3, %v220_v41  ;;  %v225_v46 = vmul.u32 2, %v8489_v50  ;;  %v226_v47 = vmul.u32 2, %v8492_v51 }
  0x60   : > { %15137 = vst [vmem:[#allocation24_spill] sm:$0xff] %v8699_v33  ;;  %v8715_v37 = vadd.s32 %v8348_v3, %v221_v42  ;;  %v8718_v38 = vadd.s32 %v8348_v3, %v222_v43  ;;  %v227_v48 = vmul.u32 2, %v8495_v52  ;;  %v228_v49 = vmul.u32 2, %v8498_v53  ;;  %v15144_v43 = vld [vmem:[#allocation10_spill] sm:$0xff]  ;;  %v8839_v33 = vld [vmem:[#allocation2] ss:$0 sm:$0xff] }
  0x61   : > { %15138 = vst [vmem:[#allocation25_spill] sm:$0xff] %v8710_v36  ;;  %v8723_v39 = vadd.s32 %v8348_v3, %v223_v44  ;;  %v8726_v40 = vadd.s32 %v8348_v3, %v224_v45  ;;  %v229_v50 = vmul.u32 2, %v8501_v54  ;;  %v230_v51 = vmul.u32 2, %v8504_v55 }
  0x62   : > { %15139 = vst [vmem:[#allocation26_spill] sm:$0xff] %v8718_v38  ;;  %v8731_v41 = vadd.s32 %v8348_v3, %v225_v46  ;;  %v8734_v42 = vadd.s32 %v8348_v3, %v226_v47  ;;  %v231_v52 = vmul.u32 2, %v15144_v43  ;;  %v15145_v38 = vld [vmem:[#allocation11_spill] sm:$0xff]  ;;  %v8739_v44 = vadd.s32 %v8348_v3, %v227_v48 }
  0x63   : > { %15140 = vst [vmem:[#allocation27_spill] sm:$0xff] %v8723_v39  ;;  %15141 = vst [vmem:[#allocation28_spill] sm:$0xff] %v8726_v40  ;;  %v232_v53 = vmul.u32 2, %v15145_v38  ;;  %v8742_v45 = vadd.s32 %v8348_v3, %v228_v49  ;;  %v15148_v40 = vld [vmem:[#allocation12_spill] sm:$0xff]  ;;  %v15149_v39 = vld [vmem:[#allocation13_spill] sm:$0xff]  ;;  %v8747_v46 = vadd.s32 %v8348_v3, %v229_v50  ;;  %v8750_v47 = vadd.s32 %v8348_v3, %v230_v51 }
  0x64   : > { %15142 = vst [vmem:[#allocation29_spill] sm:$0xff] %v8731_v41  ;;  %15143 = vst [vmem:[#allocation30_spill] sm:$0xff] %v8734_v42  ;;  %v233_v54 = vmul.u32 2, %v15148_v40  ;;  %v234_v55 = vmul.u32 2, %v15149_v39  ;;  %v15151_v42 = vld [vmem:[#allocation14_spill] sm:$0xff]  ;;  %v15152_v41 = vld [vmem:[#allocation15_spill] sm:$0xff]  ;;  %v8755_v48 = vadd.s32 %v8348_v3, %v231_v52 }
  0x65   : > { %15146 = vst [vmem:[#allocation10_spill] sm:$0xff] %v8739_v44  ;;  %15147 = vst [vmem:[#allocation11_spill] sm:$0xff] %v8742_v45  ;;  %v235_v43 = vmul.u32 2, %v15151_v42  ;;  %v236_v38 = vmul.u32 2, %v15152_v41  ;;  %v8758_v49 = vadd.s32 %v8348_v3, %v232_v53  ;;  %v15154_v45 = vld [vmem:[#allocation16_spill] sm:$0xff]  ;;  %v15155_v44 = vld [vmem:[#allocation17_spill] sm:$0xff] }
  0x66   : > { %15150 = vst [vmem:[#allocation12_spill] sm:$0xff] %v8750_v47  ;;  %v237_v40 = vmul.u32 2, %v15154_v45  ;;  %v238_v39 = vmul.u32 2, %v15155_v44  ;;  %v8763_v50 = vadd.s32 %v8348_v3, %v233_v54  ;;  %v8766_v51 = vadd.s32 %v8348_v3, %v234_v55  ;;  %v15156_v47 = vld [vmem:[#allocation18_spill] sm:$0xff]  ;;  %v15206_v45 = vld [vmem:[#allocation19_spill] sm:$0xff] }
  0x67   : > { %15153 = vst [vmem:[#allocation13_spill] sm:$0xff] %v8758_v49  ;;  %v239_v42 = vmul.u32 2, %v15156_v47  ;;  %v240_v41 = vmul.u32 2, %v8537_v60  ;;  %v8771_v52 = vadd.s32 %v8348_v3, %v235_v43  ;;  %v8774_v53 = vadd.s32 %v8348_v3, %v236_v38 }
  0x68   : > { %v8778_v44 = vadd.s32 %v8348_v3, %v237_v40  ;;  %v8781_v54 = vadd.s32 %v8348_v3, %v238_v39  ;;  %v15169_v40 = vcvt.s32.f32 %v8542_v2  ;;  %v15170_v39 = vcvt.s32.f32 %v8547_v5 }
  0x69   : > { %v8784_v55 = vadd.s32 %v8348_v3, %v239_v42  ;;  %v8787_v47 = vadd.s32 %v8348_v3, %v240_v41  ;;  %v15171_v41 = vcvt.s32.f32 %v8550_v58  ;;  %v15172_v43 = vcvt.s32.f32 %v8555_v6 }
  0x6a   : > { %v15160_v28 = vld [vmem:[#allocation27_spill] sm:$0xff]  ;;  %v15161_v29 = vld [vmem:[#allocation28_spill] sm:$0xff]  ;;  %v8857_v49 = vmul.f32 %v8839_v33, %v15169_v40  ;;  %v8862_v42 = vmul.f32 %v8839_v33, %v15170_v39  ;;  %v15173_v2 = vcvt.s32.f32 %v8558_v7  ;;  %v15174_v5 = vcvt.s32.f32 %v8563_v62 }
  0x6b   : > { %15158 = vst [vmem:[#allocation14_spill] sm:$0xff] %v8784_v55  ;;  %v15162_v30 = vld [vmem:[#allocation29_spill] sm:$0xff]  ;;  %v15163_v31 = vld [vmem:[#allocation30_spill] sm:$0xff]  ;;  %v15168_v60 = vmov %v8784_v55  ;;  %v8867_v32 = vmul.f32 %v8839_v33, %v15171_v41  ;;  %v8872_v38 = vmul.f32 %v8839_v33, %v15172_v43  ;;  %v15175_v58 = vcvt.s32.f32 %v8566_v59  ;;  %v15209_v55 = vld [vmem:[#allocation20_spill] sm:$0xff] }
  0x6c   : > { %v8877_v40 = vmul.f32 %v8839_v33, %v15173_v2  ;;  %v8882_v39 = vmul.f32 %v8839_v33, %v15174_v5  ;;  %v15176_v6 = vcvt.s32.f32 %v8571_v61  ;;  %v15177_v7 = vcvt.s32.f32 %v8574_v57 }
  0x6d   : > { %v15166_v36 = vld [vmem:[#allocation12_spill] sm:$0xff]  ;;  %v8887_v41 = vmul.f32 %v8839_v33, %v15175_v58  ;;  %v15178_v62 = vcvt.s32.f32 %v8579_v63  ;;  %v15179_v59 = vcvt.s32.f32 %v8582_v56  ;;  %v15180_v61 = vcvt.s32.f32 %v8587_v0 }
  0x6e   : > { %v15167_v3 = vld [vmem:[#allocation13_spill] sm:$0xff]  ;;  %v8892_v43 = vmul.f32 %v8839_v33, %v15176_v6  ;;  %v8897_v2 = vmul.f32 %v8839_v33, %v15177_v7  ;;  %v15181_v57 = vcvt.s32.f32 %v8590_v1  ;;  %v15182_v63 = vcvt.s32.f32 %v8595_v4 }
  0x6f   : > { %v8902_v5 = vmul.f32 %v8839_v33, %v15178_v62  ;;  %v8907_v58 = vmul.f32 %v8839_v33, %v15179_v59  ;;  %v8912_v6 = vmul.f32 %v8839_v33, %v15180_v61  ;;  %v15183_v56 = vcvt.s32.f32 %v8598_v8 }
  0x70   : > { %v8917_v7 = vmul.f32 %v8839_v33, %v15181_v57  ;;  %v8922_v62 = vmul.f32 %v8839_v33, %v15182_v63  ;;  %v15184_v0 = vcvt.s32.f32 %v8603_v9  ;;  %v15185_v1 = vcvt.s32.f32 %v8606_v10 }
  0x71   : > { %v8927_v59 = vmul.f32 %v8839_v33, %v15183_v56  ;;  %v15186_v4 = vcvt.s32.f32 %v8611_v11  ;;  %v15187_v8 = vcvt.s32.f32 %v8614_v12  ;;  %v15188_v9 = vcvt.s32.f32 %v8619_v13 }
  0x72   : > { %v8932_v61 = vmul.f32 %v8839_v33, %v15184_v0  ;;  %v8937_v57 = vmul.f32 %v8839_v33, %v15185_v1  ;;  %v15189_v10 = vcvt.s32.f32 %v8622_v14  ;;  %v15190_v11 = vcvt.s32.f32 %v8627_v15 }
  0x73   : > { %v8942_v63 = vmul.f32 %v8839_v33, %v15186_v4  ;;  %v8947_v56 = vmul.f32 %v8839_v33, %v15187_v8  ;;  %v8952_v0 = vmul.f32 %v8839_v33, %v15188_v9  ;;  %v15191_v12 = vcvt.s32.f32 %v8630_v16 }
  0x74   : > { %v8957_v1 = vmul.f32 %v8839_v33, %v15189_v10  ;;  %v8962_v4 = vmul.f32 %v8839_v33, %v15190_v11  ;;  %v15192_v13 = vcvt.s32.f32 %v8635_v17  ;;  %v15193_v14 = vcvt.s32.f32 %v8638_v18 }
  0x75   : > { %v8967_v8 = vmul.f32 %v8839_v33, %v15191_v12  ;;  %v15194_v15 = vcvt.s32.f32 %v8643_v19  ;;  %v15195_v16 = vcvt.s32.f32 %v8646_v20  ;;  %v15196_v17 = vcvt.s32.f32 %v8651_v21 }
  0x76   : > { %v8972_v9 = vmul.f32 %v8839_v33, %v15192_v13  ;;  %v8977_v10 = vmul.f32 %v8839_v33, %v15193_v14  ;;  %v15197_v18 = vcvt.s32.f32 %v8654_v22  ;;  %v15198_v19 = vcvt.s32.f32 %v8659_v23 }
  0x77   : > { %v8982_v11 = vmul.f32 %v8839_v33, %v15194_v15  ;;  %v8987_v12 = vmul.f32 %v8839_v33, %v15195_v16  ;;  %v8992_v13 = vmul.f32 %v8839_v33, %v15196_v17  ;;  %v15199_v20 = vcvt.s32.f32 %v8662_v24 }
  0x78   : > { %v8997_v14 = vmul.f32 %v8839_v33, %v15197_v18  ;;  %v9002_v15 = vmul.f32 %v8839_v33, %v15198_v19  ;;  %v15200_v21 = vcvt.s32.f32 %v8667_v25  ;;  %v15202_v22 = vcvt.s32.f32 %v8670_v26 }
  0x79   : > { %v9007_v16 = vmul.f32 %v8839_v33, %v15199_v20  ;;  %v15204_v23 = vcvt.s32.f32 %v8675_v27  ;;  %v15207_v24 = vcvt.s32.f32 %v15206_v45  ;;  %v15210_v25 = vcvt.s32.f32 %v15209_v55 }
  0x7a   : > { %v9012_v17 = vmul.f32 %v8839_v33, %v15200_v21  ;;  %v9017_v18 = vmul.f32 %v8839_v33, %v15202_v22 }
  0x7b   : > { %v9022_v19 = vmul.f32 %v8839_v33, %v15204_v23  ;;  %v9027_v20 = vmul.f32 %v8839_v33, %v15207_v24  ;;  %v9032_v21 = vmul.f32 %v8839_v33, %v15210_v25 }
  0x7c   : > { %15201 = vst [vmem:[#allocation15_spill] sm:$0xff] %v9012_v17  ;;  %15203 = vst [vmem:[#allocation16_spill] sm:$0xff] %v9017_v18  ;;  %v15211_v17 = vld [vmem:[#allocation21_spill] sm:$0xff]  ;;  %v15213_v18 = vld [vmem:[#allocation22_spill] sm:$0xff] }
  0x7d   : > { %15205 = vst [vmem:[#allocation17_spill] sm:$0xff] %v9022_v19  ;;  %15208 = vst [vmem:[#allocation18_spill] sm:$0xff] %v9027_v20  ;;  %v15212_v26 = vcvt.s32.f32 %v15211_v17  ;;  %v15214_v27 = vcvt.s32.f32 %v15213_v18  ;;  %v15216_v19 = vld [vmem:[#allocation23_spill] sm:$0xff]  ;;  %v15218_v20 = vld [vmem:[#allocation24_spill] sm:$0xff]  ;;  %v15221_v17 = vcvt.s32.f32 %v8702_v34  ;;  %v15222_v18 = vcvt.s32.f32 %v8707_v35 }
  0x7e   : > { %v15217_v45 = vcvt.s32.f32 %v15216_v19  ;;  %v15219_v55 = vcvt.s32.f32 %v15218_v20  ;;  %v15225_v20 = vcvt.s32.f32 %v8715_v37  ;;  %v15229_v35 = vcvt.s32.f32 %v15160_v28 }
  0x7f   : > { %v9037_v22 = vmul.f32 %v8839_v33, %v15212_v26  ;;  %v9042_v23 = vmul.f32 %v8839_v33, %v15214_v27  ;;  %v9057_v26 = vmul.f32 %v8839_v33, %v15221_v17  ;;  %v9062_v27 = vmul.f32 %v8839_v33, %v15222_v18 }
  0x80   : > { %v9047_v24 = vmul.f32 %v8839_v33, %v15217_v45  ;;  %v9052_v25 = vmul.f32 %v8839_v33, %v15219_v55  ;;  %v9072_v55 = vmul.f32 %v8839_v33, %v15225_v20  ;;  %v9082_v18 = vmul.f32 %v8839_v33, %v15229_v35 }
  0x81   : > { %15215 = vst [vmem:[#allocation27_spill] sm:$0xff] %v9042_v23  ;;  %v15223_v23 = vld [vmem:[#allocation25_spill] sm:$0xff]  ;;  %v15233_v37 = vcvt.s32.f32 %v15162_v30  ;;  %v15239_v30 = vcvt.s32.f32 %v8747_v46  ;;  %v15243_v46 = vcvt.s32.f32 %v8763_v50  ;;  %v15249_v50 = vcvt.s32.f32 %v8778_v44 }
  0x82   : > { %15220 = vst [vmem:[#allocation28_spill] sm:$0xff] %v9052_v25  ;;  %v15224_v19 = vcvt.s32.f32 %v15223_v23  ;;  %v15226_v25 = vld [vmem:[#allocation26_spill] sm:$0xff]  ;;  %15230 = vst [vmem:[#allocation30_spill] sm:$0xff] %v9082_v18  ;;  %v15231_v23 = vcvt.s32.f32 %v15161_v29  ;;  %v15237_v18 = vld [vmem:[#allocation11_spill] sm:$0xff] }
  0x83   : > { %v15227_v34 = vcvt.s32.f32 %v15226_v25  ;;  %v9092_v20 = vmul.f32 %v8839_v33, %v15233_v37  ;;  %v15234_v25 = vcvt.s32.f32 %v15163_v31  ;;  %v15238_v29 = vcvt.s32.f32 %v15237_v18 }
  0x84   : > { %v9067_v45 = vmul.f32 %v8839_v33, %v15224_v19  ;;  %v9087_v19 = vmul.f32 %v8839_v33, %v15231_v23  ;;  %v9114_v37 = vmul.f32 %v8839_v33, %v15239_v30  ;;  %v15240_v31 = vcvt.s32.f32 %v15166_v36 }
  0x85   : > { %v9077_v17 = vmul.f32 %v8839_v33, %v15227_v34  ;;  %v9097_v34 = vmul.f32 %v8839_v33, %v15234_v25  ;;  %v9107_v23 = vmul.f32 %v8839_v33, %v15238_v29  ;;  %v15242_v18 = vcvt.s32.f32 %v15167_v3 }
  0x86   : > { %15232 = vst [vmem:[#allocation12_spill] sm:$0xff] %v9087_v19  ;;  %v9109_v19 = vld [vmem:[#allocation2 + $0x1] ss:$0 sm:$0xff]  ;;  %v9119_v25 = vmul.f32 %v8839_v33, %v15240_v31  ;;  %v9134_v30 = vmul.f32 %v8839_v33, %v15243_v46  ;;  %v15244_v36 = vcvt.s32.f32 %v8766_v51  ;;  %v15247_v3 = vcvt.s32.f32 %v8774_v53 }
  0x87   : > { %15228 = vst [vmem:[#allocation29_spill] sm:$0xff] %v9077_v17  ;;  %v15235_v17 = vld [vmem:[#allocation10_spill] sm:$0xff]  ;;  %v9129_v29 = vmul.f32 %v8839_v33, %v15242_v18  ;;  %v9154_v46 = vmul.f32 %v8839_v33, %v15249_v50  ;;  %v15250_v51 = vcvt.s32.f32 %v8781_v54  ;;  %v15252_v53 = vcvt.s32.f32 %v8787_v47 }
  0x88   : > { %v15236_v28 = vcvt.s32.f32 %v15235_v17  ;;  %v15241_v17 = vcvt.s32.f32 %v8755_v48  ;;  %v9139_v31 = vmul.f32 %v8839_v33, %v15244_v36  ;;  %v15245_v48 = vcvt.s32.f32 %v8771_v52 }
  0x89   : > { %v9149_v18 = vmul.f32 %v8839_v33, %v15247_v3  ;;  %v9159_v36 = vmul.f32 %v8839_v33, %v15250_v51  ;;  %v15251_v52 = vcvt.s32.f32 %v15168_v60  ;;  %v9169_v3 = vmul.f32 %v8839_v33, %v15252_v53  ;;  %v15271_v53 = vld [vmem:[#allocation17_spill] sm:$0xff] }
  0x8a   : > { %v9102_v35 = vmul.f32 %v8839_v33, %v15236_v28  ;;  %v9124_v28 = vmul.f32 %v8839_v33, %v15241_v17  ;;  %v9144_v17 = vmul.f32 %v8839_v33, %v15245_v48  ;;  %v9178_v54 = vadd.f32 %v9109_v19, %v8857_v49 }
  0x8b   : > { %15248 = vst [vmem:[#allocation14_spill] sm:$0xff] %v9149_v18  ;;  %v9164_v48 = vmul.f32 %v8839_v33, %v15251_v52  ;;  %v15253_v18 = vld [vmem:[#allocation9_spill] sm:$0xff]  ;;  %v9182_v60 = vadd.f32 %v9109_v19, %v8862_v42  ;;  %v9186_v51 = vadd.f32 %v9109_v19, %v8867_v32  ;;  %v9190_v47 = vadd.f32 %v9109_v19, %v8872_v38  ;;  %v15269_v52 = vld [vmem:[#allocation16_spill] sm:$0xff] }
  0x8c   : > { %15246 = vst [vmem:[#allocation13_spill] sm:$0xff] %v9144_v17  ;;  %v15254_v44 = vmul.u32 2, %v15253_v18  ;;  %v15255_v17 = vld [vmem:[#allocation8_spill] sm:$0xff]  ;;  %v9198_v49 = vadd.f32 %v9109_v19, %v8882_v39  ;;  %v9202_v42 = vadd.f32 %v9109_v19, %v8887_v41  ;;  %v9206_v32 = vadd.f32 %v9109_v19, %v8892_v43  ;;  %v15267_v18 = vld [vmem:[#allocation15_spill] sm:$0xff] }
  0x8d   : > { %v9210_v38 = vadd.f32 %v9109_v19, %v8897_v2  ;;  %v9218_v39 = vadd.f32 %v9109_v19, %v8907_v58  ;;  %v9222_v41 = vadd.f32 %v9109_v19, %v8912_v6  ;;  %v9226_v43 = vadd.f32 %v9109_v19, %v8917_v7 }
  0x8e   : > { %v9174_v50 = vadd.s32 %v15255_v17, %v15254_v44  ;;  %v9194_v17 = vadd.f32 %v9109_v19, %v8877_v40  ;;  %v9214_v40 = vadd.f32 %v9109_v19, %v8902_v5  ;;  %v9230_v2 = vadd.f32 %v9109_v19, %v8922_v62  ;;  %v15273_v44 = vld [vmem:[#allocation18_spill] sm:$0xff] }
  0x8f   : > { %v9234_v5 = vadd.f32 %v9109_v19, %v8927_v59  ;;  %v9238_v58 = vadd.f32 %v9109_v19, %v8932_v61  ;;  %v9242_v6 = vadd.f32 %v9109_v19, %v8937_v57  ;;  %v9246_v7 = vadd.f32 %v9109_v19, %v8942_v63 }
  0x90   : > { %v9250_v62 = vadd.f32 %v9109_v19, %v8947_v56  ;;  %v9254_v59 = vadd.f32 %v9109_v19, %v8952_v0  ;;  %v9258_v61 = vadd.f32 %v9109_v19, %v8957_v1  ;;  %v9262_v57 = vadd.f32 %v9109_v19, %v8962_v4 }
  0x91   : > { %v9266_v63 = vadd.f32 %v9109_v19, %v8967_v8  ;;  %v9270_v56 = vadd.f32 %v9109_v19, %v8972_v9  ;;  %v9274_v0 = vadd.f32 %v9109_v19, %v8977_v10  ;;  %v9278_v1 = vadd.f32 %v9109_v19, %v8982_v11 }
  0x92   : > { %15256 = vst [vmem:[#allocation19_spill] sm:$0xff] %v9258_v61  ;;  %15257 = vst [vmem:[#allocation20_spill] sm:$0xff] %v9262_v57  ;;  %v9282_v4 = vadd.f32 %v9109_v19, %v8987_v12  ;;  %v9286_v8 = vadd.f32 %v9109_v19, %v8992_v13  ;;  %v9290_v9 = vadd.f32 %v9109_v19, %v8997_v14  ;;  %vm508_vm12 = vcmp.lt.s32.totalorder %v9178_v54, 0 }
  0x93   : > { %15258 = vst [vmem:[#allocation21_spill] sm:$0xff] %v9266_v63  ;;  %15259 = vst [vmem:[#allocation22_spill] sm:$0xff] %v9270_v56  ;;  %v9294_v10 = vadd.f32 %v9109_v19, %v9002_v15  ;;  %v9298_v11 = vadd.f32 %v9109_v19, %v9007_v16  ;;  %v9302_v12 = vadd.f32 %v9109_v19, %v15267_v18 }
  0x94   : > { %15260 = vst [vmem:[#allocation23_spill] sm:$0xff] %v9274_v0  ;;  %15261 = vst [vmem:[#allocation24_spill] sm:$0xff] %v9278_v1  ;;  %v9306_v13 = vadd.f32 %v9109_v19, %v15269_v52  ;;  %v9310_v14 = vadd.f32 %v9109_v19, %v15271_v53  ;;  %v9314_v15 = vadd.f32 %v9109_v19, %v15273_v44 }
  0x95   : > { %15262 = vst [vmem:[#allocation25_spill] sm:$0xff] %v9282_v4  ;;  %15263 = vst [vmem:[#allocation26_spill] sm:$0xff] %v9286_v8  ;;  %v9318_v16 = vadd.f32 %v9109_v19, %v9032_v21  ;;  %v9322_v18 = vadd.f32 %v9109_v19, %v9037_v22  ;;  %v9330_v53 = vadd.f32 %v9109_v19, %v9047_v24 }
  0x96   : > { %15264 = vst [vmem:[#allocation10_spill] sm:$0xff] %v9290_v9  ;;  %15265 = vst [vmem:[#allocation11_spill] sm:$0xff] %v9294_v10  ;;  %v9338_v21 = vadd.f32 %v9109_v19, %v9057_v26  ;;  %v9342_v22 = vadd.f32 %v9109_v19, %v9062_v27  ;;  %v9350_v24 = vadd.f32 %v9109_v19, %v9072_v55  ;;  %v15310_v10 = vmov 2475754826  }
  0x97   : > { %15266 = vst [vmem:[#allocation9_spill] sm:$0xff] %v9298_v11  ;;  %15268 = vst [vmem:[#allocation8_spill] sm:$0xff] %v9302_v12  ;;  %v15277_v12 = vld [vmem:[#allocation27_spill] sm:$0xff]  ;;  %v9370_v55 = vadd.f32 %v9109_v19, %v9097_v34  ;;  %v9390_v34 = vadd.f32 %v9109_v19, %v9124_v28 }
  0x98   : > { %15270 = vst [vmem:[#allocation15_spill] sm:$0xff] %v9306_v13  ;;  %15272 = vst [vmem:[#allocation16_spill] sm:$0xff] %v9310_v14  ;;  %v9326_v52 = vadd.f32 %v9109_v19, %v15277_v12  ;;  %v15280_v14 = vld [vmem:[#allocation28_spill] sm:$0xff]  ;;  %v9346_v12 = vadd.f32 %v9109_v19, %v9067_v45  ;;  %v9366_v45 = vadd.f32 %v9109_v19, %v9092_v20 }
  0x99   : > { %15274 = vst [vmem:[#allocation17_spill] sm:$0xff] %v9314_v15  ;;  %15275 = vst [vmem:[#allocation18_spill] sm:$0xff] %v9318_v16  ;;  %v9334_v44 = vadd.f32 %v9109_v19, %v15280_v14  ;;  %v9386_v20 = vadd.f32 %v9109_v19, %v9119_v25 }
  0x9a   : > { %15276 = vst [vmem:[#allocation31_spill] sm:$0xff] %v9322_v18  ;;  %15278 = vst [vmem:[#allocation27_spill] sm:$0xff] %v9326_v52 }
  0x9b   : > { %15279 = vst [vmem:[#allocation32_spill] sm:$0xff] %v9330_v53  ;;  %15281 = vst [vmem:[#allocation28_spill] sm:$0xff] %v9334_v44  ;;  %v15286_v53 = vld [vmem:[#allocation29_spill] sm:$0xff]  ;;  %v15288_v44 = vld [vmem:[#allocation30_spill] sm:$0xff] }
  0x9c   : > { %15282 = vst [vmem:[#allocation33_spill] sm:$0xff] %v9338_v21  ;;  %15283 = vst [vmem:[#allocation34_spill] sm:$0xff] %v9342_v22  ;;  %v9354_v14 = vadd.f32 %v9109_v19, %v15286_v53  ;;  %v9358_v26 = vadd.f32 %v9109_v19, %v15288_v44  ;;  %v15290_v21 = vld [vmem:[#allocation12_spill] sm:$0xff]  ;;  %v9374_v53 = vadd.f32 %v9109_v19, %v9102_v35 }
  0x9d   : > { %15284 = vst [vmem:[#allocation35_spill] sm:$0xff] %v9346_v12  ;;  %15285 = vst [vmem:[#allocation36_spill] sm:$0xff] %v9350_v24  ;;  %v9362_v27 = vadd.f32 %v9109_v19, %v15290_v21  ;;  %v9378_v44 = vadd.f32 %v9109_v19, %v9107_v23  ;;  %v9382_v21 = vadd.f32 %v9109_v19, %v9114_v37  ;;  %v15099_v12 = vmov 1326507024  }
  0x9e   : > { %15287 = vst [vmem:[#allocation29_spill] sm:$0xff] %v9354_v14  ;;  %15289 = vst [vmem:[#allocation30_spill] sm:$0xff] %v9358_v26  ;;  %v9394_v35 = vadd.f32 %v9109_v19, %v9129_v29  ;;  %v9398_v23 = vadd.f32 %v9109_v19, %v9134_v30  ;;  %v9402_v37 = vadd.f32 %v9109_v19, %v9139_v31 }
  0x9f   : > { %15291 = vst [vmem:[#allocation12_spill] sm:$0xff] %v9362_v27  ;;  %15292 = vst [vmem:[#allocation37_spill] sm:$0xff] %v9366_v45  ;;  %v9414_v29 = vadd.f32 %v9109_v19, %v9154_v46  ;;  %v9418_v30 = vadd.f32 %v9109_v19, %v9159_v36  ;;  %v9422_v31 = vadd.f32 %v9109_v19, %v9164_v48  ;;  %v15076_v46 = vand.u32 2147483647, %v9182_v60 }
  0xa0   : > { %15293 = vst [vmem:[#allocation38_spill] sm:$0xff] %v9370_v55  ;;  %15294 = vst [vmem:[#allocation39_spill] sm:$0xff] %v9374_v53 }
  0xa1   : > { %15295 = vst [vmem:[#allocation40_spill] sm:$0xff] %v9378_v44  ;;  %15296 = vst [vmem:[#allocation41_spill] sm:$0xff] %v9382_v21  ;;  %v15302_v21 = vld [vmem:[#allocation13_spill] sm:$0xff] }
  0xa2   : > { %15297 = vst [vmem:[#allocation42_spill] sm:$0xff] %v9386_v20  ;;  %15298 = vst [vmem:[#allocation43_spill] sm:$0xff] %v9390_v34  ;;  %v9406_v25 = vadd.f32 %v9109_v19, %v15302_v21  ;;  %v15304_v20 = vld [vmem:[#allocation14_spill] sm:$0xff]  ;;  %v9426_v21 = vadd.f32 %v9109_v19, %v9169_v3  ;;  %v717_v3 = vand.u32 2139095040, %v9186_v51 }
  0xa3   : > { %15299 = vst [vmem:[#allocation44_spill] sm:$0xff] %v9394_v35  ;;  %15300 = vst [vmem:[#allocation45_spill] sm:$0xff] %v9398_v23  ;;  %v9410_v28 = vadd.f32 %v9109_v19, %v15304_v20  ;;  %v509_v20 = vand.u32 2139095040, %v9178_v54 }
  0xa4   : > { %15301 = vst [vmem:[#allocation46_spill] sm:$0xff] %v9402_v37  ;;  %15303 = vst [vmem:[#allocation13_spill] sm:$0xff] %v9406_v25  ;;  %v15075_v25 = vand.u32 2147483647, %v9178_v54  ;;  %v718_v35 = vshrl.u32 %v717_v3, 23 }
  0xa5   : > { %15305 = vst [vmem:[#allocation14_spill] sm:$0xff] %v9410_v28  ;;  %15306 = vst [vmem:[#allocation47_spill] sm:$0xff] %v9414_v29  ;;  %v309_v28 = vcvt.s32.f32 %v9174_v50  ;;  %v613_v29 = vand.u32 2139095040, %v9182_v60  ;;  %v510_v36 = vshrl.u32 %v509_v20, 23  ;;  %v15078_v20 = vand.u32 2147483647, %v9186_v51 }
  0xa6   : > { %15307 = vst [vmem:[#allocation48_spill] sm:$0xff] %v9418_v30  ;;  %15308 = vst [vmem:[#allocation49_spill] sm:$0xff] %v9422_v31  ;;  %v513_v30 = vand.u32 8388607, %v15075_v25  ;;  %v617_v31 = vand.u32 8388607, %v15076_v46 }
  0xa7   : > { %15309 = vst [vmem:[#allocation50_spill] sm:$0xff] %v9426_v21  ;;  %v614_v48 = vshrl.u32 %v613_v29, 23  ;;  %v7311_v21 = vadd.s32 4294967169, %v510_v36  ;;  %v377_v37 = vmul.f32 %v8839_v33, %v309_v28  ;;  %v7319_v55 = vadd.s32 4294967169, %v718_v35 }
  0xa8   : > { %v514_v50 = vor.u32 8388608, %v513_v30  ;;  %v618_v44 = vor.u32 8388608, %v617_v31  ;;  %v15102_v31 = vmov 683565275   ;;  %v15096_v3 = vmov 920167782  }
  0xa9   : > { %v7315_v23 = vadd.s32 4294967169, %v614_v48  ;;  %v516_v34 = vadd.s32 1, %v7311_v21  ;;  %v9441_v29 = vadd.f32 %v9109_v19, %v377_v37  ;;  %v9451_v30 = vadd.s32 1, %v7319_v55 }
  0xaa   : > { %v9443_v36 = vshll.u32 %v514_v50, 8  ;;  %v9445_v48 = vshll.u32 %v618_v44, 8 }
  0xab   : > { %v620_v53 = vadd.s32 1, %v7315_v23  ;;  %vm517_vm0 = vcmp.gt.s32.totalorder %v516_v34, 0  ;;  %v9449_v23 = vand.u32 8388607, %v15078_v20  ;;  %vm725_vm6 = vcmp.gt.s32.totalorder %v9451_v30, 0 }
  0xac   : > { %v518_v25 = vsel %vm517_vm0, %v516_v34, 0  ;;  %v15089_v34 = vmov 2475754826  }
  0xad   : > { %vm621_vm1 = vcmp.gt.s32.totalorder %v620_v53, 0  ;;  %v519_v46 = vshrl.u32 %v518_v25, 5  ;;  %v520_v45 = vand.u32 31, %v518_v25  ;;  %v15091_v25 = vmov 2131351028  }
  0xae   : > { %v622_v33 = vsel %vm621_vm1, %v620_v53, 0  ;;  %v15094_v53 = vmov 2102212464  }
  0xaf   : > { %v624_v28 = vand.u32 31, %v622_v33  ;;  %v521_v35 = vsub.s32 32, %v520_v45  ;;  %v523_v19 = vshll.u32 %v15102_v31, %v520_v45  ;;  %v526_v37 = vshll.u32 %v15089_v34, %v520_v45 }
  0xb0   : > { %v529_v21 = vshll.u32 %v15091_v25, %v520_v45  ;;  %v532_v44 = vshll.u32 %v15094_v53, %v520_v45  ;;  %v535_v50 = vshll.u32 %v15096_v3, %v520_v45  ;;  %vm538_vm2 = vcmp.lt.s32.totalorder %v519_v46, 1 }
  0xb1   : > { %v9458_v20 = vshrl.u32 %v622_v33, 5  ;;  %v522_v55 = vshrl.u32 %v15102_v31, %v521_v35  ;;  %v524_v27 = vshrl.u32 %v15089_v34, %v521_v35  ;;  %v527_v26 = vshrl.u32 %v15091_v25, %v521_v35 }
  0xb2   : > { %v530_v14 = vshrl.u32 %v15094_v53, %v521_v35  ;;  %v533_v24 = vshrl.u32 %v15096_v3, %v521_v35  ;;  %v536_v22 = vshrl.u32 %v15099_v12, %v521_v35  ;;  %vm539_vm3 = vcmp.lt.s32.totalorder %v519_v46, 2 }
  0xb3   : > { %vm541_vm4 = vcmp.lt.s32.totalorder %v519_v46, 4  ;;  %v525_v52 = vor.u32 %v524_v27, %v523_v19  ;;  %v528_v45 = vor.u32 %v527_v26, %v526_v37  ;;  %v625_v33 = vsub.s32 32, %v624_v28 }
  0xb4   : > { %v531_v18 = vor.u32 %v530_v14, %v529_v21  ;;  %v534_v16 = vor.u32 %v533_v24, %v532_v44  ;;  %v537_v15 = vor.u32 %v536_v22, %v535_v50  ;;  %vm540_vm5 = vcmp.lt.s32.totalorder %v519_v46, 3 }
  0xb5   : > { %v627_v34 = vshll.u32 %v15102_v31, %v624_v28  ;;  %v542_v25 = vsel %vm538_vm2, %v522_v55, %v525_v52  ;;  %v546_v53 = vsel %vm538_vm2, %v525_v52, %v528_v45  ;;  %v630_v27 = vshll.u32 %v15310_v10, %v624_v28 }
  0xb6   : > { %v543_v13 = vsel %vm541_vm4, %v531_v18, 2102212464  ;;  %v550_v3 = vsel %vm538_vm2, %v528_v45, %v531_v18  ;;  %v547_v35 = vsel %vm541_vm4, %v534_v16, 920167782  ;;  %v551_v12 = vsel %vm541_vm4, %v537_v15, 1326507024 }
  0xb7   : > { %v544_v11 = vsel %vm540_vm5, %v528_v45, %v543_v13  ;;  %v548_v14 = vsel %vm540_vm5, %v531_v18, %v547_v35  ;;  %v552_v24 = vsel %vm540_vm5, %v534_v16, %v551_v12  ;;  %v626_v22 = vshrl.u32 %v15102_v31, %v625_v33 }
  0xb8   : > { %v628_v26 = vshrl.u32 %v15310_v10, %v625_v33  ;;  %v545_v19 = vsel %vm539_vm3, %v542_v25, %v544_v11  ;;  %v549_v37 = vsel %vm539_vm3, %v546_v53, %v548_v14  ;;  %v553_v52 = vsel %vm539_vm3, %v550_v3, %v552_v24 }
  0xb9   : > { %v15311_v21 = vmov 2131351028   ;;  %v9479_v15 = vmul.u32.u64.low %v9443_v36, %v553_v52  ;;  %v9480_v44 = vmul.u32.u64.high %v9443_v36, %v553_v52, %v9479_v15  ;;  %v15312_v11 = vmov 2102212464  }
  0xba   : > { %v631_v13 = vshrl.u32 %v15311_v21, %v625_v33  ;;  %v9483_v50 = vmul.u32.u64.low %v9443_v36, %v549_v37  ;;  %v9484_v18 = vmul.u32.u64.high %v9443_v36, %v549_v37, %v9483_v50  ;;  %v629_v16 = vor.u32 %v628_v26, %v627_v34 }
  0xbb   : > { %v633_v55 = vshll.u32 %v15311_v21, %v624_v28  ;;  %v634_v25 = vshrl.u32 %v15312_v11, %v625_v33  ;;  %v636_v46 = vshll.u32 %v15312_v11, %v624_v28  ;;  %v15313_v53 = vmov 920167782  }
  0xbc   : > { %v632_v12 = vor.u32 %v631_v13, %v630_v27  ;;  %v637_v3 = vshrl.u32 %v15313_v53, %v625_v33  ;;  %v639_v45 = vshll.u32 %v15313_v53, %v624_v28  ;;  %v15314_v35 = vmov 1326507024  }
  0xbd   : > { %v640_v14 = vshrl.u32 %v15314_v35, %v625_v33  ;;  %v561_v24 = vmul.u32 %v9443_v36, %v545_v19  ;;  %v635_v52 = vor.u32 %v634_v25, %v633_v55  ;;  %vm642_vm7 = vcmp.lt.s32.totalorder %v9458_v20, 1 }
  0xbe   : > { %vm643_vm8 = vcmp.lt.s32.totalorder %v9458_v20, 2  ;;  %vm563_vm9 = vc.u32 %v9480_v44, %v9483_v50  ;;  %v564_v34 = vadd.s32 1, %v9484_v18  ;;  %v638_v27 = vor.u32 %v637_v3, %v636_v46 }
  0xbf   : > { %vm644_vm10 = vcmp.lt.s32.totalorder %v9458_v20, 3  ;;  %v641_v26 = vor.u32 %v640_v14, %v639_v45  ;;  %vm645_vm11 = vcmp.lt.s32.totalorder %v9458_v20, 4  ;;  %v646_v28 = vsel %vm642_vm7, %v626_v22, %v629_v16 }
  0xc0   : > { %v650_v33 = vsel %vm642_vm7, %v629_v16, %v632_v12  ;;  %v565_v36 = vsel %vm563_vm9, %v564_v34, %v9484_v18  ;;  %v647_v19 = vsel %vm645_vm11, %v635_v52, 2102212464  ;;  %v651_v37 = vsel %vm645_vm11, %v638_v27, 920167782 }
  0xc1   : > { %v654_v13 = vsel %vm642_vm7, %v632_v12, %v635_v52  ;;  %v566_v15 = vadd.s32 %v565_v36, %v561_v24  ;;  %v648_v55 = vsel %vm644_vm10, %v632_v12, %v647_v19  ;;  %v652_v25 = vsel %vm644_vm10, %v635_v52, %v651_v37 }
  0xc2   : > { %v655_v31 = vsel %vm645_vm11, %v641_v26, 1326507024  ;;  %v649_v9 = vsel %vm643_vm8, %v646_v28, %v648_v55  ;;  %v653_v46 = vsel %vm643_vm8, %v650_v33, %v652_v25  ;;  %v726_v22 = vsel %vm725_vm6, %v9451_v30, 0 }
  0xc3   : > { %v656_v3 = vsel %vm644_vm10, %v638_v27, %v655_v31  ;;  %v567_v16 = vadd.s32 536870912, %v566_v15  ;;  %v9512_v45 = vmul.u32.u64.low %v9445_v48, %v653_v46  ;;  %v9513_v12 = vmul.u32.u64.high %v9445_v48, %v653_v46, %v9512_v45 }
  0xc4   : > { %v657_v18 = vsel %vm643_vm8, %v654_v13, %v656_v3  ;;  %v722_v52 = vor.u32 8388608, %v9449_v23  ;;  %v15105_v31 = vand.u32 2147483647, %v9441_v29  ;;  %v728_v27 = vand.u32 31, %v726_v22 }
  0xc5   : > { %v9517_v14 = vmul.u32.u64.low %v9445_v48, %v657_v18  ;;  %v9518_v24 = vmul.u32.u64.high %v9445_v48, %v657_v18, %v9517_v14  ;;  %v568_v34 = vshrl.u32 %v567_v16, 30  ;;  %v665_v30 = vmul.u32 %v9445_v48, %v649_v9 }
  0xc6   : > { %v668_v26 = vadd.s32 1, %v9513_v12  ;;  %v729_v28 = vsub.s32 32, %v728_v27  ;;  %v9527_v33 = vshll.u32 %v722_v52, 8  ;;  %v821_v36 = vand.u32 2139095040, %v9441_v29 }
  0xc7   : > { %v569_v20 = vshll.u32 %v568_v34, 30  ;;  %vm667_vm13 = vc.u32 %v9518_v24, %v9512_v45  ;;  %v9532_v23 = vand.u32 8388607, %v15105_v31  ;;  %v15315_v19 = vand.u32 2147483647, %v9178_v54 }
  0xc8   : > { %v592_v37 = vsub.s32 4, %v568_v34  ;;  %v669_v13 = vsel %vm667_vm13, %v668_v26, %v9513_v12  ;;  %v727_v55 = vshrl.u32 %v726_v22, 5  ;;  %v15318_v46 = vmov 683565275  }
  0xc9   : > { %vm9536_vm14 = vcmp.le.f32.partialorder %v15315_v19, 0.7853982  ;;  %v9540_v48 = vsub.s32 %v566_v15, %v569_v20  ;;  %v670_v25 = vadd.s32 %v669_v13, %v665_v30  ;;  %v731_v3 = vshll.u32 %v15318_v46, %v728_v27 }
  0xca   : > { %v732_v16 = vshrl.u32 %v15310_v10, %v729_v28  ;;  %v734_v18 = vshll.u32 %v15310_v10, %v728_v27  ;;  %v735_v52 = vshrl.u32 %v15311_v21, %v729_v28  ;;  %v737_v19 = vshll.u32 %v15311_v21, %v728_v27 }
  0xcb   : > { %v572_v14 = vsub.s32 0, %v9540_v48  ;;  %v738_v15 = vshrl.u32 %v15312_v11, %v729_v28  ;;  %v562_v20 = vadd.s32 %v9483_v50, %v9480_v44  ;;  %v671_v12 = vadd.s32 536870912, %v670_v25 }
  0xcc   : > { %v740_v22 = vshll.u32 %v15312_v11, %v728_v27  ;;  %v822_v30 = vshrl.u32 %v821_v36, 23  ;;  %v593_v13 = vsel %vm508_vm12, %v592_v37, %v568_v34  ;;  %v741_v31 = vshrl.u32 %v15313_v53, %v729_v28 }
  0xcd   : > { %v7312_v26 = vmin.u32 %v572_v14, %v9540_v48  ;;  %vm749_vm15 = vcmp.lt.s32.totalorder %v727_v55, 4  ;;  %v9557_v8 = vshrl.u32 %v671_v12, 30  ;;  %v730_v4 = vshrl.u32 %v15318_v46, %v729_v28 }
  0xce   : > { %v743_v1 = vshll.u32 %v15313_v53, %v728_v27  ;;  %v744_v44 = vshrl.u32 %v15314_v35, %v729_v28  ;;  %v733_v0 = vor.u32 %v732_v16, %v731_v3  ;;  %v736_v56 = vor.u32 %v735_v52, %v734_v18 }
  0xcf   : > { %v574_v50 = vclz %v7312_v26  ;;  %v739_v36 = vor.u32 %v738_v15, %v737_v19  ;;  %v673_v14 = vshll.u32 %v9557_v8, 30  ;;  %v742_v63 = vor.u32 %v741_v31, %v740_v22 }
  0xd0   : > { %vm746_vm0 = vcmp.lt.s32.totalorder %v727_v55, 1  ;;  %vm748_vm1 = vcmp.lt.s32.totalorder %v727_v55, 3  ;;  %v745_v37 = vor.u32 %v744_v44, %v743_v1  ;;  %v7323_v57 = vadd.s32 4294967169, %v822_v30 }
  0xd1   : > { %v7313_v34 = vadd.s32 4294967294, %v574_v50  ;;  %v751_v12 = vsel %vm749_vm15, %v739_v36, 2102212464  ;;  %v595_v61 = vsel %vm9536_vm14, 0, %v593_v13  ;;  %v9566_v27 = vsub.s32 %v670_v25, %v673_v14 }
  0xd2   : > { %vm747_vm2 = vcmp.lt.s32.totalorder %v727_v55, 2  ;;  %v755_v28 = vsel %vm749_vm15, %v742_v63, 920167782  ;;  %v750_v3 = vsel %vm746_vm0, %v730_v4, %v733_v0  ;;  %v754_v31 = vsel %vm746_vm0, %v733_v0, %v736_v56 }
  0xd3   : > { %vm7314_vm3 = vcmp.lt.s32.totalorder %v7313_v34, 0  ;;  %v756_v16 = vsel %vm748_vm1, %v739_v36, %v755_v28  ;;  %v676_v1 = vsub.s32 0, %v9566_v27  ;;  %v752_v52 = vsel %vm748_vm1, %v736_v56, %v751_v12 }
  0xd4   : > { %v577_v18 = vsel %vm7314_vm3, 0, %v7313_v34  ;;  %v758_v19 = vsel %vm746_vm0, %v736_v56, %v739_v36  ;;  %v759_v30 = vsel %vm749_vm15, %v745_v37, 1326507024  ;;  %vm612_vm4 = vcmp.lt.s32.totalorder %v9182_v60, 0 }
  0xd5   : > { %v578_v15 = vsub.s32 32, %v577_v18  ;;  %v579_v25 = vshll.u32 %v9540_v48, %v577_v18  ;;  %v582_v22 = vsub.s32 4294967266, %v577_v18  ;;  %v7316_v4 = vmin.u32 %v676_v1, %v9566_v27 }
  0xd6   : > { %v757_v0 = vsel %vm747_vm2, %v754_v31, %v756_v16  ;;  %v760_v26 = vsel %vm748_vm1, %v742_v63, %v759_v30  ;;  %v828_v14 = vadd.s32 1, %v7323_v57  ;;  %v599_v56 = vadd.s32 3, %v595_v61 }
  0xd7   : > { %v580_v13 = vshrl.u32 %v562_v20, %v578_v15  ;;  %v583_v44 = vadd.s32 127, %v582_v22  ;;  %v761_v50 = vsel %vm747_vm2, %v758_v19, %v760_v26  ;;  %v678_v36 = vclz %v7316_v4 }
  0xd8   : > { %v753_v48 = vsel %vm747_vm2, %v750_v3, %v752_v52  ;;  %v826_v34 = vor.u32 8388608, %v9532_v23  ;;  %v9585_v28 = vmul.u32.u64.low %v9527_v33, %v761_v50  ;;  %v9586_v18 = vmul.u32.u64.high %v9527_v33, %v761_v50, %v9585_v28 }
  0xd9   : > { %v581_v37 = vor.u32 %v580_v13, %v579_v25  ;;  %v584_v12 = vshll.u32 %v583_v44, 23  ;;  %v7317_v31 = vadd.s32 4294967294, %v678_v36  ;;  %vm829_vm5 = vcmp.gt.s32.totalorder %v828_v14, 0 }
  0xda   : > { %v9589_v63 = vmul.u32.u64.low %v9527_v33, %v757_v0  ;;  %v9590_v20 = vmul.u32.u64.high %v9527_v33, %v757_v0, %v9589_v63  ;;  %v696_v55 = vsub.s32 4, %v9557_v8  ;;  %v830_v3 = vsel %vm829_vm5, %v828_v14, 0 }
  0xdb   : > { %v585_v57 = vor.u32 4788187, %v584_v12  ;;  %v588_v61 = vcvt.s32.f32 %v581_v37  ;;  %v9594_v16 = vand.u32 3, %v599_v56  ;;  %v666_v1 = vadd.s32 %v9512_v45, %v9518_v24 }
  0xdc   : > { %vm7318_vm6 = vcmp.lt.s32.totalorder %v7317_v31, 0  ;;  %v832_v52 = vand.u32 31, %v830_v3  ;;  %v769_v25 = vmul.u32 %v9527_v33, %v753_v48  ;;  %vm771_vm7 = vc.u32 %v9586_v18, %v9589_v63 }
  0xdd   : > { %v586_v19 = vand.u32 2147483647, %v585_v57  ;;  %v681_v15 = vsel %vm7318_vm6, 0, %v7317_v31  ;;  %v15319_v22 = vand.u32 2147483647, %v9182_v60  ;;  %v772_v45 = vadd.s32 1, %v9590_v20 }
  0xde   : > { %v682_v4 = vsub.s32 32, %v681_v15  ;;  %v683_v0 = vshll.u32 %v9566_v27, %v681_v15  ;;  %v686_v26 = vsub.s32 4294967266, %v681_v15  ;;  %v697_v33 = vsel %vm612_vm4, %v696_v55, %v9557_v8 }
  0xdf   : > { %vm9603_vm8 = vcmp.le.f32.partialorder %v15319_v22, 0.7853982  ;;  %v589_v24 = vmul.f32 %v588_v61, %v586_v19  ;;  %v9612_v13 = vshrl.u32 %v830_v3, 5  ;;  %v833_v44 = vsub.s32 32, %v832_v52 }
  0xe0   : > { %v684_v50 = vshrl.u32 %v666_v1, %v682_v4  ;;  %v687_v14 = vadd.s32 127, %v686_v26  ;;  %v773_v56 = vsel %vm771_vm7, %v772_v45, %v9590_v20  ;;  %v835_v36 = vshll.u32 %v15318_v46, %v832_v52 }
  0xe1   : > { %v590_v48 = vxor.u32 2147483648, %v589_v24  ;;  %v774_v37 = vadd.s32 %v773_v56, %v769_v25  ;;  %v836_v27 = vshrl.u32 %v15310_v10, %v833_v44  ;;  %v838_v12 = vshll.u32 %v15310_v10, %v832_v52 }
  0xe2   : > { %v685_v28 = vor.u32 %v684_v50, %v683_v0  ;;  %v688_v31 = vshll.u32 %v687_v14, 23  ;;  %v839_v57 = vshrl.u32 %v15311_v21, %v833_v44  ;;  %v841_v8 = vshll.u32 %v15311_v21, %v832_v52 }
  0xe3   : > { %v591_v61 = vsel %vm508_vm12, %v590_v48, %v589_v24  ;;  %v775_v55 = vadd.s32 536870912, %v774_v37  ;;  %v842_v20 = vshrl.u32 %v15312_v11, %v833_v44  ;;  %v844_v3 = vshll.u32 %v15312_v11, %v832_v52 }
  0xe4   : > { %v594_v1 = vsel %vm9536_vm14, %v9178_v54, %v591_v61  ;;  %v689_v19 = vor.u32 4788187, %v688_v31  ;;  %v692_v15 = vcvt.s32.f32 %v685_v28  ;;  %v837_v25 = vor.u32 %v836_v27, %v835_v36 }
  0xe5   : > { %7887 = vcosq.f32 %v594_v1  ;;  %v9627_v22 = vshrl.u32 %v775_v55, 30  ;;  %v840_v4 = vor.u32 %v839_v57, %v838_v12  ;;  %v845_v0 = vshrl.u32 %v15313_v53, %v833_v44 }
  0xe6   : > { %7889 = vsinq.f32 %v594_v1  ;;  %v690_v26 = vand.u32 2147483647, %v689_v19  ;;  %v847_v45 = vshll.u32 %v15313_v53, %v832_v52  ;;  %v848_v24 = vshrl.u32 %v15314_v35, %v833_v44 }
  0xe7   : > { %v699_v50 = vsel %vm9603_vm8, 0, %v697_v33  ;;  %v777_v9 = vshll.u32 %v9627_v22, 30  ;;  %v846_v14 = vor.u32 %v845_v0, %v844_v3  ;;  %vm850_vm9 = vcmp.lt.s32.totalorder %v9612_v13, 1 }
  0xe8   : > { %v693_v56 = vmul.f32 %v692_v15, %v690_v26  ;;  %v834_v36 = vshrl.u32 %v15318_v46, %v833_v44  ;;  %v843_v48 = vor.u32 %v842_v20, %v841_v8  ;;  %v9639_v27 = vshll.u32 %v826_v34, 8 }
  0xe9   : > { %vm601_vm10 = vcmp.lt.s32.totalorder %v9594_v16, 2  ;;  %v9642_v52 = vsub.s32 %v774_v37, %v777_v9  ;;  %v849_v12 = vor.u32 %v848_v24, %v847_v45  ;;  %vm852_vm11 = vcmp.lt.s32.totalorder %v9612_v13, 3 }
  0xea   : > { %vm853_vm12 = vcmp.lt.s32.totalorder %v9612_v13, 4  ;;  %vm598_vm13 = vweird.f32 %v9178_v54  ;;  %v694_v33 = vxor.u32 2147483648, %v693_v56  ;;  %vm716_vm14 = vcmp.lt.s32.totalorder %v9186_v51, 0 }
  0xeb   : > { %vm851_vm15 = vcmp.lt.s32.totalorder %v9612_v13, 2  ;;  %v855_v23 = vsel %vm853_vm12, %v843_v48, 2102212464  ;;  %v858_v34 = vsel %vm850_vm9, %v837_v25, %v840_v4  ;;  %vm602_vm0 = vcmp.eq.s32.totalorder %v9594_v16, 0 }
  0xec   : > { %v703_v44 = vadd.s32 3, %v699_v50  ;;  %v780_v37 = vsub.s32 0, %v9642_v52  ;;  %v859_v28 = vsel %vm853_vm12, %v846_v14, 920167782  ;;  %v695_v31 = vsel %vm612_vm4, %v694_v33, %v693_v56 }
  0xed   : > { %v854_v57 = vsel %vm850_vm9, %v834_v36, %v837_v25  ;;  %v856_v8 = vsel %vm852_vm11, %v840_v4, %v855_v23  ;;  %v860_v61 = vsel %vm852_vm11, %v843_v48, %v859_v28  ;;  %v698_v55 = vsel %vm9603_vm8, %v9182_v60, %v695_v31 }
  0xee   : > { %v15322_v20 = vand.u32 2147483647, %v9186_v51  ;;  %v7320_v1 = vmin.u32 %v780_v37, %v9642_v52  ;;  %v861_v19 = vsel %vm851_vm15, %v858_v34, %v860_v61  ;;  %v862_v15 = vsel %vm850_vm9, %v840_v4, %v843_v48 }
  0xef   : > { %7891 = vcosq.f32 %v698_v55  ;;  %v863_v25 = vsel %vm853_vm12, %v849_v12, 1326507024  ;;  %v9683_v30 = vmul.u32.u64.low %v9639_v27, %v861_v19  ;;  %v9684_v0 = vmul.u32.u64.high %v9639_v27, %v861_v19, %v9683_v30  ;;  %v7888_v26 = vpop.eup %7887 }
  0xf0   : > { %vm9671_vm1 = vcmp.le.f32.partialorder %v15322_v20, 0.7853982  ;;  %vm605_vm2 = vcmp.eq.s32.totalorder %v9594_v16, 2  ;;  %7893 = vsinq.f32 %v698_v55  ;;  %v782_v45 = vclz %v7320_v1  ;;  %v7890_v50 = vpop.eup %7889 }
  0xf1   : > { %v800_v24 = vsub.s32 4, %v9627_v22  ;;  %v606_v4 = vxor.u32 2147483648, %v7888_v26  ;;  %v704_v9 = vand.u32 3, %v703_v44  ;;  %v770_v56 = vadd.s32 %v9589_v63, %v9586_v18 }
  0xf2   : > { %v864_v36 = vsel %vm852_vm11, %v846_v14, %v863_v25  ;;  %v603_v48 = vxor.u32 2147483648, %v7890_v50  ;;  %v7321_v12 = vadd.s32 4294967294, %v782_v45  ;;  %v857_v33 = vsel %vm851_vm15, %v854_v57, %v856_v8 }
  0xf3   : > { %v865_v23 = vsel %vm851_vm15, %v862_v15, %v864_v36  ;;  %v607_v34 = vsel %vm605_vm2, %v606_v4, %v7890_v50  ;;  %v922_v44 = vand.u32 2147483647, %v9190_v47  ;;  %vm702_vm3 = vweird.f32 %v9182_v60 }
  0xf4   : > { %v9702_v37 = vmul.u32.u64.low %v9639_v27, %v865_v23  ;;  %v9703_v28 = vmul.u32.u64.high %v9639_v27, %v865_v23, %v9702_v37  ;;  %v604_v18 = vsel %vm602_vm0, %v7888_v26, %v603_v48  ;;  %vm7322_vm4 = vcmp.lt.s32.totalorder %v7321_v12, 0 }
  0xf5   : > { %v801_v63 = vsel %vm716_vm14, %v800_v24, %v9627_v22  ;;  %v876_v13 = vadd.s32 1, %v9684_v0  ;;  %v608_v14 = vsel %vm601_vm10, %v604_v18, %v607_v34  ;;  %v785_v31 = vsel %vm7322_vm4, 0, %v7321_v12 }
  0xf6   : > { %v873_v57 = vmul.u32 %v9639_v27, %v857_v33  ;;  %v925_v8 = vand.u32 2139095040, %v9190_v47  ;;  %v609_v61 = vsel %vm598_vm13, nan, %v608_v14  ;;  %v786_v55 = vsub.s32 32, %v785_v31 }
  0xf7   : > { %v787_v20 = vshll.u32 %v9642_v52, %v785_v31  ;;  %v790_v1 = vsub.s32 4294967266, %v785_v31  ;;  %v803_v22 = vsel %vm9671_vm1, 0, %v801_v63  ;;  %vm875_vm5 = vc.u32 %v9703_v28, %v9683_v30  ;;  %7162 = vst [vmem:[%s9727_s11] sm:$0xff] %v609_v61 }
  0xf8   : > { %v926_v16 = vshrl.u32 %v925_v8, 23  ;;  %v929_v19 = vand.u32 8388607, %v922_v44  ;;  %vm705_vm6 = vcmp.lt.s32.totalorder %v704_v9, 2  ;;  %v788_v54 = vshrl.u32 %v770_v56, %v786_v55 }
  0xf9   : > { %v791_v27 = vadd.s32 127, %v790_v1  ;;  %v877_v52 = vsel %vm875_vm5, %v876_v13, %v9684_v0  ;;  %v7892_v15 = vpop.eup %7891  ;;  %vm706_vm7 = vcmp.eq.s32.totalorder %v704_v9, 0  ;;  %vm709_vm8 = vcmp.eq.s32.totalorder %v704_v9, 2 }
  0xfa   : > { %v878_v25 = vadd.s32 %v877_v52, %v873_v57  ;;  %v7327_v26 = vadd.s32 4294967169, %v926_v16  ;;  %v7894_v45 = vpop.eup %7893  ;;  %v710_v24 = vxor.u32 2147483648, %v7892_v15  ;;  %v789_v50 = vor.u32 %v788_v54, %v787_v20 }
  0xfb   : > { %v792_v4 = vshll.u32 %v791_v27, 23  ;;  %v807_v36 = vadd.s32 3, %v803_v22  ;;  %v707_v48 = vxor.u32 2147483648, %v7894_v45  ;;  %v930_v33 = vor.u32 8388608, %v929_v19 }
  0xfc   : > { %v879_v12 = vadd.s32 536870912, %v878_v25  ;;  %v932_v23 = vadd.s32 1, %v7327_v26  ;;  %v711_v34 = vsel %vm709_vm8, %v710_v24, %v7894_v45  ;;  %v796_v56 = vcvt.s32.f32 %v789_v50 }
  0xfd   : > { %v793_v37 = vor.u32 4788187, %v792_v4  ;;  %v1029_v0 = vand.u32 2139095040, %v9194_v17  ;;  %v708_v18 = vsel %vm706_vm7, %v7892_v15, %v707_v48  ;;  %v1026_v13 = vand.u32 2147483647, %v9194_v17 }
  0xfe   : > { %v880_v63 = vshrl.u32 %v879_v12, 30  ;;  %vm933_vm9 = vcmp.gt.s32.totalorder %v932_v23, 0  ;;  %v712_v14 = vsel %vm705_vm6, %v708_v18, %v711_v34  ;;  %v9737_v1 = vand.u32 3, %v807_v36 }
  0xff   : > { %v794_v31 = vand.u32 2147483647, %v793_v37  ;;  %v934_v57 = vsel %vm933_vm9, %v932_v23, 0  ;;  %v713_v8 = vsel %vm702_vm3, nan, %v712_v14  ;;  %v1030_v55 = vshrl.u32 %v1029_v0, 23 }
 0x100   : > { %v881_v61 = vshll.u32 %v880_v63, 30  ;;  %vm820_vm10 = vcmp.lt.s32.totalorder %v9441_v29, 0  ;;  %v936_v22 = vand.u32 31, %v934_v57  ;;  %7163 = vst [vmem:[%s9727_s11 + $0x8] sm:$0xff] %v713_v8  ;;  %v874_v16 = vadd.s32 %v9683_v30, %v9703_v28 }
 0x101   : > { %v797_v20 = vmul.f32 %v796_v56, %v794_v31  ;;  %v9745_v9 = vshll.u32 %v930_v33, 8  ;;  %v9749_v60 = vand.u32 8388607, %v1026_v13  ;;  %v904_v27 = vsub.s32 4, %v880_v63 }
 0x102   : > { %v9743_v19 = vsub.s32 %v878_v25, %v881_v61  ;;  %v9751_v52 = vshrl.u32 %v934_v57, 5  ;;  %v937_v15 = vsub.s32 32, %v936_v22  ;;  %v939_v45 = vshll.u32 %v15318_v46, %v936_v22 }
 0x103   : > { %v798_v54 = vxor.u32 2147483648, %v797_v20  ;;  %v942_v24 = vshll.u32 %v15310_v10, %v936_v22  ;;  %v7331_v30 = vadd.s32 4294967169, %v1030_v55  ;;  %v945_v4 = vshll.u32 %v15311_v21, %v936_v22 }
 0x104   : > { %v884_v26 = vsub.s32 0, %v9743_v19  ;;  %v940_v25 = vshrl.u32 %v15310_v10, %v937_v15  ;;  %v943_v50 = vshrl.u32 %v15311_v21, %v937_v15  ;;  %v946_v12 = vshrl.u32 %v15312_v11, %v937_v15 }
 0x105   : > { %v799_v28 = vsel %vm716_vm14, %v798_v54, %v797_v20  ;;  %v1034_v33 = vor.u32 8388608, %v9749_v60  ;;  %v9769_v23 = vsel %vm820_vm10, %v904_v27, %v880_v63  ;;  %v938_v34 = vshrl.u32 %v15318_v46, %v937_v15 }
 0x106   : > { %v802_v36 = vsel %vm9671_vm1, %v9186_v51, %v799_v28  ;;  %v7324_v48 = vmin.u32 %v884_v26, %v9743_v19  ;;  %v948_v37 = vshll.u32 %v15312_v11, %v936_v22  ;;  %v15325_v56 = vand.u32 2147483647, %v9441_v29 }
 0x107   : > { %7895 = vcosq.f32 %v802_v36  ;;  %v941_v18 = vor.u32 %v940_v25, %v939_v45  ;;  %v944_v14 = vor.u32 %v943_v50, %v942_v24  ;;  %vm813_vm12 = vcmp.eq.s32.totalorder %v9737_v1, 2 }
 0x108   : > { %7897 = vsinq.f32 %v802_v36  ;;  %vm9775_vm11 = vcmp.le.f32.partialorder %v15325_v56, 0.7853982  ;;  %v886_v0 = vclz %v7324_v48  ;;  %v947_v31 = vor.u32 %v946_v12, %v945_v4 }
 0x109   : > { %v949_v63 = vshrl.u32 %v15313_v53, %v937_v15  ;;  %v951_v57 = vshll.u32 %v15313_v53, %v936_v22  ;;  %vm954_vm13 = vcmp.lt.s32.totalorder %v9751_v52, 1  ;;  %vm810_vm14 = vcmp.eq.s32.totalorder %v9737_v1, 0 }
 0x10a   : > { %v7325_v8 = vadd.s32 4294967294, %v886_v0  ;;  %v952_v61 = vshrl.u32 %v15314_v35, %v937_v15  ;;  %vm955_vm15 = vcmp.lt.s32.totalorder %v9751_v52, 2  ;;  %vm957_vm0 = vcmp.lt.s32.totalorder %v9751_v52, 4 }
 0x10b   : > { %vm809_vm1 = vcmp.lt.s32.totalorder %v9737_v1, 2  ;;  %v950_v55 = vor.u32 %v949_v63, %v948_v37  ;;  %vm956_vm2 = vcmp.lt.s32.totalorder %v9751_v52, 3  ;;  %v958_v20 = vsel %vm954_vm13, %v938_v34, %v941_v18 }
 0x10c   : > { %v959_v22 = vsel %vm957_vm0, %v947_v31, 2102212464  ;;  %vm806_vm3 = vweird.f32 %v9186_v51  ;;  %vm7326_vm4 = vcmp.lt.s32.totalorder %v7325_v8, 0  ;;  %v953_v54 = vor.u32 %v952_v61, %v951_v57 }
 0x10d   : > { %v960_v27 = vsel %vm956_vm2, %v944_v14, %v959_v22  ;;  %v962_v15 = vsel %vm954_vm13, %v941_v18, %v944_v14  ;;  %v889_v26 = vsel %vm7326_vm4, 0, %v7325_v8  ;;  %v963_v45 = vsel %vm957_vm0, %v950_v55, 920167782 }
 0x10e   : > { %v966_v24 = vsel %vm954_vm13, %v944_v14, %v947_v31  ;;  %v1036_v28 = vadd.s32 1, %v7331_v30  ;;  %v890_v25 = vsub.s32 32, %v889_v26  ;;  %v891_v50 = vshll.u32 %v9743_v19, %v889_v26 }
 0x10f   : > { %v894_v4 = vsub.s32 4294967266, %v889_v26  ;;  %v964_v36 = vsel %vm956_vm2, %v947_v31, %v963_v45  ;;  %v961_v48 = vsel %vm955_vm15, %v958_v20, %v960_v27  ;;  %v967_v34 = vsel %vm957_vm0, %v953_v54, 1326507024 }
 0x110   : > { %v965_v12 = vsel %vm955_vm15, %v962_v15, %v964_v36  ;;  %vm1037_vm5 = vcmp.gt.s32.totalorder %v1036_v28, 0  ;;  %v892_v37 = vshrl.u32 %v874_v16, %v890_v25  ;;  %v968_v30 = vsel %vm956_vm2, %v950_v55, %v967_v34 }
 0x111   : > { %v895_v56 = vadd.s32 127, %v894_v4  ;;  %v1038_v19 = vsel %vm1037_vm5, %v1036_v28, 0  ;;  %v7896_v0 = vpop.eup %7895  ;;  %v907_v18 = vsel %vm9775_vm11, 0, %v9769_v23  ;;  %v969_v14 = vsel %vm955_vm15, %v966_v24, %v968_v30 }
 0x112   : > { %v9819_v31 = vmul.u32.u64.low %v9745_v9, %v965_v12  ;;  %v9820_v63 = vmul.u32.u64.high %v9745_v9, %v965_v12, %v9819_v31  ;;  %v7898_v57 = vpop.eup %7897  ;;  %v814_v16 = vxor.u32 2147483648, %v7896_v0  ;;  %v893_v8 = vor.u32 %v892_v37, %v891_v50 }
 0x113   : > { %v896_v61 = vshll.u32 %v895_v56, 23  ;;  %v1040_v20 = vand.u32 31, %v1038_v19  ;;  %v811_v55 = vxor.u32 2147483648, %v7898_v57  ;;  %v977_v23 = vmul.u32 %v9745_v9, %v961_v48 }
 0x114   : > { %v9824_v22 = vmul.u32.u64.low %v9745_v9, %v969_v14  ;;  %v9825_v54 = vmul.u32.u64.high %v9745_v9, %v969_v14, %v9824_v22  ;;  %v815_v52 = vsel %vm813_vm12, %v814_v16, %v7898_v57  ;;  %v900_v15 = vcvt.s32.f32 %v893_v8 }
 0x115   : > { %v897_v27 = vor.u32 4788187, %v896_v61  ;;  %v1041_v26 = vsub.s32 32, %v1040_v20  ;;  %v812_v45 = vsel %vm810_vm14, %v7896_v0, %v811_v55  ;;  %v980_v24 = vadd.s32 1, %v9820_v63 }
 0x116   : > { %v1043_v28 = vshll.u32 %v15318_v46, %v1040_v20  ;;  %v1046_v25 = vshll.u32 %v15310_v10, %v1040_v20  ;;  %v816_v50 = vsel %vm809_vm1, %v812_v45, %v815_v52  ;;  %v911_v4 = vadd.s32 3, %v907_v18 }
 0x117   : > { %v898_v9 = vand.u32 2147483647, %v897_v27  ;;  %v1044_v36 = vshrl.u32 %v15310_v10, %v1041_v26  ;;  %v817_v48 = vsel %vm806_vm3, nan, %v816_v50  ;;  %vm979_vm6 = vc.u32 %v9825_v54, %v9819_v31 }
 0x118   : > { %v1039_v12 = vshrl.u32 %v1038_v19, 5  ;;  %v1047_v34 = vshrl.u32 %v15311_v21, %v1041_v26  ;;  %v981_v56 = vsel %vm979_vm6, %v980_v24, %v9820_v63  ;;  %v1049_v1 = vshll.u32 %v15311_v21, %v1040_v20  ;;  %7164 = vst [vmem:[%s9727_s11 + $0x10] sm:$0xff] %v817_v48 }
 0x119   : > { %v901_v37 = vmul.f32 %v900_v15, %v898_v9  ;;  %v1045_v30 = vor.u32 %v1044_v36, %v1043_v28  ;;  %v982_v0 = vadd.s32 %v981_v56, %v977_v23  ;;  %v1050_v14 = vshrl.u32 %v15312_v11, %v1041_v26 }
 0x11a   : > { %v1048_v18 = vor.u32 %v1047_v34, %v1046_v25  ;;  %v1052_v51 = vshll.u32 %v15312_v11, %v1040_v20  ;;  %v1053_v16 = vshrl.u32 %v15313_v53, %v1041_v26  ;;  %v1055_v19 = vshll.u32 %v15313_v53, %v1040_v20 }
 0x11b   : > { %v902_v57 = vxor.u32 2147483648, %v901_v37  ;;  %v1056_v8 = vshrl.u32 %v15314_v35, %v1041_v26  ;;  %v983_v61 = vadd.s32 536870912, %v982_v0  ;;  %v1042_v63 = vshrl.u32 %v15318_v46, %v1041_v26 }
 0x11c   : > { %v1051_v55 = vor.u32 %v1050_v14, %v1049_v1  ;;  %vm1058_vm7 = vcmp.lt.s32.totalorder %v1039_v12, 1  ;;  %v1054_v23 = vor.u32 %v1053_v16, %v1052_v51  ;;  %vm1061_vm8 = vcmp.lt.s32.totalorder %v1039_v12, 4 }
 0x11d   : > { %v903_v22 = vsel %vm820_vm10, %v902_v57, %v901_v37  ;;  %v1057_v52 = vor.u32 %v1056_v8, %v1055_v19  ;;  %v984_v15 = vshrl.u32 %v983_v61, 30  ;;  %vm1060_vm9 = vcmp.lt.s32.totalorder %v1039_v12, 3 }
 0x11e   : > { %v906_v27 = vsel %vm9775_vm11, %v9441_v29, %v903_v22  ;;  %v1063_v20 = vsel %vm1061_vm8, %v1051_v55, 2102212464  ;;  %vm1059_vm12 = vcmp.lt.s32.totalorder %v1039_v12, 2  ;;  %v1066_v45 = vsel %vm1058_vm7, %v1045_v30, %v1048_v18 }
 0x11f   : > { %7899 = vcosq.f32 %v906_v27  ;;  %v1067_v26 = vsel %vm1061_vm8, %v1054_v23, 920167782  ;;  %v985_v24 = vshll.u32 %v984_v15, 30  ;;  %v1062_v28 = vsel %vm1058_vm7, %v1042_v63, %v1045_v30 }
 0x120   : > { %7901 = vsinq.f32 %v906_v27  ;;  %v1064_v25 = vsel %vm1060_vm9, %v1048_v18, %v1063_v20  ;;  %v1068_v50 = vsel %vm1060_vm9, %v1051_v55, %v1067_v26  ;;  %v1070_v9 = vsel %vm1058_vm7, %v1048_v18, %v1051_v55 }
 0x121   : > { %v1071_v3 = vsel %vm1061_vm8, %v1057_v52, 1326507024  ;;  %v1074_v36 = vshll.u32 %v1034_v33, 8  ;;  %v986_v48 = vsub.s32 %v982_v0, %v985_v24  ;;  %v1008_v34 = vsub.s32 4, %v984_v15 }
 0x122   : > { %v1069_v37 = vsel %vm1059_vm12, %v1066_v45, %v1068_v50  ;;  %v1072_v56 = vsel %vm1060_vm9, %v1054_v23, %v1071_v3  ;;  %v912_v1 = vand.u32 3, %v911_v4  ;;  %v1065_v16 = vsel %vm1059_vm12, %v1062_v28, %v1064_v25 }
 0x123   : > { %v1073_v14 = vsel %vm1059_vm12, %v1070_v9, %v1072_v56  ;;  %v9867_v30 = vmul.u32.u64.low %v1074_v36, %v1069_v37  ;;  %v9868_v51 = vmul.u32.u64.high %v1074_v36, %v1069_v37, %v9867_v30  ;;  %v988_v57 = vsub.s32 0, %v986_v48 }
 0x124   : > { %v9871_v18 = vmul.u32.u64.low %v1074_v36, %v1073_v14  ;;  %v9872_v19 = vmul.u32.u64.high %v1074_v36, %v1073_v14, %v9871_v18  ;;  %vm924_vm10 = vcmp.lt.s32.totalorder %v9190_v47, 0  ;;  %v1133_v0 = vand.u32 2139095040, %v9198_v49 }
 0x125   : > { %v7328_v60 = vmin.u32 %v988_v57, %v986_v48  ;;  %v1009_v33 = vsel %vm924_vm10, %v1008_v34, %v984_v15  ;;  %vm910_vm11 = vweird.f32 %v9441_v29  ;;  %v1081_v4 = vmul.u32 %v1074_v36, %v1065_v16 }
 0x126   : > { %v1084_v8 = vadd.s32 1, %v9868_v51  ;;  %vm913_vm13 = vcmp.lt.s32.totalorder %v912_v1, 2  ;;  %vm9882_vm14 = vcmp.le.f32.partialorder %v922_v44, 0.7853982  ;;  %v1130_v63 = vand.u32 2147483647, %v9198_v49 }
 0x127   : > { %v990_v61 = vclz %v7328_v60  ;;  %vm917_vm15 = vcmp.eq.s32.totalorder %v912_v1, 2  ;;  %v1011_v22 = vsel %vm9882_vm14, 0, %v1009_v33  ;;  %vm1083_vm0 = vc.u32 %v9872_v19, %v9867_v30 }
 0x128   : > { %v1134_v23 = vshrl.u32 %v1133_v0, 23  ;;  %vm914_vm1 = vcmp.eq.s32.totalorder %v912_v1, 0  ;;  %v1085_v44 = vsel %vm1083_vm0, %v1084_v8, %v9868_v51  ;;  %v978_v45 = vadd.s32 %v9819_v31, %v9825_v54 }
 0x129   : > { %v7900_v55 = vpop.eup %7899  ;;  %v7329_v15 = vadd.s32 4294967294, %v990_v61  ;;  %v1086_v26 = vadd.s32 %v1085_v44, %v1081_v4  ;;  %v1015_v25 = vadd.s32 3, %v1011_v22  ;;  %v1137_v50 = vand.u32 8388607, %v1130_v63 }
 0x12a   : > { %v7902_v52 = vpop.eup %7901  ;;  %v918_v27 = vxor.u32 2147483648, %v7900_v55  ;;  %v7335_v24 = vadd.s32 4294967169, %v1134_v23  ;;  %v1237_v57 = vand.u32 2139095040, %v9202_v42  ;;  %vm1028_vm4 = vcmp.lt.s32.totalorder %v9194_v17, 0 }
 0x12b   : > { %v915_v20 = vxor.u32 2147483648, %v7902_v52  ;;  %vm7330_vm2 = vcmp.lt.s32.totalorder %v7329_v15, 0  ;;  %v1087_v36 = vadd.s32 536870912, %v1086_v26  ;;  %v1138_v60 = vor.u32 8388608, %v1137_v50 }
 0x12c   : > { %v919_v28 = vsel %vm917_vm15, %v918_v27, %v7902_v52  ;;  %v993_v3 = vsel %vm7330_vm2, 0, %v7329_v15  ;;  %v1140_v34 = vadd.s32 1, %v7335_v24  ;;  %v1082_v29 = vadd.s32 %v9867_v30, %v9872_v19 }
 0x12d   : > { %v916_v9 = vsel %vm914_vm1, %v7900_v55, %v915_v20  ;;  %v994_v56 = vsub.s32 32, %v993_v3  ;;  %v995_v14 = vshll.u32 %v986_v48, %v993_v3  ;;  %v998_v51 = vsub.s32 4294967266, %v993_v3 }
 0x12e   : > { %v920_v37 = vsel %vm913_vm13, %v916_v9, %v919_v28  ;;  %v1088_v54 = vshrl.u32 %v1087_v36, 30  ;;  %vm1141_vm3 = vcmp.gt.s32.totalorder %v1140_v34, 0  ;;  %v9901_v48 = vand.u32 3, %v1015_v25 }
 0x12f   : > { %v921_v31 = vsel %vm910_vm11, nan, %v920_v37  ;;  %v996_v16 = vshrl.u32 %v978_v45, %v994_v56  ;;  %v999_v18 = vadd.s32 127, %v998_v51  ;;  %v1142_v33 = vsel %vm1141_vm3, %v1140_v34, 0 }
 0x130   : > { %7165 = vst [vmem:[%s9727_s11 + $0x18] sm:$0xff] %v921_v31  ;;  %v1089_v0 = vshll.u32 %v1088_v54, 30  ;;  %v1144_v1 = vand.u32 31, %v1142_v33  ;;  %v1234_v22 = vand.u32 2147483647, %v9202_v42  ;;  %v1238_v23 = vshrl.u32 %v1237_v57, 23 }
 0x131   : > { %v997_v4 = vor.u32 %v996_v16, %v995_v14  ;;  %v1000_v8 = vshll.u32 %v999_v18, 23  ;;  %v1112_v15 = vsub.s32 4, %v1088_v54  ;;  %v9907_v44 = vshll.u32 %v1138_v60, 8 }
 0x132   : > { %v9904_v61 = vsub.s32 %v1086_v26, %v1089_v0  ;;  %v1145_v55 = vsub.s32 32, %v1144_v1  ;;  %v1147_v45 = vshll.u32 %v15318_v46, %v1144_v1  ;;  %v1150_v28 = vshll.u32 %v15310_v10, %v1144_v1 }
 0x133   : > { %v1001_v52 = vor.u32 4788187, %v1000_v8  ;;  %v1004_v27 = vcvt.s32.f32 %v997_v4  ;;  %v1153_v26 = vshll.u32 %v15311_v21, %v1144_v1  ;;  %vm9918_vm5 = vcmp.le.f32.partialorder %v1026_v13, 0.7853982 }
 0x134   : > { %v1092_v20 = vsub.s32 0, %v9904_v61  ;;  %v1148_v24 = vshrl.u32 %v15310_v10, %v1145_v55  ;;  %v1151_v19 = vshrl.u32 %v15311_v21, %v1145_v55  ;;  %v1154_v25 = vshrl.u32 %v15312_v11, %v1145_v55 }
 0x135   : > { %v1002_v30 = vand.u32 2147483647, %v1001_v52  ;;  %v1143_v3 = vshrl.u32 %v1142_v33, 5  ;;  %v1156_v36 = vshll.u32 %v15312_v11, %v1144_v1  ;;  %v7339_v34 = vadd.s32 4294967169, %v1238_v23 }
 0x136   : > { %v7332_v9 = vmin.u32 %v1092_v20, %v9904_v61  ;;  %v1113_v56 = vsel %vm1028_vm4, %v1112_v15, %v1088_v54  ;;  %v1146_v14 = vshrl.u32 %v15318_v46, %v1145_v55  ;;  %v1157_v51 = vshrl.u32 %v15313_v53, %v1145_v55 }
 0x137   : > { %v1005_v37 = vmul.f32 %v1004_v27, %v1002_v30  ;;  %v1149_v57 = vor.u32 %v1148_v24, %v1147_v45  ;;  %v1152_v13 = vor.u32 %v1151_v19, %v1150_v28  ;;  %v1155_v16 = vor.u32 %v1154_v25, %v1153_v26 }
 0x138   : > { %v1094_v31 = vclz %v7332_v9  ;;  %v1158_v60 = vor.u32 %v1157_v51, %v1156_v36  ;;  %v1159_v0 = vshll.u32 %v15313_v53, %v1144_v1  ;;  %v1160_v33 = vshrl.u32 %v15314_v35, %v1145_v55 }
 0x139   : > { %v1006_v18 = vxor.u32 2147483648, %v1005_v37  ;;  %vm1162_vm6 = vcmp.lt.s32.totalorder %v1143_v3, 1  ;;  %vm1163_vm7 = vcmp.lt.s32.totalorder %v1143_v3, 2  ;;  %vm1164_vm8 = vcmp.lt.s32.totalorder %v1143_v3, 3 }
 0x13a   : > { %v7333_v4 = vadd.s32 4294967294, %v1094_v31  ;;  %v1161_v8 = vor.u32 %v1160_v33, %v1159_v0  ;;  %vm1165_vm9 = vcmp.lt.s32.totalorder %v1143_v3, 4  ;;  %v1166_v23 = vsel %vm1162_vm6, %v1146_v14, %v1149_v57 }
 0x13b   : > { %v1007_v54 = vsel %vm924_vm10, %v1006_v18, %v1005_v37  ;;  %v1167_v1 = vsel %vm1165_vm9, %v1155_v16, 2102212464  ;;  %v1170_v55 = vsel %vm1162_vm6, %v1149_v57, %v1152_v13  ;;  %v1171_v20 = vsel %vm1165_vm9, %v1158_v60, 920167782 }
 0x13c   : > { %v1010_v52 = vsel %vm9882_vm14, %v9190_v47, %v1007_v54  ;;  %vm7334_vm12 = vcmp.lt.s32.totalorder %v7333_v4, 0  ;;  %v1168_v15 = vsel %vm1164_vm8, %v1152_v13, %v1167_v1  ;;  %v1115_v12 = vsel %vm9918_vm5, 0, %v1113_v56 }
 0x13d   : > { %7903 = vcosq.f32 %v1010_v52  ;;  %v1097_v27 = vsel %vm7334_vm12, 0, %v7333_v4  ;;  %v1172_v30 = vsel %vm1164_vm8, %v1155_v16, %v1171_v20  ;;  %v1174_v19 = vsel %vm1162_vm6, %v1152_v13, %v1155_v16 }
 0x13e   : > { %7905 = vsinq.f32 %v1010_v52  ;;  %v1098_v45 = vsub.s32 32, %v1097_v27  ;;  %v1099_v24 = vshll.u32 %v9904_v61, %v1097_v27  ;;  %v1102_v28 = vsub.s32 4294967266, %v1097_v27 }
 0x13f   : > { %v1175_v26 = vsel %vm1165_vm9, %v1161_v8, 1326507024  ;;  %v1173_v36 = vsel %vm1163_vm7, %v1170_v55, %v1172_v30  ;;  %v1169_v14 = vsel %vm1163_vm7, %v1166_v23, %v1168_v15  ;;  %v1244_v18 = vadd.s32 1, %v7339_v34 }
 0x140   : > { %v1100_v25 = vshrl.u32 %v1082_v29, %v1098_v45  ;;  %v1103_v9 = vadd.s32 127, %v1102_v28  ;;  %v1176_v37 = vsel %vm1164_vm8, %v1158_v60, %v1175_v26  ;;  %v1241_v29 = vand.u32 8388607, %v1234_v22 }
 0x141   : > { %v1177_v61 = vsel %vm1163_vm7, %v1174_v19, %v1176_v37  ;;  %v9951_v51 = vmul.u32.u64.low %v9907_v44, %v1173_v36  ;;  %v9952_v31 = vmul.u32.u64.high %v9907_v44, %v1173_v36, %v9951_v51  ;;  %v1119_v33 = vadd.s32 3, %v1115_v12 }
 0x142   : > { %v1101_v56 = vor.u32 %v1100_v25, %v1099_v24  ;;  %v1104_v57 = vshll.u32 %v1103_v9, 23  ;;  %v9956_v13 = vmul.u32.u64.low %v9907_v44, %v1177_v61  ;;  %v9957_v16 = vmul.u32.u64.high %v9907_v44, %v1177_v61, %v9956_v13 }
 0x143   : > { %v1185_v3 = vmul.u32 %v9907_v44, %v1169_v14  ;;  %vm1014_vm10 = vweird.f32 %v9190_v47  ;;  %vm1017_vm11 = vcmp.lt.s32.totalorder %v9901_v48, 2  ;;  %v1188_v4 = vadd.s32 1, %v9952_v31 }
 0x144   : > { %v1105_v60 = vor.u32 4788187, %v1104_v57  ;;  %v1108_v0 = vcvt.s32.f32 %v1101_v56  ;;  %vm1245_vm13 = vcmp.gt.s32.totalorder %v1244_v18, 0  ;;  %vm1018_vm14 = vcmp.eq.s32.totalorder %v9901_v48, 0 }
 0x145   : > { %vm1187_vm15 = vc.u32 %v9957_v16, %v9951_v51  ;;  %v1246_v8 = vsel %vm1245_vm13, %v1244_v18, 0  ;;  %vm1021_vm0 = vcmp.eq.s32.totalorder %v9901_v48, 2  ;;  %v1242_v44 = vor.u32 8388608, %v1241_v29 }
 0x146   : > { %v1106_v54 = vand.u32 2147483647, %v1105_v60  ;;  %v1189_v23 = vsel %vm1187_vm15, %v1188_v4, %v9952_v31  ;;  %v1248_v52 = vand.u32 31, %v1246_v8  ;;  %v9970_v15 = vand.u32 3, %v1119_v33 }
 0x147   : > { %v7904_v34 = vpop.eup %7903  ;;  %v1190_v20 = vadd.s32 %v1189_v23, %v1185_v3  ;;  %v9972_v24 = vshrl.u32 %v1246_v8, 5  ;;  %v1341_v60 = vand.u32 2139095040, %v9206_v32  ;;  %vm1132_vm2 = vcmp.lt.s32.totalorder %v9198_v49, 0 }
 0x148   : > { %v7906_v1 = vpop.eup %7905  ;;  %v1022_v55 = vxor.u32 2147483648, %v7904_v34  ;;  %v1109_v27 = vmul.f32 %v1108_v0, %v1106_v54  ;;  %v1249_v28 = vsub.s32 32, %v1248_v52  ;;  %v1251_v12 = vshll.u32 %v15318_v46, %v1248_v52 }
 0x149   : > { %v1019_v45 = vxor.u32 2147483648, %v7906_v1  ;;  %v1191_v26 = vadd.s32 536870912, %v1190_v20  ;;  %v1254_v25 = vshll.u32 %v15310_v10, %v1248_v52  ;;  %v1257_v14 = vshll.u32 %v15311_v21, %v1248_v52 }
 0x14a   : > { %v1023_v30 = vsel %vm1021_vm0, %v1022_v55, %v7906_v1  ;;  %v1110_v19 = vxor.u32 2147483648, %v1109_v27  ;;  %v1252_v36 = vshrl.u32 %v15310_v10, %v1249_v28  ;;  %v1255_v37 = vshrl.u32 %v15311_v21, %v1249_v28 }
 0x14b   : > { %v1020_v9 = vsel %vm1018_vm14, %v7904_v34, %v1019_v45  ;;  %v1192_v56 = vshrl.u32 %v1191_v26, 30  ;;  %v1258_v57 = vshrl.u32 %v15312_v11, %v1249_v28  ;;  %v1250_v18 = vshrl.u32 %v15318_v46, %v1249_v28 }
 0x14c   : > { %v1024_v61 = vsel %vm1017_vm11, %v1020_v9, %v1023_v30  ;;  %v1111_v31 = vsel %vm1028_vm4, %v1110_v19, %v1109_v27  ;;  %v1253_v0 = vor.u32 %v1252_v36, %v1251_v12  ;;  %v1256_v33 = vor.u32 %v1255_v37, %v1254_v25 }
 0x14d   : > { %v1025_v13 = vsel %vm1014_vm10, nan, %v1024_v61  ;;  %v1114_v29 = vsel %vm9918_vm5, %v9194_v17, %v1111_v31  ;;  %v1193_v48 = vshll.u32 %v1192_v56, 30  ;;  %v1260_v3 = vshll.u32 %v15312_v11, %v1248_v52 }
 0x14e   : > { %7907 = vcosq.f32 %v1114_v29  ;;  %7166 = vst [vmem:[%s9727_s11 + $0x20] sm:$0xff] %v1025_v13  ;;  %v1261_v4 = vshrl.u32 %v15313_v53, %v1249_v28  ;;  %v1263_v47 = vshll.u32 %v15313_v53, %v1248_v52  ;;  %v1259_v50 = vor.u32 %v1258_v57, %v1257_v14 }
 0x14f   : > { %7909 = vsinq.f32 %v1114_v29  ;;  %v9997_v54 = vsub.s32 %v1190_v20, %v1193_v48  ;;  %v1264_v8 = vshrl.u32 %v15314_v35, %v1249_v28  ;;  %vm1266_vm1 = vcmp.lt.s32.totalorder %v9972_v24, 1 }
 0x150   : > { %v1262_v34 = vor.u32 %v1261_v4, %v1260_v3  ;;  %vm1268_vm3 = vcmp.lt.s32.totalorder %v9972_v24, 3  ;;  %v1282_v23 = vshll.u32 %v1242_v44, 8  ;;  %vm1121_vm4 = vcmp.lt.s32.totalorder %v9970_v15, 2 }
 0x151   : > { %v1196_v1 = vsub.s32 0, %v9997_v54  ;;  %v1265_v55 = vor.u32 %v1264_v8, %v1263_v47  ;;  %vm1267_vm5 = vcmp.lt.s32.totalorder %v9972_v24, 2  ;;  %vm1269_vm6 = vcmp.lt.s32.totalorder %v9972_v24, 4 }
 0x152   : > { %vm1118_vm7 = vweird.f32 %v9194_v17  ;;  %v1271_v52 = vsel %vm1269_vm6, %v1259_v50, 2102212464  ;;  %v1274_v27 = vsel %vm1266_vm1, %v1253_v0, %v1256_v33  ;;  %v1275_v20 = vsel %vm1269_vm6, %v1262_v34, 920167782 }
 0x153   : > { %v1338_v45 = vand.u32 2147483647, %v9206_v32  ;;  %vm10013_vm8 = vcmp.le.f32.partialorder %v1130_v63, 0.7853982  ;;  %v7336_v28 = vmin.u32 %v1196_v1, %v9997_v54  ;;  %v1270_v12 = vsel %vm1266_vm1, %v1250_v18, %v1253_v0 }
 0x154   : > { %v1276_v30 = vsel %vm1268_vm3, %v1259_v50, %v1275_v20  ;;  %v1342_v19 = vshrl.u32 %v1341_v60, 23  ;;  %v1272_v26 = vsel %vm1268_vm3, %v1256_v33, %v1271_v52  ;;  %v1278_v63 = vsel %vm1266_vm1, %v1256_v33, %v1259_v50 }
 0x155   : > { %v1277_v25 = vsel %vm1267_vm5, %v1274_v27, %v1276_v30  ;;  %v1279_v9 = vsel %vm1269_vm6, %v1265_v55, 1326507024  ;;  %vm1122_vm9 = vcmp.eq.s32.totalorder %v9970_v15, 0  ;;  %vm1125_vm12 = vcmp.eq.s32.totalorder %v9970_v15, 2 }
 0x156   : > { %v1198_v36 = vclz %v7336_v28  ;;  %v1216_v37 = vsub.s32 4, %v1192_v56  ;;  %v1280_v14 = vsel %vm1268_vm3, %v1262_v34, %v1279_v9  ;;  %v1345_v57 = vand.u32 8388607, %v1338_v45 }
 0x157   : > { %v10032_v61 = vmul.u32.u64.low %v1282_v23, %v1277_v25  ;;  %v10033_v31 = vmul.u32.u64.high %v1282_v23, %v1277_v25, %v10032_v61  ;;  %v1273_v18 = vsel %vm1267_vm5, %v1270_v12, %v1272_v26  ;;  %v1281_v60 = vsel %vm1267_vm5, %v1278_v63, %v1280_v14 }
 0x158   : > { %v7908_v13 = vpop.eup %7907  ;;  %v7337_v29 = vadd.s32 4294967294, %v1198_v36  ;;  %v7343_v48 = vadd.s32 4294967169, %v1342_v19  ;;  %v1186_v3 = vadd.s32 %v9951_v51, %v9957_v16  ;;  %v1217_v8 = vsel %vm1132_vm2, %v1216_v37, %v1192_v56 }
 0x159   : > { %v7910_v0 = vpop.eup %7909  ;;  %v1126_v33 = vxor.u32 2147483648, %v7908_v13  ;;  %v10044_v4 = vmul.u32.u64.low %v1282_v23, %v1281_v60  ;;  %v10045_v47 = vmul.u32.u64.high %v1282_v23, %v1281_v60, %v10044_v4  ;;  %v1289_v55 = vmul.u32 %v1282_v23, %v1273_v18 }
 0x15a   : > { %v1123_v50 = vxor.u32 2147483648, %v7910_v0  ;;  %vm7338_vm10 = vcmp.lt.s32.totalorder %v7337_v29, 0  ;;  %v1348_v34 = vadd.s32 1, %v7343_v48  ;;  %v1292_v52 = vadd.s32 1, %v10033_v31 }
 0x15b   : > { %v1127_v1 = vsel %vm1125_vm12, %v1126_v33, %v7910_v0  ;;  %v1201_v24 = vsel %vm7338_vm10, 0, %v7337_v29  ;;  %v1219_v56 = vsel %vm10013_vm8, 0, %v1217_v8  ;;  %vm1291_vm11 = vc.u32 %v10045_v47, %v10032_v61 }
 0x15c   : > { %v1124_v51 = vsel %vm1122_vm9, %v7908_v13, %v1123_v50  ;;  %v1202_v16 = vsub.s32 32, %v1201_v24  ;;  %v1203_v27 = vshll.u32 %v9997_v54, %v1201_v24  ;;  %v1206_v20 = vsub.s32 4294967266, %v1201_v24 }
 0x15d   : > { %v1128_v28 = vsel %vm1121_vm4, %v1124_v51, %v1127_v1  ;;  %vm1349_vm13 = vcmp.gt.s32.totalorder %v1348_v34, 0  ;;  %v1293_v19 = vsel %vm1291_vm11, %v1292_v52, %v10033_v31  ;;  %v1223_v9 = vadd.s32 3, %v1219_v56 }
 0x15e   : > { %v1129_v23 = vsel %vm1118_vm7, nan, %v1128_v28  ;;  %v1204_v12 = vshrl.u32 %v1186_v3, %v1202_v16  ;;  %v1207_v30 = vadd.s32 127, %v1206_v20  ;;  %v1294_v26 = vadd.s32 %v1293_v19, %v1289_v55 }
 0x15f   : > { %v1350_v54 = vsel %vm1349_vm13, %v1348_v34, 0  ;;  %7167 = vst [vmem:[%s9727_s11 + $0x28] sm:$0xff] %v1129_v23  ;;  %v1346_v37 = vor.u32 8388608, %v1345_v57  ;;  %v1445_v18 = vand.u32 2139095040, %v9210_v38  ;;  %v10074_v24 = vand.u32 3, %v1223_v9 }
 0x160   : > { %v1205_v25 = vor.u32 %v1204_v12, %v1203_v27  ;;  %v1208_v15 = vshll.u32 %v1207_v30, 23  ;;  %v1352_v63 = vand.u32 31, %v1350_v54  ;;  %v1295_v36 = vadd.s32 536870912, %v1294_v26 }
 0x161   : > { %v1351_v60 = vshrl.u32 %v1350_v54, 5  ;;  %v10079_v16 = vshll.u32 %v1346_v37, 8  ;;  %vm1236_vm14 = vcmp.lt.s32.totalorder %v9202_v42, 0  ;;  %v1446_v30 = vshrl.u32 %v1445_v18, 23 }
 0x162   : > { %v1209_v14 = vor.u32 4788187, %v1208_v15  ;;  %v1212_v13 = vcvt.s32.f32 %v1205_v25  ;;  %v1353_v29 = vsub.s32 32, %v1352_v63  ;;  %v1296_v17 = vshrl.u32 %v1295_v36, 30 }
 0x163   : > { %v1355_v48 = vshll.u32 %v15318_v46, %v1352_v63  ;;  %v1358_v31 = vshll.u32 %v15310_v10, %v1352_v63  ;;  %v1364_v4 = vshll.u32 %v15312_v11, %v1352_v63  ;;  %v1361_v57 = vshll.u32 %v15311_v21, %v1352_v63 }
 0x164   : > { %v1210_v0 = vand.u32 2147483647, %v1209_v14  ;;  %v1356_v33 = vshrl.u32 %v15310_v10, %v1353_v29  ;;  %v1359_v3 = vshrl.u32 %v15311_v21, %v1353_v29  ;;  %v1297_v50 = vshll.u32 %v1296_v17, 30 }
 0x165   : > { %v1362_v8 = vshrl.u32 %v15312_v11, %v1353_v29  ;;  %v1365_v34 = vshrl.u32 %v15313_v53, %v1353_v29  ;;  %v1367_v51 = vshll.u32 %v15313_v53, %v1352_v63  ;;  %v1368_v56 = vshrl.u32 %v15314_v35, %v1353_v29 }
 0x166   : > { %v1213_v1 = vmul.f32 %v1212_v13, %v1210_v0  ;;  %v10076_v55 = vsub.s32 %v1294_v26, %v1297_v50  ;;  %v1357_v52 = vor.u32 %v1356_v33, %v1355_v48  ;;  %v1360_v20 = vor.u32 %v1359_v3, %v1358_v31 }
 0x167   : > { %v1366_v28 = vor.u32 %v1365_v34, %v1364_v4  ;;  %v1363_v12 = vor.u32 %v1362_v8, %v1361_v57  ;;  %vm1370_vm15 = vcmp.lt.s32.totalorder %v1351_v60, 1  ;;  %v1354_v26 = vshrl.u32 %v15318_v46, %v1353_v29 }
 0x168   : > { %v1214_v27 = vxor.u32 2147483648, %v1213_v1  ;;  %v1300_v23 = vsub.s32 0, %v10076_v55  ;;  %vm1372_vm0 = vcmp.lt.s32.totalorder %v1351_v60, 3  ;;  %vm1373_vm1 = vcmp.lt.s32.totalorder %v1351_v60, 4 }
 0x169   : > { %v1369_v15 = vor.u32 %v1368_v56, %v1367_v51  ;;  %v1375_v63 = vsel %vm1373_vm1, %v1363_v12, 2102212464  ;;  %vm10094_vm3 = vcmp.le.f32.partialorder %v1234_v22, 0.7853982  ;;  %v1378_v36 = vsel %vm1370_vm15, %v1357_v52, %v1360_v20 }
 0x16a   : > { %v1215_v19 = vsel %vm1132_vm2, %v1214_v27, %v1213_v1  ;;  %v7340_v25 = vmin.u32 %v1300_v23, %v10076_v55  ;;  %vm1371_vm2 = vcmp.lt.s32.totalorder %v1351_v60, 2  ;;  %v1379_v37 = vsel %vm1373_vm1, %v1366_v28, 920167782 }
 0x16b   : > { %v1218_v54 = vsel %vm10013_vm8, %v9198_v49, %v1215_v19  ;;  %v1320_v14 = vsub.s32 4, %v1296_v17  ;;  %v1442_v13 = vand.u32 2147483647, %v9210_v38  ;;  %v1374_v29 = vsel %vm1370_vm15, %v1354_v26, %v1357_v52 }
 0x16c   : > { %7911 = vcosq.f32 %v1218_v54  ;;  %v1302_v44 = vclz %v7340_v25  ;;  %v1376_v18 = vsel %vm1372_vm0, %v1360_v20, %v1375_v63  ;;  %v1380_v48 = vsel %vm1372_vm0, %v1363_v12, %v1379_v37 }
 0x16d   : > { %7913 = vsinq.f32 %v1218_v54  ;;  %v1382_v22 = vsel %vm1370_vm15, %v1360_v20, %v1363_v12  ;;  %v1290_v31 = vadd.s32 %v10032_v61, %v10045_v47  ;;  %v1381_v33 = vsel %vm1371_vm2, %v1378_v36, %v1380_v48 }
 0x16e   : > { %v7341_v0 = vadd.s32 4294967294, %v1302_v44  ;;  %v1383_v3 = vsel %vm1373_vm1, %v1369_v15, 1326507024  ;;  %v10111_v50 = vmul.u32.u64.low %v10079_v16, %v1381_v33  ;;  %v10112_v57 = vmul.u32.u64.high %v10079_v16, %v1381_v33, %v10111_v50 }
 0x16f   : > { %v1384_v4 = vsel %vm1372_vm0, %v1366_v28, %v1383_v3  ;;  %v7347_v8 = vadd.s32 4294967169, %v1446_v30  ;;  %vm1222_vm4 = vweird.f32 %v9198_v49  ;;  %v1321_v34 = vsel %vm1236_vm14, %v1320_v14, %v1296_v17 }
 0x170   : > { %vm7342_vm5 = vcmp.lt.s32.totalorder %v7341_v0, 0  ;;  %v1377_v61 = vsel %vm1371_vm2, %v1374_v29, %v1376_v18  ;;  %v1385_v47 = vsel %vm1371_vm2, %v1382_v22, %v1384_v4  ;;  %vm1225_vm6 = vcmp.lt.s32.totalorder %v10074_v24, 2 }
 0x171   : > { %v1305_v1 = vsel %vm7342_vm5, 0, %v7341_v0  ;;  %v10121_v52 = vmul.u32.u64.low %v10079_v16, %v1385_v47  ;;  %v10122_v51 = vmul.u32.u64.high %v10079_v16, %v1385_v47, %v10121_v52  ;;  %v1452_v27 = vadd.s32 1, %v7347_v8 }
 0x172   : > { %v1306_v20 = vsub.s32 32, %v1305_v1  ;;  %v1307_v28 = vshll.u32 %v10076_v55, %v1305_v1  ;;  %v1310_v56 = vsub.s32 4294967266, %v1305_v1  ;;  %v1393_v23 = vmul.u32 %v10079_v16, %v1377_v61 }
 0x173   : > { %v1396_v17 = vadd.s32 1, %v10112_v57  ;;  %v1449_v60 = vand.u32 8388607, %v1442_v13  ;;  %vm1453_vm7 = vcmp.gt.s32.totalorder %v1452_v27, 0  ;;  %v1323_v19 = vsel %vm10094_vm3, 0, %v1321_v34 }
 0x174   : > { %v1308_v12 = vshrl.u32 %v1290_v31, %v1306_v20  ;;  %v1311_v30 = vadd.s32 127, %v1310_v56  ;;  %v1454_v26 = vsel %vm1453_vm7, %v1452_v27, 0  ;;  %vm1226_vm8 = vcmp.eq.s32.totalorder %v10074_v24, 0 }
 0x175   : > { %vm1229_vm9 = vcmp.eq.s32.totalorder %v10074_v24, 2  ;;  %vm1395_vm12 = vc.u32 %v10122_v51, %v10111_v50  ;;  %v1456_v55 = vand.u32 31, %v1454_v26  ;;  %v1327_v44 = vadd.s32 3, %v1323_v19 }
 0x176   : > { %v7912_v54 = vpop.eup %7911  ;;  %v1309_v15 = vor.u32 %v1308_v12, %v1307_v28  ;;  %v1312_v63 = vshll.u32 %v1311_v30, 23  ;;  %v1397_v36 = vsel %vm1395_vm12, %v1396_v17, %v10112_v57  ;;  %v1450_v31 = vor.u32 8388608, %v1449_v60 }
 0x177   : > { %v7914_v16 = vpop.eup %7913  ;;  %v1230_v25 = vxor.u32 2147483648, %v7912_v54  ;;  %v1398_v14 = vadd.s32 %v1397_v36, %v1393_v23  ;;  %v1457_v29 = vsub.s32 32, %v1456_v55  ;;  %v1459_v3 = vshll.u32 %v15318_v46, %v1456_v55 }
 0x178   : > { %v1227_v37 = vxor.u32 2147483648, %v7914_v16  ;;  %v1313_v48 = vor.u32 4788187, %v1312_v63  ;;  %v1316_v22 = vcvt.s32.f32 %v1309_v15  ;;  %v1462_v4 = vshll.u32 %v15310_v10, %v1456_v55 }
 0x179   : > { %v1231_v18 = vsel %vm1229_vm9, %v1230_v25, %v7914_v16  ;;  %v1399_v33 = vadd.s32 536870912, %v1398_v14  ;;  %v1460_v34 = vshrl.u32 %v15310_v10, %v1457_v29  ;;  %v1463_v61 = vshrl.u32 %v15311_v21, %v1457_v29 }
 0x17a   : > { %v1228_v0 = vsel %vm1226_vm8, %v7912_v54, %v1227_v37  ;;  %v1314_v8 = vand.u32 2147483647, %v1313_v48  ;;  %v1465_v52 = vshll.u32 %v15311_v21, %v1456_v55  ;;  %v1466_v27 = vshrl.u32 %v15312_v11, %v1457_v29 }
 0x17b   : > { %v1232_v57 = vsel %vm1225_vm6, %v1228_v0, %v1231_v18  ;;  %v1400_v1 = vshrl.u32 %v1399_v33, 30  ;;  %v1455_v28 = vshrl.u32 %v1454_v26, 5  ;;  %v1468_v56 = vshll.u32 %v15312_v11, %v1456_v55 }
 0x17c   : > { %v1233_v47 = vsel %vm1222_vm4, nan, %v1232_v57  ;;  %v1317_v20 = vmul.f32 %v1316_v22, %v1314_v8  ;;  %v1469_v24 = vshrl.u32 %v15313_v53, %v1457_v29  ;;  %v1471_v17 = vshll.u32 %v15313_v53, %v1456_v55 }
 0x17d   : > { %7168 = vst [vmem:[%s9727_s11 + $0x30] sm:$0xff] %v1233_v47  ;;  %v1401_v23 = vshll.u32 %v1400_v1, 30  ;;  %v10153_v60 = vshll.u32 %v1450_v31, 8  ;;  %v1549_v49 = vand.u32 2139095040, %v9214_v40  ;;  %v1458_v30 = vshrl.u32 %v15318_v46, %v1457_v29 }
 0x17e   : > { %v1318_v12 = vxor.u32 2147483648, %v1317_v20  ;;  %v1470_v19 = vor.u32 %v1469_v24, %v1468_v56  ;;  %v1472_v54 = vshrl.u32 %v15314_v35, %v1457_v29  ;;  %v1461_v26 = vor.u32 %v1460_v34, %v1459_v3 }
 0x17f   : > { %v10158_v16 = vsub.s32 %v1398_v14, %v1401_v23  ;;  %v1464_v25 = vor.u32 %v1463_v61, %v1462_v4  ;;  %v1467_v15 = vor.u32 %v1466_v27, %v1465_v52  ;;  %vm1474_vm10 = vcmp.lt.s32.totalorder %v1455_v28, 1 }
 0x180   : > { %v1319_v63 = vsel %vm1236_vm14, %v1318_v12, %v1317_v20  ;;  %v1473_v36 = vor.u32 %v1472_v54, %v1471_v17  ;;  %vm1477_vm11 = vcmp.lt.s32.totalorder %v1455_v28, 4  ;;  %vm1475_vm13 = vcmp.lt.s32.totalorder %v1455_v28, 2 }
 0x181   : > { %v1322_v55 = vsel %vm10094_vm3, %v9202_v42, %v1319_v63  ;;  %v1404_v37 = vsub.s32 0, %v10158_v16  ;;  %vm1476_vm15 = vcmp.lt.s32.totalorder %v1455_v28, 3  ;;  %v1478_v14 = vsel %vm1474_vm10, %v1458_v30, %v1461_v26 }
 0x182   : > { %7915 = vcosq.f32 %v1322_v55  ;;  %v1479_v29 = vsel %vm1477_vm11, %v1467_v15, 2102212464  ;;  %v1483_v18 = vsel %vm1477_vm11, %v1470_v19, 920167782  ;;  %v1482_v31 = vsel %vm1474_vm10, %v1461_v26, %v1464_v25 }
 0x183   : > { %7917 = vsinq.f32 %v1322_v55  ;;  %v7344_v48 = vmin.u32 %v1404_v37, %v10158_v16  ;;  %v1480_v22 = vsel %vm1476_vm15, %v1464_v25, %v1479_v29  ;;  %vm1340_vm14 = vcmp.lt.s32.totalorder %v9206_v32, 0 }
 0x184   : > { %v1484_v9 = vsel %vm1476_vm15, %v1467_v15, %v1483_v18  ;;  %v1486_v0 = vsel %vm1474_vm10, %v1464_v25, %v1467_v15  ;;  %v1487_v33 = vsel %vm1477_vm11, %v1473_v36, 1326507024  ;;  %v1328_v3 = vand.u32 3, %v1327_v44 }
 0x185   : > { %vm10178_vm0 = vcmp.le.f32.partialorder %v1338_v45, 0.7853982  ;;  %v1406_v57 = vclz %v7344_v48  ;;  %v1424_v8 = vsub.s32 4, %v1400_v1  ;;  %v1481_v34 = vsel %vm1475_vm13, %v1478_v14, %v1480_v22 }
 0x186   : > { %v1485_v61 = vsel %vm1475_vm13, %v1482_v31, %v1484_v9  ;;  %v1488_v47 = vsel %vm1476_vm15, %v1470_v19, %v1487_v33  ;;  %v1550_v52 = vshrl.u32 %v1549_v49, 23  ;;  %v1546_v23 = vand.u32 2147483647, %v9214_v40 }
 0x187   : > { %v7345_v27 = vadd.s32 4294967294, %v1406_v57  ;;  %v1489_v20 = vsel %vm1475_vm13, %v1486_v0, %v1488_v47  ;;  %v10187_v44 = vmul.u32.u64.low %v10153_v60, %v1485_v61  ;;  %v10188_v56 = vmul.u32.u64.high %v10153_v60, %v1485_v61, %v10187_v44 }
 0x188   : > { %v10192_v45 = vmul.u32.u64.low %v10153_v60, %v1489_v20  ;;  %v10193_v24 = vmul.u32.u64.high %v10153_v60, %v1489_v20, %v10192_v45  ;;  %v7351_v17 = vadd.s32 4294967169, %v1550_v52  ;;  %vm1330_vm1 = vcmp.eq.s32.totalorder %v1328_v3, 0 }
 0x189   : > { %v1394_v12 = vadd.s32 %v10111_v50, %v10122_v51  ;;  %vm7346_vm3 = vcmp.lt.s32.totalorder %v7345_v27, 0  ;;  %v1425_v28 = vsel %vm1340_vm14, %v1424_v8, %v1400_v1  ;;  %vm1333_vm2 = vcmp.eq.s32.totalorder %v1328_v3, 2 }
 0x18a   : > { %v1409_v49 = vsel %vm7346_vm3, 0, %v7345_v27  ;;  %v1497_v30 = vmul.u32 %v10153_v60, %v1481_v34  ;;  %v1556_v19 = vadd.s32 1, %v7351_v17  ;;  %v1500_v15 = vadd.s32 1, %v10188_v56 }
 0x18b   : > { %v1410_v54 = vsub.s32 32, %v1409_v49  ;;  %v1411_v26 = vshll.u32 %v10158_v16, %v1409_v49  ;;  %v1414_v25 = vsub.s32 4294967266, %v1409_v49  ;;  %v1427_v36 = vsel %vm10178_vm0, 0, %v1425_v28 }
 0x18c   : > { %v7916_v63 = vpop.eup %7915  ;;  %vm1499_vm4 = vc.u32 %v10193_v24, %v10187_v44  ;;  %v1553_v50 = vand.u32 8388607, %v1546_v23  ;;  %vm1557_vm5 = vcmp.gt.s32.totalorder %v1556_v19, 0  ;;  %vm1329_vm6 = vcmp.lt.s32.totalorder %v1328_v3, 2 }
 0x18d   : > { %v7918_v51 = vpop.eup %7917  ;;  %v1334_v1 = vxor.u32 2147483648, %v7916_v63  ;;  %v1412_v60 = vshrl.u32 %v1394_v12, %v1410_v54  ;;  %v1415_v55 = vadd.s32 127, %v1414_v25  ;;  %v1501_v16 = vsel %vm1499_vm4, %v1500_v15, %v10188_v56 }
 0x18e   : > { %v1331_v37 = vxor.u32 2147483648, %v7918_v51  ;;  %v1502_v14 = vadd.s32 %v1501_v16, %v1497_v30  ;;  %v1558_v29 = vsel %vm1557_vm5, %v1556_v19, 0  ;;  %vm1326_vm7 = vweird.f32 %v9202_v42 }
 0x18f   : > { %v1335_v18 = vsel %vm1333_vm2, %v1334_v1, %v7918_v51  ;;  %v1413_v48 = vor.u32 %v1412_v60, %v1411_v26  ;;  %v1416_v22 = vshll.u32 %v1415_v55, 23  ;;  %v1431_v9 = vadd.s32 3, %v1427_v36 }
 0x190   : > { %v1332_v31 = vsel %vm1330_vm1, %v7916_v63, %v1331_v37  ;;  %v1503_v0 = vadd.s32 536870912, %v1502_v14  ;;  %v1560_v33 = vand.u32 31, %v1558_v29  ;;  %v1554_v61 = vor.u32 8388608, %v1553_v50 }
 0x191   : > { %v1336_v57 = vsel %vm1329_vm6, %v1332_v31, %v1335_v18  ;;  %v1417_v8 = vor.u32 4788187, %v1416_v22  ;;  %v1420_v34 = vcvt.s32.f32 %v1413_v48  ;;  %v1653_v20 = vand.u32 2139095040, %v9218_v39 }
 0x192   : > { %v1337_v47 = vsel %vm1326_vm7, nan, %v1336_v57  ;;  %v1504_v52 = vshrl.u32 %v1503_v0, 30  ;;  %v1561_v27 = vsub.s32 32, %v1560_v33  ;;  %v1559_v56 = vshrl.u32 %v1558_v29, 5 }
 0x193   : > { %v1418_v42 = vand.u32 2147483647, %v1417_v8  ;;  %v1563_v45 = vshll.u32 %v15318_v46, %v1560_v33  ;;  %v1566_v3 = vshll.u32 %v15310_v10, %v1560_v33  ;;  %7169 = vst [vmem:[%s9727_s11 + $0x38] sm:$0xff] %v1337_v47  ;;  %v1569_v28 = vshll.u32 %v15311_v21, %v1560_v33 }
 0x194   : > { %v1505_v17 = vshll.u32 %v1504_v52, 30  ;;  %v1564_v12 = vshrl.u32 %v15310_v10, %v1561_v27  ;;  %v1572_v49 = vshll.u32 %v15312_v11, %v1560_v33  ;;  %v1567_v19 = vshrl.u32 %v15311_v21, %v1561_v27 }
 0x195   : > { %v1421_v30 = vmul.f32 %v1420_v34, %v1418_v42  ;;  %v1570_v54 = vshrl.u32 %v15312_v11, %v1561_v27  ;;  %v1573_v26 = vshrl.u32 %v15313_v53, %v1561_v27  ;;  %v10223_v25 = vand.u32 3, %v1431_v9 }
 0x196   : > { %v10225_v15 = vsub.s32 %v1502_v14, %v1505_v17  ;;  %v1575_v63 = vshll.u32 %v15313_v53, %v1560_v33  ;;  %v1562_v50 = vshrl.u32 %v15318_v46, %v1561_v27  ;;  %v10229_v51 = vshll.u32 %v1554_v61, 8 }
 0x197   : > { %v1422_v36 = vxor.u32 2147483648, %v1421_v30  ;;  %v1654_v1 = vshrl.u32 %v1653_v20, 23  ;;  %vm1444_vm8 = vcmp.lt.s32.totalorder %v9210_v38, 0  ;;  %v1565_v55 = vor.u32 %v1564_v12, %v1563_v45 }
 0x198   : > { %v1508_v60 = vsub.s32 0, %v10225_v15  ;;  %v1568_v16 = vor.u32 %v1567_v19, %v1566_v3  ;;  %v1576_v37 = vshrl.u32 %v15314_v35, %v1561_v27  ;;  %v1571_v29 = vor.u32 %v1570_v54, %v1569_v28 }
 0x199   : > { %v1423_v14 = vsel %vm1340_vm14, %v1422_v36, %v1421_v30  ;;  %v1574_v18 = vor.u32 %v1573_v26, %v1572_v49  ;;  %vm1578_vm9 = vcmp.lt.s32.totalorder %v1559_v56, 1  ;;  %vm1581_vm12 = vcmp.lt.s32.totalorder %v1559_v56, 4 }
 0x19a   : > { %v1426_v48 = vsel %vm10178_vm0, %v9206_v32, %v1423_v14  ;;  %v7348_v22 = vmin.u32 %v1508_v60, %v10225_v15  ;;  %v1577_v31 = vor.u32 %v1576_v37, %v1575_v63  ;;  %vm1579_vm10 = vcmp.lt.s32.totalorder %v1559_v56, 2 }
 0x19b   : > { %7919 = vcosq.f32 %v1426_v48  ;;  %vm1580_vm11 = vcmp.lt.s32.totalorder %v1559_v56, 3  ;;  %v1583_v9 = vsel %vm1581_vm12, %v1571_v29, 2102212464  ;;  %v1582_v33 = vsel %vm1578_vm9, %v1562_v50, %v1565_v55 }
 0x19c   : > { %7921 = vsinq.f32 %v1426_v48  ;;  %v1510_v0 = vclz %v7348_v22  ;;  %v1586_v57 = vsel %vm1578_vm9, %v1565_v55, %v1568_v16  ;;  %v1528_v8 = vsub.s32 4, %v1504_v52 }
 0x19d   : > { %v1584_v34 = vsel %vm1580_vm11, %v1568_v16, %v1583_v9  ;;  %v1587_v4 = vsel %vm1581_vm12, %v1574_v18, 920167782  ;;  %v1590_v61 = vsel %vm1578_vm9, %v1568_v16, %v1571_v29  ;;  %v1498_v47 = vadd.s32 %v10187_v44, %v10193_v24 }
 0x19e   : > { %v7349_v27 = vadd.s32 4294967294, %v1510_v0  ;;  %v1588_v20 = vsel %vm1580_vm11, %v1571_v29, %v1587_v4  ;;  %v1591_v42 = vsel %vm1581_vm12, %v1577_v31, 1326507024  ;;  %v1585_v45 = vsel %vm1579_vm10, %v1582_v33, %v1584_v34 }
 0x19f   : > { %v1589_v3 = vsel %vm1579_vm10, %v1586_v57, %v1588_v20  ;;  %v1592_v17 = vsel %vm1580_vm11, %v1574_v18, %v1591_v42  ;;  %v7355_v12 = vadd.s32 4294967169, %v1654_v1  ;;  %v1529_v24 = vsel %vm1444_vm8, %v1528_v8, %v1504_v52 }
 0x1a0   : > { %vm7350_vm13 = vcmp.lt.s32.totalorder %v7349_v27, 0  ;;  %v1593_v28 = vsel %vm1579_vm10, %v1590_v61, %v1592_v17  ;;  %v10255_v49 = vmul.u32.u64.low %v10229_v51, %v1589_v3  ;;  %v10256_v30 = vmul.u32.u64.high %v10229_v51, %v1589_v3, %v10255_v49 }
 0x1a1   : > { %v1513_v44 = vsel %vm7350_vm13, 0, %v7349_v27  ;;  %v10262_v19 = vmul.u32.u64.low %v10229_v51, %v1593_v28  ;;  %v10263_v54 = vmul.u32.u64.high %v10229_v51, %v1593_v28, %v10262_v19  ;;  %v1660_v50 = vadd.s32 1, %v7355_v12 }
 0x1a2   : > { %v1514_v26 = vsub.s32 32, %v1513_v44  ;;  %v1515_v63 = vshll.u32 %v10225_v15, %v1513_v44  ;;  %v1518_v36 = vsub.s32 4294967266, %v1513_v44  ;;  %vm1434_vm15 = vcmp.eq.s32.totalorder %v10223_v25, 0 }
 0x1a3   : > { %vm1437_vm14 = vcmp.eq.s32.totalorder %v10223_v25, 2  ;;  %vm10270_vm0 = vcmp.le.f32.partialorder %v1442_v13, 0.7853982  ;;  %v1601_v52 = vmul.u32 %v10229_v51, %v1585_v45  ;;  %v1604_v55 = vadd.s32 1, %v10256_v30 }
 0x1a4   : > { %v1516_v1 = vshrl.u32 %v1498_v47, %v1514_v26  ;;  %v1519_v60 = vadd.s32 127, %v1518_v36  ;;  %vm1661_vm1 = vcmp.gt.s32.totalorder %v1660_v50, 0  ;;  %v1531_v16 = vsel %vm10270_vm0, 0, %v1529_v24 }
 0x1a5   : > { %v7920_v15 = vpop.eup %7919  ;;  %vm1603_vm3 = vc.u32 %v10263_v54, %v10255_v49  ;;  %v1650_v37 = vand.u32 2147483647, %v9218_v39  ;;  %v1662_v13 = vsel %vm1661_vm1, %v1660_v50, 0  ;;  %vm1433_vm2 = vcmp.lt.s32.totalorder %v10223_v25, 2 }
 0x1a6   : > { %v7922_v14 = vpop.eup %7921  ;;  %v1438_v29 = vxor.u32 2147483648, %v7920_v15  ;;  %v1517_v18 = vor.u32 %v1516_v1, %v1515_v63  ;;  %v1520_v48 = vshll.u32 %v1519_v60, 23  ;;  %v1605_v51 = vsel %vm1603_vm3, %v1604_v55, %v10256_v30 }
 0x1a7   : > { %v1435_v22 = vxor.u32 2147483648, %v7922_v14  ;;  %v1606_v31 = vadd.s32 %v1605_v51, %v1601_v52  ;;  %v1664_v9 = vand.u32 31, %v1662_v13  ;;  %vm1430_vm4 = vweird.f32 %v9206_v32 }
 0x1a8   : > { %v1439_v0 = vsel %vm1437_vm14, %v1438_v29, %v7922_v14  ;;  %v1521_v33 = vor.u32 4788187, %v1520_v48  ;;  %v1524_v57 = vcvt.s32.f32 %v1517_v18  ;;  %v1535_v34 = vadd.s32 3, %v1531_v16 }
 0x1a9   : > { %v1436_v8 = vsel %vm1434_vm15, %v7920_v15, %v1435_v22  ;;  %v1607_v4 = vadd.s32 536870912, %v1606_v31  ;;  %v1665_v61 = vsub.s32 32, %v1664_v9  ;;  %v1657_v20 = vand.u32 8388607, %v1650_v37 }
 0x1aa   : > { %v1440_v47 = vsel %vm1433_vm2, %v1436_v8, %v1439_v0  ;;  %v1522_v27 = vand.u32 2147483647, %v1521_v33  ;;  %v10290_v42 = vshrl.u32 %v1662_v13, 5  ;;  %v1667_v3 = vshll.u32 %v15318_v46, %v1664_v9 }
 0x1ab   : > { %v1441_v32 = vsel %vm1430_vm4, nan, %v1440_v47  ;;  %v1608_v45 = vshrl.u32 %v1607_v4, 30  ;;  %v1670_v17 = vshll.u32 %v15310_v10, %v1664_v9  ;;  %v1668_v25 = vshrl.u32 %v15310_v10, %v1665_v61 }
 0x1ac   : > { %v1525_v12 = vmul.f32 %v1524_v57, %v1522_v27  ;;  %v1671_v28 = vshrl.u32 %v15311_v21, %v1665_v61  ;;  %v1676_v30 = vshll.u32 %v15312_v11, %v1664_v9  ;;  %7170 = vst [vmem:[%s9727_s11 + $0x40] sm:$0xff] %v1441_v32  ;;  %v1673_v24 = vshll.u32 %v15311_v21, %v1664_v9 }
 0x1ad   : > { %v1609_v44 = vshll.u32 %v1608_v45, 30  ;;  %v1674_v19 = vshrl.u32 %v15312_v11, %v1665_v61  ;;  %v1677_v26 = vshrl.u32 %v15313_v53, %v1665_v61  ;;  %v10301_v36 = vand.u32 3, %v1535_v34 }
 0x1ae   : > { %v1526_v63 = vxor.u32 2147483648, %v1525_v12  ;;  %vm1548_vm5 = vcmp.lt.s32.totalorder %v9214_v40, 0  ;;  %v1679_v50 = vshll.u32 %v15313_v53, %v1664_v9  ;;  %v1658_v1 = vor.u32 8388608, %v1657_v20 }
 0x1af   : > { %v10305_v52 = vsub.s32 %v1606_v31, %v1609_v44  ;;  %v1666_v60 = vshrl.u32 %v15318_v46, %v1665_v61  ;;  %v1680_v55 = vshrl.u32 %v15314_v35, %v1665_v61  ;;  %v1669_v16 = vor.u32 %v1668_v25, %v1667_v3 }
 0x1b0   : > { %v1527_v15 = vsel %vm1444_vm8, %v1526_v63, %v1525_v12  ;;  %v1672_v13 = vor.u32 %v1671_v28, %v1670_v17  ;;  %v1678_v14 = vor.u32 %v1677_v26, %v1676_v30  ;;  %vm10316_vm6 = vcmp.le.f32.partialorder %v1546_v23, 0.7853982 }
 0x1b1   : > { %v1530_v29 = vsel %vm10270_vm0, %v9210_v38, %v1527_v15  ;;  %v1612_v48 = vsub.s32 0, %v10305_v52  ;;  %v1675_v51 = vor.u32 %v1674_v19, %v1673_v24  ;;  %vm1682_vm7 = vcmp.lt.s32.totalorder %v10290_v42, 1 }
 0x1b2   : > { %7923 = vcosq.f32 %v1530_v29  ;;  %v1632_v22 = vsub.s32 4, %v1608_v45  ;;  %v1681_v31 = vor.u32 %v1680_v55, %v1679_v50  ;;  %vm1685_vm8 = vcmp.lt.s32.totalorder %v10290_v42, 4 }
 0x1b3   : > { %7925 = vsinq.f32 %v1530_v29  ;;  %v7352_v56 = vmin.u32 %v1612_v48, %v10305_v52  ;;  %vm1684_vm9 = vcmp.lt.s32.totalorder %v10290_v42, 3  ;;  %v1687_v23 = vsel %vm1685_vm8, %v1675_v51, 2102212464 }
 0x1b4   : > { %vm1683_vm12 = vcmp.lt.s32.totalorder %v10290_v42, 2  ;;  %v1690_v9 = vsel %vm1682_vm7, %v1669_v16, %v1672_v13  ;;  %v1691_v0 = vsel %vm1685_vm8, %v1678_v14, 920167782  ;;  %v1698_v33 = vshll.u32 %v1658_v1, 8 }
 0x1b5   : > { %v1602_v57 = vadd.s32 %v10255_v49, %v10263_v54  ;;  %v1614_v8 = vclz %v7352_v56  ;;  %v1686_v34 = vsel %vm1682_vm7, %v1666_v60, %v1669_v16  ;;  %v1694_v4 = vsel %vm1682_vm7, %v1672_v13, %v1675_v51 }
 0x1b6   : > { %vm1537_vm10 = vcmp.lt.s32.totalorder %v10301_v36, 2  ;;  %v1688_v61 = vsel %vm1684_vm9, %v1672_v13, %v1687_v23  ;;  %v1692_v47 = vsel %vm1684_vm9, %v1675_v51, %v1691_v0  ;;  %v1695_v27 = vsel %vm1685_vm8, %v1681_v31, 1326507024 }
 0x1b7   : > { %v1757_v49 = vand.u32 2139095040, %v9222_v41  ;;  %vm1534_vm11 = vweird.f32 %v9210_v38  ;;  %v7353_v54 = vadd.s32 4294967294, %v1614_v8  ;;  %v1633_v20 = vsel %vm1548_vm5, %v1632_v22, %v1608_v45 }
 0x1b8   : > { %v1693_v32 = vsel %vm1683_vm12, %v1690_v9, %v1692_v47  ;;  %v1696_v3 = vsel %vm1684_vm9, %v1678_v14, %v1695_v27  ;;  %v1689_v30 = vsel %vm1683_vm12, %v1686_v34, %v1688_v61  ;;  %v1635_v19 = vsel %vm10316_vm6, 0, %v1633_v20 }
 0x1b9   : > { %v1697_v17 = vsel %vm1683_vm12, %v1694_v4, %v1696_v3  ;;  %v10355_v12 = vmul.u32.u64.low %v1698_v33, %v1693_v32  ;;  %v10356_v25 = vmul.u32.u64.high %v1698_v33, %v1693_v32, %v10355_v12  ;;  %v1758_v28 = vshrl.u32 %v1757_v49, 23 }
 0x1ba   : > { %vm7354_vm13 = vcmp.lt.s32.totalorder %v7353_v54, 0  ;;  %v10361_v44 = vmul.u32.u64.low %v1698_v33, %v1697_v17  ;;  %v10362_v45 = vmul.u32.u64.high %v1698_v33, %v1697_v17, %v10361_v44  ;;  %v1754_v26 = vand.u32 2147483647, %v9222_v41 }
 0x1bb   : > { %v1617_v24 = vsel %vm7354_vm13, 0, %v7353_v54  ;;  %v7359_v63 = vadd.s32 4294967169, %v1758_v28  ;;  %vm1538_vm15 = vcmp.eq.s32.totalorder %v10301_v36, 0  ;;  %vm1541_vm14 = vcmp.eq.s32.totalorder %v10301_v36, 2 }
 0x1bc   : > { %v1618_v50 = vsub.s32 32, %v1617_v24  ;;  %v1619_v1 = vshll.u32 %v10305_v52, %v1617_v24  ;;  %v1622_v60 = vsub.s32 4294967266, %v1617_v24  ;;  %v7924_v55 = vpop.eup %7923  ;;  %v1705_v42 = vmul.u32 %v1698_v33, %v1689_v30 }
 0x1bd   : > { %v1708_v15 = vadd.s32 1, %v10356_v25  ;;  %v1764_v16 = vadd.s32 1, %v7359_v63  ;;  %v7926_v13 = vpop.eup %7925  ;;  %v1542_v14 = vxor.u32 2147483648, %v7924_v55  ;;  %v1639_v51 = vadd.s32 3, %v1635_v19 }
 0x1be   : > { %v1620_v29 = vshrl.u32 %v1602_v57, %v1618_v50  ;;  %v1623_v48 = vadd.s32 127, %v1622_v60  ;;  %v1539_v22 = vxor.u32 2147483648, %v7926_v13  ;;  %vm1707_vm0 = vc.u32 %v10362_v45, %v10355_v12 }
 0x1bf   : > { %v1761_v52 = vand.u32 8388607, %v1754_v26  ;;  %vm1765_vm1 = vcmp.gt.s32.totalorder %v1764_v16, 0  ;;  %v1543_v31 = vsel %vm1541_vm14, %v1542_v14, %v7926_v13  ;;  %v1709_v9 = vsel %vm1707_vm0, %v1708_v15, %v10356_v25 }
 0x1c0   : > { %v1621_v56 = vor.u32 %v1620_v29, %v1619_v1  ;;  %v1624_v23 = vshll.u32 %v1623_v48, 23  ;;  %v1540_v0 = vsel %vm1538_vm15, %v7924_v55, %v1539_v22  ;;  %v1710_v33 = vadd.s32 %v1709_v9, %v1705_v42 }
 0x1c1   : > { %v1766_v57 = vsel %vm1765_vm1, %v1764_v16, 0  ;;  %v1544_v8 = vsel %vm1537_vm10, %v1540_v0, %v1543_v31  ;;  %v10382_v54 = vand.u32 3, %v1639_v51  ;;  %v1762_v20 = vor.u32 8388608, %v1761_v52 }
 0x1c2   : > { %v1625_v34 = vor.u32 4788187, %v1624_v23  ;;  %v1628_v4 = vcvt.s32.f32 %v1621_v56  ;;  %v1545_v61 = vsel %vm1534_vm11, nan, %v1544_v8  ;;  %v1711_v47 = vadd.s32 536870912, %v1710_v33 }
 0x1c3   : > { %v1768_v27 = vand.u32 31, %v1766_v57  ;;  %7171 = vst [vmem:[%s9727_s11 + $0x48] sm:$0xff] %v1545_v61  ;;  %v1767_v3 = vshrl.u32 %v1766_v57, 5  ;;  %v1861_v25 = vand.u32 2139095040, %v9226_v43  ;;  %vm1652_vm3 = vcmp.lt.s32.totalorder %v9218_v39, 0 }
 0x1c4   : > { %v1626_v49 = vand.u32 2147483647, %v1625_v34  ;;  %v1712_v32 = vshrl.u32 %v1711_v47, 30  ;;  %vm10407_vm4 = vcmp.le.f32.partialorder %v1650_v37, 0.7853982  ;;  %v1802_v57 = vshll.u32 %v1762_v20, 8 }
 0x1c5   : > { %v1769_v17 = vsub.s32 32, %v1768_v27  ;;  %v1771_v36 = vshll.u32 %v15318_v46, %v1768_v27  ;;  %v1774_v30 = vshll.u32 %v15310_v10, %v1768_v27  ;;  %v1777_v38 = vshll.u32 %v15311_v21, %v1768_v27 }
 0x1c6   : > { %v1629_v28 = vmul.f32 %v1628_v4, %v1626_v49  ;;  %v1713_v44 = vshll.u32 %v1712_v32, 30  ;;  %v1780_v19 = vshll.u32 %v15312_v11, %v1768_v27  ;;  %v1783_v63 = vshll.u32 %v15313_v53, %v1768_v27 }
 0x1c7   : > { %v1772_v24 = vshrl.u32 %v15310_v10, %v1769_v17  ;;  %v1775_v1 = vshrl.u32 %v15311_v21, %v1769_v17  ;;  %v1778_v60 = vshrl.u32 %v15312_v11, %v1769_v17  ;;  %v1781_v55 = vshrl.u32 %v15313_v53, %v1769_v17 }
 0x1c8   : > { %v1630_v50 = vxor.u32 2147483648, %v1629_v28  ;;  %v10396_v42 = vsub.s32 %v1710_v33, %v1713_v44  ;;  %v1784_v15 = vshrl.u32 %v15314_v35, %v1769_v17  ;;  %vm1786_vm2 = vcmp.lt.s32.totalorder %v1767_v3, 1 }
 0x1c9   : > { %v1862_v16 = vshrl.u32 %v1861_v25, 23  ;;  %v1770_v14 = vshrl.u32 %v15318_v46, %v1769_v17  ;;  %v1773_v29 = vor.u32 %v1772_v24, %v1771_v36  ;;  %v1776_v48 = vor.u32 %v1775_v1, %v1774_v30 }
 0x1ca   : > { %v1631_v13 = vsel %vm1548_vm5, %v1630_v50, %v1629_v28  ;;  %v1716_v52 = vsub.s32 0, %v10396_v42  ;;  %v1779_v31 = vor.u32 %v1778_v60, %v1777_v38  ;;  %v1782_v56 = vor.u32 %v1781_v55, %v1780_v19 }
 0x1cb   : > { %v1634_v51 = vsel %vm10316_vm6, %v9214_v40, %v1631_v13  ;;  %v1785_v23 = vor.u32 %v1784_v15, %v1783_v63  ;;  %vm1788_vm5 = vcmp.lt.s32.totalorder %v1767_v3, 3  ;;  %vm1789_vm7 = vcmp.lt.s32.totalorder %v1767_v3, 4 }
 0x1cc   : > { %7927 = vcosq.f32 %v1634_v51  ;;  %v7356_v9 = vmin.u32 %v1716_v52, %v10396_v42  ;;  %v1736_v0 = vsub.s32 4, %v1712_v32  ;;  %v1791_v18 = vsel %vm1789_vm7, %v1779_v31, 2102212464 }
 0x1cd   : > { %7929 = vsinq.f32 %v1634_v51  ;;  %vm1787_vm6 = vcmp.lt.s32.totalorder %v1767_v3, 2  ;;  %v1794_v33 = vsel %vm1786_vm2, %v1773_v29, %v1776_v48  ;;  %v1795_v37 = vsel %vm1789_vm7, %v1782_v56, 920167782 }
 0x1ce   : > { %v1718_v8 = vclz %v7356_v9  ;;  %v1790_v34 = vsel %vm1786_vm2, %v1770_v14, %v1773_v29  ;;  %v1792_v4 = vsel %vm1788_vm5, %v1776_v48, %v1791_v18  ;;  %v1798_v61 = vsel %vm1786_vm2, %v1776_v48, %v1779_v31 }
 0x1cf   : > { %v1706_v47 = vadd.s32 %v10355_v12, %v10362_v45  ;;  %v1796_v27 = vsel %vm1788_vm5, %v1779_v31, %v1795_v37  ;;  %v1799_v49 = vsel %vm1789_vm7, %v1785_v23, 1326507024  ;;  %v7363_v17 = vadd.s32 4294967169, %v1862_v16 }
 0x1d0   : > { %vm1638_vm8 = vweird.f32 %v9214_v40  ;;  %v7357_v25 = vadd.s32 4294967294, %v1718_v8  ;;  %v1737_v20 = vsel %vm1652_vm3, %v1736_v0, %v1712_v32  ;;  %v1797_v28 = vsel %vm1787_vm6, %v1794_v33, %v1796_v27 }
 0x1d1   : > { %v1800_v36 = vsel %vm1788_vm5, %v1782_v56, %v1799_v49  ;;  %v1793_v30 = vsel %vm1787_vm6, %v1790_v34, %v1792_v4  ;;  %v10427_v44 = vmul.u32.u64.low %v1802_v57, %v1797_v28  ;;  %v10428_v12 = vmul.u32.u64.high %v1802_v57, %v1797_v28, %v10427_v44 }
 0x1d2   : > { %v1801_v38 = vsel %vm1787_vm6, %v1798_v61, %v1800_v36  ;;  %vm7358_vm9 = vcmp.lt.s32.totalorder %v7357_v25, 0  ;;  %v1868_v19 = vadd.s32 1, %v7363_v17  ;;  %vm1641_vm12 = vcmp.lt.s32.totalorder %v10382_v54, 2 }
 0x1d3   : > { %v10431_v45 = vmul.u32.u64.low %v1802_v57, %v1801_v38  ;;  %v10432_v24 = vmul.u32.u64.high %v1802_v57, %v1801_v38, %v10431_v45  ;;  %vm1645_vm10 = vcmp.eq.s32.totalorder %v10382_v54, 2  ;;  %v1721_v32 = vsel %vm7358_vm9, 0, %v7357_v25 }
 0x1d4   : > { %v1739_v63 = vsel %vm10407_vm4, 0, %v1737_v20  ;;  %v1722_v50 = vsub.s32 32, %v1721_v32  ;;  %v1723_v3 = vshll.u32 %v10396_v42, %v1721_v32  ;;  %v1726_v1 = vsub.s32 4294967266, %v1721_v32 }
 0x1d5   : > { %vm1869_vm11 = vcmp.gt.s32.totalorder %v1868_v19, 0  ;;  %v1809_v55 = vmul.u32 %v1802_v57, %v1793_v30  ;;  %v1812_v15 = vadd.s32 1, %v10428_v12  ;;  %v1858_v16 = vand.u32 2147483647, %v9226_v43 }
 0x1d6   : > { %v7928_v60 = vpop.eup %7927  ;;  %v1870_v13 = vsel %vm1869_vm11, %v1868_v19, 0  ;;  %vm1642_vm13 = vcmp.eq.s32.totalorder %v10382_v54, 0  ;;  %v1724_v48 = vshrl.u32 %v1706_v47, %v1722_v50  ;;  %v1727_v51 = vadd.s32 127, %v1726_v1 }
 0x1d7   : > { %v7930_v14 = vpop.eup %7929  ;;  %v1646_v29 = vxor.u32 2147483648, %v7928_v60  ;;  %v1743_v31 = vadd.s32 3, %v1739_v63  ;;  %vm1811_vm15 = vc.u32 %v10432_v24, %v10427_v44  ;;  %v1872_v42 = vand.u32 31, %v1870_v13 }
 0x1d8   : > { %v1643_v52 = vxor.u32 2147483648, %v7930_v14  ;;  %v1725_v23 = vor.u32 %v1724_v48, %v1723_v3  ;;  %v1728_v9 = vshll.u32 %v1727_v51, 23  ;;  %v1813_v0 = vsel %vm1811_vm15, %v1812_v15, %v10428_v12 }
 0x1d9   : > { %v1647_v56 = vsel %vm1645_vm10, %v1646_v29, %v7930_v14  ;;  %v1814_v33 = vadd.s32 %v1813_v0, %v1809_v55  ;;  %v1865_v37 = vand.u32 8388607, %v1858_v16  ;;  %v1873_v57 = vsub.s32 32, %v1872_v42 }
 0x1da   : > { %v1644_v18 = vsel %vm1642_vm13, %v7928_v60, %v1643_v52  ;;  %v1729_v34 = vor.u32 4788187, %v1728_v9  ;;  %v1732_v4 = vcvt.s32.f32 %v1725_v23  ;;  %v1871_v61 = vshrl.u32 %v1870_v13, 5 }
 0x1db   : > { %v1648_v8 = vsel %vm1641_vm12, %v1644_v18, %v1647_v56  ;;  %v1815_v27 = vadd.s32 536870912, %v1814_v33  ;;  %v1875_v49 = vshll.u32 %v15318_v46, %v1872_v42  ;;  %v1878_v17 = vshll.u32 %v15310_v10, %v1872_v42 }
 0x1dc   : > { %v1649_v47 = vsel %vm1638_vm8, nan, %v1648_v8  ;;  %v1730_v25 = vand.u32 2147483647, %v1729_v34  ;;  %v1876_v20 = vshrl.u32 %v15310_v10, %v1873_v57  ;;  %v1879_v28 = vshrl.u32 %v15311_v21, %v1873_v57 }
 0x1dd   : > { %v1881_v36 = vshll.u32 %v15311_v21, %v1872_v42  ;;  %7172 = vst [vmem:[%s9727_s11 + $0x50] sm:$0xff] %v1649_v47  ;;  %v1816_v54 = vshrl.u32 %v1815_v27, 30  ;;  %v1882_v30 = vshrl.u32 %v15312_v11, %v1873_v57  ;;  %v1884_v38 = vshll.u32 %v15312_v11, %v1872_v42 }
 0x1de   : > { %v1885_v40 = vshrl.u32 %v15313_v53, %v1873_v57  ;;  %v1733_v12 = vmul.f32 %v1732_v4, %v1730_v25  ;;  %v1866_v45 = vor.u32 8388608, %v1865_v37  ;;  %v1887_v19 = vshll.u32 %v15313_v53, %v1872_v42 }
 0x1df   : > { %v10463_v32 = vand.u32 3, %v1743_v31  ;;  %v1817_v63 = vshll.u32 %v1816_v54, 30  ;;  %v1874_v50 = vshrl.u32 %v15318_v46, %v1873_v57  ;;  %v1888_v3 = vshrl.u32 %v15314_v35, %v1873_v57 }
 0x1e0   : > { %v1734_v1 = vxor.u32 2147483648, %v1733_v12  ;;  %v1877_v60 = vor.u32 %v1876_v20, %v1875_v49  ;;  %v1880_v55 = vor.u32 %v1879_v28, %v1878_v17  ;;  %v1886_v15 = vor.u32 %v1885_v40, %v1884_v38 }
 0x1e1   : > { %v10467_v13 = vsub.s32 %v1814_v33, %v1817_v63  ;;  %v1883_v14 = vor.u32 %v1882_v30, %v1881_v36  ;;  %vm1890_vm14 = vcmp.lt.s32.totalorder %v1871_v61, 1  ;;  %vm1893_vm0 = vcmp.lt.s32.totalorder %v1871_v61, 4 }
 0x1e2   : > { %v1735_v29 = vsel %vm1652_vm3, %v1734_v1, %v1733_v12  ;;  %v1889_v48 = vor.u32 %v1888_v3, %v1887_v19  ;;  %vm1892_vm1 = vcmp.lt.s32.totalorder %v1871_v61, 3  ;;  %v1906_v51 = vshll.u32 %v1866_v45, 8 }
 0x1e3   : > { %v1738_v52 = vsel %vm10407_vm4, %v9218_v39, %v1735_v29  ;;  %v1820_v31 = vsub.s32 0, %v10467_v13  ;;  %vm1891_vm2 = vcmp.lt.s32.totalorder %v1871_v61, 2  ;;  %v1895_v42 = vsel %vm1893_vm0, %v1883_v14, 2102212464 }
 0x1e4   : > { %7931 = vcosq.f32 %v1738_v52  ;;  %v1840_v56 = vsub.s32 4, %v1816_v54  ;;  %v1898_v23 = vsel %vm1890_vm14, %v1877_v60, %v1880_v55  ;;  %v1899_v9 = vsel %vm1893_vm0, %v1886_v15, 920167782 }
 0x1e5   : > { %7933 = vsinq.f32 %v1738_v52  ;;  %v7360_v0 = vmin.u32 %v1820_v31, %v10467_v13  ;;  %v1894_v18 = vsel %vm1890_vm14, %v1874_v50, %v1877_v60  ;;  %v1900_v33 = vsel %vm1892_vm1, %v1883_v14, %v1899_v9 }
 0x1e6   : > { %v1896_v22 = vsel %vm1892_vm1, %v1880_v55, %v1895_v42  ;;  %v1901_v37 = vsel %vm1891_vm2, %v1898_v23, %v1900_v33  ;;  %v1902_v57 = vsel %vm1890_vm14, %v1880_v55, %v1883_v14  ;;  %v1903_v8 = vsel %vm1893_vm0, %v1889_v48, 1326507024 }
 0x1e7   : > { %vm1756_vm3 = vcmp.lt.s32.totalorder %v9222_v41, 0  ;;  %v1822_v34 = vclz %v7360_v0  ;;  %v1904_v47 = vsel %vm1892_vm1, %v1886_v15, %v1903_v8  ;;  %vm1742_vm4 = vweird.f32 %v9218_v39 }
 0x1e8   : > { %v1841_v4 = vsel %vm1756_vm3, %v1840_v56, %v1816_v54  ;;  %v10489_v27 = vmul.u32.u64.low %v1906_v51, %v1901_v37  ;;  %v10490_v49 = vmul.u32.u64.high %v1906_v51, %v1901_v37, %v10489_v27  ;;  %v1897_v25 = vsel %vm1891_vm2, %v1894_v18, %v1896_v22 }
 0x1e9   : > { %v7361_v17 = vadd.s32 4294967294, %v1822_v34  ;;  %v1905_v20 = vsel %vm1891_vm2, %v1902_v57, %v1904_v47  ;;  %v1965_v28 = vand.u32 2139095040, %v9230_v2  ;;  %vm1745_vm5 = vcmp.lt.s32.totalorder %v10463_v32, 2 }
 0x1ea   : > { %vm10500_vm7 = vcmp.le.f32.partialorder %v1754_v26, 0.7853982  ;;  %v10504_v54 = vmul.u32.u64.low %v1906_v51, %v1905_v20  ;;  %v10505_v30 = vmul.u32.u64.high %v1906_v51, %v1905_v20, %v10504_v54  ;;  %v1810_v38 = vadd.s32 %v10427_v44, %v10432_v24 }
 0x1eb   : > { %vm7362_vm6 = vcmp.lt.s32.totalorder %v7361_v17, 0  ;;  %v1962_v61 = vand.u32 2147483647, %v9230_v2  ;;  %v1966_v40 = vshrl.u32 %v1965_v28, 23  ;;  %v1843_v45 = vsel %vm10500_vm7, 0, %v1841_v4 }
 0x1ec   : > { %v1825_v12 = vsel %vm7362_vm6, 0, %v7361_v17  ;;  %v1913_v19 = vmul.u32 %v1906_v51, %v1897_v25  ;;  %v1916_v26 = vadd.s32 1, %v10490_v49  ;;  %vm1746_vm8 = vcmp.eq.s32.totalorder %v10463_v32, 0 }
 0x1ed   : > { %v1826_v63 = vsub.s32 32, %v1825_v12  ;;  %v1827_v50 = vshll.u32 %v10467_v13, %v1825_v12  ;;  %v1830_v3 = vsub.s32 4294967266, %v1825_v12  ;;  %v7367_v1 = vadd.s32 4294967169, %v1966_v40 }
 0x1ee   : > { %v7932_v60 = vpop.eup %7931  ;;  %vm1749_vm9 = vcmp.eq.s32.totalorder %v10463_v32, 2  ;;  %vm1915_vm12 = vc.u32 %v10505_v30, %v10489_v27  ;;  %v2069_v44 = vand.u32 2139095040, %v9234_v5  ;;  %v1847_v13 = vadd.s32 3, %v1843_v45 }
 0x1ef   : > { %v7934_v24 = vpop.eup %7933  ;;  %v1750_v55 = vxor.u32 2147483648, %v7932_v60  ;;  %v1828_v15 = vshrl.u32 %v1810_v38, %v1826_v63  ;;  %v1831_v14 = vadd.s32 127, %v1830_v3  ;;  %v1917_v29 = vsel %vm1915_vm12, %v1916_v26, %v10490_v49 }
 0x1f0   : > { %v1747_v48 = vxor.u32 2147483648, %v7934_v24  ;;  %v1918_v51 = vadd.s32 %v1917_v29, %v1913_v19  ;;  %v1972_v52 = vadd.s32 1, %v7367_v1  ;;  %v1969_v23 = vand.u32 8388607, %v1962_v61 }
 0x1f1   : > { %v1751_v31 = vsel %vm1749_vm9, %v1750_v55, %v7934_v24  ;;  %v1829_v42 = vor.u32 %v1828_v15, %v1827_v50  ;;  %v1832_v56 = vshll.u32 %v1831_v14, 23  ;;  %v2070_v18 = vshrl.u32 %v2069_v44, 23 }
 0x1f2   : > { %v1748_v9 = vsel %vm1746_vm8, %v7932_v60, %v1747_v48  ;;  %v1919_v0 = vadd.s32 536870912, %v1918_v51  ;;  %vm1973_vm10 = vcmp.gt.s32.totalorder %v1972_v52, 0  ;;  %v10530_v49 = vand.u32 3, %v1847_v13 }
 0x1f3   : > { %v1752_v33 = vsel %vm1745_vm5, %v1748_v9, %v1751_v31  ;;  %v1833_v22 = vor.u32 4788187, %v1832_v56  ;;  %v1836_v37 = vcvt.s32.f32 %v1829_v42  ;;  %v1974_v57 = vsel %vm1973_vm10, %v1972_v52, 0 }
 0x1f4   : > { %v1753_v8 = vsel %vm1742_vm4, nan, %v1752_v33  ;;  %v10528_v34 = vshrl.u32 %v1919_v0, 30  ;;  %v1976_v4 = vand.u32 31, %v1974_v57  ;;  %v2066_v20 = vand.u32 2147483647, %v9234_v5 }
 0x1f5   : > { %v1834_v47 = vand.u32 2147483647, %v1833_v22  ;;  %7173 = vst [vmem:[%s9727_s11 + $0x58] sm:$0xff] %v1753_v8  ;;  %v7371_v32 = vadd.s32 4294967169, %v2070_v18  ;;  %v1970_v54 = vor.u32 8388608, %v1969_v23  ;;  %v1975_v38 = vshrl.u32 %v1974_v57, 5 }
 0x1f6   : > { %v1921_v17 = vshll.u32 %v10528_v34, 30  ;;  %v1977_v25 = vsub.s32 32, %v1976_v4  ;;  %v1979_v40 = vshll.u32 %v15318_v46, %v1976_v4  ;;  %v1982_v45 = vshll.u32 %v15310_v10, %v1976_v4 }
 0x1f7   : > { %v1837_v28 = vmul.f32 %v1836_v37, %v1834_v47  ;;  %v1985_v19 = vshll.u32 %v15311_v21, %v1976_v4  ;;  %v1988_v3 = vshll.u32 %v15312_v11, %v1976_v4  ;;  %v1914_v1 = vadd.s32 %v10489_v27, %v10505_v30 }
 0x1f8   : > { %v10536_v39 = vsub.s32 %v1918_v51, %v1921_v17  ;;  %v1980_v12 = vshrl.u32 %v15310_v10, %v1977_v25  ;;  %v1983_v63 = vshrl.u32 %v15311_v21, %v1977_v25  ;;  %v1986_v50 = vshrl.u32 %v15312_v11, %v1977_v25 }
 0x1f9   : > { %v1838_v26 = vxor.u32 2147483648, %v1837_v28  ;;  %v1989_v44 = vshrl.u32 %v15313_v53, %v1977_v25  ;;  %v2076_v24 = vadd.s32 1, %v7371_v32  ;;  %v1978_v15 = vshrl.u32 %v15318_v46, %v1977_v25 }
 0x1fa   : > { %v1924_v60 = vsub.s32 0, %v10536_v39  ;;  %v1981_v14 = vor.u32 %v1980_v12, %v1979_v40  ;;  %v1991_v29 = vshll.u32 %v15313_v53, %v1976_v4  ;;  %v1984_v27 = vor.u32 %v1983_v63, %v1982_v45 }
 0x1fb   : > { %v1839_v55 = vsel %vm1756_vm3, %v1838_v26, %v1837_v28  ;;  %v1987_v30 = vor.u32 %v1986_v50, %v1985_v19  ;;  %v1990_v51 = vor.u32 %v1989_v44, %v1988_v3  ;;  %v1992_v52 = vshrl.u32 %v15314_v35, %v1977_v25 }
 0x1fc   : > { %v1842_v48 = vsel %vm10500_vm7, %v9222_v41, %v1839_v55  ;;  %v7364_v13 = vmin.u32 %v1924_v60, %v10536_v39  ;;  %vm1994_vm11 = vcmp.lt.s32.totalorder %v1975_v38, 1  ;;  %vm1860_vm13 = vcmp.lt.s32.totalorder %v9226_v43, 0 }
 0x1fd   : > { %7935 = vcosq.f32 %v1842_v48  ;;  %v2010_v42 = vshll.u32 %v1970_v54, 8  ;;  %vm2077_vm15 = vcmp.gt.s32.totalorder %v2076_v24, 0  ;;  %v1993_v56 = vor.u32 %v1992_v52, %v1991_v29 }
 0x1fe   : > { %7937 = vsinq.f32 %v1842_v48  ;;  %v1926_v31 = vclz %v7364_v13  ;;  %vm1995_vm14 = vcmp.lt.s32.totalorder %v1975_v38, 2  ;;  %vm1996_vm0 = vcmp.lt.s32.totalorder %v1975_v38, 3 }
 0x1ff   : > { %vm1997_vm1 = vcmp.lt.s32.totalorder %v1975_v38, 4  ;;  %v1998_v23 = vsel %vm1994_vm11, %v1978_v15, %v1981_v14  ;;  %v2002_v0 = vsel %vm1994_vm11, %v1981_v14, %v1984_v27  ;;  %vm10562_vm2 = vcmp.le.f32.partialorder %v1858_v16, 0.7853982 }
 0x200   : > { %v7365_v36 = vadd.s32 4294967294, %v1926_v31  ;;  %v1999_v9 = vsel %vm1997_vm1, %v1987_v30, 2102212464  ;;  %v2003_v22 = vsel %vm1997_vm1, %v1990_v51, 920167782  ;;  %v2006_v37 = vsel %vm1994_vm11, %v1984_v27, %v1987_v30 }
 0x201   : > { %v2000_v33 = vsel %vm1996_vm0, %v1984_v27, %v1999_v9  ;;  %v2007_v57 = vsel %vm1997_vm1, %v1993_v56, 1326507024  ;;  %vm1846_vm3 = vweird.f32 %v9222_v41  ;;  %v1944_v8 = vsub.s32 4, %v10528_v34 }
 0x202   : > { %vm7366_vm4 = vcmp.lt.s32.totalorder %v7365_v36, 0  ;;  %v2004_v4 = vsel %vm1996_vm0, %v1987_v30, %v2003_v22  ;;  %v2008_v47 = vsel %vm1996_vm0, %v1990_v51, %v2007_v57  ;;  %v2001_v25 = vsel %vm1995_vm14, %v1998_v23, %v2000_v33 }
 0x203   : > { %v1929_v17 = vsel %vm7366_vm4, 0, %v7365_v36  ;;  %v2005_v16 = vsel %vm1995_vm14, %v2002_v0, %v2004_v4  ;;  %v2009_v32 = vsel %vm1995_vm14, %v2006_v37, %v2008_v47  ;;  %v2078_v12 = vsel %vm2077_vm15, %v2076_v24, 0 }
 0x204   : > { %v1930_v28 = vsub.s32 32, %v1929_v17  ;;  %v1931_v54 = vshll.u32 %v10536_v39, %v1929_v17  ;;  %v1934_v40 = vsub.s32 4294967266, %v1929_v17  ;;  %vm1849_vm5 = vcmp.lt.s32.totalorder %v10530_v49, 2 }
 0x205   : > { %v10574_v45 = vmul.u32.u64.low %v2010_v42, %v2009_v32  ;;  %v10575_v19 = vmul.u32.u64.high %v2010_v42, %v2009_v32, %v10574_v45  ;;  %v10577_v26 = vmul.u32.u64.low %v2010_v42, %v2005_v16  ;;  %v10578_v63 = vmul.u32.u64.high %v2010_v42, %v2005_v16, %v10577_v26 }
 0x206   : > { %v1932_v50 = vshrl.u32 %v1914_v1, %v1930_v28  ;;  %v1935_v3 = vadd.s32 127, %v1934_v40  ;;  %v2080_v60 = vand.u32 31, %v2078_v12  ;;  %vm1850_vm7 = vcmp.eq.s32.totalorder %v10530_v49, 0 }
 0x207   : > { %v7936_v38 = vpop.eup %7935  ;;  %vm1853_vm6 = vcmp.eq.s32.totalorder %v10530_v49, 2  ;;  %v1945_v39 = vsel %vm1860_vm13, %v1944_v8, %v10528_v34  ;;  %v2017_v44 = vmul.u32 %v2010_v42, %v2001_v25  ;;  %vm2019_vm8 = vc.u32 %v10575_v19, %v10577_v26 }
 0x208   : > { %v7938_v24 = vpop.eup %7937  ;;  %v1854_v55 = vxor.u32 2147483648, %v7936_v38  ;;  %v1933_v15 = vor.u32 %v1932_v50, %v1931_v54  ;;  %v1936_v14 = vshll.u32 %v1935_v3, 23  ;;  %v2081_v29 = vsub.s32 32, %v2080_v60 }
 0x209   : > { %v1851_v48 = vxor.u32 2147483648, %v7938_v24  ;;  %v2020_v1 = vadd.s32 1, %v10578_v63  ;;  %v2073_v13 = vand.u32 8388607, %v2066_v20  ;;  %v1947_v34 = vsel %vm10562_vm2, 0, %v1945_v39 }
 0x20a   : > { %v1855_v27 = vsel %vm1853_vm6, %v1854_v55, %v7938_v24  ;;  %v1937_v30 = vor.u32 4788187, %v1936_v14  ;;  %v1940_v51 = vcvt.s32.f32 %v1933_v15  ;;  %v2083_v42 = vshll.u32 %v15318_v46, %v2080_v60 }
 0x20b   : > { %v1852_v52 = vsel %vm1850_vm7, %v7936_v38, %v1851_v48  ;;  %v2021_v31 = vsel %vm2019_vm8, %v2020_v1, %v10578_v63  ;;  %v2084_v56 = vshrl.u32 %v15310_v10, %v2081_v29  ;;  %v2086_v0 = vshll.u32 %v15310_v10, %v2080_v60 }
 0x20c   : > { %v1856_v36 = vsel %vm1849_vm5, %v1852_v52, %v1855_v27  ;;  %v1938_v23 = vand.u32 2147483647, %v1937_v30  ;;  %v2022_v9 = vadd.s32 %v2021_v31, %v2017_v44  ;;  %v2079_v22 = vshrl.u32 %v2078_v12, 5 }
 0x20d   : > { %v1857_v33 = vsel %vm1846_vm3, nan, %v1856_v36  ;;  %v2087_v37 = vshrl.u32 %v15311_v21, %v2081_v29  ;;  %v2089_v57 = vshll.u32 %v15311_v21, %v2080_v60  ;;  %v2090_v47 = vshrl.u32 %v15312_v11, %v2081_v29 }
 0x20e   : > { %v1941_v8 = vmul.f32 %v1940_v51, %v1938_v23  ;;  %v2023_v4 = vadd.s32 536870912, %v2022_v9  ;;  %v2092_v17 = vshll.u32 %v15312_v11, %v2080_v60  ;;  %7174 = vst [vmem:[%s9727_s11 + $0x60] sm:$0xff] %v1857_v33  ;;  %v2074_v49 = vor.u32 8388608, %v2073_v13 }
 0x20f   : > { %v2093_v25 = vshrl.u32 %v15313_v53, %v2081_v29  ;;  %v2095_v16 = vshll.u32 %v15313_v53, %v2080_v60  ;;  %v2096_v41 = vshrl.u32 %v15314_v35, %v2081_v29  ;;  %v2085_v54 = vor.u32 %v2084_v56, %v2083_v42 }
 0x210   : > { %v1942_v32 = vxor.u32 2147483648, %v1941_v8  ;;  %v2024_v28 = vshrl.u32 %v2023_v4, 30  ;;  %v2088_v40 = vor.u32 %v2087_v37, %v2086_v0  ;;  %v1951_v12 = vadd.s32 3, %v1947_v34 }
 0x211   : > { %v2094_v45 = vor.u32 %v2093_v25, %v2092_v17  ;;  %vm2098_vm9 = vcmp.lt.s32.totalorder %v2079_v22, 1  ;;  %v2173_v63 = vand.u32 2139095040, %v9238_v58  ;;  %v2091_v38 = vor.u32 %v2090_v47, %v2089_v57 }
 0x212   : > { %v1943_v50 = vsel %vm1860_vm13, %v1942_v32, %v1941_v8  ;;  %v2025_v3 = vshll.u32 %v2024_v28, 30  ;;  %vm2101_vm12 = vcmp.lt.s32.totalorder %v2079_v22, 4  ;;  %v2082_v39 = vshrl.u32 %v15318_v46, %v2081_v29 }
 0x213   : > { %v1946_v60 = vsel %vm10562_vm2, %v9226_v43, %v1943_v50  ;;  %v2097_v44 = vor.u32 %v2096_v41, %v2095_v16  ;;  %vm2100_vm10 = vcmp.lt.s32.totalorder %v2079_v22, 3  ;;  %vm2099_vm11 = vcmp.lt.s32.totalorder %v2079_v22, 2 }
 0x214   : > { %7939 = vcosq.f32 %v1946_v60  ;;  %v10619_v24 = vsub.s32 %v2022_v9, %v2025_v3  ;;  %v2106_v55 = vsel %vm2098_vm9, %v2085_v54, %v2088_v40  ;;  %v2103_v15 = vsel %vm2101_vm12, %v2091_v38, 2102212464 }
 0x215   : > { %7941 = vsinq.f32 %v1946_v60  ;;  %v2107_v14 = vsel %vm2101_vm12, %v2094_v45, 920167782  ;;  %v2114_v48 = vshll.u32 %v2074_v49, 8  ;;  %v1952_v1 = vand.u32 3, %v1951_v12 }
 0x216   : > { %v2028_v18 = vsub.s32 0, %v10619_v24  ;;  %v2108_v13 = vsel %vm2100_vm10, %v2091_v38, %v2107_v14  ;;  %v2110_v29 = vsel %vm2098_vm9, %v2088_v40, %v2091_v38  ;;  %v2048_v27 = vsub.s32 4, %v2024_v28 }
 0x217   : > { %v2102_v30 = vsel %vm2098_vm9, %v2082_v39, %v2085_v54  ;;  %v2109_v51 = vsel %vm2099_vm11, %v2106_v55, %v2108_v13  ;;  %v2111_v34 = vsel %vm2101_vm12, %v2097_v44, 1326507024  ;;  %v2104_v31 = vsel %vm2100_vm10, %v2088_v40, %v2103_v15 }
 0x218   : > { %v7368_v52 = vmin.u32 %v2028_v18, %v10619_v24  ;;  %v2112_v42 = vsel %vm2100_vm10, %v2094_v45, %v2111_v34  ;;  %v2174_v56 = vshrl.u32 %v2173_v63, 23  ;;  %vm1950_vm13 = vweird.f32 %v9226_v43 }
 0x219   : > { %v2113_v36 = vsel %vm2099_vm11, %v2110_v29, %v2112_v42  ;;  %v10634_v23 = vmul.u32.u64.low %v2114_v48, %v2109_v51  ;;  %v10635_v9 = vmul.u32.u64.high %v2114_v48, %v2109_v51, %v10634_v23  ;;  %vm1964_vm15 = vcmp.lt.s32.totalorder %v9230_v2, 0 }
 0x21a   : > { %v2030_v0 = vclz %v7368_v52  ;;  %v2105_v33 = vsel %vm2099_vm11, %v2102_v30, %v2104_v31  ;;  %v10641_v37 = vmul.u32.u64.low %v2114_v48, %v2113_v36  ;;  %v10642_v57 = vmul.u32.u64.high %v2114_v48, %v2113_v36, %v10641_v37 }
 0x21b   : > { %v7375_v8 = vadd.s32 4294967169, %v2174_v56  ;;  %vm1953_vm14 = vcmp.lt.s32.totalorder %v1952_v1, 2  ;;  %vm10646_vm0 = vcmp.le.f32.partialorder %v1962_v61, 0.7853982  ;;  %v2049_v17 = vsel %vm1964_vm15, %v2048_v27, %v2024_v28 }
 0x21c   : > { %v7369_v47 = vadd.s32 4294967294, %v2030_v0  ;;  %vm1954_vm1 = vcmp.eq.s32.totalorder %v1952_v1, 0  ;;  %v2124_v49 = vadd.s32 1, %v10635_v9  ;;  %v2170_v22 = vand.u32 2147483647, %v9238_v58 }
 0x21d   : > { %v2180_v25 = vadd.s32 1, %v7375_v8  ;;  %vm1957_vm2 = vcmp.eq.s32.totalorder %v1952_v1, 2  ;;  %v2018_v41 = vadd.s32 %v10577_v26, %v10575_v19  ;;  %v2121_v61 = vmul.u32 %v2114_v48, %v2105_v33 }
 0x21e   : > { %v7940_v16 = vpop.eup %7939  ;;  %vm7370_vm3 = vcmp.lt.s32.totalorder %v7369_v47, 0  ;;  %v2051_v12 = vsel %vm10646_vm0, 0, %v2049_v17  ;;  %vm2123_vm4 = vc.u32 %v10642_v57, %v10634_v23  ;;  %v2177_v19 = vand.u32 8388607, %v2170_v22 }
 0x21f   : > { %v7942_v32 = vpop.eup %7941  ;;  %v1958_v54 = vxor.u32 2147483648, %v7940_v16  ;;  %v2033_v40 = vsel %vm7370_vm3, 0, %v7369_v47  ;;  %v2125_v38 = vsel %vm2123_vm4, %v2124_v49, %v10635_v9  ;;  %vm2181_vm5 = vcmp.gt.s32.totalorder %v2180_v25, 0 }
 0x220   : > { %v1955_v28 = vxor.u32 2147483648, %v7942_v32  ;;  %v2034_v45 = vsub.s32 32, %v2033_v40  ;;  %v2035_v63 = vshll.u32 %v10619_v24, %v2033_v40  ;;  %v2038_v50 = vsub.s32 4294967266, %v2033_v40 }
 0x221   : > { %v1959_v3 = vsel %vm1957_vm2, %v1958_v54, %v7942_v32  ;;  %v2126_v44 = vadd.s32 %v2125_v38, %v2121_v61  ;;  %v2182_v15 = vsel %vm2181_vm5, %v2180_v25, 0  ;;  %v2277_v14 = vand.u32 2139095040, %v9242_v6 }
 0x222   : > { %v1956_v26 = vsel %vm1954_vm1, %v7940_v16, %v1955_v28  ;;  %v2036_v60 = vshrl.u32 %v2018_v41, %v2034_v45  ;;  %v2039_v39 = vadd.s32 127, %v2038_v50  ;;  %v2055_v29 = vadd.s32 3, %v2051_v12 }
 0x223   : > { %v1960_v55 = vsel %vm1953_vm14, %v1956_v26, %v1959_v3  ;;  %v2127_v13 = vadd.s32 536870912, %v2126_v44  ;;  %v2184_v27 = vand.u32 31, %v2182_v15  ;;  %v2178_v52 = vor.u32 8388608, %v2177_v19 }
 0x224   : > { %v1961_v24 = vsel %vm1950_vm13, nan, %v1960_v55  ;;  %v2037_v48 = vor.u32 %v2036_v60, %v2035_v63  ;;  %v2040_v18 = vshll.u32 %v2039_v39, 23  ;;  %v2183_v31 = vshrl.u32 %v2182_v15, 5 }
 0x225   : > { %7175 = vst [vmem:[%s9727_s11 + $0x68] sm:$0xff] %v1961_v24  ;;  %v10670_v34 = vshrl.u32 %v2127_v13, 30  ;;  %v2185_v1 = vsub.s32 32, %v2184_v27  ;;  %v2274_v42 = vand.u32 2147483647, %v9242_v6  ;;  %v2278_v56 = vshrl.u32 %v2277_v14, 23 }
 0x226   : > { %v2041_v30 = vor.u32 4788187, %v2040_v18  ;;  %v2044_v51 = vcvt.s32.f32 %v2037_v48  ;;  %v2187_v9 = vshll.u32 %v15318_v46, %v2184_v27  ;;  %v2190_v0 = vshll.u32 %v15310_v10, %v2184_v27 }
 0x227   : > { %v2129_v43 = vshll.u32 %v10670_v34, 30  ;;  %v2188_v33 = vshrl.u32 %v15310_v10, %v2185_v1  ;;  %v2191_v37 = vshrl.u32 %v15311_v21, %v2185_v1  ;;  %v2193_v8 = vshll.u32 %v15311_v21, %v2184_v27 }
 0x228   : > { %v2042_v36 = vand.u32 2147483647, %v2041_v30  ;;  %v2194_v47 = vshrl.u32 %v15312_v11, %v2185_v1  ;;  %v2196_v25 = vshll.u32 %v15312_v11, %v2184_v27  ;;  %v2197_v16 = vshrl.u32 %v15313_v53, %v2185_v1 }
 0x229   : > { %v10680_v49 = vsub.s32 %v2126_v44, %v2129_v43  ;;  %v10684_v41 = vand.u32 3, %v2055_v29  ;;  %v10686_v61 = vshll.u32 %v2178_v52, 8  ;;  %v7379_v32 = vadd.s32 4294967169, %v2278_v56 }
 0x22a   : > { %v2045_v17 = vmul.f32 %v2044_v51, %v2042_v36  ;;  %v10690_v54 = vand.u32 8388607, %v2274_v42  ;;  %v2186_v28 = vshrl.u32 %v15318_v46, %v2185_v1  ;;  %v2189_v45 = vor.u32 %v2188_v33, %v2187_v9 }
 0x22b   : > { %v2132_v12 = vsub.s32 0, %v10680_v49  ;;  %v2192_v63 = vor.u32 %v2191_v37, %v2190_v0  ;;  %v2195_v50 = vor.u32 %v2194_v47, %v2193_v8  ;;  %v2199_v3 = vshll.u32 %v15313_v53, %v2184_v27 }
 0x22c   : > { %v2046_v40 = vxor.u32 2147483648, %v2045_v17  ;;  %v2200_v38 = vshrl.u32 %v15314_v35, %v2185_v1  ;;  %v2198_v60 = vor.u32 %v2197_v16, %v2196_v25  ;;  %vm2202_vm7 = vcmp.lt.s32.totalorder %v2183_v31, 1 }
 0x22d   : > { %v7372_v26 = vmin.u32 %v2132_v12, %v10680_v49  ;;  %vm2205_vm6 = vcmp.lt.s32.totalorder %v2183_v31, 4  ;;  %v2284_v55 = vadd.s32 1, %v7379_v32  ;;  %vm2203_vm8 = vcmp.lt.s32.totalorder %v2183_v31, 2 }
 0x22e   : > { %v2047_v19 = vsel %vm1964_vm15, %v2046_v40, %v2045_v17  ;;  %v2201_v44 = vor.u32 %v2200_v38, %v2199_v3  ;;  %vm2204_vm9 = vcmp.lt.s32.totalorder %v2183_v31, 3  ;;  %v2206_v14 = vsel %vm2202_vm7, %v2186_v28, %v2189_v45 }
 0x22f   : > { %v2050_v39 = vsel %vm10646_vm0, %v9230_v2, %v2047_v19  ;;  %v2134_v15 = vclz %v7372_v26  ;;  %v2207_v24 = vsel %vm2205_vm6, %v2195_v50, 2102212464  ;;  %v2210_v48 = vsel %vm2202_vm7, %v2189_v45, %v2192_v63 }
 0x230   : > { %7943 = vcosq.f32 %v2050_v39  ;;  %v2208_v13 = vsel %vm2204_vm9, %v2192_v63, %v2207_v24  ;;  %v2211_v4 = vsel %vm2205_vm6, %v2198_v60, 920167782  ;;  %v2214_v29 = vsel %vm2202_vm7, %v2192_v63, %v2195_v50 }
 0x231   : > { %7945 = vsinq.f32 %v2050_v39  ;;  %v7373_v18 = vadd.s32 4294967294, %v2134_v15  ;;  %vm2058_vm12 = vcmp.eq.s32.totalorder %v10684_v41, 0  ;;  %v2122_v27 = vadd.s32 %v10634_v23, %v10642_v57 }
 0x232   : > { %v2212_v30 = vsel %vm2204_vm9, %v2195_v50, %v2211_v4  ;;  %v2215_v51 = vsel %vm2205_vm6, %v2201_v44, 1326507024  ;;  %vm2285_vm10 = vcmp.gt.s32.totalorder %v2284_v55, 0  ;;  %vm2057_vm11 = vcmp.lt.s32.totalorder %v10684_v41, 2 }
 0x233   : > { %vm7374_vm13 = vcmp.lt.s32.totalorder %v7373_v18, 0  ;;  %v2209_v52 = vsel %vm2203_vm8, %v2206_v14, %v2208_v13  ;;  %v2213_v1 = vsel %vm2203_vm8, %v2210_v48, %v2212_v30  ;;  %v2216_v56 = vsel %vm2204_vm9, %v2198_v60, %v2215_v51 }
 0x234   : > { %vm2054_vm15 = vweird.f32 %v9230_v2  ;;  %v2137_v36 = vsel %vm7374_vm13, 0, %v7373_v18  ;;  %v2217_v43 = vsel %vm2203_vm8, %v2214_v29, %v2216_v56  ;;  %vm2068_vm14 = vcmp.lt.s32.totalorder %v9234_v5, 0 }
 0x235   : > { %v10720_v23 = vmul.u32.u64.low %v10686_v61, %v2213_v1  ;;  %v10721_v57 = vmul.u32.u64.high %v10686_v61, %v2213_v1, %v10720_v23  ;;  %v2138_v9 = vsub.s32 32, %v2137_v36  ;;  %v2139_v0 = vshll.u32 %v10680_v49, %v2137_v36 }
 0x236   : > { %v2142_v33 = vsub.s32 4294967266, %v2137_v36  ;;  %v2286_v37 = vsel %vm2285_vm10, %v2284_v55, 0  ;;  %vm2061_vm0 = vcmp.eq.s32.totalorder %v10684_v41, 2  ;;  %v2152_v16 = vsub.s32 4, %v10670_v34 }
 0x237   : > { %v10728_v8 = vmul.u32.u64.low %v10686_v61, %v2217_v43  ;;  %v10729_v47 = vmul.u32.u64.high %v10686_v61, %v2217_v43, %v10728_v8  ;;  %v2288_v31 = vand.u32 31, %v2286_v37  ;;  %v2140_v17 = vshrl.u32 %v2122_v27, %v2138_v9 }
 0x238   : > { %v2143_v25 = vadd.s32 127, %v2142_v33  ;;  %v2282_v32 = vor.u32 8388608, %v10690_v54  ;;  %v2225_v40 = vmul.u32 %v10686_v61, %v2209_v52  ;;  %v2228_v12 = vadd.s32 1, %v10721_v57 }
 0x239   : > { %v10735_v49 = vshrl.u32 %v2286_v37, 5  ;;  %v2289_v28 = vsub.s32 32, %v2288_v31  ;;  %vm10739_vm1 = vcmp.le.f32.partialorder %v2066_v20, 0.7853982  ;;  %v2141_v50 = vor.u32 %v2140_v17, %v2139_v0 }
 0x23a   : > { %v7944_v45 = vpop.eup %7943  ;;  %v2144_v3 = vshll.u32 %v2143_v25, 23  ;;  %v2291_v38 = vshll.u32 %v15318_v46, %v2288_v31  ;;  %v2294_v54 = vshll.u32 %v15310_v10, %v2288_v31  ;;  %vm2227_vm2 = vc.u32 %v10729_v47, %v10720_v23 }
 0x23b   : > { %v7946_v19 = vpop.eup %7945  ;;  %v2062_v61 = vxor.u32 2147483648, %v7944_v45  ;;  %v2297_v26 = vshll.u32 %v15311_v21, %v2288_v31  ;;  %v2300_v60 = vshll.u32 %v15312_v11, %v2288_v31  ;;  %v2148_v44 = vcvt.s32.f32 %v2141_v50 }
 0x23c   : > { %v2059_v39 = vxor.u32 2147483648, %v7946_v19  ;;  %v2145_v20 = vor.u32 4788187, %v2144_v3  ;;  %v2229_v55 = vsel %vm2227_vm2, %v2228_v12, %v10721_v57  ;;  %v2292_v24 = vshrl.u32 %v15310_v10, %v2289_v28 }
 0x23d   : > { %v2063_v15 = vsel %vm2061_vm0, %v2062_v61, %v7946_v19  ;;  %v2230_v14 = vadd.s32 %v2229_v55, %v2225_v40  ;;  %v2295_v48 = vshrl.u32 %v15311_v21, %v2289_v28  ;;  %v2298_v4 = vshrl.u32 %v15312_v11, %v2289_v28 }
 0x23e   : > { %v2060_v18 = vsel %vm2058_vm12, %v7944_v45, %v2059_v39  ;;  %v2146_v13 = vand.u32 2147483647, %v2145_v20  ;;  %v2301_v29 = vshrl.u32 %v15313_v53, %v2289_v28  ;;  %v2153_v30 = vsel %vm2068_vm14, %v2152_v16, %v10670_v34 }
 0x23f   : > { %v2064_v27 = vsel %vm2057_vm11, %v2060_v18, %v2063_v15  ;;  %v2231_v51 = vadd.s32 536870912, %v2230_v14  ;;  %v2293_v52 = vor.u32 %v2292_v24, %v2291_v38  ;;  %v2296_v36 = vor.u32 %v2295_v48, %v2294_v54 }
 0x240   : > { %v2065_v1 = vsel %vm2054_vm15, nan, %v2064_v27  ;;  %v2149_v56 = vmul.f32 %v2148_v44, %v2146_v13  ;;  %v2302_v43 = vor.u32 %v2301_v29, %v2300_v60  ;;  %v2303_v9 = vshll.u32 %v15313_v53, %v2288_v31 }
 0x241   : > { %v2232_v57 = vshrl.u32 %v2231_v51, 30  ;;  %v2304_v0 = vshrl.u32 %v15314_v35, %v2289_v28  ;;  %vm2306_vm3 = vcmp.lt.s32.totalorder %v10735_v49, 1  ;;  %7176 = vst [vmem:[%s9727_s11 + $0x70] sm:$0xff] %v2065_v1  ;;  %v2299_v33 = vor.u32 %v2298_v4, %v2297_v26 }
 0x242   : > { %v2150_v41 = vxor.u32 2147483648, %v2149_v56  ;;  %vm2309_vm4 = vcmp.lt.s32.totalorder %v10735_v49, 4  ;;  %v10770_v34 = vshll.u32 %v2282_v32, 8  ;;  %v2155_v2 = vsel %vm10739_vm1, 0, %v2153_v30 }
 0x243   : > { %v2233_v37 = vshll.u32 %v2232_v57, 30  ;;  %vm2307_vm5 = vcmp.lt.s32.totalorder %v10735_v49, 2  ;;  %vm2308_vm7 = vcmp.lt.s32.totalorder %v10735_v49, 3  ;;  %v2305_v31 = vor.u32 %v2304_v0, %v2303_v9 }
 0x244   : > { %v2151_v8 = vsel %vm2068_vm14, %v2150_v41, %v2149_v56  ;;  %v2314_v17 = vsel %vm2306_vm3, %v2293_v52, %v2296_v36  ;;  %v2315_v25 = vsel %vm2309_vm4, %v2302_v43, 920167782  ;;  %v2290_v40 = vshrl.u32 %v15318_v46, %v2289_v28 }
 0x245   : > { %v2154_v16 = vsel %vm10739_vm1, %v9234_v5, %v2151_v8  ;;  %v10785_v32 = vsub.s32 %v2230_v14, %v2233_v37  ;;  %v2159_v12 = vadd.s32 3, %v2155_v2  ;;  %v2311_v45 = vsel %vm2309_vm4, %v2299_v33, 2102212464 }
 0x246   : > { %7947 = vcosq.f32 %v2154_v16  ;;  %v2316_v50 = vsel %vm2308_vm7, %v2299_v33, %v2315_v25  ;;  %v2256_v38 = vsub.s32 4, %v2232_v57  ;;  %v2318_v54 = vsel %vm2306_vm3, %v2296_v36, %v2299_v33 }
 0x247   : > { %7949 = vsinq.f32 %v2154_v16  ;;  %v2236_v3 = vsub.s32 0, %v10785_v32  ;;  %v2317_v63 = vsel %vm2307_vm5, %v2314_v17, %v2316_v50  ;;  %v2319_v28 = vsel %vm2309_vm4, %v2305_v31, 1326507024 }
 0x248   : > { %v10800_v19 = vmul.u32.u64.low %v10770_v34, %v2317_v63  ;;  %v10801_v61 = vmul.u32.u64.high %v10770_v34, %v2317_v63, %v10800_v19  ;;  %v2310_v60 = vsel %vm2306_vm3, %v2290_v40, %v2293_v52  ;;  %v2312_v39 = vsel %vm2308_vm7, %v2296_v36, %v2311_v45 }
 0x249   : > { %v7376_v26 = vmin.u32 %v2236_v3, %v10785_v32  ;;  %v2320_v20 = vsel %vm2308_vm7, %v2302_v43, %v2319_v28  ;;  %v2160_v44 = vand.u32 3, %v2159_v12  ;;  %v2381_v15 = vand.u32 2139095040, %v9246_v7 }
 0x24a   : > { %v2321_v55 = vsel %vm2307_vm5, %v2318_v54, %v2320_v20  ;;  %vm2158_vm6 = vweird.f32 %v9234_v5  ;;  %vm2172_vm8 = vcmp.lt.s32.totalorder %v9238_v58, 0  ;;  %v2313_v24 = vsel %vm2307_vm5, %v2310_v60, %v2312_v39 }
 0x24b   : > { %v2238_v14 = vclz %v7376_v26  ;;  %v10819_v48 = vmul.u32.u64.low %v10770_v34, %v2321_v55  ;;  %v10820_v18 = vmul.u32.u64.high %v10770_v34, %v2321_v55, %v10819_v48  ;;  %v2382_v13 = vshrl.u32 %v2381_v15, 23 }
 0x24c   : > { %vm10824_vm9 = vcmp.le.f32.partialorder %v2170_v22, 0.7853982  ;;  %v2257_v27 = vsel %vm2172_vm8, %v2256_v38, %v2232_v57  ;;  %v2378_v30 = vand.u32 2147483647, %v9246_v7  ;;  %vm2161_vm12 = vcmp.lt.s32.totalorder %v2160_v44, 2 }
 0x24d   : > { %v7377_v29 = vadd.s32 4294967294, %v2238_v14  ;;  %vm2162_vm10 = vcmp.eq.s32.totalorder %v2160_v44, 0  ;;  %v2332_v49 = vadd.s32 1, %v10801_v61  ;;  %v7383_v51 = vadd.s32 4294967169, %v2382_v13 }
 0x24e   : > { %vm2165_vm11 = vcmp.eq.s32.totalorder %v2160_v44, 2  ;;  %v2226_v52 = vadd.s32 %v10720_v23, %v10729_v47  ;;  %v2329_v22 = vmul.u32 %v10770_v34, %v2313_v24  ;;  %v2259_v36 = vsel %vm10824_vm9, 0, %v2257_v27 }
 0x24f   : > { %vm7378_vm13 = vcmp.lt.s32.totalorder %v7377_v29, 0  ;;  %vm2331_vm15 = vc.u32 %v10820_v18, %v10800_v19  ;;  %v2388_v43 = vadd.s32 1, %v7383_v51  ;;  %v2385_v47 = vand.u32 8388607, %v2378_v30 }
 0x250   : > { %v7948_v1 = vpop.eup %7947  ;;  %v2241_v56 = vsel %vm7378_vm13, 0, %v7377_v29  ;;  %v2333_v23 = vsel %vm2331_vm15, %v2332_v49, %v10801_v61  ;;  %v2485_v16 = vand.u32 2139095040, %v9250_v62  ;;  %v2263_v3 = vadd.s32 3, %v2259_v36 }
 0x251   : > { %v7950_v57 = vpop.eup %7949  ;;  %v2166_v9 = vxor.u32 2147483648, %v7948_v1  ;;  %v2242_v0 = vsub.s32 32, %v2241_v56  ;;  %v2243_v41 = vshll.u32 %v10785_v32, %v2241_v56  ;;  %v2246_v33 = vsub.s32 4294967266, %v2241_v56 }
 0x252   : > { %v2163_v2 = vxor.u32 2147483648, %v7950_v57  ;;  %vm2389_vm14 = vcmp.gt.s32.totalorder %v2388_v43, 0  ;;  %v2334_v31 = vadd.s32 %v2333_v23, %v2329_v22  ;;  %v2386_v61 = vor.u32 8388608, %v2385_v47 }
 0x253   : > { %v2167_v34 = vsel %vm2165_vm11, %v2166_v9, %v7950_v57  ;;  %v2244_v37 = vshrl.u32 %v2226_v52, %v2242_v0  ;;  %v2247_v8 = vadd.s32 127, %v2246_v33  ;;  %v2390_v25 = vsel %vm2389_vm14, %v2388_v43, 0 }
 0x254   : > { %v2164_v17 = vsel %vm2162_vm10, %v7948_v1, %v2163_v2  ;;  %v2335_v45 = vadd.s32 536870912, %v2334_v31  ;;  %v2392_v38 = vand.u32 31, %v2390_v25  ;;  %v2391_v26 = vshrl.u32 %v2390_v25, 5 }
 0x255   : > { %v2168_v32 = vsel %vm2161_vm12, %v2164_v17, %v2167_v34  ;;  %v2245_v40 = vor.u32 %v2244_v37, %v2243_v41  ;;  %v2248_v12 = vshll.u32 %v2247_v8, 23  ;;  %v2482_v39 = vand.u32 2147483647, %v9250_v62 }
 0x256   : > { %v2169_v50 = vsel %vm2158_vm6, nan, %v2168_v32  ;;  %v10849_v28 = vshrl.u32 %v2335_v45, 30  ;;  %v2393_v60 = vsub.s32 32, %v2392_v38  ;;  %v2486_v20 = vshrl.u32 %v2485_v16, 23 }
 0x257   : > { %v2249_v63 = vor.u32 4788187, %v2248_v12  ;;  %v2252_v54 = vcvt.s32.f32 %v2245_v40  ;;  %7177 = vst [vmem:[%s9727_s11 + $0x78] sm:$0xff] %v2169_v50  ;;  %v2395_v15 = vshll.u32 %v15318_v46, %v2392_v38  ;;  %v2398_v5 = vshll.u32 %v15310_v10, %v2392_v38 }
 0x258   : > { %v2337_v55 = vshll.u32 %v10849_v28, 30  ;;  %v2396_v14 = vshrl.u32 %v15310_v10, %v2393_v60  ;;  %v2399_v24 = vshrl.u32 %v15311_v21, %v2393_v60  ;;  %v2401_v48 = vshll.u32 %v15311_v21, %v2392_v38 }
 0x259   : > { %v2250_v44 = vand.u32 2147483647, %v2249_v63  ;;  %v2402_v13 = vshrl.u32 %v15312_v11, %v2393_v60  ;;  %v2404_v49 = vshll.u32 %v15312_v11, %v2392_v38  ;;  %v2405_v51 = vshrl.u32 %v15313_v53, %v2393_v60 }
 0x25a   : > { %v10860_v27 = vsub.s32 %v2334_v31, %v2337_v55  ;;  %v10864_v52 = vand.u32 3, %v2263_v3  ;;  %v10866_v22 = vshll.u32 %v2386_v61, 8  ;;  %v7387_v1 = vadd.s32 4294967169, %v2486_v20 }
 0x25b   : > { %v2253_v29 = vmul.f32 %v2252_v54, %v2250_v44  ;;  %v10870_v56 = vand.u32 8388607, %v2482_v39  ;;  %v2394_v57 = vshrl.u32 %v15318_v46, %v2393_v60  ;;  %v2397_v9 = vor.u32 %v2396_v14, %v2395_v15 }
 0x25c   : > { %v2340_v43 = vsub.s32 0, %v10860_v27  ;;  %v2400_v0 = vor.u32 %v2399_v24, %v2398_v5  ;;  %v2403_v41 = vor.u32 %v2402_v13, %v2401_v48  ;;  %v2407_v33 = vshll.u32 %v15313_v53, %v2392_v38 }
 0x25d   : > { %v2254_v36 = vxor.u32 2147483648, %v2253_v29  ;;  %v2408_v2 = vshrl.u32 %v15314_v35, %v2393_v60  ;;  %v2406_v34 = vor.u32 %v2405_v51, %v2404_v49  ;;  %vm2410_vm0 = vcmp.lt.s32.totalorder %v2391_v26, 1 }
 0x25e   : > { %v7380_v47 = vmin.u32 %v2340_v43, %v10860_v27  ;;  %vm2413_vm1 = vcmp.lt.s32.totalorder %v2391_v26, 4  ;;  %v2492_v31 = vadd.s32 1, %v7387_v1  ;;  %vm2411_vm2 = vcmp.lt.s32.totalorder %v2391_v26, 2 }
 0x25f   : > { %v2255_v23 = vsel %vm2172_vm8, %v2254_v36, %v2253_v29  ;;  %v2409_v8 = vor.u32 %v2408_v2, %v2407_v33  ;;  %vm2412_vm3 = vcmp.lt.s32.totalorder %v2391_v26, 3  ;;  %v2414_v25 = vsel %vm2410_vm0, %v2394_v57, %v2397_v9 }
 0x260   : > { %v2258_v37 = vsel %vm10824_vm9, %v9238_v58, %v2255_v23  ;;  %v2342_v17 = vclz %v7380_v47  ;;  %v2415_v16 = vsel %vm2413_vm1, %v2403_v41, 2102212464  ;;  %v2418_v32 = vsel %vm2410_vm0, %v2397_v9, %v2400_v0 }
 0x261   : > { %7951 = vcosq.f32 %v2258_v37  ;;  %v2416_v12 = vsel %vm2412_vm3, %v2400_v0, %v2415_v16  ;;  %v2419_v4 = vsel %vm2413_vm1, %v2406_v34, 920167782  ;;  %v2422_v45 = vsel %vm2410_vm0, %v2400_v0, %v2403_v41 }
 0x262   : > { %7953 = vsinq.f32 %v2258_v37  ;;  %v7381_v40 = vadd.s32 4294967294, %v2342_v17  ;;  %vm2266_vm4 = vcmp.eq.s32.totalorder %v10864_v52, 0  ;;  %v2330_v50 = vadd.s32 %v10800_v19, %v10820_v18 }
 0x263   : > { %v2420_v3 = vsel %vm2412_vm3, %v2403_v41, %v2419_v4  ;;  %v2423_v38 = vsel %vm2413_vm1, %v2409_v8, 1326507024  ;;  %vm2493_vm5 = vcmp.gt.s32.totalorder %v2492_v31, 0  ;;  %vm2265_vm7 = vcmp.lt.s32.totalorder %v10864_v52, 2 }
 0x264   : > { %vm7382_vm6 = vcmp.lt.s32.totalorder %v7381_v40, 0  ;;  %v2417_v63 = vsel %vm2411_vm2, %v2414_v25, %v2416_v12  ;;  %v2421_v54 = vsel %vm2411_vm2, %v2418_v32, %v2420_v3  ;;  %v2424_v61 = vsel %vm2412_vm3, %v2406_v34, %v2423_v38 }
 0x265   : > { %vm2262_vm8 = vweird.f32 %v9238_v58  ;;  %v2345_v60 = vsel %vm7382_vm6, 0, %v7381_v40  ;;  %v2425_v20 = vsel %vm2411_vm2, %v2422_v45, %v2424_v61  ;;  %vm2276_vm9 = vcmp.lt.s32.totalorder %v9242_v6, 0 }
 0x266   : > { %v10900_v19 = vmul.u32.u64.low %v10866_v22, %v2421_v54  ;;  %v10901_v18 = vmul.u32.u64.high %v10866_v22, %v2421_v54, %v10900_v19  ;;  %v2346_v44 = vsub.s32 32, %v2345_v60  ;;  %v2347_v55 = vshll.u32 %v10860_v27, %v2345_v60 }
 0x267   : > { %v2350_v15 = vsub.s32 4294967266, %v2345_v60  ;;  %v2494_v5 = vsel %vm2493_vm5, %v2492_v31, 0  ;;  %vm2269_vm12 = vcmp.eq.s32.totalorder %v10864_v52, 2  ;;  %v2360_v29 = vsub.s32 4, %v10849_v28 }
 0x268   : > { %v10908_v14 = vmul.u32.u64.low %v10866_v22, %v2425_v20  ;;  %v10909_v24 = vmul.u32.u64.high %v10866_v22, %v2425_v20, %v10908_v14  ;;  %v2496_v26 = vand.u32 31, %v2494_v5  ;;  %v2348_v48 = vshrl.u32 %v2330_v50, %v2346_v44 }
 0x269   : > { %v2351_v13 = vadd.s32 127, %v2350_v15  ;;  %v2490_v49 = vor.u32 8388608, %v10870_v56  ;;  %v2433_v51 = vmul.u32 %v10866_v22, %v2417_v63  ;;  %v2436_v1 = vadd.s32 1, %v10901_v18 }
 0x26a   : > { %v10915_v27 = vshrl.u32 %v2494_v5, 5  ;;  %v2497_v36 = vsub.s32 32, %v2496_v26  ;;  %vm10919_vm10 = vcmp.le.f32.partialorder %v2274_v42, 0.7853982  ;;  %v2349_v9 = vor.u32 %v2348_v48, %v2347_v55 }
 0x26b   : > { %v7952_v43 = vpop.eup %7951  ;;  %v2352_v0 = vshll.u32 %v2351_v13, 23  ;;  %v2499_v41 = vshll.u32 %v15318_v46, %v2496_v26  ;;  %v2502_v56 = vshll.u32 %v15310_v10, %v2496_v26  ;;  %vm2435_vm11 = vc.u32 %v10909_v24, %v10900_v19 }
 0x26c   : > { %v7954_v33 = vpop.eup %7953  ;;  %v2270_v22 = vxor.u32 2147483648, %v7952_v43  ;;  %v2505_v2 = vshll.u32 %v15311_v21, %v2496_v26  ;;  %v2508_v23 = vshll.u32 %v15312_v11, %v2496_v26  ;;  %v2356_v34 = vcvt.s32.f32 %v2349_v9 }
 0x26d   : > { %v2267_v47 = vxor.u32 2147483648, %v7954_v33  ;;  %v2353_v42 = vor.u32 4788187, %v2352_v0  ;;  %v2437_v37 = vsel %vm2435_vm11, %v2436_v1, %v10901_v18  ;;  %v2500_v17 = vshrl.u32 %v15310_v10, %v2497_v36 }
 0x26e   : > { %v2271_v8 = vsel %vm2269_vm12, %v2270_v22, %v7954_v33  ;;  %v2438_v31 = vadd.s32 %v2437_v37, %v2433_v51  ;;  %v2503_v25 = vshrl.u32 %v15311_v21, %v2497_v36  ;;  %v2506_v40 = vshrl.u32 %v15312_v11, %v2497_v36 }
 0x26f   : > { %v2268_v16 = vsel %vm2266_vm4, %v7952_v43, %v2267_v47  ;;  %v2354_v32 = vand.u32 2147483647, %v2353_v42  ;;  %v2509_v12 = vshrl.u32 %v15313_v53, %v2497_v36  ;;  %v2361_v45 = vsel %vm2276_vm9, %v2360_v29, %v10849_v28 }
 0x270   : > { %v2272_v4 = vsel %vm2265_vm7, %v2268_v16, %v2271_v8  ;;  %v2439_v50 = vadd.s32 536870912, %v2438_v31  ;;  %v2501_v3 = vor.u32 %v2500_v17, %v2499_v41  ;;  %v2504_v54 = vor.u32 %v2503_v25, %v2502_v56 }
 0x271   : > { %v2273_v38 = vsel %vm2262_vm8, nan, %v2272_v4  ;;  %v2357_v63 = vmul.f32 %v2356_v34, %v2354_v32  ;;  %v2510_v61 = vor.u32 %v2509_v12, %v2508_v23  ;;  %v2511_v20 = vshll.u32 %v15313_v53, %v2496_v26 }
 0x272   : > { %v2440_v60 = vshrl.u32 %v2439_v50, 30  ;;  %v2512_v18 = vshrl.u32 %v15314_v35, %v2497_v36  ;;  %vm2514_vm13 = vcmp.lt.s32.totalorder %v10915_v27, 1  ;;  %7178 = vst [vmem:[%s9727_s11 + $0x80] sm:$0xff] %v2273_v38  ;;  %v2507_v44 = vor.u32 %v2506_v40, %v2505_v2 }
 0x273   : > { %v2358_v52 = vxor.u32 2147483648, %v2357_v63  ;;  %vm2517_vm15 = vcmp.lt.s32.totalorder %v10915_v27, 4  ;;  %v10950_v28 = vshll.u32 %v2490_v49, 8  ;;  %v2363_v58 = vsel %vm10919_vm10, 0, %v2361_v45 }
 0x274   : > { %v2441_v55 = vshll.u32 %v2440_v60, 30  ;;  %vm2515_vm14 = vcmp.lt.s32.totalorder %v10915_v27, 2  ;;  %vm2516_vm0 = vcmp.lt.s32.totalorder %v10915_v27, 3  ;;  %v2513_v5 = vor.u32 %v2512_v18, %v2511_v20 }
 0x275   : > { %v2359_v15 = vsel %vm2276_vm9, %v2358_v52, %v2357_v63  ;;  %v2522_v14 = vsel %vm2514_vm13, %v2501_v3, %v2504_v54  ;;  %v2523_v26 = vsel %vm2517_vm15, %v2510_v61, 920167782  ;;  %v2498_v29 = vshrl.u32 %v15318_v46, %v2497_v36 }
 0x276   : > { %v2362_v48 = vsel %vm10919_vm10, %v9242_v6, %v2359_v15  ;;  %v10965_v13 = vsub.s32 %v2438_v31, %v2441_v55  ;;  %v2367_v49 = vadd.s32 3, %v2363_v58  ;;  %v2519_v51 = vsel %vm2517_vm15, %v2507_v44, 2102212464 }
 0x277   : > { %7955 = vcosq.f32 %v2362_v48  ;;  %v2524_v1 = vsel %vm2516_vm0, %v2507_v44, %v2523_v26  ;;  %v2464_v9 = vsub.s32 4, %v2440_v60  ;;  %v2526_v0 = vsel %vm2514_vm13, %v2504_v54, %v2507_v44 }
 0x278   : > { %7957 = vsinq.f32 %v2362_v48  ;;  %v2444_v43 = vsub.s32 0, %v10965_v13  ;;  %v2525_v57 = vsel %vm2515_vm14, %v2522_v14, %v2524_v1  ;;  %v2527_v36 = vsel %vm2517_vm15, %v2513_v5, 1326507024  ;;  %v15358_v14 = vld [vmem:[#allocation19_spill] sm:$0xff] }
 0x279   : > { %v10980_v41 = vmul.u32.u64.low %v10950_v28, %v2525_v57  ;;  %v10981_v56 = vmul.u32.u64.high %v10950_v28, %v2525_v57, %v10980_v41  ;;  %v2518_v22 = vsel %vm2514_vm13, %v2498_v29, %v2501_v3  ;;  %v2520_v2 = vsel %vm2516_vm0, %v2504_v54, %v2519_v51 }
 0x27a   : > { %v7384_v33 = vmin.u32 %v2444_v43, %v10965_v13  ;;  %v2528_v23 = vsel %vm2516_vm0, %v2510_v61, %v2527_v36  ;;  %v2368_v47 = vand.u32 3, %v2367_v49  ;;  %v2589_v34 = vand.u32 2139095040, %v9254_v59 }
 0x27b   : > { %v2529_v42 = vsel %vm2515_vm14, %v2526_v0, %v2528_v23  ;;  %vm2366_vm1 = vweird.f32 %v9242_v6  ;;  %vm2380_vm2 = vcmp.lt.s32.totalorder %v9246_v7, 0  ;;  %v2521_v8 = vsel %vm2515_vm14, %v2518_v22, %v2520_v2 }
 0x27c   : > { %v2446_v37 = vclz %v7384_v33  ;;  %v10999_v31 = vmul.u32.u64.low %v10950_v28, %v2529_v42  ;;  %v11000_v17 = vmul.u32.u64.high %v10950_v28, %v2529_v42, %v10999_v31  ;;  %v2590_v25 = vshrl.u32 %v2589_v34, 23 }
 0x27d   : > { %vm11004_vm3 = vcmp.le.f32.partialorder %v2378_v30, 0.7853982  ;;  %v2465_v40 = vsel %vm2380_vm2, %v2464_v9, %v2440_v60  ;;  %v2586_v12 = vand.u32 2147483647, %v9254_v59  ;;  %vm2369_vm4 = vcmp.lt.s32.totalorder %v2368_v47, 2 }
 0x27e   : > { %v7385_v32 = vadd.s32 4294967294, %v2446_v37  ;;  %vm2370_vm5 = vcmp.eq.s32.totalorder %v2368_v47, 0  ;;  %v2540_v27 = vadd.s32 1, %v10981_v56  ;;  %v7391_v4 = vadd.s32 4294967169, %v2590_v25 }
 0x27f   : > { %vm2373_vm7 = vcmp.eq.s32.totalorder %v2368_v47, 2  ;;  %v2434_v45 = vadd.s32 %v10900_v19, %v10909_v24  ;;  %v2537_v30 = vmul.u32 %v10950_v28, %v2521_v8  ;;  %v2467_v38 = vsel %vm11004_vm3, 0, %v2465_v40 }
 0x280   : > { %vm7386_vm6 = vcmp.lt.s32.totalorder %v7385_v32, 0  ;;  %vm2539_vm8 = vc.u32 %v11000_v17, %v10980_v41  ;;  %v2596_v63 = vadd.s32 1, %v7391_v4  ;;  %v2593_v24 = vand.u32 8388607, %v2586_v12 }
 0x281   : > { %v7956_v50 = vpop.eup %7955  ;;  %v2449_v3 = vsel %vm7386_vm6, 0, %v7385_v32  ;;  %v2541_v19 = vsel %vm2539_vm8, %v2540_v27, %v10981_v56  ;;  %v2693_v26 = vand.u32 2139095040, %v15358_v14  ;;  %v2471_v1 = vadd.s32 3, %v2467_v38 }
 0x282   : > { %v7958_v54 = vpop.eup %7957  ;;  %v2374_v61 = vxor.u32 2147483648, %v7956_v50  ;;  %v2450_v60 = vsub.s32 32, %v2449_v3  ;;  %v2451_v20 = vshll.u32 %v10965_v13, %v2449_v3  ;;  %v2454_v18 = vsub.s32 4294967266, %v2449_v3 }
 0x283   : > { %v2371_v52 = vxor.u32 2147483648, %v7958_v54  ;;  %vm2597_vm9 = vcmp.gt.s32.totalorder %v2596_v63, 0  ;;  %v2542_v55 = vadd.s32 %v2541_v19, %v2537_v30  ;;  %v2594_v36 = vor.u32 8388608, %v2593_v24 }
 0x284   : > { %v2375_v44 = vsel %vm2373_vm7, %v2374_v61, %v7958_v54  ;;  %v2452_v28 = vshrl.u32 %v2434_v45, %v2450_v60  ;;  %v2455_v58 = vadd.s32 127, %v2454_v18  ;;  %v2598_v5 = vsel %vm2597_vm9, %v2596_v63, 0 }
 0x285   : > { %v2372_v15 = vsel %vm2370_vm5, %v7956_v50, %v2371_v52  ;;  %v2543_v49 = vadd.s32 536870912, %v2542_v55  ;;  %v2600_v43 = vand.u32 31, %v2598_v5  ;;  %v2599_v56 = vshrl.u32 %v2598_v5, 5 }
 0x286   : > { %v2376_v48 = vsel %vm2369_vm4, %v2372_v15, %v2375_v44  ;;  %v2453_v13 = vor.u32 %v2452_v28, %v2451_v20  ;;  %v2456_v29 = vshll.u32 %v2455_v58, 23  ;;  %v2690_v22 = vand.u32 2147483647, %v15358_v14 }
 0x287   : > { %v2377_v51 = vsel %vm2366_vm1, nan, %v2376_v48  ;;  %v11029_v0 = vshrl.u32 %v2543_v49, 30  ;;  %v2601_v33 = vsub.s32 32, %v2600_v43  ;;  %v2694_v2 = vshrl.u32 %v2693_v26, 23 }
 0x288   : > { %v2457_v9 = vor.u32 4788187, %v2456_v29  ;;  %v2460_v57 = vcvt.s32.f32 %v2453_v13  ;;  %7179 = vst [vmem:[%s9727_s11 + $0x88] sm:$0xff] %v2377_v51  ;;  %v2603_v42 = vshll.u32 %v15318_v46, %v2600_v43  ;;  %v2606_v6 = vshll.u32 %v15310_v10, %v2600_v43 }
 0x289   : > { %v2545_v47 = vshll.u32 %v11029_v0, 30  ;;  %v2604_v34 = vshrl.u32 %v15310_v10, %v2601_v33  ;;  %v2607_v37 = vshrl.u32 %v15311_v21, %v2601_v33  ;;  %v2609_v8 = vshll.u32 %v15311_v21, %v2600_v43 }
 0x28a   : > { %v2458_v23 = vand.u32 2147483647, %v2457_v9  ;;  %v2610_v31 = vshrl.u32 %v15312_v11, %v2601_v33  ;;  %v2612_v40 = vshll.u32 %v15312_v11, %v2600_v43  ;;  %v2613_v27 = vshrl.u32 %v15313_v53, %v2601_v33 }
 0x28b   : > { %v11040_v32 = vsub.s32 %v2542_v55, %v2545_v47  ;;  %v11044_v4 = vand.u32 3, %v2471_v1  ;;  %v11046_v45 = vshll.u32 %v2594_v36, 8  ;;  %v7395_v30 = vadd.s32 4294967169, %v2694_v2 }
 0x28c   : > { %v2461_v25 = vmul.f32 %v2460_v57, %v2458_v23  ;;  %v11050_v50 = vand.u32 8388607, %v2690_v22  ;;  %v2602_v63 = vshrl.u32 %v15318_v46, %v2601_v33  ;;  %v2605_v54 = vor.u32 %v2604_v34, %v2603_v42 }
 0x28d   : > { %v2548_v38 = vsub.s32 0, %v11040_v32  ;;  %v2608_v61 = vor.u32 %v2607_v37, %v2606_v6  ;;  %v2611_v60 = vor.u32 %v2610_v31, %v2609_v8  ;;  %v2615_v20 = vshll.u32 %v15313_v53, %v2600_v43 }
 0x28e   : > { %v2462_v3 = vxor.u32 2147483648, %v2461_v25  ;;  %v2616_v18 = vshrl.u32 %v15314_v35, %v2601_v33  ;;  %v2614_v24 = vor.u32 %v2613_v27, %v2612_v40  ;;  %vm2618_vm12 = vcmp.lt.s32.totalorder %v2599_v56, 1 }
 0x28f   : > { %v7388_v19 = vmin.u32 %v2548_v38, %v11040_v32  ;;  %vm2621_vm10 = vcmp.lt.s32.totalorder %v2599_v56, 4  ;;  %v2700_v58 = vadd.s32 1, %v7395_v30  ;;  %vm2619_vm11 = vcmp.lt.s32.totalorder %v2599_v56, 2 }
 0x290   : > { %v2463_v52 = vsel %vm2380_vm2, %v2462_v3, %v2461_v25  ;;  %v2617_v28 = vor.u32 %v2616_v18, %v2615_v20  ;;  %vm2620_vm13 = vcmp.lt.s32.totalorder %v2599_v56, 3  ;;  %v2622_v15 = vsel %vm2618_vm12, %v2602_v63, %v2605_v54 }
 0x291   : > { %v2466_v44 = vsel %vm11004_vm3, %v9246_v7, %v2463_v52  ;;  %v2550_v55 = vclz %v7388_v19  ;;  %v2623_v5 = vsel %vm2621_vm10, %v2611_v60, 2102212464  ;;  %v2626_v26 = vsel %vm2618_vm12, %v2605_v54, %v2608_v61 }
 0x292   : > { %7959 = vcosq.f32 %v2466_v44  ;;  %v2624_v13 = vsel %vm2620_vm13, %v2608_v61, %v2623_v5  ;;  %v2627_v16 = vsel %vm2621_vm10, %v2614_v24, 920167782  ;;  %v2630_v29 = vsel %vm2618_vm12, %v2608_v61, %v2611_v60 }
 0x293   : > { %7961 = vsinq.f32 %v2466_v44  ;;  %v7389_v48 = vadd.s32 4294967294, %v2550_v55  ;;  %vm2474_vm15 = vcmp.eq.s32.totalorder %v11044_v4, 0  ;;  %v2538_v49 = vadd.s32 %v10980_v41, %v11000_v17 }
 0x294   : > { %v2628_v51 = vsel %vm2620_vm13, %v2611_v60, %v2627_v16  ;;  %v2631_v1 = vsel %vm2621_vm10, %v2617_v28, 1326507024  ;;  %vm2701_vm14 = vcmp.gt.s32.totalorder %v2700_v58, 0  ;;  %vm2473_vm0 = vcmp.lt.s32.totalorder %v11044_v4, 2 }
 0x295   : > { %vm7390_vm1 = vcmp.lt.s32.totalorder %v7389_v48, 0  ;;  %v2625_v43 = vsel %vm2619_vm11, %v2622_v15, %v2624_v13  ;;  %v2629_v9 = vsel %vm2619_vm11, %v2626_v26, %v2628_v51  ;;  %v2632_v57 = vsel %vm2620_vm13, %v2614_v24, %v2631_v1 }
 0x296   : > { %vm2470_vm2 = vweird.f32 %v9246_v7  ;;  %v2553_v36 = vsel %vm7390_vm1, 0, %v7389_v48  ;;  %v2633_v33 = vsel %vm2619_vm11, %v2630_v29, %v2632_v57  ;;  %vm2484_vm3 = vcmp.lt.s32.totalorder %v9250_v62, 0 }
 0x297   : > { %v11080_v41 = vmul.u32.u64.low %v11046_v45, %v2629_v9  ;;  %v11081_v17 = vmul.u32.u64.high %v11046_v45, %v2629_v9, %v11080_v41  ;;  %v2554_v2 = vsub.s32 32, %v2553_v36  ;;  %v2555_v23 = vshll.u32 %v11040_v32, %v2553_v36 }
 0x298   : > { %v2558_v47 = vsub.s32 4294967266, %v2553_v36  ;;  %v2702_v42 = vsel %vm2701_vm14, %v2700_v58, 0  ;;  %vm2477_vm4 = vcmp.eq.s32.totalorder %v11044_v4, 2  ;;  %v2568_v31 = vsub.s32 4, %v11029_v0 }
 0x299   : > { %v11088_v6 = vmul.u32.u64.low %v11046_v45, %v2633_v33  ;;  %v11089_v34 = vmul.u32.u64.high %v11046_v45, %v2633_v33, %v11088_v6  ;;  %v2704_v56 = vand.u32 31, %v2702_v42  ;;  %v2556_v37 = vshrl.u32 %v2538_v49, %v2554_v2 }
 0x29a   : > { %v2559_v8 = vadd.s32 127, %v2558_v47  ;;  %v2698_v25 = vor.u32 8388608, %v11050_v50  ;;  %v2641_v40 = vmul.u32 %v11046_v45, %v2625_v43  ;;  %v2644_v27 = vadd.s32 1, %v11081_v17 }
 0x29b   : > { %v11095_v32 = vshrl.u32 %v2702_v42, 5  ;;  %v2705_v30 = vsub.s32 32, %v2704_v56  ;;  %vm11099_vm5 = vcmp.le.f32.partialorder %v2482_v39, 0.7853982  ;;  %v2557_v63 = vor.u32 %v2556_v37, %v2555_v23 }
 0x29c   : > { %v7960_v3 = vpop.eup %7959  ;;  %v2560_v54 = vshll.u32 %v2559_v8, 23  ;;  %v2707_v61 = vshll.u32 %v15318_v46, %v2704_v56  ;;  %v2710_v50 = vshll.u32 %v15310_v10, %v2704_v56  ;;  %vm2643_vm7 = vc.u32 %v11089_v34, %v11080_v41 }
 0x29d   : > { %v7962_v60 = vpop.eup %7961  ;;  %v2478_v45 = vxor.u32 2147483648, %v7960_v3  ;;  %v2713_v20 = vshll.u32 %v15311_v21, %v2704_v56  ;;  %v2716_v18 = vshll.u32 %v15312_v11, %v2704_v56  ;;  %v2564_v19 = vcvt.s32.f32 %v2557_v63 }
 0x29e   : > { %v2475_v52 = vxor.u32 2147483648, %v7962_v60  ;;  %v2561_v39 = vor.u32 4788187, %v2560_v54  ;;  %v2645_v24 = vsel %vm2643_vm7, %v2644_v27, %v11081_v17  ;;  %v2708_v58 = vshrl.u32 %v15310_v10, %v2705_v30 }
 0x29f   : > { %v2479_v44 = vsel %vm2477_vm4, %v2478_v45, %v7962_v60  ;;  %v2646_v28 = vadd.s32 %v2645_v24, %v2641_v40  ;;  %v2711_v55 = vshrl.u32 %v15311_v21, %v2705_v30  ;;  %v2714_v26 = vshrl.u32 %v15312_v11, %v2705_v30 }
 0x2a0   : > { %v2476_v15 = vsel %vm2474_vm15, %v7960_v3, %v2475_v52  ;;  %v2562_v5 = vand.u32 2147483647, %v2561_v39  ;;  %v2717_v48 = vshrl.u32 %v15313_v53, %v2705_v30  ;;  %v2569_v16 = vsel %vm2484_vm3, %v2568_v31, %v11029_v0  ;;  %v15361_v39 = vld [vmem:[#allocation20_spill] sm:$0xff] }
 0x2a1   : > { %v2480_v13 = vsel %vm2473_vm0, %v2476_v15, %v2479_v44  ;;  %v2647_v29 = vadd.s32 536870912, %v2646_v28  ;;  %v2709_v49 = vor.u32 %v2708_v58, %v2707_v61  ;;  %v2712_v43 = vor.u32 %v2711_v55, %v2710_v50 }
 0x2a2   : > { %v2481_v51 = vsel %vm2470_vm2, nan, %v2480_v13  ;;  %v2565_v1 = vmul.f32 %v2564_v19, %v2562_v5  ;;  %v2718_v9 = vor.u32 %v2717_v48, %v2716_v18  ;;  %v2719_v36 = vshll.u32 %v15313_v53, %v2704_v56 }
 0x2a3   : > { %v2648_v57 = vshrl.u32 %v2647_v29, 30  ;;  %v2720_v33 = vshrl.u32 %v15314_v35, %v2705_v30  ;;  %vm2722_vm6 = vcmp.lt.s32.totalorder %v11095_v32, 1  ;;  %7180 = vst [vmem:[%s9727_s11 + $0x90] sm:$0xff] %v2481_v51  ;;  %v2715_v17 = vor.u32 %v2714_v26, %v2713_v20 }
 0x2a4   : > { %v2566_v4 = vxor.u32 2147483648, %v2565_v1  ;;  %vm2725_vm8 = vcmp.lt.s32.totalorder %v11095_v32, 4  ;;  %v11130_v0 = vshll.u32 %v2698_v25, 8  ;;  %v2571_v7 = vsel %vm11099_vm5, 0, %v2569_v16 }
 0x2a5   : > { %v2649_v2 = vshll.u32 %v2648_v57, 30  ;;  %vm2723_vm9 = vcmp.lt.s32.totalorder %v11095_v32, 2  ;;  %vm2724_vm12 = vcmp.lt.s32.totalorder %v11095_v32, 3  ;;  %v2721_v47 = vor.u32 %v2720_v33, %v2719_v36 }
 0x2a6   : > { %v2567_v23 = vsel %vm2484_vm3, %v2566_v4, %v2565_v1  ;;  %v2730_v42 = vsel %vm2722_vm6, %v2709_v49, %v2712_v43  ;;  %v2731_v6 = vsel %vm2725_vm8, %v2718_v9, 920167782  ;;  %v2706_v8 = vshrl.u32 %v15318_v46, %v2705_v30 }
 0x2a7   : > { %v2570_v56 = vsel %vm11099_vm5, %v9250_v62, %v2567_v23  ;;  %v11145_v37 = vsub.s32 %v2646_v28, %v2649_v2  ;;  %v2575_v31 = vadd.s32 3, %v2571_v7  ;;  %v2727_v25 = vsel %vm2725_vm8, %v2715_v17, 2102212464 }
 0x2a8   : > { %7963 = vcosq.f32 %v2570_v56  ;;  %v2732_v40 = vsel %vm2724_vm12, %v2715_v17, %v2731_v6  ;;  %v2672_v3 = vsub.s32 4, %v2648_v57  ;;  %v2734_v63 = vsel %vm2722_vm6, %v2712_v43, %v2715_v17 }
 0x2a9   : > { %7965 = vsinq.f32 %v2570_v56  ;;  %v2652_v27 = vsub.s32 0, %v11145_v37  ;;  %v2733_v38 = vsel %vm2723_vm9, %v2730_v42, %v2732_v40  ;;  %v2735_v30 = vsel %vm2725_vm8, %v2721_v47, 1326507024  ;;  %v15364_v42 = vld [vmem:[#allocation21_spill] sm:$0xff] }
 0x2aa   : > { %v11160_v54 = vmul.u32.u64.low %v11130_v0, %v2733_v38  ;;  %v11161_v61 = vmul.u32.u64.high %v11130_v0, %v2733_v38, %v11160_v54  ;;  %v2726_v60 = vsel %vm2722_vm6, %v2706_v8, %v2709_v49  ;;  %v2728_v45 = vsel %vm2724_vm12, %v2712_v43, %v2727_v25 }
 0x2ab   : > { %v7392_v50 = vmin.u32 %v2652_v27, %v11145_v37  ;;  %v2736_v20 = vsel %vm2724_vm12, %v2718_v9, %v2735_v30  ;;  %v2576_v18 = vand.u32 3, %v2575_v31  ;;  %v2797_v19 = vand.u32 2139095040, %v15361_v39 }
 0x2ac   : > { %v2737_v52 = vsel %vm2723_vm9, %v2734_v63, %v2736_v20  ;;  %vm2574_vm10 = vweird.f32 %v9250_v62  ;;  %vm2588_vm11 = vcmp.lt.s32.totalorder %v9254_v59, 0  ;;  %v2729_v44 = vsel %vm2723_vm9, %v2726_v60, %v2728_v45 }
 0x2ad   : > { %v2654_v24 = vclz %v7392_v50  ;;  %v11179_v28 = vmul.u32.u64.low %v11130_v0, %v2737_v52  ;;  %v11180_v58 = vmul.u32.u64.high %v11130_v0, %v2737_v52, %v11179_v28  ;;  %v2798_v55 = vshrl.u32 %v2797_v19, 23 }
 0x2ae   : > { %vm11184_vm13 = vcmp.le.f32.partialorder %v2586_v12, 0.7853982  ;;  %v2673_v26 = vsel %vm2588_vm11, %v2672_v3, %v2648_v57  ;;  %v2794_v48 = vand.u32 2147483647, %v15361_v39  ;;  %vm2577_vm15 = vcmp.lt.s32.totalorder %v2576_v18, 2 }
 0x2af   : > { %v7393_v5 = vadd.s32 4294967294, %v2654_v24  ;;  %vm2578_vm14 = vcmp.eq.s32.totalorder %v2576_v18, 0  ;;  %v2748_v32 = vadd.s32 1, %v11161_v61  ;;  %v7399_v13 = vadd.s32 4294967169, %v2798_v55 }
 0x2b0   : > { %vm2581_vm0 = vcmp.eq.s32.totalorder %v2576_v18, 2  ;;  %v2642_v16 = vadd.s32 %v11080_v41, %v11089_v34  ;;  %v2745_v12 = vmul.u32 %v11130_v0, %v2729_v44  ;;  %v2675_v51 = vsel %vm11184_vm13, 0, %v2673_v26 }
 0x2b1   : > { %vm7394_vm1 = vcmp.lt.s32.totalorder %v7393_v5, 0  ;;  %vm2747_vm2 = vc.u32 %v11180_v58, %v11160_v54  ;;  %v2804_v1 = vadd.s32 1, %v7399_v13  ;;  %v2801_v34 = vand.u32 8388607, %v2794_v48 }
 0x2b2   : > { %v7964_v29 = vpop.eup %7963  ;;  %v2657_v49 = vsel %vm7394_vm1, 0, %v7393_v5  ;;  %v2749_v41 = vsel %vm2747_vm2, %v2748_v32, %v11161_v61  ;;  %v2901_v6 = vand.u32 2139095040, %v15364_v42  ;;  %v2679_v40 = vadd.s32 3, %v2675_v51 }
 0x2b3   : > { %v7966_v43 = vpop.eup %7965  ;;  %v2582_v9 = vxor.u32 2147483648, %v7964_v29  ;;  %v2658_v57 = vsub.s32 32, %v2657_v49  ;;  %v2659_v36 = vshll.u32 %v11145_v37, %v2657_v49  ;;  %v2662_v33 = vsub.s32 4294967266, %v2657_v49 }
 0x2b4   : > { %v2579_v4 = vxor.u32 2147483648, %v7966_v43  ;;  %vm2805_vm3 = vcmp.gt.s32.totalorder %v2804_v1, 0  ;;  %v2750_v2 = vadd.s32 %v2749_v41, %v2745_v12  ;;  %v2802_v30 = vor.u32 8388608, %v2801_v34 }
 0x2b5   : > { %v2583_v17 = vsel %vm2581_vm0, %v2582_v9, %v7966_v43  ;;  %v2660_v0 = vshrl.u32 %v2642_v16, %v2658_v57  ;;  %v2663_v7 = vadd.s32 127, %v2662_v33  ;;  %v2806_v47 = vsel %vm2805_vm3, %v2804_v1, 0 }
 0x2b6   : > { %v2580_v23 = vsel %vm2578_vm14, %v7964_v29, %v2579_v4  ;;  %v2751_v31 = vadd.s32 536870912, %v2750_v2  ;;  %v2808_v27 = vand.u32 31, %v2806_v47  ;;  %v2807_v61 = vshrl.u32 %v2806_v47, 5 }
 0x2b7   : > { %v2584_v56 = vsel %vm2577_vm15, %v2580_v23, %v2583_v17  ;;  %v2661_v37 = vor.u32 %v2660_v0, %v2659_v36  ;;  %v2664_v8 = vshll.u32 %v2663_v7, 23  ;;  %v2898_v60 = vand.u32 2147483647, %v15364_v42 }
 0x2b8   : > { %v2585_v25 = vsel %vm2574_vm10, nan, %v2584_v56  ;;  %v11209_v63 = vshrl.u32 %v2751_v31, 30  ;;  %v2809_v50 = vsub.s32 32, %v2808_v27  ;;  %v2902_v45 = vshrl.u32 %v2901_v6, 23 }
 0x2b9   : > { %v2665_v3 = vor.u32 4788187, %v2664_v8  ;;  %v2668_v38 = vcvt.s32.f32 %v2661_v37  ;;  %7181 = vst [vmem:[%s9727_s11 + $0x98] sm:$0xff] %v2585_v25  ;;  %v2811_v52 = vshll.u32 %v15318_v46, %v2808_v27  ;;  %v2814_v62 = vshll.u32 %v15310_v10, %v2808_v27 }
 0x2ba   : > { %v2753_v18 = vshll.u32 %v11209_v63, 30  ;;  %v2812_v19 = vshrl.u32 %v15310_v10, %v2809_v50  ;;  %v2815_v24 = vshrl.u32 %v15311_v21, %v2809_v50  ;;  %v2817_v44 = vshll.u32 %v15311_v21, %v2808_v27 }
 0x2bb   : > { %v2666_v20 = vand.u32 2147483647, %v2665_v3  ;;  %v2818_v28 = vshrl.u32 %v15312_v11, %v2809_v50  ;;  %v2820_v26 = vshll.u32 %v15312_v11, %v2808_v27  ;;  %v2821_v32 = vshrl.u32 %v15313_v53, %v2809_v50 }
 0x2bc   : > { %v11220_v5 = vsub.s32 %v2750_v2, %v2753_v18  ;;  %v11224_v13 = vand.u32 3, %v2679_v40  ;;  %v11226_v16 = vshll.u32 %v2802_v30, 8  ;;  %v7403_v12 = vadd.s32 4294967169, %v2902_v45 }
 0x2bd   : > { %v2669_v55 = vmul.f32 %v2668_v38, %v2666_v20  ;;  %v11230_v29 = vand.u32 8388607, %v2898_v60  ;;  %v2810_v1 = vshrl.u32 %v15318_v46, %v2809_v50  ;;  %v2813_v43 = vor.u32 %v2812_v19, %v2811_v52 }
 0x2be   : > { %v2756_v51 = vsub.s32 0, %v11220_v5  ;;  %v2816_v9 = vor.u32 %v2815_v24, %v2814_v62  ;;  %v2819_v57 = vor.u32 %v2818_v28, %v2817_v44  ;;  %v2823_v36 = vshll.u32 %v15313_v53, %v2808_v27 }
 0x2bf   : > { %v2670_v49 = vxor.u32 2147483648, %v2669_v55  ;;  %v2824_v33 = vshrl.u32 %v15314_v35, %v2809_v50  ;;  %v2822_v34 = vor.u32 %v2821_v32, %v2820_v26  ;;  %vm2826_vm4 = vcmp.lt.s32.totalorder %v2807_v61, 1 }
 0x2c0   : > { %v7396_v41 = vmin.u32 %v2756_v51, %v11220_v5  ;;  %vm2829_vm5 = vcmp.lt.s32.totalorder %v2807_v61, 4  ;;  %v2908_v7 = vadd.s32 1, %v7403_v12  ;;  %vm2827_vm7 = vcmp.lt.s32.totalorder %v2807_v61, 2 }
 0x2c1   : > { %v2671_v4 = vsel %vm2588_vm11, %v2670_v49, %v2669_v55  ;;  %v2825_v0 = vor.u32 %v2824_v33, %v2823_v36  ;;  %vm2828_vm6 = vcmp.lt.s32.totalorder %v2807_v61, 3  ;;  %v2830_v23 = vsel %vm2826_vm4, %v2810_v1, %v2813_v43 }
 0x2c2   : > { %v2674_v17 = vsel %vm11184_vm13, %v9254_v59, %v2671_v4  ;;  %v2758_v2 = vclz %v7396_v41  ;;  %v2831_v47 = vsel %vm2829_vm5, %v2819_v57, 2102212464  ;;  %v2834_v6 = vsel %vm2826_vm4, %v2813_v43, %v2816_v9 }
 0x2c3   : > { %7967 = vcosq.f32 %v2674_v17  ;;  %v2832_v37 = vsel %vm2828_vm6, %v2816_v9, %v2831_v47  ;;  %v2835_v15 = vsel %vm2829_vm5, %v2822_v34, 920167782  ;;  %v2838_v8 = vsel %vm2826_vm4, %v2816_v9, %v2819_v57 }
 0x2c4   : > { %7969 = vsinq.f32 %v2674_v17  ;;  %v7397_v56 = vadd.s32 4294967294, %v2758_v2  ;;  %vm2682_vm8 = vcmp.eq.s32.totalorder %v11224_v13, 0  ;;  %v2746_v31 = vadd.s32 %v11160_v54, %v11180_v58 }
 0x2c5   : > { %v2836_v25 = vsel %vm2828_vm6, %v2819_v57, %v2835_v15  ;;  %v2839_v40 = vsel %vm2829_vm5, %v2825_v0, 1326507024  ;;  %vm2909_vm9 = vcmp.gt.s32.totalorder %v2908_v7, 0  ;;  %vm2681_vm12 = vcmp.lt.s32.totalorder %v11224_v13, 2 }
 0x2c6   : > { %vm7398_vm10 = vcmp.lt.s32.totalorder %v7397_v56, 0  ;;  %v2833_v27 = vsel %vm2827_vm7, %v2830_v23, %v2832_v37  ;;  %v2837_v3 = vsel %vm2827_vm7, %v2834_v6, %v2836_v25  ;;  %v2840_v38 = vsel %vm2828_vm6, %v2822_v34, %v2839_v40 }
 0x2c7   : > { %vm2678_vm11 = vweird.f32 %v9254_v59  ;;  %v2761_v30 = vsel %vm7398_vm10, 0, %v7397_v56  ;;  %v2841_v50 = vsel %vm2827_vm7, %v2838_v8, %v2840_v38  ;;  %vm2692_vm13 = vcmp.lt.s32.totalorder %v15358_v14, 0 }
 0x2c8   : > { %v11260_v54 = vmul.u32.u64.low %v11226_v16, %v2837_v3  ;;  %v11261_v58 = vmul.u32.u64.high %v11226_v16, %v2837_v3, %v11260_v54  ;;  %v2762_v45 = vsub.s32 32, %v2761_v30  ;;  %v2763_v20 = vshll.u32 %v11220_v5, %v2761_v30 }
 0x2c9   : > { %v2766_v18 = vsub.s32 4294967266, %v2761_v30  ;;  %v2910_v52 = vsel %vm2909_vm9, %v2908_v7, 0  ;;  %vm2685_vm15 = vcmp.eq.s32.totalorder %v11224_v13, 2  ;;  %v2776_v28 = vsub.s32 4, %v11209_v63 }
 0x2ca   : > { %v11268_v62 = vmul.u32.u64.low %v11226_v16, %v2841_v50  ;;  %v11269_v19 = vmul.u32.u64.high %v11226_v16, %v2841_v50, %v11268_v62  ;;  %v2912_v61 = vand.u32 31, %v2910_v52  ;;  %v2764_v24 = vshrl.u32 %v2746_v31, %v2762_v45 }
 0x2cb   : > { %v2767_v44 = vadd.s32 127, %v2766_v18  ;;  %v2906_v55 = vor.u32 8388608, %v11230_v29  ;;  %v2849_v26 = vmul.u32 %v11226_v16, %v2833_v27  ;;  %v2852_v32 = vadd.s32 1, %v11261_v58 }
 0x2cc   : > { %v11275_v5 = vshrl.u32 %v2910_v52, 5  ;;  %v2913_v12 = vsub.s32 32, %v2912_v61  ;;  %vm11279_vm14 = vcmp.le.f32.partialorder %v2690_v22, 0.7853982  ;;  %v2765_v1 = vor.u32 %v2764_v24, %v2763_v20 }
 0x2cd   : > { %v7968_v49 = vpop.eup %7967  ;;  %v2768_v43 = vshll.u32 %v2767_v44, 23  ;;  %v2915_v9 = vshll.u32 %v15318_v46, %v2912_v61  ;;  %v2918_v29 = vshll.u32 %v15310_v10, %v2912_v61  ;;  %vm2851_vm0 = vc.u32 %v11269_v19, %v11260_v54 }
 0x2ce   : > { %v7970_v57 = vpop.eup %7969  ;;  %v2686_v16 = vxor.u32 2147483648, %v7968_v49  ;;  %v2921_v36 = vshll.u32 %v15311_v21, %v2912_v61  ;;  %v2924_v33 = vshll.u32 %v15312_v11, %v2912_v61  ;;  %v2772_v41 = vcvt.s32.f32 %v2765_v1 }
 0x2cf   : > { %v2683_v4 = vxor.u32 2147483648, %v7970_v57  ;;  %v2769_v22 = vor.u32 4788187, %v2768_v43  ;;  %v2853_v34 = vsel %vm2851_vm0, %v2852_v32, %v11261_v58  ;;  %v2916_v7 = vshrl.u32 %v15310_v10, %v2913_v12 }
 0x2d0   : > { %v2687_v17 = vsel %vm2685_vm15, %v2686_v16, %v7970_v57  ;;  %v2854_v0 = vadd.s32 %v2853_v34, %v2849_v26  ;;  %v2919_v2 = vshrl.u32 %v15311_v21, %v2913_v12  ;;  %v2922_v6 = vshrl.u32 %v15312_v11, %v2913_v12 }
 0x2d1   : > { %v2684_v23 = vsel %vm2682_vm8, %v7968_v49, %v2683_v4  ;;  %v2770_v47 = vand.u32 2147483647, %v2769_v22  ;;  %v2925_v56 = vshrl.u32 %v15313_v53, %v2913_v12  ;;  %v2777_v15 = vsel %vm2692_vm13, %v2776_v28, %v11209_v63  ;;  %v15367_v22 = vld [vmem:[#allocation22_spill] sm:$0xff] }
 0x2d2   : > { %v2688_v37 = vsel %vm2681_vm12, %v2684_v23, %v2687_v17  ;;  %v2855_v8 = vadd.s32 536870912, %v2854_v0  ;;  %v2917_v31 = vor.u32 %v2916_v7, %v2915_v9  ;;  %v2920_v27 = vor.u32 %v2919_v2, %v2918_v29 }
 0x2d3   : > { %v2689_v25 = vsel %vm2678_vm11, nan, %v2688_v37  ;;  %v2773_v40 = vmul.f32 %v2772_v41, %v2770_v47  ;;  %v2926_v3 = vor.u32 %v2925_v56, %v2924_v33  ;;  %v2927_v30 = vshll.u32 %v15313_v53, %v2912_v61 }
 0x2d4   : > { %v2856_v38 = vshrl.u32 %v2855_v8, 30  ;;  %v2928_v50 = vshrl.u32 %v15314_v35, %v2913_v12  ;;  %vm2930_vm1 = vcmp.lt.s32.totalorder %v11275_v5, 1  ;;  %7182 = vst [vmem:[%s9727_s11 + $0xa0] sm:$0xff] %v2689_v25  ;;  %v2923_v58 = vor.u32 %v2922_v6, %v2921_v36 }
 0x2d5   : > { %v2774_v13 = vxor.u32 2147483648, %v2773_v40  ;;  %vm2933_vm2 = vcmp.lt.s32.totalorder %v11275_v5, 4  ;;  %v11310_v63 = vshll.u32 %v2906_v55, 8  ;;  %v2779_v59 = vsel %vm11279_vm14, 0, %v2777_v15 }
 0x2d6   : > { %v2857_v45 = vshll.u32 %v2856_v38, 30  ;;  %vm2931_vm3 = vcmp.lt.s32.totalorder %v11275_v5, 2  ;;  %vm2932_vm4 = vcmp.lt.s32.totalorder %v11275_v5, 3  ;;  %v2929_v18 = vor.u32 %v2928_v50, %v2927_v30 }
 0x2d7   : > { %v2775_v20 = vsel %vm2692_vm13, %v2774_v13, %v2773_v40  ;;  %v2938_v52 = vsel %vm2930_vm1, %v2917_v31, %v2920_v27  ;;  %v2939_v62 = vsel %vm2933_vm2, %v2926_v3, 920167782  ;;  %v2914_v44 = vshrl.u32 %v15318_v46, %v2913_v12 }
 0x2d8   : > { %v2778_v61 = vsel %vm11279_vm14, %v15358_v14, %v2775_v20  ;;  %v11325_v24 = vsub.s32 %v2854_v0, %v2857_v45  ;;  %v2783_v28 = vadd.s32 3, %v2779_v59  ;;  %v2935_v55 = vsel %vm2933_vm2, %v2923_v58, 2102212464 }
 0x2d9   : > { %7971 = vcosq.f32 %v2778_v61  ;;  %v2940_v26 = vsel %vm2932_vm4, %v2923_v58, %v2939_v62  ;;  %v2880_v49 = vsub.s32 4, %v2856_v38  ;;  %v2942_v1 = vsel %vm2930_vm1, %v2920_v27, %v2923_v58 }
 0x2da   : > { %7973 = vsinq.f32 %v2778_v61  ;;  %v2860_v32 = vsub.s32 0, %v11325_v24  ;;  %v2941_v51 = vsel %vm2931_vm3, %v2938_v52, %v2940_v26  ;;  %v2943_v12 = vsel %vm2933_vm2, %v2929_v18, 1326507024  ;;  %v15370_v52 = vld [vmem:[#allocation23_spill] sm:$0xff] }
 0x2db   : > { %v11340_v43 = vmul.u32.u64.low %v11310_v63, %v2941_v51  ;;  %v11341_v9 = vmul.u32.u64.high %v11310_v63, %v2941_v51, %v11340_v43  ;;  %v2934_v57 = vsel %vm2930_vm1, %v2914_v44, %v2917_v31  ;;  %v2936_v16 = vsel %vm2932_vm4, %v2920_v27, %v2935_v55 }
 0x2dc   : > { %v7400_v29 = vmin.u32 %v2860_v32, %v11325_v24  ;;  %v2944_v36 = vsel %vm2932_vm4, %v2926_v3, %v2943_v12  ;;  %v2784_v33 = vand.u32 3, %v2783_v28  ;;  %v3005_v41 = vand.u32 2139095040, %v15367_v22 }
 0x2dd   : > { %v2945_v4 = vsel %vm2931_vm3, %v2942_v1, %v2944_v36  ;;  %vm2782_vm5 = vweird.f32 %v15358_v14  ;;  %vm2796_vm7 = vcmp.lt.s32.totalorder %v15361_v39, 0  ;;  %v2937_v17 = vsel %vm2931_vm3, %v2934_v57, %v2936_v16 }
 0x2de   : > { %v2862_v34 = vclz %v7400_v29  ;;  %v11359_v0 = vmul.u32.u64.low %v11310_v63, %v2945_v4  ;;  %v11360_v7 = vmul.u32.u64.high %v11310_v63, %v2945_v4, %v11359_v0  ;;  %v3006_v2 = vshrl.u32 %v3005_v41, 23 }
 0x2df   : > { %vm11364_vm6 = vcmp.le.f32.partialorder %v2794_v48, 0.7853982  ;;  %v2881_v6 = vsel %vm2796_vm7, %v2880_v49, %v2856_v38  ;;  %v3002_v56 = vand.u32 2147483647, %v15367_v22  ;;  %vm2785_vm8 = vcmp.lt.s32.totalorder %v2784_v33, 2 }
 0x2e0   : > { %v7401_v47 = vadd.s32 4294967294, %v2862_v34  ;;  %vm2786_vm9 = vcmp.eq.s32.totalorder %v2784_v33, 0  ;;  %v2956_v5 = vadd.s32 1, %v11341_v9  ;;  %v7407_v37 = vadd.s32 4294967169, %v3006_v2 }
 0x2e1   : > { %vm2789_vm12 = vcmp.eq.s32.totalorder %v2784_v33, 2  ;;  %v2850_v15 = vadd.s32 %v11260_v54, %v11269_v19  ;;  %v2953_v48 = vmul.u32 %v11310_v63, %v2937_v17  ;;  %v2883_v25 = vsel %vm11364_vm6, 0, %v2881_v6 }
 0x2e2   : > { %vm7402_vm10 = vcmp.lt.s32.totalorder %v7401_v47, 0  ;;  %vm2955_vm11 = vc.u32 %v11360_v7, %v11340_v43  ;;  %v3012_v40 = vadd.s32 1, %v7407_v37  ;;  %v3009_v19 = vand.u32 8388607, %v3002_v56 }
 0x2e3   : > { %v7972_v8 = vpop.eup %7971  ;;  %v2865_v31 = vsel %vm7402_vm10, 0, %v7401_v47  ;;  %v2957_v54 = vsel %vm2955_vm11, %v2956_v5, %v11341_v9  ;;  %v3109_v62 = vand.u32 2139095040, %v15370_v52  ;;  %v2887_v26 = vadd.s32 3, %v2883_v25 }
 0x2e4   : > { %v7974_v27 = vpop.eup %7973  ;;  %v2790_v3 = vxor.u32 2147483648, %v7972_v8  ;;  %v2866_v38 = vsub.s32 32, %v2865_v31  ;;  %v2867_v30 = vshll.u32 %v11325_v24, %v2865_v31  ;;  %v2870_v50 = vsub.s32 4294967266, %v2865_v31 }
 0x2e5   : > { %v2787_v13 = vxor.u32 2147483648, %v7974_v27  ;;  %vm3013_vm13 = vcmp.gt.s32.totalorder %v3012_v40, 0  ;;  %v2958_v45 = vadd.s32 %v2957_v54, %v2953_v48  ;;  %v3010_v12 = vor.u32 8388608, %v3009_v19 }
 0x2e6   : > { %v2791_v58 = vsel %vm2789_vm12, %v2790_v3, %v7974_v27  ;;  %v2868_v63 = vshrl.u32 %v2850_v15, %v2866_v38  ;;  %v2871_v59 = vadd.s32 127, %v2870_v50  ;;  %v3014_v18 = vsel %vm3013_vm13, %v3012_v40, 0 }
 0x2e7   : > { %v2788_v20 = vsel %vm2786_vm9, %v7972_v8, %v2787_v13  ;;  %v2959_v28 = vadd.s32 536870912, %v2958_v45  ;;  %v3016_v32 = vand.u32 31, %v3014_v18  ;;  %v3015_v9 = vshrl.u32 %v3014_v18, 5 }
 0x2e8   : > { %v2792_v61 = vsel %vm2785_vm8, %v2788_v20, %v2791_v58  ;;  %v2869_v24 = vor.u32 %v2868_v63, %v2867_v30  ;;  %v2872_v44 = vshll.u32 %v2871_v59, 23  ;;  %v3106_v57 = vand.u32 2147483647, %v15370_v52 }
 0x2e9   : > { %v2793_v55 = vsel %vm2782_vm5, nan, %v2792_v61  ;;  %v11389_v1 = vshrl.u32 %v2959_v28, 30  ;;  %v3017_v29 = vsub.s32 32, %v3016_v32  ;;  %v3110_v16 = vshrl.u32 %v3109_v62, 23 }
 0x2ea   : > { %v2873_v49 = vor.u32 4788187, %v2872_v44  ;;  %v2876_v51 = vcvt.s32.f32 %v2869_v24  ;;  %7183 = vst [vmem:[%s9727_s11 + $0xa8] sm:$0xff] %v2793_v55  ;;  %v3019_v4 = vshll.u32 %v15318_v46, %v3016_v32  ;;  %v3022_v14 = vshll.u32 %v15310_v10, %v3016_v32 }
 0x2eb   : > { %v2961_v33 = vshll.u32 %v11389_v1, 30  ;;  %v3020_v41 = vshrl.u32 %v15310_v10, %v3017_v29  ;;  %v3023_v34 = vshrl.u32 %v15311_v21, %v3017_v29  ;;  %v3025_v17 = vshll.u32 %v15311_v21, %v3016_v32 }
 0x2ec   : > { %v2874_v36 = vand.u32 2147483647, %v2873_v49  ;;  %v3026_v0 = vshrl.u32 %v15312_v11, %v3017_v29  ;;  %v3028_v6 = vshll.u32 %v15312_v11, %v3016_v32  ;;  %v3029_v5 = vshrl.u32 %v15313_v53, %v3017_v29 }
 0x2ed   : > { %v11400_v47 = vsub.s32 %v2958_v45, %v2961_v33  ;;  %v11404_v37 = vand.u32 3, %v2887_v26  ;;  %v11406_v15 = vshll.u32 %v3010_v12, 8  ;;  %v7411_v48 = vadd.s32 4294967169, %v3110_v16 }
 0x2ee   : > { %v2877_v2 = vmul.f32 %v2876_v51, %v2874_v36  ;;  %v11410_v8 = vand.u32 8388607, %v3106_v57  ;;  %v3018_v40 = vshrl.u32 %v15318_v46, %v3017_v29  ;;  %v3021_v27 = vor.u32 %v3020_v41, %v3019_v4 }
 0x2ef   : > { %v2964_v25 = vsub.s32 0, %v11400_v47  ;;  %v3024_v3 = vor.u32 %v3023_v34, %v3022_v14  ;;  %v3027_v38 = vor.u32 %v3026_v0, %v3025_v17  ;;  %v3031_v30 = vshll.u32 %v15313_v53, %v3016_v32 }
 0x2f0   : > { %v2878_v31 = vxor.u32 2147483648, %v2877_v2  ;;  %v3032_v50 = vshrl.u32 %v15314_v35, %v3017_v29  ;;  %v3030_v19 = vor.u32 %v3029_v5, %v3028_v6  ;;  %vm3034_vm15 = vcmp.lt.s32.totalorder %v3015_v9, 1 }
 0x2f1   : > { %v7404_v54 = vmin.u32 %v2964_v25, %v11400_v47  ;;  %vm3037_vm14 = vcmp.lt.s32.totalorder %v3015_v9, 4  ;;  %v3116_v59 = vadd.s32 1, %v7411_v48  ;;  %vm3035_vm0 = vcmp.lt.s32.totalorder %v3015_v9, 2 }
 0x2f2   : > { %v2879_v13 = vsel %vm2796_vm7, %v2878_v31, %v2877_v2  ;;  %v3033_v63 = vor.u32 %v3032_v50, %v3031_v30  ;;  %vm3036_vm1 = vcmp.lt.s32.totalorder %v3015_v9, 3  ;;  %v3038_v20 = vsel %vm3034_vm15, %v3018_v40, %v3021_v27 }
 0x2f3   : > { %v2882_v58 = vsel %vm11364_vm6, %v15361_v39, %v2879_v13  ;;  %v2966_v45 = vclz %v7404_v54  ;;  %v3039_v18 = vsel %vm3037_vm14, %v3027_v38, 2102212464  ;;  %v3042_v62 = vsel %vm3034_vm15, %v3021_v27, %v3024_v3 }
 0x2f4   : > { %7975 = vcosq.f32 %v2882_v58  ;;  %v3040_v24 = vsel %vm3036_vm1, %v3024_v3, %v3039_v18  ;;  %v3043_v23 = vsel %vm3037_vm14, %v3030_v19, 920167782  ;;  %v3046_v44 = vsel %vm3034_vm15, %v3024_v3, %v3027_v38 }
 0x2f5   : > { %7977 = vsinq.f32 %v2882_v58  ;;  %v7405_v61 = vadd.s32 4294967294, %v2966_v45  ;;  %vm2890_vm2 = vcmp.eq.s32.totalorder %v11404_v37, 0  ;;  %v2954_v28 = vadd.s32 %v11340_v43, %v11360_v7 }
 0x2f6   : > { %v3044_v55 = vsel %vm3036_vm1, %v3027_v38, %v3043_v23  ;;  %v3047_v26 = vsel %vm3037_vm14, %v3033_v63, 1326507024  ;;  %vm3117_vm3 = vcmp.gt.s32.totalorder %v3116_v59, 0  ;;  %vm2889_vm4 = vcmp.lt.s32.totalorder %v11404_v37, 2 }
 0x2f7   : > { %vm7406_vm5 = vcmp.lt.s32.totalorder %v7405_v61, 0  ;;  %v3041_v32 = vsel %vm3035_vm0, %v3038_v20, %v3040_v24  ;;  %v3045_v49 = vsel %vm3035_vm0, %v3042_v62, %v3044_v55  ;;  %v3048_v51 = vsel %vm3036_vm1, %v3030_v19, %v3047_v26 }
 0x2f8   : > { %vm2886_vm7 = vweird.f32 %v15361_v39  ;;  %v2969_v12 = vsel %vm7406_vm5, 0, %v7405_v61  ;;  %v3049_v29 = vsel %vm3035_vm0, %v3046_v44, %v3048_v51  ;;  %vm2900_vm6 = vcmp.lt.s32.totalorder %v15364_v42, 0 }
 0x2f9   : > { %v11440_v43 = vmul.u32.u64.low %v11406_v15, %v3045_v49  ;;  %v11441_v7 = vmul.u32.u64.high %v11406_v15, %v3045_v49, %v11440_v43  ;;  %v2970_v16 = vsub.s32 32, %v2969_v12  ;;  %v2971_v36 = vshll.u32 %v11400_v47, %v2969_v12 }
 0x2fa   : > { %v2974_v33 = vsub.s32 4294967266, %v2969_v12  ;;  %v3118_v4 = vsel %vm3117_vm3, %v3116_v59, 0  ;;  %vm2893_vm8 = vcmp.eq.s32.totalorder %v11404_v37, 2  ;;  %v2984_v0 = vsub.s32 4, %v11389_v1 }
 0x2fb   : > { %v11448_v14 = vmul.u32.u64.low %v11406_v15, %v3049_v29  ;;  %v11449_v41 = vmul.u32.u64.high %v11406_v15, %v3049_v29, %v11448_v14  ;;  %v3120_v9 = vand.u32 31, %v3118_v4  ;;  %v2972_v34 = vshrl.u32 %v2954_v28, %v2970_v16 }
 0x2fc   : > { %v2975_v17 = vadd.s32 127, %v2974_v33  ;;  %v3114_v2 = vor.u32 8388608, %v11410_v8  ;;  %v3057_v6 = vmul.u32 %v11406_v15, %v3041_v32  ;;  %v3060_v5 = vadd.s32 1, %v11441_v7 }
 0x2fd   : > { %v11455_v47 = vshrl.u32 %v3118_v4, 5  ;;  %v3121_v48 = vsub.s32 32, %v3120_v9  ;;  %vm11459_vm9 = vcmp.le.f32.partialorder %v2898_v60, 0.7853982  ;;  %v2973_v40 = vor.u32 %v2972_v34, %v2971_v36 }
 0x2fe   : > { %v7976_v31 = vpop.eup %7975  ;;  %v2976_v27 = vshll.u32 %v2975_v17, 23  ;;  %v3123_v3 = vshll.u32 %v15318_v46, %v3120_v9  ;;  %v3126_v8 = vshll.u32 %v15310_v10, %v3120_v9  ;;  %vm3059_vm12 = vc.u32 %v11449_v41, %v11440_v43 }
 0x2ff   : > { %v7978_v38 = vpop.eup %7977  ;;  %v2894_v15 = vxor.u32 2147483648, %v7976_v31  ;;  %v3129_v30 = vshll.u32 %v15311_v21, %v3120_v9  ;;  %v3132_v50 = vshll.u32 %v15312_v11, %v3120_v9  ;;  %v2980_v54 = vcvt.s32.f32 %v2973_v40 }
 0x300   : > { %v2891_v13 = vxor.u32 2147483648, %v7978_v38  ;;  %v2977_v60 = vor.u32 4788187, %v2976_v27  ;;  %v3061_v19 = vsel %vm3059_vm12, %v3060_v5, %v11441_v7  ;;  %v3124_v59 = vshrl.u32 %v15310_v10, %v3121_v48 }
 0x301   : > { %v2895_v58 = vsel %vm2893_vm8, %v2894_v15, %v7978_v38  ;;  %v3062_v63 = vadd.s32 %v3061_v19, %v3057_v6  ;;  %v3127_v45 = vshrl.u32 %v15311_v21, %v3121_v48  ;;  %v3130_v62 = vshrl.u32 %v15312_v11, %v3121_v48 }
 0x302   : > { %v2892_v20 = vsel %vm2890_vm2, %v7976_v31, %v2891_v13  ;;  %v2978_v18 = vand.u32 2147483647, %v2977_v60  ;;  %v3133_v61 = vshrl.u32 %v15313_v53, %v3121_v48  ;;  %v2985_v23 = vsel %vm2900_vm6, %v2984_v0, %v11389_v1  ;;  %v15373_v60 = vld [vmem:[#allocation24_spill] sm:$0xff] }
 0x303   : > { %v2896_v24 = vsel %vm2889_vm4, %v2892_v20, %v2895_v58  ;;  %v3063_v44 = vadd.s32 536870912, %v3062_v63  ;;  %v3125_v28 = vor.u32 %v3124_v59, %v3123_v3  ;;  %v3128_v32 = vor.u32 %v3127_v45, %v3126_v8 }
 0x304   : > { %v2897_v55 = vsel %vm2886_vm7, nan, %v2896_v24  ;;  %v2981_v26 = vmul.f32 %v2980_v54, %v2978_v18  ;;  %v3134_v49 = vor.u32 %v3133_v61, %v3132_v50  ;;  %v3135_v12 = vshll.u32 %v15313_v53, %v3120_v9 }
 0x305   : > { %v3064_v51 = vshrl.u32 %v3063_v44, 30  ;;  %v3136_v29 = vshrl.u32 %v15314_v35, %v3121_v48  ;;  %vm3138_vm10 = vcmp.lt.s32.totalorder %v11455_v47, 1  ;;  %7184 = vst [vmem:[%s9727_s11 + $0xb0] sm:$0xff] %v2897_v55  ;;  %v3131_v7 = vor.u32 %v3130_v62, %v3129_v30 }
 0x306   : > { %v2982_v37 = vxor.u32 2147483648, %v2981_v26  ;;  %vm3141_vm11 = vcmp.lt.s32.totalorder %v11455_v47, 4  ;;  %v11490_v1 = vshll.u32 %v3114_v2, 8  ;;  %v2987_v39 = vsel %vm11459_vm9, 0, %v2985_v23 }
 0x307   : > { %v3065_v16 = vshll.u32 %v3064_v51, 30  ;;  %vm3139_vm13 = vcmp.lt.s32.totalorder %v11455_v47, 2  ;;  %vm3140_vm15 = vcmp.lt.s32.totalorder %v11455_v47, 3  ;;  %v3137_v33 = vor.u32 %v3136_v29, %v3135_v12 }
 0x308   : > { %v2983_v36 = vsel %vm2900_vm6, %v2982_v37, %v2981_v26  ;;  %v3146_v4 = vsel %vm3138_vm10, %v3125_v28, %v3128_v32  ;;  %v3147_v14 = vsel %vm3141_vm11, %v3134_v49, 920167782  ;;  %v3122_v17 = vshrl.u32 %v15318_v46, %v3121_v48 }
 0x309   : > { %v2986_v9 = vsel %vm11459_vm9, %v15364_v42, %v2983_v36  ;;  %v11505_v34 = vsub.s32 %v3062_v63, %v3065_v16  ;;  %v2991_v0 = vadd.s32 3, %v2987_v39  ;;  %v3143_v2 = vsel %vm3141_vm11, %v3131_v7, 2102212464 }
 0x30a   : > { %7979 = vcosq.f32 %v2986_v9  ;;  %v3148_v6 = vsel %vm3140_vm15, %v3131_v7, %v3147_v14  ;;  %v3088_v31 = vsub.s32 4, %v3064_v51  ;;  %v3150_v40 = vsel %vm3138_vm10, %v3128_v32, %v3131_v7 }
 0x30b   : > { %7981 = vsinq.f32 %v2986_v9  ;;  %v3068_v5 = vsub.s32 0, %v11505_v34  ;;  %v3149_v25 = vsel %vm3139_vm13, %v3146_v4, %v3148_v6  ;;  %v3151_v48 = vsel %vm3141_vm11, %v3137_v33, 1326507024  ;;  %v15376_v4 = vld [vmem:[#allocation25_spill] sm:$0xff] }
 0x30c   : > { %v11520_v27 = vmul.u32.u64.low %v11490_v1, %v3149_v25  ;;  %v11521_v3 = vmul.u32.u64.high %v11490_v1, %v3149_v25, %v11520_v27  ;;  %v3142_v38 = vsel %vm3138_vm10, %v3122_v17, %v3125_v28  ;;  %v3144_v15 = vsel %vm3140_vm15, %v3128_v32, %v3143_v2 }
 0x30d   : > { %v7408_v8 = vmin.u32 %v3068_v5, %v11505_v34  ;;  %v3152_v30 = vsel %vm3140_vm15, %v3134_v49, %v3151_v48  ;;  %v2992_v50 = vand.u32 3, %v2991_v0  ;;  %v3213_v54 = vand.u32 2139095040, %v15373_v60 }
 0x30e   : > { %v3153_v13 = vsel %vm3139_vm13, %v3150_v40, %v3152_v30  ;;  %vm2990_vm14 = vweird.f32 %v15364_v42  ;;  %vm3004_vm0 = vcmp.lt.s32.totalorder %v15367_v22, 0  ;;  %v3145_v58 = vsel %vm3139_vm13, %v3142_v38, %v3144_v15 }
 0x30f   : > { %v3070_v19 = vclz %v7408_v8  ;;  %v11539_v63 = vmul.u32.u64.low %v11490_v1, %v3153_v13  ;;  %v11540_v59 = vmul.u32.u64.high %v11490_v1, %v3153_v13, %v11539_v63  ;;  %v3214_v45 = vshrl.u32 %v3213_v54, 23 }
 0x310   : > { %vm11544_vm1 = vcmp.le.f32.partialorder %v3002_v56, 0.7853982  ;;  %v3089_v62 = vsel %vm3004_vm0, %v3088_v31, %v3064_v51  ;;  %v3210_v61 = vand.u32 2147483647, %v15373_v60  ;;  %vm2993_vm2 = vcmp.lt.s32.totalorder %v2992_v50, 2 }
 0x311   : > { %v7409_v18 = vadd.s32 4294967294, %v3070_v19  ;;  %vm2994_vm3 = vcmp.eq.s32.totalorder %v2992_v50, 0  ;;  %v3164_v47 = vadd.s32 1, %v11521_v3  ;;  %v7415_v24 = vadd.s32 4294967169, %v3214_v45 }
 0x312   : > { %vm2997_vm4 = vcmp.eq.s32.totalorder %v2992_v50, 2  ;;  %v3058_v23 = vadd.s32 %v11440_v43, %v11449_v41  ;;  %v3161_v56 = vmul.u32 %v11490_v1, %v3145_v58  ;;  %v3091_v55 = vsel %vm11544_vm1, 0, %v3089_v62 }
 0x313   : > { %vm7410_vm5 = vcmp.lt.s32.totalorder %v7409_v18, 0  ;;  %vm3163_vm7 = vc.u32 %v11540_v59, %v11520_v27  ;;  %v3220_v26 = vadd.s32 1, %v7415_v24  ;;  %v3217_v41 = vand.u32 8388607, %v3210_v61 }
 0x314   : > { %v7980_v44 = vpop.eup %7979  ;;  %v3073_v28 = vsel %vm7410_vm5, 0, %v7409_v18  ;;  %v3165_v43 = vsel %vm3163_vm7, %v3164_v47, %v11521_v3  ;;  %v3317_v14 = vand.u32 2139095040, %v15376_v4  ;;  %v3095_v6 = vadd.s32 3, %v3091_v55 }
 0x315   : > { %v7982_v32 = vpop.eup %7981  ;;  %v2998_v49 = vxor.u32 2147483648, %v7980_v44  ;;  %v3074_v51 = vsub.s32 32, %v3073_v28  ;;  %v3075_v12 = vshll.u32 %v11505_v34, %v3073_v28  ;;  %v3078_v29 = vsub.s32 4294967266, %v3073_v28 }
 0x316   : > { %v2995_v37 = vxor.u32 2147483648, %v7982_v32  ;;  %vm3221_vm6 = vcmp.gt.s32.totalorder %v3220_v26, 0  ;;  %v3166_v16 = vadd.s32 %v3165_v43, %v3161_v56  ;;  %v3218_v48 = vor.u32 8388608, %v3217_v41 }
 0x317   : > { %v2999_v7 = vsel %vm2997_vm4, %v2998_v49, %v7982_v32  ;;  %v3076_v1 = vshrl.u32 %v3058_v23, %v3074_v51  ;;  %v3079_v39 = vadd.s32 127, %v3078_v29  ;;  %v3222_v33 = vsel %vm3221_vm6, %v3220_v26, 0 }
 0x318   : > { %v2996_v36 = vsel %vm2994_vm3, %v7980_v44, %v2995_v37  ;;  %v3167_v0 = vadd.s32 536870912, %v3166_v16  ;;  %v3224_v5 = vand.u32 31, %v3222_v33  ;;  %v3223_v3 = vshrl.u32 %v3222_v33, 5 }
 0x319   : > { %v3000_v9 = vsel %vm2993_vm2, %v2996_v36, %v2999_v7  ;;  %v3077_v34 = vor.u32 %v3076_v1, %v3075_v12  ;;  %v3080_v17 = vshll.u32 %v3079_v39, 23  ;;  %v3314_v38 = vand.u32 2147483647, %v15376_v4 }
 0x31a   : > { %v3001_v2 = vsel %vm2990_vm14, nan, %v3000_v9  ;;  %v11569_v40 = vshrl.u32 %v3167_v0, 30  ;;  %v3225_v8 = vsub.s32 32, %v3224_v5  ;;  %v3318_v15 = vshrl.u32 %v3317_v14, 23 }
 0x31b   : > { %v3081_v31 = vor.u32 4788187, %v3080_v17  ;;  %v3084_v25 = vcvt.s32.f32 %v3077_v34  ;;  %7185 = vst [vmem:[%s9727_s11 + $0xb8] sm:$0xff] %v3001_v2  ;;  %v3227_v13 = vshll.u32 %v15318_v46, %v3224_v5  ;;  %v3230_v42 = vshll.u32 %v15310_v10, %v3224_v5 }
 0x31c   : > { %v3169_v50 = vshll.u32 %v11569_v40, 30  ;;  %v3228_v54 = vshrl.u32 %v15310_v10, %v3225_v8  ;;  %v3231_v19 = vshrl.u32 %v15311_v21, %v3225_v8  ;;  %v3233_v58 = vshll.u32 %v15311_v21, %v3224_v5 }
 0x31d   : > { %v3082_v30 = vand.u32 2147483647, %v3081_v31  ;;  %v3234_v63 = vshrl.u32 %v15312_v11, %v3225_v8  ;;  %v3236_v62 = vshll.u32 %v15312_v11, %v3224_v5  ;;  %v3237_v47 = vshrl.u32 %v15313_v53, %v3225_v8 }
 0x31e   : > { %v11580_v18 = vsub.s32 %v3166_v16, %v3169_v50  ;;  %v11584_v24 = vand.u32 3, %v3095_v6  ;;  %v11586_v23 = vshll.u32 %v3218_v48, 8  ;;  %v7419_v56 = vadd.s32 4294967169, %v3318_v15 }
 0x31f   : > { %v3085_v45 = vmul.f32 %v3084_v25, %v3082_v30  ;;  %v11590_v44 = vand.u32 8388607, %v3314_v38  ;;  %v3226_v26 = vshrl.u32 %v15318_v46, %v3225_v8  ;;  %v3229_v32 = vor.u32 %v3228_v54, %v3227_v13 }
 0x320   : > { %v3172_v55 = vsub.s32 0, %v11580_v18  ;;  %v3232_v49 = vor.u32 %v3231_v19, %v3230_v42  ;;  %v3235_v51 = vor.u32 %v3234_v63, %v3233_v58  ;;  %v3239_v12 = vshll.u32 %v15313_v53, %v3224_v5 }
 0x321   : > { %v3086_v28 = vxor.u32 2147483648, %v3085_v45  ;;  %v3240_v29 = vshrl.u32 %v15314_v35, %v3225_v8  ;;  %v3238_v41 = vor.u32 %v3237_v47, %v3236_v62  ;;  %vm3242_vm8 = vcmp.lt.s32.totalorder %v3223_v3, 1 }
 0x322   : > { %v7412_v43 = vmin.u32 %v3172_v55, %v11580_v18  ;;  %vm3245_vm9 = vcmp.lt.s32.totalorder %v3223_v3, 4  ;;  %v3324_v39 = vadd.s32 1, %v7419_v56  ;;  %vm3243_vm12 = vcmp.lt.s32.totalorder %v3223_v3, 2 }
 0x323   : > { %v3087_v37 = vsel %vm3004_vm0, %v3086_v28, %v3085_v45  ;;  %v3241_v1 = vor.u32 %v3240_v29, %v3239_v12  ;;  %vm3244_vm10 = vcmp.lt.s32.totalorder %v3223_v3, 3  ;;  %v3246_v36 = vsel %vm3242_vm8, %v3226_v26, %v3229_v32 }
 0x324   : > { %v3090_v7 = vsel %vm11544_vm1, %v15367_v22, %v3087_v37  ;;  %v3174_v16 = vclz %v7412_v43  ;;  %v3247_v33 = vsel %vm3245_vm9, %v3235_v51, 2102212464  ;;  %v3250_v14 = vsel %vm3242_vm8, %v3229_v32, %v3232_v49 }
 0x325   : > { %7983 = vcosq.f32 %v3090_v7  ;;  %v3248_v34 = vsel %vm3244_vm10, %v3232_v49, %v3247_v33  ;;  %v3251_v20 = vsel %vm3245_vm9, %v3238_v41, 920167782  ;;  %v3254_v17 = vsel %vm3242_vm8, %v3232_v49, %v3235_v51 }
 0x326   : > { %7985 = vsinq.f32 %v3090_v7  ;;  %v7413_v9 = vadd.s32 4294967294, %v3174_v16  ;;  %vm3098_vm11 = vcmp.eq.s32.totalorder %v11584_v24, 0  ;;  %v3162_v0 = vadd.s32 %v11520_v27, %v11540_v59 }
 0x327   : > { %v3252_v2 = vsel %vm3244_vm10, %v3235_v51, %v3251_v20  ;;  %v3255_v6 = vsel %vm3245_vm9, %v3241_v1, 1326507024  ;;  %vm3325_vm13 = vcmp.gt.s32.totalorder %v3324_v39, 0  ;;  %vm3097_vm15 = vcmp.lt.s32.totalorder %v11584_v24, 2 }
 0x328   : > { %vm7414_vm14 = vcmp.lt.s32.totalorder %v7413_v9, 0  ;;  %v3249_v5 = vsel %vm3243_vm12, %v3246_v36, %v3248_v34  ;;  %v3253_v31 = vsel %vm3243_vm12, %v3250_v14, %v3252_v2  ;;  %v3256_v25 = vsel %vm3244_vm10, %v3238_v41, %v3255_v6 }
 0x329   : > { %vm3094_vm0 = vweird.f32 %v15367_v22  ;;  %v3177_v48 = vsel %vm7414_vm14, 0, %v7413_v9  ;;  %v3257_v8 = vsel %vm3243_vm12, %v3254_v17, %v3256_v25  ;;  %vm3108_vm1 = vcmp.lt.s32.totalorder %v15370_v52, 0 }
 0x32a   : > { %v11620_v27 = vmul.u32.u64.low %v11586_v23, %v3253_v31  ;;  %v11621_v59 = vmul.u32.u64.high %v11586_v23, %v3253_v31, %v11620_v27  ;;  %v3178_v15 = vsub.s32 32, %v3177_v48  ;;  %v3179_v30 = vshll.u32 %v11580_v18, %v3177_v48 }
 0x32b   : > { %v3182_v50 = vsub.s32 4294967266, %v3177_v48  ;;  %v3326_v13 = vsel %vm3325_vm13, %v3324_v39, 0  ;;  %vm3101_vm2 = vcmp.eq.s32.totalorder %v11584_v24, 2  ;;  %v3192_v63 = vsub.s32 4, %v11569_v40 }
 0x32c   : > { %v11628_v42 = vmul.u32.u64.low %v11586_v23, %v3257_v8  ;;  %v11629_v54 = vmul.u32.u64.high %v11586_v23, %v3257_v8, %v11628_v42  ;;  %v3328_v3 = vand.u32 31, %v3326_v13  ;;  %v3180_v19 = vshrl.u32 %v3162_v0, %v3178_v15 }
 0x32d   : > { %v3183_v58 = vadd.s32 127, %v3182_v50  ;;  %v3322_v45 = vor.u32 8388608, %v11590_v44  ;;  %v3265_v62 = vmul.u32 %v11586_v23, %v3249_v5  ;;  %v3268_v47 = vadd.s32 1, %v11621_v59 }
 0x32e   : > { %v11635_v18 = vshrl.u32 %v3326_v13, 5  ;;  %v3329_v56 = vsub.s32 32, %v3328_v3  ;;  %vm11639_vm3 = vcmp.le.f32.partialorder %v3106_v57, 0.7853982  ;;  %v3181_v26 = vor.u32 %v3180_v19, %v3179_v30 }
 0x32f   : > { %v7984_v28 = vpop.eup %7983  ;;  %v3184_v32 = vshll.u32 %v3183_v58, 23  ;;  %v3331_v49 = vshll.u32 %v15318_v46, %v3328_v3  ;;  %v3334_v44 = vshll.u32 %v15310_v10, %v3328_v3  ;;  %vm3267_vm4 = vc.u32 %v11629_v54, %v11620_v27 }
 0x330   : > { %v7986_v51 = vpop.eup %7985  ;;  %v3102_v23 = vxor.u32 2147483648, %v7984_v28  ;;  %v3337_v12 = vshll.u32 %v15311_v21, %v3328_v3  ;;  %v3340_v29 = vshll.u32 %v15312_v11, %v3328_v3  ;;  %v3188_v43 = vcvt.s32.f32 %v3181_v26 }
 0x331   : > { %v3099_v37 = vxor.u32 2147483648, %v7986_v51  ;;  %v3185_v57 = vor.u32 4788187, %v3184_v32  ;;  %v3269_v41 = vsel %vm3267_vm4, %v3268_v47, %v11621_v59  ;;  %v3332_v39 = vshrl.u32 %v15310_v10, %v3329_v56 }
 0x332   : > { %v3103_v7 = vsel %vm3101_vm2, %v3102_v23, %v7986_v51  ;;  %v3270_v1 = vadd.s32 %v3269_v41, %v3265_v62  ;;  %v3335_v16 = vshrl.u32 %v15311_v21, %v3329_v56  ;;  %v3338_v14 = vshrl.u32 %v15312_v11, %v3329_v56 }
 0x333   : > { %v3100_v36 = vsel %vm3098_vm11, %v7984_v28, %v3099_v37  ;;  %v3186_v33 = vand.u32 2147483647, %v3185_v57  ;;  %v3341_v9 = vshrl.u32 %v15313_v53, %v3329_v56  ;;  %v3193_v20 = vsel %vm3108_vm1, %v3192_v63, %v11569_v40  ;;  %v15379_v57 = vld [vmem:[#allocation26_spill] sm:$0xff] }
 0x334   : > { %v3104_v34 = vsel %vm3097_vm15, %v3100_v36, %v3103_v7  ;;  %v3271_v17 = vadd.s32 536870912, %v3270_v1  ;;  %v3333_v0 = vor.u32 %v3332_v39, %v3331_v49  ;;  %v3336_v5 = vor.u32 %v3335_v16, %v3334_v44 }
 0x335   : > { %v3105_v2 = vsel %vm3094_vm0, nan, %v3104_v34  ;;  %v3189_v6 = vmul.f32 %v3188_v43, %v3186_v33  ;;  %v3342_v31 = vor.u32 %v3341_v9, %v3340_v29  ;;  %v3343_v48 = vshll.u32 %v15313_v53, %v3328_v3 }
 0x336   : > { %v3272_v25 = vshrl.u32 %v3271_v17, 30  ;;  %v3344_v8 = vshrl.u32 %v15314_v35, %v3329_v56  ;;  %vm3346_vm5 = vcmp.lt.s32.totalorder %v11635_v18, 1  ;;  %7186 = vst [vmem:[%s9727_s11 + $0xc0] sm:$0xff] %v3105_v2  ;;  %v3339_v59 = vor.u32 %v3338_v14, %v3337_v12 }
 0x337   : > { %v3190_v24 = vxor.u32 2147483648, %v3189_v6  ;;  %vm3349_vm7 = vcmp.lt.s32.totalorder %v11635_v18, 4  ;;  %v11670_v40 = vshll.u32 %v3322_v45, 8  ;;  %v3195_v22 = vsel %vm11639_vm3, 0, %v3193_v20 }
 0x338   : > { %v3273_v15 = vshll.u32 %v3272_v25, 30  ;;  %vm3347_vm6 = vcmp.lt.s32.totalorder %v11635_v18, 2  ;;  %vm3348_vm8 = vcmp.lt.s32.totalorder %v11635_v18, 3  ;;  %v3345_v50 = vor.u32 %v3344_v8, %v3343_v48 }
 0x339   : > { %v3191_v30 = vsel %vm3108_vm1, %v3190_v24, %v3189_v6  ;;  %v3354_v13 = vsel %vm3346_vm5, %v3333_v0, %v3336_v5  ;;  %v3355_v42 = vsel %vm3349_vm7, %v3342_v31, 920167782  ;;  %v3330_v58 = vshrl.u32 %v15318_v46, %v3329_v56 }
 0x33a   : > { %v3194_v3 = vsel %vm11639_vm3, %v15370_v52, %v3191_v30  ;;  %v11685_v19 = vsub.s32 %v3270_v1, %v3273_v15  ;;  %v3199_v63 = vadd.s32 3, %v3195_v22  ;;  %v3351_v45 = vsel %vm3349_vm7, %v3339_v59, 2102212464 }
 0x33b   : > { %7987 = vcosq.f32 %v3194_v3  ;;  %v3356_v62 = vsel %vm3348_vm8, %v3339_v59, %v3355_v42  ;;  %v3296_v28 = vsub.s32 4, %v3272_v25  ;;  %v3358_v26 = vsel %vm3346_vm5, %v3336_v5, %v3339_v59 }
 0x33c   : > { %7989 = vsinq.f32 %v3194_v3  ;;  %v3276_v47 = vsub.s32 0, %v11685_v19  ;;  %v3357_v55 = vsel %vm3347_vm6, %v3354_v13, %v3356_v62  ;;  %v3359_v56 = vsel %vm3349_vm7, %v3345_v50, 1326507024  ;;  %v15382_v13 = vld [vmem:[#allocation10_spill] sm:$0xff] }
 0x33d   : > { %v11700_v32 = vmul.u32.u64.low %v11670_v40, %v3357_v55  ;;  %v11701_v49 = vmul.u32.u64.high %v11670_v40, %v3357_v55, %v11700_v32  ;;  %v3350_v51 = vsel %vm3346_vm5, %v3330_v58, %v3333_v0  ;;  %v3352_v23 = vsel %vm3348_vm8, %v3336_v5, %v3351_v45 }
 0x33e   : > { %v7416_v44 = vmin.u32 %v3276_v47, %v11685_v19  ;;  %v3360_v12 = vsel %vm3348_vm8, %v3342_v31, %v3359_v56  ;;  %v3200_v29 = vand.u32 3, %v3199_v63  ;;  %v3421_v43 = vand.u32 2139095040, %v15379_v57 }
 0x33f   : > { %v3361_v37 = vsel %vm3347_vm6, %v3358_v26, %v3360_v12  ;;  %vm3198_vm9 = vweird.f32 %v15370_v52  ;;  %vm3212_vm12 = vcmp.lt.s32.totalorder %v15373_v60, 0  ;;  %v3353_v7 = vsel %vm3347_vm6, %v3350_v51, %v3352_v23 }
 0x340   : > { %v3278_v41 = vclz %v7416_v44  ;;  %v11719_v1 = vmul.u32.u64.low %v11670_v40, %v3361_v37  ;;  %v11720_v39 = vmul.u32.u64.high %v11670_v40, %v3361_v37, %v11719_v1  ;;  %v3422_v16 = vshrl.u32 %v3421_v43, 23 }
 0x341   : > { %vm11724_vm10 = vcmp.le.f32.partialorder %v3210_v61, 0.7853982  ;;  %v3297_v14 = vsel %vm3212_vm12, %v3296_v28, %v3272_v25  ;;  %v3418_v9 = vand.u32 2147483647, %v15379_v57  ;;  %vm3201_vm11 = vcmp.lt.s32.totalorder %v3200_v29, 2 }
 0x342   : > { %v7417_v33 = vadd.s32 4294967294, %v3278_v41  ;;  %vm3202_vm13 = vcmp.eq.s32.totalorder %v3200_v29, 0  ;;  %v3372_v18 = vadd.s32 1, %v11701_v49  ;;  %v7423_v34 = vadd.s32 4294967169, %v3422_v16 }
 0x343   : > { %vm3205_vm15 = vcmp.eq.s32.totalorder %v3200_v29, 2  ;;  %v3266_v20 = vadd.s32 %v11620_v27, %v11629_v54  ;;  %v3369_v61 = vmul.u32 %v11670_v40, %v3353_v7  ;;  %v3299_v2 = vsel %vm11724_vm10, 0, %v3297_v14 }
 0x344   : > { %vm7418_vm14 = vcmp.lt.s32.totalorder %v7417_v33, 0  ;;  %vm3371_vm0 = vc.u32 %v11720_v39, %v11700_v32  ;;  %v3428_v6 = vadd.s32 1, %v7423_v34  ;;  %v3425_v54 = vand.u32 8388607, %v3418_v9 }
 0x345   : > { %v7988_v17 = vpop.eup %7987  ;;  %v3281_v0 = vsel %vm7418_vm14, 0, %v7417_v33  ;;  %v3373_v27 = vsel %vm3371_vm0, %v3372_v18, %v11701_v49  ;;  %v3525_v42 = vand.u32 2139095040, %v15382_v13  ;;  %v3303_v62 = vadd.s32 3, %v3299_v2 }
 0x346   : > { %v7990_v5 = vpop.eup %7989  ;;  %v3206_v31 = vxor.u32 2147483648, %v7988_v17  ;;  %v3282_v25 = vsub.s32 32, %v3281_v0  ;;  %v3283_v48 = vshll.u32 %v11685_v19, %v3281_v0  ;;  %v3286_v8 = vsub.s32 4294967266, %v3281_v0 }
 0x347   : > { %v3203_v24 = vxor.u32 2147483648, %v7990_v5  ;;  %vm3429_vm1 = vcmp.gt.s32.totalorder %v3428_v6, 0  ;;  %v3374_v15 = vadd.s32 %v3373_v27, %v3369_v61  ;;  %v3426_v56 = vor.u32 8388608, %v3425_v54 }
 0x348   : > { %v3207_v59 = vsel %vm3205_vm15, %v3206_v31, %v7990_v5  ;;  %v3284_v40 = vshrl.u32 %v3266_v20, %v3282_v25  ;;  %v3287_v22 = vadd.s32 127, %v3286_v8  ;;  %v3430_v50 = vsel %vm3429_vm1, %v3428_v6, 0 }
 0x349   : > { %v3204_v30 = vsel %vm3202_vm13, %v7988_v17, %v3203_v24  ;;  %v3375_v63 = vadd.s32 536870912, %v3374_v15  ;;  %v3432_v47 = vand.u32 31, %v3430_v50  ;;  %v3431_v49 = vshrl.u32 %v3430_v50, 5 }
 0x34a   : > { %v3208_v3 = vsel %vm3201_vm11, %v3204_v30, %v3207_v59  ;;  %v3285_v19 = vor.u32 %v3284_v40, %v3283_v48  ;;  %v3288_v58 = vshll.u32 %v3287_v22, 23  ;;  %v3522_v51 = vand.u32 2147483647, %v15382_v13 }
 0x34b   : > { %v3209_v45 = vsel %vm3198_vm9, nan, %v3208_v3  ;;  %v11749_v26 = vshrl.u32 %v3375_v63, 30  ;;  %v3433_v44 = vsub.s32 32, %v3432_v47  ;;  %v3526_v23 = vshrl.u32 %v3525_v42, 23 }
 0x34c   : > { %v3289_v28 = vor.u32 4788187, %v3288_v58  ;;  %v3292_v55 = vcvt.s32.f32 %v3285_v19  ;;  %7187 = vst [vmem:[%s9727_s11 + $0xc8] sm:$0xff] %v3209_v45  ;;  %v3435_v37 = vshll.u32 %v15318_v46, %v3432_v47  ;;  %v3438_v52 = vshll.u32 %v15310_v10, %v3432_v47 }
 0x34d   : > { %v3377_v29 = vshll.u32 %v11749_v26, 30  ;;  %v3436_v43 = vshrl.u32 %v15310_v10, %v3433_v44  ;;  %v3439_v41 = vshrl.u32 %v15311_v21, %v3433_v44  ;;  %v3441_v7 = vshll.u32 %v15311_v21, %v3432_v47 }
 0x34e   : > { %v3290_v12 = vand.u32 2147483647, %v3289_v28  ;;  %v3442_v1 = vshrl.u32 %v15312_v11, %v3433_v44  ;;  %v3444_v14 = vshll.u32 %v15312_v11, %v3432_v47  ;;  %v3445_v18 = vshrl.u32 %v15313_v53, %v3433_v44 }
 0x34f   : > { %v11760_v33 = vsub.s32 %v3374_v15, %v3377_v29  ;;  %v11764_v34 = vand.u32 3, %v3303_v62  ;;  %v11766_v20 = vshll.u32 %v3426_v56, 8  ;;  %v7427_v61 = vadd.s32 4294967169, %v3526_v23 }
 0x350   : > { %v3293_v16 = vmul.f32 %v3292_v55, %v3290_v12  ;;  %v11770_v17 = vand.u32 8388607, %v3522_v51  ;;  %v3434_v6 = vshrl.u32 %v15318_v46, %v3433_v44  ;;  %v3437_v5 = vor.u32 %v3436_v43, %v3435_v37 }
 0x351   : > { %v3380_v2 = vsub.s32 0, %v11760_v33  ;;  %v3440_v31 = vor.u32 %v3439_v41, %v3438_v52  ;;  %v3443_v25 = vor.u32 %v3442_v1, %v3441_v7  ;;  %v3447_v48 = vshll.u32 %v15313_v53, %v3432_v47 }
 0x352   : > { %v3294_v0 = vxor.u32 2147483648, %v3293_v16  ;;  %v3448_v8 = vshrl.u32 %v15314_v35, %v3433_v44  ;;  %v3446_v54 = vor.u32 %v3445_v18, %v3444_v14  ;;  %vm3450_vm2 = vcmp.lt.s32.totalorder %v3431_v49, 1 }
 0x353   : > { %v7420_v27 = vmin.u32 %v3380_v2, %v11760_v33  ;;  %vm3453_vm3 = vcmp.lt.s32.totalorder %v3431_v49, 4  ;;  %v3532_v22 = vadd.s32 1, %v7427_v61  ;;  %vm3451_vm4 = vcmp.lt.s32.totalorder %v3431_v49, 2 }
 0x354   : > { %v3295_v24 = vsel %vm3212_vm12, %v3294_v0, %v3293_v16  ;;  %v3449_v40 = vor.u32 %v3448_v8, %v3447_v48  ;;  %vm3452_vm5 = vcmp.lt.s32.totalorder %v3431_v49, 3  ;;  %v3454_v30 = vsel %vm3450_vm2, %v3434_v6, %v3437_v5 }
 0x355   : > { %v3298_v59 = vsel %vm11724_vm10, %v15373_v60, %v3295_v24  ;;  %v3382_v15 = vclz %v7420_v27  ;;  %v3455_v50 = vsel %vm3453_vm3, %v3443_v25, 2102212464  ;;  %v3458_v42 = vsel %vm3450_vm2, %v3437_v5, %v3440_v31 }
 0x356   : > { %7991 = vcosq.f32 %v3298_v59  ;;  %v3456_v19 = vsel %vm3452_vm5, %v3440_v31, %v3455_v50  ;;  %v3459_v36 = vsel %vm3453_vm3, %v3446_v54, 920167782  ;;  %v3462_v58 = vsel %vm3450_vm2, %v3440_v31, %v3443_v25 }
 0x357   : > { %7993 = vsinq.f32 %v3298_v59  ;;  %v7421_v3 = vadd.s32 4294967294, %v3382_v15  ;;  %vm3306_vm7 = vcmp.eq.s32.totalorder %v11764_v34, 0  ;;  %v3370_v63 = vadd.s32 %v11700_v32, %v11720_v39 }
 0x358   : > { %v3460_v45 = vsel %vm3452_vm5, %v3443_v25, %v3459_v36  ;;  %v3463_v62 = vsel %vm3453_vm3, %v3449_v40, 1326507024  ;;  %vm3533_vm6 = vcmp.gt.s32.totalorder %v3532_v22, 0  ;;  %vm3305_vm8 = vcmp.lt.s32.totalorder %v11764_v34, 2 }
 0x359   : > { %vm7422_vm9 = vcmp.lt.s32.totalorder %v7421_v3, 0  ;;  %v3457_v47 = vsel %vm3451_vm4, %v3454_v30, %v3456_v19  ;;  %v3461_v28 = vsel %vm3451_vm4, %v3458_v42, %v3460_v45  ;;  %v3464_v55 = vsel %vm3452_vm5, %v3446_v54, %v3463_v62 }
 0x35a   : > { %vm3302_vm12 = vweird.f32 %v15373_v60  ;;  %v3385_v56 = vsel %vm7422_vm9, 0, %v7421_v3  ;;  %v3465_v44 = vsel %vm3451_vm4, %v3462_v58, %v3464_v55  ;;  %vm3316_vm10 = vcmp.lt.s32.totalorder %v15376_v4, 0 }
 0x35b   : > { %v11800_v32 = vmul.u32.u64.low %v11766_v20, %v3461_v28  ;;  %v11801_v39 = vmul.u32.u64.high %v11766_v20, %v3461_v28, %v11800_v32  ;;  %v3386_v23 = vsub.s32 32, %v3385_v56  ;;  %v3387_v12 = vshll.u32 %v11760_v33, %v3385_v56 }
 0x35c   : > { %v3390_v29 = vsub.s32 4294967266, %v3385_v56  ;;  %v3534_v37 = vsel %vm3533_vm6, %v3532_v22, 0  ;;  %vm3309_vm11 = vcmp.eq.s32.totalorder %v11764_v34, 2  ;;  %v3400_v1 = vsub.s32 4, %v11749_v26 }
 0x35d   : > { %v11808_v52 = vmul.u32.u64.low %v11766_v20, %v3465_v44  ;;  %v11809_v43 = vmul.u32.u64.high %v11766_v20, %v3465_v44, %v11808_v52  ;;  %v3536_v49 = vand.u32 31, %v3534_v37  ;;  %v3388_v41 = vshrl.u32 %v3370_v63, %v3386_v23 }
 0x35e   : > { %v3391_v7 = vadd.s32 127, %v3390_v29  ;;  %v3530_v16 = vor.u32 8388608, %v11770_v17  ;;  %v3473_v14 = vmul.u32 %v11766_v20, %v3457_v47  ;;  %v3476_v18 = vadd.s32 1, %v11801_v39 }
 0x35f   : > { %v11815_v33 = vshrl.u32 %v3534_v37, 5  ;;  %v3537_v61 = vsub.s32 32, %v3536_v49  ;;  %vm11819_vm13 = vcmp.le.f32.partialorder %v3314_v38, 0.7853982  ;;  %v3389_v6 = vor.u32 %v3388_v41, %v3387_v12 }
 0x360   : > { %v7992_v0 = vpop.eup %7991  ;;  %v3392_v5 = vshll.u32 %v3391_v7, 23  ;;  %v3539_v31 = vshll.u32 %v15318_v46, %v3536_v49  ;;  %v3542_v17 = vshll.u32 %v15310_v10, %v3536_v49  ;;  %vm3475_vm15 = vc.u32 %v11809_v43, %v11800_v32 }
 0x361   : > { %v7994_v25 = vpop.eup %7993  ;;  %v3310_v20 = vxor.u32 2147483648, %v7992_v0  ;;  %v3545_v48 = vshll.u32 %v15311_v21, %v3536_v49  ;;  %v3548_v8 = vshll.u32 %v15312_v11, %v3536_v49  ;;  %v3396_v27 = vcvt.s32.f32 %v3389_v6 }
 0x362   : > { %v3307_v24 = vxor.u32 2147483648, %v7994_v25  ;;  %v3393_v38 = vor.u32 4788187, %v3392_v5  ;;  %v3477_v54 = vsel %vm3475_vm15, %v3476_v18, %v11801_v39  ;;  %v3540_v22 = vshrl.u32 %v15310_v10, %v3537_v61 }
 0x363   : > { %v3311_v59 = vsel %vm3309_vm11, %v3310_v20, %v7994_v25  ;;  %v3478_v40 = vadd.s32 %v3477_v54, %v3473_v14  ;;  %v3543_v15 = vshrl.u32 %v15311_v21, %v3537_v61  ;;  %v3546_v42 = vshrl.u32 %v15312_v11, %v3537_v61 }
 0x364   : > { %v3308_v30 = vsel %vm3306_vm7, %v7992_v0, %v3307_v24  ;;  %v3394_v50 = vand.u32 2147483647, %v3393_v38  ;;  %v3549_v3 = vshrl.u32 %v15313_v53, %v3537_v61  ;;  %v3401_v36 = vsel %vm3316_vm10, %v3400_v1, %v11749_v26  ;;  %v15385_v38 = vld [vmem:[#allocation11_spill] sm:$0xff] }
 0x365   : > { %v3312_v19 = vsel %vm3305_vm8, %v3308_v30, %v3311_v59  ;;  %v3479_v58 = vadd.s32 536870912, %v3478_v40  ;;  %v3541_v63 = vor.u32 %v3540_v22, %v3539_v31  ;;  %v3544_v47 = vor.u32 %v3543_v15, %v3542_v17 }
 0x366   : > { %v3313_v45 = vsel %vm3302_vm12, nan, %v3312_v19  ;;  %v3397_v62 = vmul.f32 %v3396_v27, %v3394_v50  ;;  %v3550_v28 = vor.u32 %v3549_v3, %v3548_v8  ;;  %v3551_v56 = vshll.u32 %v15313_v53, %v3536_v49 }
 0x367   : > { %v3480_v55 = vshrl.u32 %v3479_v58, 30  ;;  %v3552_v44 = vshrl.u32 %v15314_v35, %v3537_v61  ;;  %vm3554_vm14 = vcmp.lt.s32.totalorder %v11815_v33, 1  ;;  %7188 = vst [vmem:[%s9727_s11 + $0xd0] sm:$0xff] %v3313_v45  ;;  %v3547_v39 = vor.u32 %v3546_v42, %v3545_v48 }
 0x368   : > { %v3398_v34 = vxor.u32 2147483648, %v3397_v62  ;;  %vm3557_vm0 = vcmp.lt.s32.totalorder %v11815_v33, 4  ;;  %v11850_v26 = vshll.u32 %v3530_v16, 8  ;;  %v3403_v60 = vsel %vm11819_vm13, 0, %v3401_v36 }
 0x369   : > { %v3481_v23 = vshll.u32 %v3480_v55, 30  ;;  %vm3555_vm1 = vcmp.lt.s32.totalorder %v11815_v33, 2  ;;  %vm3556_vm2 = vcmp.lt.s32.totalorder %v11815_v33, 3  ;;  %v3553_v29 = vor.u32 %v3552_v44, %v3551_v56 }
 0x36a   : > { %v3399_v12 = vsel %vm3316_vm10, %v3398_v34, %v3397_v62  ;;  %v3562_v37 = vsel %vm3554_vm14, %v3541_v63, %v3544_v47  ;;  %v3563_v52 = vsel %vm3557_vm0, %v3550_v28, 920167782  ;;  %v3538_v7 = vshrl.u32 %v15318_v46, %v3537_v61 }
 0x36b   : > { %v3402_v49 = vsel %vm11819_vm13, %v15376_v4, %v3399_v12  ;;  %v11865_v41 = vsub.s32 %v3478_v40, %v3481_v23  ;;  %v3407_v1 = vadd.s32 3, %v3403_v60  ;;  %v3559_v16 = vsel %vm3557_vm0, %v3547_v39, 2102212464 }
 0x36c   : > { %7995 = vcosq.f32 %v3402_v49  ;;  %v3564_v14 = vsel %vm3556_vm2, %v3547_v39, %v3563_v52  ;;  %v3504_v0 = vsub.s32 4, %v3480_v55  ;;  %v3566_v6 = vsel %vm3554_vm14, %v3544_v47, %v3547_v39 }
 0x36d   : > { %7997 = vsinq.f32 %v3402_v49  ;;  %v3484_v18 = vsub.s32 0, %v11865_v41  ;;  %v3565_v2 = vsel %vm3555_vm1, %v3562_v37, %v3564_v14  ;;  %v3567_v61 = vsel %vm3557_vm0, %v3553_v29, 1326507024  ;;  %v15388_v37 = vld [vmem:[#allocation9_spill] sm:$0xff] }
 0x36e   : > { %v11880_v5 = vmul.u32.u64.low %v11850_v26, %v3565_v2  ;;  %v11881_v31 = vmul.u32.u64.high %v11850_v26, %v3565_v2, %v11880_v5  ;;  %v3558_v25 = vsel %vm3554_vm14, %v3538_v7, %v3541_v63  ;;  %v3560_v20 = vsel %vm3556_vm2, %v3544_v47, %v3559_v16 }
 0x36f   : > { %v7424_v17 = vmin.u32 %v3484_v18, %v11865_v41  ;;  %v3568_v48 = vsel %vm3556_vm2, %v3550_v28, %v3567_v61  ;;  %v3408_v8 = vand.u32 3, %v3407_v1  ;;  %v3629_v27 = vand.u32 2139095040, %v15385_v38 }
 0x370   : > { %v3569_v24 = vsel %vm3555_vm1, %v3566_v6, %v3568_v48  ;;  %vm3406_vm3 = vweird.f32 %v15376_v4  ;;  %vm3420_vm4 = vcmp.lt.s32.totalorder %v15379_v57, 0  ;;  %v3561_v59 = vsel %vm3555_vm1, %v3558_v25, %v3560_v20 }
 0x371   : > { %v3486_v54 = vclz %v7424_v17  ;;  %v11899_v40 = vmul.u32.u64.low %v11850_v26, %v3569_v24  ;;  %v11900_v22 = vmul.u32.u64.high %v11850_v26, %v3569_v24, %v11899_v40  ;;  %v3630_v15 = vshrl.u32 %v3629_v27, 23 }
 0x372   : > { %vm11904_vm5 = vcmp.le.f32.partialorder %v3418_v9, 0.7853982  ;;  %v3505_v42 = vsel %vm3420_vm4, %v3504_v0, %v3480_v55  ;;  %v3626_v3 = vand.u32 2147483647, %v15385_v38  ;;  %vm3409_vm7 = vcmp.lt.s32.totalorder %v3408_v8, 2 }
 0x373   : > { %v7425_v50 = vadd.s32 4294967294, %v3486_v54  ;;  %vm3410_vm6 = vcmp.eq.s32.totalorder %v3408_v8, 0  ;;  %v3580_v33 = vadd.s32 1, %v11881_v31  ;;  %v7431_v19 = vadd.s32 4294967169, %v3630_v15 }
 0x374   : > { %vm3413_vm8 = vcmp.eq.s32.totalorder %v3408_v8, 2  ;;  %v3474_v36 = vadd.s32 %v11800_v32, %v11809_v43  ;;  %v3577_v9 = vmul.u32 %v11850_v26, %v3561_v59  ;;  %v3507_v45 = vsel %vm11904_vm5, 0, %v3505_v42 }
 0x375   : > { %vm7426_vm9 = vcmp.lt.s32.totalorder %v7425_v50, 0  ;;  %vm3579_vm12 = vc.u32 %v11900_v22, %v11880_v5  ;;  %v3636_v62 = vadd.s32 1, %v7431_v19  ;;  %v3633_v43 = vand.u32 8388607, %v3626_v3 }
 0x376   : > { %v7996_v58 = vpop.eup %7995  ;;  %v3489_v63 = vsel %vm7426_vm9, 0, %v7425_v50  ;;  %v3581_v32 = vsel %vm3579_vm12, %v3580_v33, %v11881_v31  ;;  %v3733_v52 = vand.u32 2139095040, %v15388_v37  ;;  %v3511_v14 = vadd.s32 3, %v3507_v45 }
 0x377   : > { %v7998_v47 = vpop.eup %7997  ;;  %v3414_v28 = vxor.u32 2147483648, %v7996_v58  ;;  %v3490_v55 = vsub.s32 32, %v3489_v63  ;;  %v3491_v56 = vshll.u32 %v11865_v41, %v3489_v63  ;;  %v3494_v44 = vsub.s32 4294967266, %v3489_v63 }
 0x378   : > { %v3411_v34 = vxor.u32 2147483648, %v7998_v47  ;;  %vm3637_vm10 = vcmp.gt.s32.totalorder %v3636_v62, 0  ;;  %v3582_v23 = vadd.s32 %v3581_v32, %v3577_v9  ;;  %v3634_v61 = vor.u32 8388608, %v3633_v43 }
 0x379   : > { %v3415_v39 = vsel %vm3413_vm8, %v3414_v28, %v7998_v47  ;;  %v3492_v26 = vshrl.u32 %v3474_v36, %v3490_v55  ;;  %v3495_v60 = vadd.s32 127, %v3494_v44  ;;  %v3638_v29 = vsel %vm3637_vm10, %v3636_v62, 0 }
 0x37a   : > { %v3412_v12 = vsel %vm3410_vm6, %v7996_v58, %v3411_v34  ;;  %v3583_v1 = vadd.s32 536870912, %v3582_v23  ;;  %v3640_v18 = vand.u32 31, %v3638_v29  ;;  %v3639_v31 = vshrl.u32 %v3638_v29, 5 }
 0x37b   : > { %v3416_v49 = vsel %vm3409_vm7, %v3412_v12, %v3415_v39  ;;  %v3493_v41 = vor.u32 %v3492_v26, %v3491_v56  ;;  %v3496_v7 = vshll.u32 %v3495_v60, 23  ;;  %v3730_v25 = vand.u32 2147483647, %v15388_v37 }
 0x37c   : > { %v3417_v16 = vsel %vm3406_vm3, nan, %v3416_v49  ;;  %v11929_v6 = vshrl.u32 %v3583_v1, 30  ;;  %v3641_v17 = vsub.s32 32, %v3640_v18  ;;  %v3734_v20 = vshrl.u32 %v3733_v52, 23 }
 0x37d   : > { %v3497_v0 = vor.u32 4788187, %v3496_v7  ;;  %v3500_v2 = vcvt.s32.f32 %v3493_v41  ;;  %7189 = vst [vmem:[%s9727_s11 + $0xd8] sm:$0xff] %v3417_v16  ;;  %v3643_v24 = vshll.u32 %v15318_v46, %v3640_v18  ;;  %v3646_v4 = vshll.u32 %v15310_v10, %v3640_v18 }
 0x37e   : > { %v3585_v8 = vshll.u32 %v11929_v6, 30  ;;  %v3644_v27 = vshrl.u32 %v15310_v10, %v3641_v17  ;;  %v3647_v54 = vshrl.u32 %v15311_v21, %v3641_v17  ;;  %v3649_v59 = vshll.u32 %v15311_v21, %v3640_v18 }
 0x37f   : > { %v3498_v48 = vand.u32 2147483647, %v3497_v0  ;;  %v3650_v40 = vshrl.u32 %v15312_v11, %v3641_v17  ;;  %v3652_v42 = vshll.u32 %v15312_v11, %v3640_v18  ;;  %v3653_v33 = vshrl.u32 %v15313_v53, %v3641_v17 }
 0x380   : > { %v11940_v50 = vsub.s32 %v3582_v23, %v3585_v8  ;;  %v11944_v19 = vand.u32 3, %v3511_v14  ;;  %v11946_v36 = vshll.u32 %v3634_v61, 8  ;;  %v7435_v9 = vadd.s32 4294967169, %v3734_v20 }
 0x381   : > { %v3501_v15 = vmul.f32 %v3500_v2, %v3498_v48  ;;  %v11950_v58 = vand.u32 8388607, %v3730_v25  ;;  %v3642_v62 = vshrl.u32 %v15318_v46, %v3641_v17  ;;  %v3645_v47 = vor.u32 %v3644_v27, %v3643_v24 }
 0x382   : > { %v3588_v45 = vsub.s32 0, %v11940_v50  ;;  %v3648_v28 = vor.u32 %v3647_v54, %v3646_v4  ;;  %v3651_v55 = vor.u32 %v3650_v40, %v3649_v59  ;;  %v3655_v56 = vshll.u32 %v15313_v53, %v3640_v18 }
 0x383   : > { %v3502_v63 = vxor.u32 2147483648, %v3501_v15  ;;  %v3656_v44 = vshrl.u32 %v15314_v35, %v3641_v17  ;;  %v3654_v43 = vor.u32 %v3653_v33, %v3652_v42  ;;  %vm3658_vm11 = vcmp.lt.s32.totalorder %v3639_v31, 1 }
 0x384   : > { %v7428_v32 = vmin.u32 %v3588_v45, %v11940_v50  ;;  %vm3661_vm13 = vcmp.lt.s32.totalorder %v3639_v31, 4  ;;  %v3740_v60 = vadd.s32 1, %v7435_v9  ;;  %vm3659_vm15 = vcmp.lt.s32.totalorder %v3639_v31, 2 }
 0x385   : > { %v3503_v34 = vsel %vm3420_vm4, %v3502_v63, %v3501_v15  ;;  %v3657_v26 = vor.u32 %v3656_v44, %v3655_v56  ;;  %vm3660_vm14 = vcmp.lt.s32.totalorder %v3639_v31, 3  ;;  %v3662_v12 = vsel %vm3658_vm11, %v3642_v62, %v3645_v47 }
 0x386   : > { %v3506_v39 = vsel %vm11904_vm5, %v15379_v57, %v3503_v34  ;;  %v3590_v23 = vclz %v7428_v32  ;;  %v3663_v29 = vsel %vm3661_vm13, %v3651_v55, 2102212464  ;;  %v3666_v52 = vsel %vm3658_vm11, %v3645_v47, %v3648_v28 }
 0x387   : > { %7999 = vcosq.f32 %v3506_v39  ;;  %v3664_v41 = vsel %vm3660_vm14, %v3648_v28, %v3663_v29  ;;  %v3667_v30 = vsel %vm3661_vm13, %v3654_v43, 920167782  ;;  %v3670_v7 = vsel %vm3658_vm11, %v3648_v28, %v3651_v55 }
 0x388   : > { %8001 = vsinq.f32 %v3506_v39  ;;  %v7429_v49 = vadd.s32 4294967294, %v3590_v23  ;;  %vm3514_vm0 = vcmp.eq.s32.totalorder %v11944_v19, 0  ;;  %v3578_v1 = vadd.s32 %v11880_v5, %v11900_v22 }
 0x389   : > { %v3668_v16 = vsel %vm3660_vm14, %v3651_v55, %v3667_v30  ;;  %v3671_v14 = vsel %vm3661_vm13, %v3657_v26, 1326507024  ;;  %vm3741_vm1 = vcmp.gt.s32.totalorder %v3740_v60, 0  ;;  %vm3513_vm2 = vcmp.lt.s32.totalorder %v11944_v19, 2 }
 0x38a   : > { %vm7430_vm3 = vcmp.lt.s32.totalorder %v7429_v49, 0  ;;  %v3665_v18 = vsel %vm3659_vm15, %v3662_v12, %v3664_v41  ;;  %v3669_v0 = vsel %vm3659_vm15, %v3666_v52, %v3668_v16  ;;  %v3672_v2 = vsel %vm3660_vm14, %v3654_v43, %v3671_v14 }
 0x38b   : > { %vm3510_vm4 = vweird.f32 %v15379_v57  ;;  %v3593_v61 = vsel %vm7430_vm3, 0, %v7429_v49  ;;  %v3673_v17 = vsel %vm3659_vm15, %v3670_v7, %v3672_v2  ;;  %vm3524_vm5 = vcmp.lt.s32.totalorder %v15382_v13, 0 }
 0x38c   : > { %v11980_v5 = vmul.u32.u64.low %v11946_v36, %v3669_v0  ;;  %v11981_v22 = vmul.u32.u64.high %v11946_v36, %v3669_v0, %v11980_v5  ;;  %v3594_v20 = vsub.s32 32, %v3593_v61  ;;  %v3595_v48 = vshll.u32 %v11940_v50, %v3593_v61 }
 0x38d   : > { %v3598_v8 = vsub.s32 4294967266, %v3593_v61  ;;  %v3742_v24 = vsel %vm3741_vm1, %v3740_v60, 0  ;;  %vm3517_vm7 = vcmp.eq.s32.totalorder %v11944_v19, 2  ;;  %v3608_v40 = vsub.s32 4, %v11929_v6 }
 0x38e   : > { %v11988_v4 = vmul.u32.u64.low %v11946_v36, %v3673_v17  ;;  %v11989_v27 = vmul.u32.u64.high %v11946_v36, %v3673_v17, %v11988_v4  ;;  %v3744_v31 = vand.u32 31, %v3742_v24  ;;  %v3596_v54 = vshrl.u32 %v3578_v1, %v3594_v20 }
 0x38f   : > { %v3599_v59 = vadd.s32 127, %v3598_v8  ;;  %v3738_v15 = vor.u32 8388608, %v11950_v58  ;;  %v3681_v42 = vmul.u32 %v11946_v36, %v3665_v18  ;;  %v3684_v33 = vadd.s32 1, %v11981_v22 }
 0x390   : > { %v11995_v50 = vshrl.u32 %v3742_v24, 5  ;;  %v3745_v9 = vsub.s32 32, %v3744_v31  ;;  %vm11999_vm6 = vcmp.le.f32.partialorder %v3522_v51, 0.7853982  ;;  %v3597_v62 = vor.u32 %v3596_v54, %v3595_v48 }
 0x391   : > { %v8000_v63 = vpop.eup %7999  ;;  %v3600_v47 = vshll.u32 %v3599_v59, 23  ;;  %v3747_v28 = vshll.u32 %v15318_v46, %v3744_v31  ;;  %v3750_v58 = vshll.u32 %v15310_v10, %v3744_v31  ;;  %vm3683_vm8 = vc.u32 %v11989_v27, %v11980_v5 }
 0x392   : > { %v8002_v55 = vpop.eup %8001  ;;  %v3518_v36 = vxor.u32 2147483648, %v8000_v63  ;;  %v3753_v56 = vshll.u32 %v15311_v21, %v3744_v31  ;;  %v3756_v44 = vshll.u32 %v15312_v11, %v3744_v31  ;;  %v3604_v32 = vcvt.s32.f32 %v3597_v62 }
 0x393   : > { %v3515_v34 = vxor.u32 2147483648, %v8002_v55  ;;  %v3601_v51 = vor.u32 4788187, %v3600_v47  ;;  %v3685_v43 = vsel %vm3683_vm8, %v3684_v33, %v11981_v22  ;;  %v3748_v60 = vshrl.u32 %v15310_v10, %v3745_v9 }
 0x394   : > { %v3519_v39 = vsel %vm3517_vm7, %v3518_v36, %v8002_v55  ;;  %v3686_v26 = vadd.s32 %v3685_v43, %v3681_v42  ;;  %v3751_v23 = vshrl.u32 %v15311_v21, %v3745_v9  ;;  %v3754_v52 = vshrl.u32 %v15312_v11, %v3745_v9 }
 0x395   : > { %v3516_v12 = vsel %vm3514_vm0, %v8000_v63, %v3515_v34  ;;  %v3602_v29 = vand.u32 2147483647, %v3601_v51  ;;  %v3757_v49 = vshrl.u32 %v15313_v53, %v3745_v9  ;;  %v3609_v30 = vsel %vm3524_vm5, %v3608_v40, %v11929_v6  ;;  %v15391_v51 = vld [vmem:[#allocation8_spill] sm:$0xff] }
 0x396   : > { %v3520_v41 = vsel %vm3513_vm2, %v3516_v12, %v3519_v39  ;;  %v3687_v7 = vadd.s32 536870912, %v3686_v26  ;;  %v3749_v1 = vor.u32 %v3748_v60, %v3747_v28  ;;  %v3752_v18 = vor.u32 %v3751_v23, %v3750_v58 }
 0x397   : > { %v3521_v16 = vsel %vm3510_vm4, nan, %v3520_v41  ;;  %v3605_v14 = vmul.f32 %v3604_v32, %v3602_v29  ;;  %v3758_v0 = vor.u32 %v3757_v49, %v3756_v44  ;;  %v3759_v61 = vshll.u32 %v15313_v53, %v3744_v31 }
 0x398   : > { %v3688_v2 = vshrl.u32 %v3687_v7, 30  ;;  %v3760_v17 = vshrl.u32 %v15314_v35, %v3745_v9  ;;  %vm3762_vm9 = vcmp.lt.s32.totalorder %v11995_v50, 1  ;;  %7190 = vst [vmem:[%s9727_s11 + $0xe0] sm:$0xff] %v3521_v16  ;;  %v3755_v22 = vor.u32 %v3754_v52, %v3753_v56 }
 0x399   : > { %v3606_v19 = vxor.u32 2147483648, %v3605_v14  ;;  %vm3765_vm12 = vcmp.lt.s32.totalorder %v11995_v50, 4  ;;  %v12030_v6 = vshll.u32 %v3738_v15, 8  ;;  %v3611_v57 = vsel %vm11999_vm6, 0, %v3609_v30 }
 0x39a   : > { %v3689_v20 = vshll.u32 %v3688_v2, 30  ;;  %vm3763_vm10 = vcmp.lt.s32.totalorder %v11995_v50, 2  ;;  %vm3764_vm11 = vcmp.lt.s32.totalorder %v11995_v50, 3  ;;  %v3761_v8 = vor.u32 %v3760_v17, %v3759_v61 }
 0x39b   : > { %v3607_v48 = vsel %vm3524_vm5, %v3606_v19, %v3605_v14  ;;  %v3770_v24 = vsel %vm3762_vm9, %v3749_v1, %v3752_v18  ;;  %v3771_v4 = vsel %vm3765_vm12, %v3758_v0, 920167782  ;;  %v3746_v59 = vshrl.u32 %v15318_v46, %v3745_v9 }
 0x39c   : > { %v3610_v31 = vsel %vm11999_vm6, %v15382_v13, %v3607_v48  ;;  %v12045_v54 = vsub.s32 %v3686_v26, %v3689_v20  ;;  %v3615_v40 = vadd.s32 3, %v3611_v57  ;;  %v3767_v15 = vsel %vm3765_vm12, %v3755_v22, 2102212464 }
 0x39d   : > { %8003 = vcosq.f32 %v3610_v31  ;;  %v3772_v42 = vsel %vm3764_vm11, %v3755_v22, %v3771_v4  ;;  %v3712_v63 = vsub.s32 4, %v3688_v2  ;;  %v3774_v62 = vsel %vm3762_vm9, %v3752_v18, %v3755_v22 }
 0x39e   : > { %8005 = vsinq.f32 %v3610_v31  ;;  %v3692_v33 = vsub.s32 0, %v12045_v54  ;;  %v3773_v45 = vsel %vm3763_vm10, %v3770_v24, %v3772_v42  ;;  %v3775_v9 = vsel %vm3765_vm12, %v3761_v8, 1326507024  ;;  %v15394_v24 = vld [vmem:[#allocation15_spill] sm:$0xff] }
 0x39f   : > { %v12060_v47 = vmul.u32.u64.low %v12030_v6, %v3773_v45  ;;  %v12061_v28 = vmul.u32.u64.high %v12030_v6, %v3773_v45, %v12060_v47  ;;  %v3766_v55 = vsel %vm3762_vm9, %v3746_v59, %v3749_v1  ;;  %v3768_v36 = vsel %vm3764_vm11, %v3752_v18, %v3767_v15 }
 0x3a0   : > { %v7432_v58 = vmin.u32 %v3692_v33, %v12045_v54  ;;  %v3776_v56 = vsel %vm3764_vm11, %v3758_v0, %v3775_v9  ;;  %v3616_v44 = vand.u32 3, %v3615_v40  ;;  %v3837_v32 = vand.u32 2139095040, %v15391_v51 }
 0x3a1   : > { %v3777_v34 = vsel %vm3763_vm10, %v3774_v62, %v3776_v56  ;;  %vm3614_vm13 = vweird.f32 %v15382_v13  ;;  %vm3628_vm15 = vcmp.lt.s32.totalorder %v15385_v38, 0  ;;  %v3769_v39 = vsel %vm3763_vm10, %v3766_v55, %v3768_v36 }
 0x3a2   : > { %v3694_v43 = vclz %v7432_v58  ;;  %v12079_v26 = vmul.u32.u64.low %v12030_v6, %v3777_v34  ;;  %v12080_v60 = vmul.u32.u64.high %v12030_v6, %v3777_v34, %v12079_v26  ;;  %v3838_v23 = vshrl.u32 %v3837_v32, 23 }
 0x3a3   : > { %vm12084_vm14 = vcmp.le.f32.partialorder %v3626_v3, 0.7853982  ;;  %v3713_v52 = vsel %vm3628_vm15, %v3712_v63, %v3688_v2  ;;  %v3834_v49 = vand.u32 2147483647, %v15391_v51  ;;  %vm3617_vm0 = vcmp.lt.s32.totalorder %v3616_v44, 2 }
 0x3a4   : > { %v7433_v29 = vadd.s32 4294967294, %v3694_v43  ;;  %vm3618_vm1 = vcmp.eq.s32.totalorder %v3616_v44, 0  ;;  %v3788_v50 = vadd.s32 1, %v12061_v28  ;;  %v7439_v41 = vadd.s32 4294967169, %v3838_v23 }
 0x3a5   : > { %vm3621_vm2 = vcmp.eq.s32.totalorder %v3616_v44, 2  ;;  %v3682_v30 = vadd.s32 %v11980_v5, %v11989_v27  ;;  %v3785_v3 = vmul.u32 %v12030_v6, %v3769_v39  ;;  %v3715_v16 = vsel %vm12084_vm14, 0, %v3713_v52 }
 0x3a6   : > { %vm7434_vm3 = vcmp.lt.s32.totalorder %v7433_v29, 0  ;;  %vm3787_vm4 = vc.u32 %v12080_v60, %v12060_v47  ;;  %v3844_v14 = vadd.s32 1, %v7439_v41  ;;  %v3841_v27 = vand.u32 8388607, %v3834_v49 }
 0x3a7   : > { %v8004_v7 = vpop.eup %8003  ;;  %v3697_v1 = vsel %vm7434_vm3, 0, %v7433_v29  ;;  %v3789_v5 = vsel %vm3787_vm4, %v3788_v50, %v12061_v28  ;;  %v3941_v4 = vand.u32 2139095040, %v15394_v24  ;;  %v3719_v42 = vadd.s32 3, %v3715_v16 }
 0x3a8   : > { %v8006_v18 = vpop.eup %8005  ;;  %v3622_v0 = vxor.u32 2147483648, %v8004_v7  ;;  %v3698_v2 = vsub.s32 32, %v3697_v1  ;;  %v3699_v61 = vshll.u32 %v12045_v54, %v3697_v1  ;;  %v3702_v17 = vsub.s32 4294967266, %v3697_v1 }
 0x3a9   : > { %v3619_v19 = vxor.u32 2147483648, %v8006_v18  ;;  %vm3845_vm5 = vcmp.gt.s32.totalorder %v3844_v14, 0  ;;  %v3790_v20 = vadd.s32 %v3789_v5, %v3785_v3  ;;  %v3842_v9 = vor.u32 8388608, %v3841_v27 }
 0x3aa   : > { %v3623_v22 = vsel %vm3621_vm2, %v3622_v0, %v8006_v18  ;;  %v3700_v6 = vshrl.u32 %v3682_v30, %v3698_v2  ;;  %v3703_v57 = vadd.s32 127, %v3702_v17  ;;  %v3846_v8 = vsel %vm3845_vm5, %v3844_v14, 0 }
 0x3ab   : > { %v3620_v48 = vsel %vm3618_vm1, %v8004_v7, %v3619_v19  ;;  %v3791_v40 = vadd.s32 536870912, %v3790_v20  ;;  %v3848_v33 = vand.u32 31, %v3846_v8  ;;  %v3847_v28 = vshrl.u32 %v3846_v8, 5 }
 0x3ac   : > { %v3624_v31 = vsel %vm3617_vm0, %v3620_v48, %v3623_v22  ;;  %v3701_v54 = vor.u32 %v3700_v6, %v3699_v61  ;;  %v3704_v59 = vshll.u32 %v3703_v57, 23  ;;  %v3938_v55 = vand.u32 2147483647, %v15394_v24 }
 0x3ad   : > { %v3625_v15 = vsel %vm3614_vm13, nan, %v3624_v31  ;;  %v12109_v62 = vshrl.u32 %v3791_v40, 30  ;;  %v3849_v58 = vsub.s32 32, %v3848_v33  ;;  %v3942_v36 = vshrl.u32 %v3941_v4, 23 }
 0x3ae   : > { %v3705_v63 = vor.u32 4788187, %v3704_v59  ;;  %v3708_v45 = vcvt.s32.f32 %v3701_v54  ;;  %7191 = vst [vmem:[%s9727_s11 + $0xe8] sm:$0xff] %v3625_v15  ;;  %v3851_v34 = vshll.u32 %v15318_v46, %v3848_v33  ;;  %v3854_v13 = vshll.u32 %v15310_v10, %v3848_v33 }
 0x3af   : > { %v3793_v44 = vshll.u32 %v12109_v62, 30  ;;  %v3852_v32 = vshrl.u32 %v15310_v10, %v3849_v58  ;;  %v3855_v43 = vshrl.u32 %v15311_v21, %v3849_v58  ;;  %v3857_v39 = vshll.u32 %v15311_v21, %v3848_v33 }
 0x3b0   : > { %v3706_v56 = vand.u32 2147483647, %v3705_v63  ;;  %v3858_v26 = vshrl.u32 %v15312_v11, %v3849_v58  ;;  %v3860_v52 = vshll.u32 %v15312_v11, %v3848_v33  ;;  %v3861_v50 = vshrl.u32 %v15313_v53, %v3849_v58 }
 0x3b1   : > { %v12120_v29 = vsub.s32 %v3790_v20, %v3793_v44  ;;  %v12124_v41 = vand.u32 3, %v3719_v42  ;;  %v12126_v30 = vshll.u32 %v3842_v9, 8  ;;  %v7443_v3 = vadd.s32 4294967169, %v3942_v36 }
 0x3b2   : > { %v3709_v23 = vmul.f32 %v3708_v45, %v3706_v56  ;;  %v12130_v7 = vand.u32 8388607, %v3938_v55  ;;  %v3850_v14 = vshrl.u32 %v15318_v46, %v3849_v58  ;;  %v3853_v18 = vor.u32 %v3852_v32, %v3851_v34 }
 0x3b3   : > { %v3796_v16 = vsub.s32 0, %v12120_v29  ;;  %v3856_v0 = vor.u32 %v3855_v43, %v3854_v13  ;;  %v3859_v2 = vor.u32 %v3858_v26, %v3857_v39  ;;  %v3863_v61 = vshll.u32 %v15313_v53, %v3848_v33 }
 0x3b4   : > { %v3710_v1 = vxor.u32 2147483648, %v3709_v23  ;;  %v3864_v17 = vshrl.u32 %v15314_v35, %v3849_v58  ;;  %v3862_v27 = vor.u32 %v3861_v50, %v3860_v52  ;;  %vm3866_vm7 = vcmp.lt.s32.totalorder %v3847_v28, 1 }
 0x3b5   : > { %v7436_v5 = vmin.u32 %v3796_v16, %v12120_v29  ;;  %vm3869_vm6 = vcmp.lt.s32.totalorder %v3847_v28, 4  ;;  %v3948_v57 = vadd.s32 1, %v7443_v3  ;;  %vm3867_vm8 = vcmp.lt.s32.totalorder %v3847_v28, 2 }
 0x3b6   : > { %v3711_v19 = vsel %vm3628_vm15, %v3710_v1, %v3709_v23  ;;  %v3865_v6 = vor.u32 %v3864_v17, %v3863_v61  ;;  %vm3868_vm9 = vcmp.lt.s32.totalorder %v3847_v28, 3  ;;  %v3870_v48 = vsel %vm3866_vm7, %v3850_v14, %v3853_v18 }
 0x3b7   : > { %v3714_v22 = vsel %vm12084_vm14, %v15385_v38, %v3711_v19  ;;  %v3798_v20 = vclz %v7436_v5  ;;  %v3871_v8 = vsel %vm3869_vm6, %v3859_v2, 2102212464  ;;  %v3874_v4 = vsel %vm3866_vm7, %v3853_v18, %v3856_v0 }
 0x3b8   : > { %8007 = vcosq.f32 %v3714_v22  ;;  %v3872_v54 = vsel %vm3868_vm9, %v3856_v0, %v3871_v8  ;;  %v3875_v12 = vsel %vm3869_vm6, %v3862_v27, 920167782  ;;  %v3878_v59 = vsel %vm3866_vm7, %v3856_v0, %v3859_v2 }
 0x3b9   : > { %8009 = vsinq.f32 %v3714_v22  ;;  %v7437_v31 = vadd.s32 4294967294, %v3798_v20  ;;  %vm3722_vm12 = vcmp.eq.s32.totalorder %v12124_v41, 0  ;;  %v3786_v40 = vadd.s32 %v12060_v47, %v12080_v60 }
 0x3ba   : > { %v3876_v15 = vsel %vm3868_vm9, %v3859_v2, %v3875_v12  ;;  %v3879_v42 = vsel %vm3869_vm6, %v3865_v6, 1326507024  ;;  %vm3949_vm10 = vcmp.gt.s32.totalorder %v3948_v57, 0  ;;  %vm3721_vm11 = vcmp.lt.s32.totalorder %v12124_v41, 2 }
 0x3bb   : > { %vm7438_vm13 = vcmp.lt.s32.totalorder %v7437_v31, 0  ;;  %v3873_v33 = vsel %vm3867_vm8, %v3870_v48, %v3872_v54  ;;  %v3877_v63 = vsel %vm3867_vm8, %v3874_v4, %v3876_v15  ;;  %v3880_v45 = vsel %vm3868_vm9, %v3862_v27, %v3879_v42 }
 0x3bc   : > { %vm3718_vm15 = vweird.f32 %v15385_v38  ;;  %v3801_v9 = vsel %vm7438_vm13, 0, %v7437_v31  ;;  %v3881_v58 = vsel %vm3867_vm8, %v3878_v59, %v3880_v45  ;;  %vm3732_vm14 = vcmp.lt.s32.totalorder %v15388_v37, 0 }
 0x3bd   : > { %v12160_v47 = vmul.u32.u64.low %v12126_v30, %v3877_v63  ;;  %v12161_v60 = vmul.u32.u64.high %v12126_v30, %v3877_v63, %v12160_v47  ;;  %v3802_v36 = vsub.s32 32, %v3801_v9  ;;  %v3803_v56 = vshll.u32 %v12120_v29, %v3801_v9 }
 0x3be   : > { %v3806_v44 = vsub.s32 4294967266, %v3801_v9  ;;  %v3950_v34 = vsel %vm3949_vm10, %v3948_v57, 0  ;;  %vm3725_vm0 = vcmp.eq.s32.totalorder %v12124_v41, 2  ;;  %v3816_v26 = vsub.s32 4, %v12109_v62 }
 0x3bf   : > { %v12168_v13 = vmul.u32.u64.low %v12126_v30, %v3881_v58  ;;  %v12169_v32 = vmul.u32.u64.high %v12126_v30, %v3881_v58, %v12168_v13  ;;  %v3952_v28 = vand.u32 31, %v3950_v34  ;;  %v3804_v43 = vshrl.u32 %v3786_v40, %v3802_v36 }
 0x3c0   : > { %v3807_v39 = vadd.s32 127, %v3806_v44  ;;  %v3946_v23 = vor.u32 8388608, %v12130_v7  ;;  %v3889_v52 = vmul.u32 %v12126_v30, %v3873_v33  ;;  %v3892_v50 = vadd.s32 1, %v12161_v60 }
 0x3c1   : > { %v12175_v29 = vshrl.u32 %v3950_v34, 5  ;;  %v3953_v3 = vsub.s32 32, %v3952_v28  ;;  %vm12179_vm1 = vcmp.le.f32.partialorder %v3730_v25, 0.7853982  ;;  %v3805_v14 = vor.u32 %v3804_v43, %v3803_v56 }
 0x3c2   : > { %v8008_v1 = vpop.eup %8007  ;;  %v3808_v18 = vshll.u32 %v3807_v39, 23  ;;  %v3955_v0 = vshll.u32 %v15318_v46, %v3952_v28  ;;  %v3958_v7 = vshll.u32 %v15310_v10, %v3952_v28  ;;  %vm3891_vm2 = vc.u32 %v12169_v32, %v12160_v47 }
 0x3c3   : > { %v8010_v2 = vpop.eup %8009  ;;  %v3726_v30 = vxor.u32 2147483648, %v8008_v1  ;;  %v3961_v61 = vshll.u32 %v15311_v21, %v3952_v28  ;;  %v3964_v17 = vshll.u32 %v15312_v11, %v3952_v28  ;;  %v3812_v5 = vcvt.s32.f32 %v3805_v14 }
 0x3c4   : > { %v3723_v19 = vxor.u32 2147483648, %v8010_v2  ;;  %v3809_v25 = vor.u32 4788187, %v3808_v18  ;;  %v3893_v27 = vsel %vm3891_vm2, %v3892_v50, %v12161_v60  ;;  %v3956_v57 = vshrl.u32 %v15310_v10, %v3953_v3 }
 0x3c5   : > { %v3727_v22 = vsel %vm3725_vm0, %v3726_v30, %v8010_v2  ;;  %v3894_v6 = vadd.s32 %v3893_v27, %v3889_v52  ;;  %v3959_v20 = vshrl.u32 %v15311_v21, %v3953_v3  ;;  %v3962_v4 = vshrl.u32 %v15312_v11, %v3953_v3 }
 0x3c6   : > { %v3724_v48 = vsel %vm3722_vm12, %v8008_v1, %v3723_v19  ;;  %v3810_v8 = vand.u32 2147483647, %v3809_v25  ;;  %v3965_v31 = vshrl.u32 %v15313_v53, %v3953_v3  ;;  %v3817_v12 = vsel %vm3732_vm14, %v3816_v26, %v12109_v62  ;;  %v15397_v25 = vld [vmem:[#allocation16_spill] sm:$0xff] }
 0x3c7   : > { %v3728_v54 = vsel %vm3721_vm11, %v3724_v48, %v3727_v22  ;;  %v3895_v59 = vadd.s32 536870912, %v3894_v6  ;;  %v3957_v40 = vor.u32 %v3956_v57, %v3955_v0  ;;  %v3960_v33 = vor.u32 %v3959_v20, %v3958_v7 }
 0x3c8   : > { %v3729_v15 = vsel %vm3718_vm15, nan, %v3728_v54  ;;  %v3813_v42 = vmul.f32 %v3812_v5, %v3810_v8  ;;  %v3966_v63 = vor.u32 %v3965_v31, %v3964_v17  ;;  %v3967_v9 = vshll.u32 %v15313_v53, %v3952_v28 }
 0x3c9   : > { %v3896_v45 = vshrl.u32 %v3895_v59, 30  ;;  %v3968_v58 = vshrl.u32 %v15314_v35, %v3953_v3  ;;  %vm3970_vm3 = vcmp.lt.s32.totalorder %v12175_v29, 1  ;;  %7192 = vst [vmem:[%s9727_s11 + $0xf0] sm:$0xff] %v3729_v15  ;;  %v3963_v60 = vor.u32 %v3962_v4, %v3961_v61 }
 0x3ca   : > { %v3814_v41 = vxor.u32 2147483648, %v3813_v42  ;;  %vm3973_vm4 = vcmp.lt.s32.totalorder %v12175_v29, 4  ;;  %v12210_v62 = vshll.u32 %v3946_v23, 8  ;;  %v3819_v38 = vsel %vm12179_vm1, 0, %v3817_v12 }
 0x3cb   : > { %v3897_v36 = vshll.u32 %v3896_v45, 30  ;;  %vm3971_vm5 = vcmp.lt.s32.totalorder %v12175_v29, 2  ;;  %vm3972_vm7 = vcmp.lt.s32.totalorder %v12175_v29, 3  ;;  %v3969_v44 = vor.u32 %v3968_v58, %v3967_v9 }
 0x3cc   : > { %v3815_v56 = vsel %vm3732_vm14, %v3814_v41, %v3813_v42  ;;  %v3978_v34 = vsel %vm3970_vm3, %v3957_v40, %v3960_v33  ;;  %v3979_v13 = vsel %vm3973_vm4, %v3966_v63, 920167782  ;;  %v3954_v39 = vshrl.u32 %v15318_v46, %v3953_v3 }
 0x3cd   : > { %v3818_v28 = vsel %vm12179_vm1, %v15388_v37, %v3815_v56  ;;  %v12225_v43 = vsub.s32 %v3894_v6, %v3897_v36  ;;  %v3823_v26 = vadd.s32 3, %v3819_v38  ;;  %v3975_v23 = vsel %vm3973_vm4, %v3963_v60, 2102212464 }
 0x3ce   : > { %8011 = vcosq.f32 %v3818_v28  ;;  %v3980_v52 = vsel %vm3972_vm7, %v3963_v60, %v3979_v13  ;;  %v3920_v1 = vsub.s32 4, %v3896_v45  ;;  %v3982_v14 = vsel %vm3970_vm3, %v3960_v33, %v3963_v60 }
 0x3cf   : > { %8013 = vsinq.f32 %v3818_v28  ;;  %v3900_v50 = vsub.s32 0, %v12225_v43  ;;  %v3981_v16 = vsel %vm3971_vm5, %v3978_v34, %v3980_v52  ;;  %v3983_v3 = vsel %vm3973_vm4, %v3969_v44, 1326507024  ;;  %v15400_v34 = vld [vmem:[#allocation17_spill] sm:$0xff] }
 0x3d0   : > { %v12240_v18 = vmul.u32.u64.low %v12210_v62, %v3981_v16  ;;  %v12241_v0 = vmul.u32.u64.high %v12210_v62, %v3981_v16, %v12240_v18  ;;  %v3974_v2 = vsel %vm3970_vm3, %v3954_v39, %v3957_v40  ;;  %v3976_v30 = vsel %vm3972_vm7, %v3960_v33, %v3975_v23 }
 0x3d1   : > { %v7440_v7 = vmin.u32 %v3900_v50, %v12225_v43  ;;  %v3984_v61 = vsel %vm3972_vm7, %v3966_v63, %v3983_v3  ;;  %v3824_v17 = vand.u32 3, %v3823_v26  ;;  %v4045_v5 = vand.u32 2139095040, %v15397_v25 }
 0x3d2   : > { %v3985_v19 = vsel %vm3971_vm5, %v3982_v14, %v3984_v61  ;;  %vm3822_vm6 = vweird.f32 %v15388_v37  ;;  %vm3836_vm8 = vcmp.lt.s32.totalorder %v15391_v51, 0  ;;  %v3977_v22 = vsel %vm3971_vm5, %v3974_v2, %v3976_v30 }
 0x3d3   : > { %v3902_v27 = vclz %v7440_v7  ;;  %v12259_v6 = vmul.u32.u64.low %v12210_v62, %v3985_v19  ;;  %v12260_v57 = vmul.u32.u64.high %v12210_v62, %v3985_v19, %v12259_v6  ;;  %v4046_v20 = vshrl.u32 %v4045_v5, 23 }
 0x3d4   : > { %vm12264_vm9 = vcmp.le.f32.partialorder %v3834_v49, 0.7853982  ;;  %v3921_v4 = vsel %vm3836_vm8, %v3920_v1, %v3896_v45  ;;  %v4042_v31 = vand.u32 2147483647, %v15397_v25  ;;  %vm3825_vm12 = vcmp.lt.s32.totalorder %v3824_v17, 2 }
 0x3d5   : > { %v7441_v8 = vadd.s32 4294967294, %v3902_v27  ;;  %vm3826_vm10 = vcmp.eq.s32.totalorder %v3824_v17, 0  ;;  %v3996_v29 = vadd.s32 1, %v12241_v0  ;;  %v7447_v54 = vadd.s32 4294967169, %v4046_v20 }
 0x3d6   : > { %vm3829_vm11 = vcmp.eq.s32.totalorder %v3824_v17, 2  ;;  %v3890_v12 = vadd.s32 %v12160_v47, %v12169_v32  ;;  %v3993_v49 = vmul.u32 %v12210_v62, %v3977_v22  ;;  %v3923_v15 = vsel %vm12264_vm9, 0, %v3921_v4 }
 0x3d7   : > { %vm7442_vm13 = vcmp.lt.s32.totalorder %v7441_v8, 0  ;;  %vm3995_vm15 = vc.u32 %v12260_v57, %v12240_v18  ;;  %v4052_v42 = vadd.s32 1, %v7447_v54  ;;  %v4049_v32 = vand.u32 8388607, %v4042_v31 }
 0x3d8   : > { %v8012_v59 = vpop.eup %8011  ;;  %v3905_v40 = vsel %vm7442_vm13, 0, %v7441_v8  ;;  %v3997_v47 = vsel %vm3995_vm15, %v3996_v29, %v12241_v0  ;;  %v4149_v13 = vand.u32 2139095040, %v15400_v34  ;;  %v3927_v52 = vadd.s32 3, %v3923_v15 }
 0x3d9   : > { %v8014_v33 = vpop.eup %8013  ;;  %v3830_v63 = vxor.u32 2147483648, %v8012_v59  ;;  %v3906_v45 = vsub.s32 32, %v3905_v40  ;;  %v3907_v9 = vshll.u32 %v12225_v43, %v3905_v40  ;;  %v3910_v58 = vsub.s32 4294967266, %v3905_v40 }
 0x3da   : > { %v3827_v41 = vxor.u32 2147483648, %v8014_v33  ;;  %vm4053_vm14 = vcmp.gt.s32.totalorder %v4052_v42, 0  ;;  %v3998_v36 = vadd.s32 %v3997_v47, %v3993_v49  ;;  %v4050_v3 = vor.u32 8388608, %v4049_v32 }
 0x3db   : > { %v3831_v60 = vsel %vm3829_vm11, %v3830_v63, %v8014_v33  ;;  %v3908_v62 = vshrl.u32 %v3890_v12, %v3906_v45  ;;  %v3911_v38 = vadd.s32 127, %v3910_v58  ;;  %v4054_v44 = vsel %vm4053_vm14, %v4052_v42, 0 }
 0x3dc   : > { %v3828_v56 = vsel %vm3826_vm10, %v8012_v59, %v3827_v41  ;;  %v3999_v26 = vadd.s32 536870912, %v3998_v36  ;;  %v4056_v50 = vand.u32 31, %v4054_v44  ;;  %v4055_v0 = vshrl.u32 %v4054_v44, 5 }
 0x3dd   : > { %v3832_v28 = vsel %vm3825_vm12, %v3828_v56, %v3831_v60  ;;  %v3909_v43 = vor.u32 %v3908_v62, %v3907_v9  ;;  %v3912_v39 = vshll.u32 %v3911_v38, 23  ;;  %v4146_v2 = vand.u32 2147483647, %v15400_v34 }
 0x3de   : > { %v3833_v23 = vsel %vm3822_vm6, nan, %v3832_v28  ;;  %v12289_v14 = vshrl.u32 %v3999_v26, 30  ;;  %v4057_v7 = vsub.s32 32, %v4056_v50  ;;  %v4150_v30 = vshrl.u32 %v4149_v13, 23 }
 0x3df   : > { %v3913_v1 = vor.u32 4788187, %v3912_v39  ;;  %v3916_v16 = vcvt.s32.f32 %v3909_v43  ;;  %7193 = vst [vmem:[%s9727_s11 + $0xf8] sm:$0xff] %v3833_v23  ;;  %v4059_v19 = vshll.u32 %v15318_v46, %v4056_v50  ;;  %v4062_v37 = vshll.u32 %v15310_v10, %v4056_v50 }
 0x3e0   : > { %v4001_v17 = vshll.u32 %v12289_v14, 30  ;;  %v4060_v5 = vshrl.u32 %v15310_v10, %v4057_v7  ;;  %v4063_v27 = vshrl.u32 %v15311_v21, %v4057_v7  ;;  %v4065_v22 = vshll.u32 %v15311_v21, %v4056_v50 }
 0x3e1   : > { %v3914_v61 = vand.u32 2147483647, %v3913_v1  ;;  %v4066_v6 = vshrl.u32 %v15312_v11, %v4057_v7  ;;  %v4068_v4 = vshll.u32 %v15312_v11, %v4056_v50  ;;  %v4069_v29 = vshrl.u32 %v15313_v53, %v4057_v7 }
 0x3e2   : > { %v12300_v8 = vsub.s32 %v3998_v36, %v4001_v17  ;;  %v12304_v54 = vand.u32 3, %v3927_v52  ;;  %v12306_v12 = vshll.u32 %v4050_v3, 8  ;;  %v7451_v49 = vadd.s32 4294967169, %v4150_v30 }
 0x3e3   : > { %v3917_v20 = vmul.f32 %v3916_v16, %v3914_v61  ;;  %v12310_v59 = vand.u32 8388607, %v4146_v2  ;;  %v4058_v42 = vshrl.u32 %v15318_v46, %v4057_v7  ;;  %v4061_v33 = vor.u32 %v4060_v5, %v4059_v19 }
 0x3e4   : > { %v4004_v15 = vsub.s32 0, %v12300_v8  ;;  %v4064_v63 = vor.u32 %v4063_v27, %v4062_v37  ;;  %v4067_v45 = vor.u32 %v4066_v6, %v4065_v22  ;;  %v4071_v9 = vshll.u32 %v15313_v53, %v4056_v50 }
 0x3e5   : > { %v3918_v40 = vxor.u32 2147483648, %v3917_v20  ;;  %v4072_v58 = vshrl.u32 %v15314_v35, %v4057_v7  ;;  %v4070_v32 = vor.u32 %v4069_v29, %v4068_v4  ;;  %vm4074_vm0 = vcmp.lt.s32.totalorder %v4055_v0, 1 }
 0x3e6   : > { %v7444_v47 = vmin.u32 %v4004_v15, %v12300_v8  ;;  %vm4077_vm1 = vcmp.lt.s32.totalorder %v4055_v0, 4  ;;  %v4156_v38 = vadd.s32 1, %v7451_v49  ;;  %vm4075_vm2 = vcmp.lt.s32.totalorder %v4055_v0, 2 }
 0x3e7   : > { %v3919_v41 = vsel %vm3836_vm8, %v3918_v40, %v3917_v20  ;;  %v4073_v62 = vor.u32 %v4072_v58, %v4071_v9  ;;  %vm4076_vm3 = vcmp.lt.s32.totalorder %v4055_v0, 3  ;;  %v4078_v56 = vsel %vm4074_vm0, %v4058_v42, %v4061_v33 }
 0x3e8   : > { %v3922_v60 = vsel %vm12264_vm9, %v15391_v51, %v3919_v41  ;;  %v4006_v36 = vclz %v7444_v47  ;;  %v4079_v44 = vsel %vm4077_vm1, %v4067_v45, 2102212464  ;;  %v4082_v13 = vsel %vm4074_vm0, %v4061_v33, %v4064_v63 }
 0x3e9   : > { %8015 = vcosq.f32 %v3922_v60  ;;  %v4080_v43 = vsel %vm4076_vm3, %v4064_v63, %v4079_v44  ;;  %v4083_v48 = vsel %vm4077_vm1, %v4070_v32, 920167782  ;;  %v4086_v39 = vsel %vm4074_vm0, %v4064_v63, %v4067_v45 }
 0x3ea   : > { %8017 = vsinq.f32 %v3922_v60  ;;  %v7445_v28 = vadd.s32 4294967294, %v4006_v36  ;;  %vm3930_vm4 = vcmp.eq.s32.totalorder %v12304_v54, 0  ;;  %v3994_v26 = vadd.s32 %v12240_v18, %v12260_v57 }
 0x3eb   : > { %v4084_v23 = vsel %vm4076_vm3, %v4067_v45, %v4083_v48  ;;  %v4087_v52 = vsel %vm4077_vm1, %v4073_v62, 1326507024  ;;  %vm4157_vm5 = vcmp.gt.s32.totalorder %v4156_v38, 0  ;;  %vm3929_vm7 = vcmp.lt.s32.totalorder %v12304_v54, 2 }
 0x3ec   : > { %vm7446_vm6 = vcmp.lt.s32.totalorder %v7445_v28, 0  ;;  %v4081_v50 = vsel %vm4075_vm2, %v4078_v56, %v4080_v43  ;;  %v4085_v1 = vsel %vm4075_vm2, %v4082_v13, %v4084_v23  ;;  %v4088_v16 = vsel %vm4076_vm3, %v4070_v32, %v4087_v52 }
 0x3ed   : > { %vm3926_vm8 = vweird.f32 %v15391_v51  ;;  %v4009_v3 = vsel %vm7446_vm6, 0, %v7445_v28  ;;  %v4089_v7 = vsel %vm4075_vm2, %v4086_v39, %v4088_v16  ;;  %vm3940_vm9 = vcmp.lt.s32.totalorder %v15394_v24, 0 }
 0x3ee   : > { %v12340_v18 = vmul.u32.u64.low %v12306_v12, %v4085_v1  ;;  %v12341_v57 = vmul.u32.u64.high %v12306_v12, %v4085_v1, %v12340_v18  ;;  %v4010_v30 = vsub.s32 32, %v4009_v3  ;;  %v4011_v61 = vshll.u32 %v12300_v8, %v4009_v3 }
 0x3ef   : > { %v4014_v17 = vsub.s32 4294967266, %v4009_v3  ;;  %v4158_v19 = vsel %vm4157_vm5, %v4156_v38, 0  ;;  %vm3933_vm12 = vcmp.eq.s32.totalorder %v12304_v54, 2  ;;  %v4024_v6 = vsub.s32 4, %v12289_v14 }
 0x3f0   : > { %v12348_v37 = vmul.u32.u64.low %v12306_v12, %v4089_v7  ;;  %v12349_v5 = vmul.u32.u64.high %v12306_v12, %v4089_v7, %v12348_v37  ;;  %v4160_v0 = vand.u32 31, %v4158_v19  ;;  %v4012_v27 = vshrl.u32 %v3994_v26, %v4010_v30 }
 0x3f1   : > { %v4015_v22 = vadd.s32 127, %v4014_v17  ;;  %v4154_v20 = vor.u32 8388608, %v12310_v59  ;;  %v4097_v4 = vmul.u32 %v12306_v12, %v4081_v50  ;;  %v4100_v29 = vadd.s32 1, %v12341_v57 }
 0x3f2   : > { %v12355_v8 = vshrl.u32 %v4158_v19, 5  ;;  %v4161_v49 = vsub.s32 32, %v4160_v0  ;;  %vm12359_vm10 = vcmp.le.f32.partialorder %v3938_v55, 0.7853982  ;;  %v4013_v42 = vor.u32 %v4012_v27, %v4011_v61 }
 0x3f3   : > { %v8016_v40 = vpop.eup %8015  ;;  %v4016_v33 = vshll.u32 %v4015_v22, 23  ;;  %v4163_v63 = vshll.u32 %v15318_v46, %v4160_v0  ;;  %v4166_v59 = vshll.u32 %v15310_v10, %v4160_v0  ;;  %vm4099_vm11 = vc.u32 %v12349_v5, %v12340_v18 }
 0x3f4   : > { %v8018_v45 = vpop.eup %8017  ;;  %v3934_v12 = vxor.u32 2147483648, %v8016_v40  ;;  %v4169_v9 = vshll.u32 %v15311_v21, %v4160_v0  ;;  %v4172_v58 = vshll.u32 %v15312_v11, %v4160_v0  ;;  %v4020_v47 = vcvt.s32.f32 %v4013_v42 }
 0x3f5   : > { %v3931_v41 = vxor.u32 2147483648, %v8018_v45  ;;  %v4017_v55 = vor.u32 4788187, %v4016_v33  ;;  %v4101_v32 = vsel %vm4099_vm11, %v4100_v29, %v12341_v57  ;;  %v4164_v38 = vshrl.u32 %v15310_v10, %v4161_v49 }
 0x3f6   : > { %v3935_v60 = vsel %vm3933_vm12, %v3934_v12, %v8018_v45  ;;  %v4102_v62 = vadd.s32 %v4101_v32, %v4097_v4  ;;  %v4167_v36 = vshrl.u32 %v15311_v21, %v4161_v49  ;;  %v4170_v13 = vshrl.u32 %v15312_v11, %v4161_v49 }
 0x3f7   : > { %v3932_v56 = vsel %vm3930_vm4, %v8016_v40, %v3931_v41  ;;  %v4018_v44 = vand.u32 2147483647, %v4017_v55  ;;  %v4173_v28 = vshrl.u32 %v15313_v53, %v4161_v49  ;;  %v4025_v48 = vsel %vm3940_vm9, %v4024_v6, %v12289_v14  ;;  %v15403_v55 = vld [vmem:[#allocation18_spill] sm:$0xff] }
 0x3f8   : > { %v3936_v43 = vsel %vm3929_vm7, %v3932_v56, %v3935_v60  ;;  %v4103_v39 = vadd.s32 536870912, %v4102_v62  ;;  %v4165_v26 = vor.u32 %v4164_v38, %v4163_v63  ;;  %v4168_v50 = vor.u32 %v4167_v36, %v4166_v59 }
 0x3f9   : > { %v3937_v23 = vsel %vm3926_vm8, nan, %v3936_v43  ;;  %v4021_v52 = vmul.f32 %v4020_v47, %v4018_v44  ;;  %v4174_v1 = vor.u32 %v4173_v28, %v4172_v58  ;;  %v4175_v3 = vshll.u32 %v15313_v53, %v4160_v0 }
 0x3fa   : > { %v4104_v16 = vshrl.u32 %v4103_v39, 30  ;;  %v4176_v7 = vshrl.u32 %v15314_v35, %v4161_v49  ;;  %vm4178_vm13 = vcmp.lt.s32.totalorder %v12355_v8, 1  ;;  %7194 = vst [vmem:[%s9727_s11 + $0x100] sm:$0xff] %v3937_v23  ;;  %v4171_v57 = vor.u32 %v4170_v13, %v4169_v9 }
 0x3fb   : > { %v4022_v54 = vxor.u32 2147483648, %v4021_v52  ;;  %vm4181_vm15 = vcmp.lt.s32.totalorder %v12355_v8, 4  ;;  %v12390_v14 = vshll.u32 %v4154_v20, 8  ;;  %v4027_v51 = vsel %vm12359_vm10, 0, %v4025_v48 }
 0x3fc   : > { %v4105_v30 = vshll.u32 %v4104_v16, 30  ;;  %vm4179_vm14 = vcmp.lt.s32.totalorder %v12355_v8, 2  ;;  %vm4180_vm0 = vcmp.lt.s32.totalorder %v12355_v8, 3  ;;  %v4177_v17 = vor.u32 %v4176_v7, %v4175_v3 }
 0x3fd   : > { %v4023_v61 = vsel %vm3940_vm9, %v4022_v54, %v4021_v52  ;;  %v4186_v19 = vsel %vm4178_vm13, %v4165_v26, %v4168_v50  ;;  %v4187_v37 = vsel %vm4181_vm15, %v4174_v1, 920167782  ;;  %v4162_v22 = vshrl.u32 %v15318_v46, %v4161_v49 }
 0x3fe   : > { %v4026_v0 = vsel %vm12359_vm10, %v15394_v24, %v4023_v61  ;;  %v12405_v27 = vsub.s32 %v4102_v62, %v4105_v30  ;;  %v4031_v6 = vadd.s32 3, %v4027_v51  ;;  %v4183_v20 = vsel %vm4181_vm15, %v4171_v57, 2102212464 }
 0x3ff   : > { %8019 = vcosq.f32 %v4026_v0  ;;  %v4188_v4 = vsel %vm4180_vm0, %v4171_v57, %v4187_v37  ;;  %v4128_v40 = vsub.s32 4, %v4104_v16  ;;  %v4190_v42 = vsel %vm4178_vm13, %v4168_v50, %v4171_v57 }
 0x400   : > { %8021 = vsinq.f32 %v4026_v0  ;;  %v4108_v29 = vsub.s32 0, %v12405_v27  ;;  %v4189_v15 = vsel %vm4179_vm14, %v4186_v19, %v4188_v4  ;;  %v4191_v49 = vsel %vm4181_vm15, %v4177_v17, 1326507024  ;;  %v15406_v19 = vld [vmem:[#allocation31_spill] sm:$0xff] }
 0x401   : > { %v12420_v33 = vmul.u32.u64.low %v12390_v14, %v4189_v15  ;;  %v12421_v63 = vmul.u32.u64.high %v12390_v14, %v4189_v15, %v12420_v33  ;;  %v4182_v45 = vsel %vm4178_vm13, %v4162_v22, %v4165_v26  ;;  %v4184_v12 = vsel %vm4180_vm0, %v4168_v50, %v4183_v20 }
 0x402   : > { %v7448_v59 = vmin.u32 %v4108_v29, %v12405_v27  ;;  %v4192_v9 = vsel %vm4180_vm0, %v4174_v1, %v4191_v49  ;;  %v4032_v58 = vand.u32 3, %v4031_v6  ;;  %v4253_v47 = vand.u32 2139095040, %v15403_v55 }
 0x403   : > { %v4193_v41 = vsel %vm4179_vm14, %v4190_v42, %v4192_v9  ;;  %vm4030_vm1 = vweird.f32 %v15394_v24  ;;  %vm4044_vm2 = vcmp.lt.s32.totalorder %v15397_v25, 0  ;;  %v4185_v60 = vsel %vm4179_vm14, %v4182_v45, %v4184_v12 }
 0x404   : > { %v4110_v32 = vclz %v7448_v59  ;;  %v12439_v62 = vmul.u32.u64.low %v12390_v14, %v4193_v41  ;;  %v12440_v38 = vmul.u32.u64.high %v12390_v14, %v4193_v41, %v12439_v62  ;;  %v4254_v36 = vshrl.u32 %v4253_v47, 23 }
 0x405   : > { %vm12444_vm3 = vcmp.le.f32.partialorder %v4042_v31, 0.7853982  ;;  %v4129_v13 = vsel %vm4044_vm2, %v4128_v40, %v4104_v16  ;;  %v4250_v28 = vand.u32 2147483647, %v15403_v55  ;;  %vm4033_vm4 = vcmp.lt.s32.totalorder %v4032_v58, 2 }
 0x406   : > { %v7449_v44 = vadd.s32 4294967294, %v4110_v32  ;;  %vm4034_vm5 = vcmp.eq.s32.totalorder %v4032_v58, 0  ;;  %v4204_v8 = vadd.s32 1, %v12421_v63  ;;  %v7455_v43 = vadd.s32 4294967169, %v4254_v36 }
 0x407   : > { %vm4037_vm7 = vcmp.eq.s32.totalorder %v4032_v58, 2  ;;  %v4098_v48 = vadd.s32 %v12340_v18, %v12349_v5  ;;  %v4201_v31 = vmul.u32 %v12390_v14, %v4185_v60  ;;  %v4131_v23 = vsel %vm12444_vm3, 0, %v4129_v13 }
 0x408   : > { %vm7450_vm6 = vcmp.lt.s32.totalorder %v7449_v44, 0  ;;  %vm4203_vm8 = vc.u32 %v12440_v38, %v12420_v33  ;;  %v4260_v52 = vadd.s32 1, %v7455_v43  ;;  %v4257_v5 = vand.u32 8388607, %v4250_v28 }
 0x409   : > { %v8020_v39 = vpop.eup %8019  ;;  %v4113_v26 = vsel %vm7450_vm6, 0, %v7449_v44  ;;  %v4205_v18 = vsel %vm4203_vm8, %v4204_v8, %v12421_v63  ;;  %v4357_v37 = vand.u32 2139095040, %v15406_v19  ;;  %v4135_v4 = vadd.s32 3, %v4131_v23 }
 0x40a   : > { %v8022_v50 = vpop.eup %8021  ;;  %v4038_v1 = vxor.u32 2147483648, %v8020_v39  ;;  %v4114_v16 = vsub.s32 32, %v4113_v26  ;;  %v4115_v3 = vshll.u32 %v12405_v27, %v4113_v26  ;;  %v4118_v7 = vsub.s32 4294967266, %v4113_v26 }
 0x40b   : > { %v4035_v54 = vxor.u32 2147483648, %v8022_v50  ;;  %vm4261_vm9 = vcmp.gt.s32.totalorder %v4260_v52, 0  ;;  %v4206_v30 = vadd.s32 %v4205_v18, %v4201_v31  ;;  %v4258_v49 = vor.u32 8388608, %v4257_v5 }
 0x40c   : > { %v4039_v57 = vsel %vm4037_vm7, %v4038_v1, %v8022_v50  ;;  %v4116_v14 = vshrl.u32 %v4098_v48, %v4114_v16  ;;  %v4119_v51 = vadd.s32 127, %v4118_v7  ;;  %v4262_v17 = vsel %vm4261_vm9, %v4260_v52, 0 }
 0x40d   : > { %v4036_v61 = vsel %vm4034_vm5, %v8020_v39, %v4035_v54  ;;  %v4207_v6 = vadd.s32 536870912, %v4206_v30  ;;  %v4264_v29 = vand.u32 31, %v4262_v17  ;;  %v4263_v63 = vshrl.u32 %v4262_v17, 5 }
 0x40e   : > { %v4040_v0 = vsel %vm4033_vm4, %v4036_v61, %v4039_v57  ;;  %v4117_v27 = vor.u32 %v4116_v14, %v4115_v3  ;;  %v4120_v22 = vshll.u32 %v4119_v51, 23  ;;  %v4354_v45 = vand.u32 2147483647, %v15406_v19 }
 0x40f   : > { %v4041_v20 = vsel %vm4030_vm1, nan, %v4040_v0  ;;  %v12469_v42 = vshrl.u32 %v4207_v6, 30  ;;  %v4265_v59 = vsub.s32 32, %v4264_v29  ;;  %v4358_v12 = vshrl.u32 %v4357_v37, 23 }
 0x410   : > { %v4121_v40 = vor.u32 4788187, %v4120_v22  ;;  %v4124_v15 = vcvt.s32.f32 %v4117_v27  ;;  %7195 = vst [vmem:[%s9727_s11 + $0x108] sm:$0xff] %v4041_v20  ;;  %v4267_v41 = vshll.u32 %v15318_v46, %v4264_v29  ;;  %v4270_v24 = vshll.u32 %v15310_v10, %v4264_v29 }
 0x411   : > { %v4209_v58 = vshll.u32 %v12469_v42, 30  ;;  %v4268_v47 = vshrl.u32 %v15310_v10, %v4265_v59  ;;  %v4271_v32 = vshrl.u32 %v15311_v21, %v4265_v59  ;;  %v4273_v60 = vshll.u32 %v15311_v21, %v4264_v29 }
 0x412   : > { %v4122_v9 = vand.u32 2147483647, %v4121_v40  ;;  %v4274_v62 = vshrl.u32 %v15312_v11, %v4265_v59  ;;  %v4276_v13 = vshll.u32 %v15312_v11, %v4264_v29  ;;  %v4277_v8 = vshrl.u32 %v15313_v53, %v4265_v59 }
 0x413   : > { %v12480_v44 = vsub.s32 %v4206_v30, %v4209_v58  ;;  %v12484_v43 = vand.u32 3, %v4135_v4  ;;  %v12486_v48 = vshll.u32 %v4258_v49, 8  ;;  %v7459_v31 = vadd.s32 4294967169, %v4358_v12 }
 0x414   : > { %v4125_v36 = vmul.f32 %v4124_v15, %v4122_v9  ;;  %v12490_v39 = vand.u32 8388607, %v4354_v45  ;;  %v4266_v52 = vshrl.u32 %v15318_v46, %v4265_v59  ;;  %v4269_v50 = vor.u32 %v4268_v47, %v4267_v41 }
 0x415   : > { %v4212_v23 = vsub.s32 0, %v12480_v44  ;;  %v4272_v1 = vor.u32 %v4271_v32, %v4270_v24  ;;  %v4275_v16 = vor.u32 %v4274_v62, %v4273_v60  ;;  %v4279_v3 = vshll.u32 %v15313_v53, %v4264_v29 }
 0x416   : > { %v4126_v26 = vxor.u32 2147483648, %v4125_v36  ;;  %v4280_v7 = vshrl.u32 %v15314_v35, %v4265_v59  ;;  %v4278_v5 = vor.u32 %v4277_v8, %v4276_v13  ;;  %vm4282_vm12 = vcmp.lt.s32.totalorder %v4263_v63, 1 }
 0x417   : > { %v7452_v18 = vmin.u32 %v4212_v23, %v12480_v44  ;;  %vm4285_vm10 = vcmp.lt.s32.totalorder %v4263_v63, 4  ;;  %v4364_v51 = vadd.s32 1, %v7459_v31  ;;  %vm4283_vm11 = vcmp.lt.s32.totalorder %v4263_v63, 2 }
 0x418   : > { %v4127_v54 = vsel %vm4044_vm2, %v4126_v26, %v4125_v36  ;;  %v4281_v14 = vor.u32 %v4280_v7, %v4279_v3  ;;  %vm4284_vm13 = vcmp.lt.s32.totalorder %v4263_v63, 3  ;;  %v4286_v61 = vsel %vm4282_vm12, %v4266_v52, %v4269_v50 }
 0x419   : > { %v4130_v57 = vsel %vm12444_vm3, %v15397_v25, %v4127_v54  ;;  %v4214_v30 = vclz %v7452_v18  ;;  %v4287_v17 = vsel %vm4285_vm10, %v4275_v16, 2102212464  ;;  %v4290_v37 = vsel %vm4282_vm12, %v4269_v50, %v4272_v1 }
 0x41a   : > { %8023 = vcosq.f32 %v4130_v57  ;;  %v4288_v27 = vsel %vm4284_vm13, %v4272_v1, %v4287_v17  ;;  %v4291_v56 = vsel %vm4285_vm10, %v4278_v5, 920167782  ;;  %v4294_v22 = vsel %vm4282_vm12, %v4272_v1, %v4275_v16 }
 0x41b   : > { %8025 = vsinq.f32 %v4130_v57  ;;  %v7453_v0 = vadd.s32 4294967294, %v4214_v30  ;;  %vm4138_vm15 = vcmp.eq.s32.totalorder %v12484_v43, 0  ;;  %v4202_v6 = vadd.s32 %v12420_v33, %v12440_v38 }
 0x41c   : > { %v4292_v20 = vsel %vm4284_vm13, %v4275_v16, %v4291_v56  ;;  %v4295_v4 = vsel %vm4285_vm10, %v4281_v14, 1326507024  ;;  %vm4365_vm14 = vcmp.gt.s32.totalorder %v4364_v51, 0  ;;  %vm4137_vm0 = vcmp.lt.s32.totalorder %v12484_v43, 2 }
 0x41d   : > { %vm7454_vm1 = vcmp.lt.s32.totalorder %v7453_v0, 0  ;;  %v4289_v29 = vsel %vm4283_vm11, %v4286_v61, %v4288_v27  ;;  %v4293_v40 = vsel %vm4283_vm11, %v4290_v37, %v4292_v20  ;;  %v4296_v15 = vsel %vm4284_vm13, %v4278_v5, %v4295_v4 }
 0x41e   : > { %vm4134_vm2 = vweird.f32 %v15397_v25  ;;  %v4217_v49 = vsel %vm7454_vm1, 0, %v7453_v0  ;;  %v4297_v59 = vsel %vm4283_vm11, %v4294_v22, %v4296_v15  ;;  %vm4148_vm3 = vcmp.lt.s32.totalorder %v15400_v34, 0 }
 0x41f   : > { %v12520_v33 = vmul.u32.u64.low %v12486_v48, %v4293_v40  ;;  %v12521_v38 = vmul.u32.u64.high %v12486_v48, %v4293_v40, %v12520_v33  ;;  %v4218_v12 = vsub.s32 32, %v4217_v49  ;;  %v4219_v9 = vshll.u32 %v12480_v44, %v4217_v49 }
 0x420   : > { %v4222_v58 = vsub.s32 4294967266, %v4217_v49  ;;  %v4366_v41 = vsel %vm4365_vm14, %v4364_v51, 0  ;;  %vm4141_vm4 = vcmp.eq.s32.totalorder %v12484_v43, 2  ;;  %v4232_v62 = vsub.s32 4, %v12469_v42 }
 0x421   : > { %v12528_v24 = vmul.u32.u64.low %v12486_v48, %v4297_v59  ;;  %v12529_v47 = vmul.u32.u64.high %v12486_v48, %v4297_v59, %v12528_v24  ;;  %v4368_v63 = vand.u32 31, %v4366_v41  ;;  %v4220_v32 = vshrl.u32 %v4202_v6, %v4218_v12 }
 0x422   : > { %v4223_v60 = vadd.s32 127, %v4222_v58  ;;  %v4362_v36 = vor.u32 8388608, %v12490_v39  ;;  %v4305_v13 = vmul.u32 %v12486_v48, %v4289_v29  ;;  %v4308_v8 = vadd.s32 1, %v12521_v38 }
 0x423   : > { %v12535_v44 = vshrl.u32 %v4366_v41, 5  ;;  %v4369_v31 = vsub.s32 32, %v4368_v63  ;;  %vm12539_vm5 = vcmp.le.f32.partialorder %v4146_v2, 0.7853982  ;;  %v4221_v52 = vor.u32 %v4220_v32, %v4219_v9 }
 0x424   : > { %v8024_v26 = vpop.eup %8023  ;;  %v4224_v50 = vshll.u32 %v4223_v60, 23  ;;  %v4371_v1 = vshll.u32 %v15318_v46, %v4368_v63  ;;  %v4374_v39 = vshll.u32 %v15310_v10, %v4368_v63  ;;  %vm4307_vm7 = vc.u32 %v12529_v47, %v12520_v33 }
 0x425   : > { %v8026_v16 = vpop.eup %8025  ;;  %v4142_v48 = vxor.u32 2147483648, %v8024_v26  ;;  %v4377_v3 = vshll.u32 %v15311_v21, %v4368_v63  ;;  %v4380_v7 = vshll.u32 %v15312_v11, %v4368_v63  ;;  %v4228_v18 = vcvt.s32.f32 %v4221_v52 }
 0x426   : > { %v4139_v54 = vxor.u32 2147483648, %v8026_v16  ;;  %v4225_v2 = vor.u32 4788187, %v4224_v50  ;;  %v4309_v5 = vsel %vm4307_vm7, %v4308_v8, %v12521_v38  ;;  %v4372_v51 = vshrl.u32 %v15310_v10, %v4369_v31 }
 0x427   : > { %v4143_v57 = vsel %vm4141_vm4, %v4142_v48, %v8026_v16  ;;  %v4310_v14 = vadd.s32 %v4309_v5, %v4305_v13  ;;  %v4375_v30 = vshrl.u32 %v15311_v21, %v4369_v31  ;;  %v4378_v37 = vshrl.u32 %v15312_v11, %v4369_v31 }
 0x428   : > { %v4140_v61 = vsel %vm4138_vm15, %v8024_v26, %v4139_v54  ;;  %v4226_v17 = vand.u32 2147483647, %v4225_v2  ;;  %v4381_v0 = vshrl.u32 %v15313_v53, %v4369_v31  ;;  %v4233_v56 = vsel %vm4148_vm3, %v4232_v62, %v12469_v42  ;;  %v15409_v2 = vld [vmem:[#allocation27_spill] sm:$0xff] }
 0x429   : > { %v4144_v27 = vsel %vm4137_vm0, %v4140_v61, %v4143_v57  ;;  %v4311_v22 = vadd.s32 536870912, %v4310_v14  ;;  %v4373_v6 = vor.u32 %v4372_v51, %v4371_v1  ;;  %v4376_v29 = vor.u32 %v4375_v30, %v4374_v39 }
 0x42a   : > { %v4145_v20 = vsel %vm4134_vm2, nan, %v4144_v27  ;;  %v4229_v4 = vmul.f32 %v4228_v18, %v4226_v17  ;;  %v4382_v40 = vor.u32 %v4381_v0, %v4380_v7  ;;  %v4383_v49 = vshll.u32 %v15313_v53, %v4368_v63 }
 0x42b   : > { %v4312_v15 = vshrl.u32 %v4311_v22, 30  ;;  %v4384_v59 = vshrl.u32 %v15314_v35, %v4369_v31  ;;  %vm4386_vm6 = vcmp.lt.s32.totalorder %v12535_v44, 1  ;;  %7196 = vst [vmem:[%s9727_s11 + $0x110] sm:$0xff] %v4145_v20  ;;  %v4379_v38 = vor.u32 %v4378_v37, %v4377_v3 }
 0x42c   : > { %v4230_v43 = vxor.u32 2147483648, %v4229_v4  ;;  %vm4389_vm8 = vcmp.lt.s32.totalorder %v12535_v44, 4  ;;  %v12570_v42 = vshll.u32 %v4362_v36, 8  ;;  %v4235_v25 = vsel %vm12539_vm5, 0, %v4233_v56 }
 0x42d   : > { %v4313_v12 = vshll.u32 %v4312_v15, 30  ;;  %vm4387_vm9 = vcmp.lt.s32.totalorder %v12535_v44, 2  ;;  %vm4388_vm12 = vcmp.lt.s32.totalorder %v12535_v44, 3  ;;  %v4385_v58 = vor.u32 %v4384_v59, %v4383_v49 }
 0x42e   : > { %v4231_v9 = vsel %vm4148_vm3, %v4230_v43, %v4229_v4  ;;  %v4394_v41 = vsel %vm4386_vm6, %v4373_v6, %v4376_v29  ;;  %v4395_v24 = vsel %vm4389_vm8, %v4382_v40, 920167782  ;;  %v4370_v60 = vshrl.u32 %v15318_v46, %v4369_v31 }
 0x42f   : > { %v4234_v63 = vsel %vm12539_vm5, %v15400_v34, %v4231_v9  ;;  %v12585_v32 = vsub.s32 %v4310_v14, %v4313_v12  ;;  %v4239_v62 = vadd.s32 3, %v4235_v25  ;;  %v4391_v36 = vsel %vm4389_vm8, %v4379_v38, 2102212464 }
 0x430   : > { %8027 = vcosq.f32 %v4234_v63  ;;  %v4396_v13 = vsel %vm4388_vm12, %v4379_v38, %v4395_v24  ;;  %v4336_v26 = vsub.s32 4, %v4312_v15  ;;  %v4398_v52 = vsel %vm4386_vm6, %v4376_v29, %v4379_v38 }
 0x431   : > { %8029 = vsinq.f32 %v4234_v63  ;;  %v4316_v8 = vsub.s32 0, %v12585_v32  ;;  %v4397_v23 = vsel %vm4387_vm9, %v4394_v41, %v4396_v13  ;;  %v4399_v31 = vsel %vm4389_vm8, %v4385_v58, 1326507024  ;;  %v15412_v41 = vld [vmem:[#allocation32_spill] sm:$0xff] }
 0x432   : > { %v12600_v50 = vmul.u32.u64.low %v12570_v42, %v4397_v23  ;;  %v12601_v1 = vmul.u32.u64.high %v12570_v42, %v4397_v23, %v12600_v50  ;;  %v4390_v16 = vsel %vm4386_vm6, %v4370_v60, %v4373_v6  ;;  %v4392_v48 = vsel %vm4388_vm12, %v4376_v29, %v4391_v36 }
 0x433   : > { %v7456_v39 = vmin.u32 %v4316_v8, %v12585_v32  ;;  %v4400_v3 = vsel %vm4388_vm12, %v4382_v40, %v4399_v31  ;;  %v4240_v7 = vand.u32 3, %v4239_v62  ;;  %v4461_v18 = vand.u32 2139095040, %v15409_v2 }
 0x434   : > { %v4401_v54 = vsel %vm4387_vm9, %v4398_v52, %v4400_v3  ;;  %vm4238_vm10 = vweird.f32 %v15400_v34  ;;  %vm4252_vm11 = vcmp.lt.s32.totalorder %v15403_v55, 0  ;;  %v4393_v57 = vsel %vm4387_vm9, %v4390_v16, %v4392_v48 }
 0x435   : > { %v4318_v5 = vclz %v7456_v39  ;;  %v12619_v14 = vmul.u32.u64.low %v12570_v42, %v4401_v54  ;;  %v12620_v51 = vmul.u32.u64.high %v12570_v42, %v4401_v54, %v12619_v14  ;;  %v4462_v30 = vshrl.u32 %v4461_v18, 23 }
 0x436   : > { %vm12624_vm13 = vcmp.le.f32.partialorder %v4250_v28, 0.7853982  ;;  %v4337_v37 = vsel %vm4252_vm11, %v4336_v26, %v4312_v15  ;;  %v4458_v0 = vand.u32 2147483647, %v15409_v2  ;;  %vm4241_vm15 = vcmp.lt.s32.totalorder %v4240_v7, 2 }
 0x437   : > { %v7457_v17 = vadd.s32 4294967294, %v4318_v5  ;;  %vm4242_vm14 = vcmp.eq.s32.totalorder %v4240_v7, 0  ;;  %v4412_v44 = vadd.s32 1, %v12601_v1  ;;  %v7463_v27 = vadd.s32 4294967169, %v4462_v30 }
 0x438   : > { %vm4245_vm0 = vcmp.eq.s32.totalorder %v4240_v7, 2  ;;  %v4306_v56 = vadd.s32 %v12520_v33, %v12529_v47  ;;  %v4409_v28 = vmul.u32 %v12570_v42, %v4393_v57  ;;  %v4339_v20 = vsel %vm12624_vm13, 0, %v4337_v37 }
 0x439   : > { %vm7458_vm1 = vcmp.lt.s32.totalorder %v7457_v17, 0  ;;  %vm4411_vm2 = vc.u32 %v12620_v51, %v12600_v50  ;;  %v4468_v4 = vadd.s32 1, %v7463_v27  ;;  %v4465_v47 = vand.u32 8388607, %v4458_v0 }
 0x43a   : > { %v8028_v22 = vpop.eup %8027  ;;  %v4321_v6 = vsel %vm7458_vm1, 0, %v7457_v17  ;;  %v4413_v33 = vsel %vm4411_vm2, %v4412_v44, %v12601_v1  ;;  %v4565_v24 = vand.u32 2139095040, %v15412_v41  ;;  %v4343_v13 = vadd.s32 3, %v4339_v20 }
 0x43b   : > { %v8030_v29 = vpop.eup %8029  ;;  %v4246_v40 = vxor.u32 2147483648, %v8028_v22  ;;  %v4322_v15 = vsub.s32 32, %v4321_v6  ;;  %v4323_v49 = vshll.u32 %v12585_v32, %v4321_v6  ;;  %v4326_v59 = vsub.s32 4294967266, %v4321_v6 }
 0x43c   : > { %v4243_v43 = vxor.u32 2147483648, %v8030_v29  ;;  %vm4469_vm3 = vcmp.gt.s32.totalorder %v4468_v4, 0  ;;  %v4414_v12 = vadd.s32 %v4413_v33, %v4409_v28  ;;  %v4466_v31 = vor.u32 8388608, %v4465_v47 }
 0x43d   : > { %v4247_v38 = vsel %vm4245_vm0, %v4246_v40, %v8030_v29  ;;  %v4324_v42 = vshrl.u32 %v4306_v56, %v4322_v15  ;;  %v4327_v25 = vadd.s32 127, %v4326_v59  ;;  %v4470_v58 = vsel %vm4469_vm3, %v4468_v4, 0 }
 0x43e   : > { %v4244_v9 = vsel %vm4242_vm14, %v8028_v22, %v4243_v43  ;;  %v4415_v62 = vadd.s32 536870912, %v4414_v12  ;;  %v4472_v8 = vand.u32 31, %v4470_v58  ;;  %v4471_v1 = vshrl.u32 %v4470_v58, 5 }
 0x43f   : > { %v4248_v63 = vsel %vm4241_vm15, %v4244_v9, %v4247_v38  ;;  %v4325_v32 = vor.u32 %v4324_v42, %v4323_v49  ;;  %v4328_v60 = vshll.u32 %v4327_v25, 23  ;;  %v4562_v16 = vand.u32 2147483647, %v15412_v41 }
 0x440   : > { %v4249_v36 = vsel %vm4238_vm10, nan, %v4248_v63  ;;  %v12649_v52 = vshrl.u32 %v4415_v62, 30  ;;  %v4473_v39 = vsub.s32 32, %v4472_v8  ;;  %v4566_v48 = vshrl.u32 %v4565_v24, 23 }
 0x441   : > { %v4329_v26 = vor.u32 4788187, %v4328_v60  ;;  %v4332_v23 = vcvt.s32.f32 %v4325_v32  ;;  %7197 = vst [vmem:[%s9727_s11 + $0x118] sm:$0xff] %v4249_v36  ;;  %v4475_v54 = vshll.u32 %v15318_v46, %v4472_v8  ;;  %v4478_v34 = vshll.u32 %v15310_v10, %v4472_v8 }
 0x442   : > { %v4417_v7 = vshll.u32 %v12649_v52, 30  ;;  %v4476_v18 = vshrl.u32 %v15310_v10, %v4473_v39  ;;  %v4479_v5 = vshrl.u32 %v15311_v21, %v4473_v39  ;;  %v4481_v57 = vshll.u32 %v15311_v21, %v4472_v8 }
 0x443   : > { %v4330_v3 = vand.u32 2147483647, %v4329_v26  ;;  %v4482_v14 = vshrl.u32 %v15312_v11, %v4473_v39  ;;  %v4484_v37 = vshll.u32 %v15312_v11, %v4472_v8  ;;  %v4485_v44 = vshrl.u32 %v15313_v53, %v4473_v39 }
 0x444   : > { %v12660_v17 = vsub.s32 %v4414_v12, %v4417_v7  ;;  %v12664_v27 = vand.u32 3, %v4343_v13  ;;  %v12666_v56 = vshll.u32 %v4466_v31, 8  ;;  %v7467_v28 = vadd.s32 4294967169, %v4566_v48 }
 0x445   : > { %v4333_v30 = vmul.f32 %v4332_v23, %v4330_v3  ;;  %v12670_v22 = vand.u32 8388607, %v4562_v16  ;;  %v4474_v4 = vshrl.u32 %v15318_v46, %v4473_v39  ;;  %v4477_v29 = vor.u32 %v4476_v18, %v4475_v54 }
 0x446   : > { %v4420_v20 = vsub.s32 0, %v12660_v17  ;;  %v4480_v40 = vor.u32 %v4479_v5, %v4478_v34  ;;  %v4483_v15 = vor.u32 %v4482_v14, %v4481_v57  ;;  %v4487_v49 = vshll.u32 %v15313_v53, %v4472_v8 }
 0x447   : > { %v4334_v6 = vxor.u32 2147483648, %v4333_v30  ;;  %v4488_v59 = vshrl.u32 %v15314_v35, %v4473_v39  ;;  %v4486_v47 = vor.u32 %v4485_v44, %v4484_v37  ;;  %vm4490_vm4 = vcmp.lt.s32.totalorder %v4471_v1, 1 }
 0x448   : > { %v7460_v33 = vmin.u32 %v4420_v20, %v12660_v17  ;;  %vm4493_vm5 = vcmp.lt.s32.totalorder %v4471_v1, 4  ;;  %v4572_v25 = vadd.s32 1, %v7467_v28  ;;  %vm4491_vm7 = vcmp.lt.s32.totalorder %v4471_v1, 2 }
 0x449   : > { %v4335_v43 = vsel %vm4252_vm11, %v4334_v6, %v4333_v30  ;;  %v4489_v42 = vor.u32 %v4488_v59, %v4487_v49  ;;  %vm4492_vm6 = vcmp.lt.s32.totalorder %v4471_v1, 3  ;;  %v4494_v9 = vsel %vm4490_vm4, %v4474_v4, %v4477_v29 }
 0x44a   : > { %v4338_v38 = vsel %vm12624_vm13, %v15403_v55, %v4335_v43  ;;  %v4422_v12 = vclz %v7460_v33  ;;  %v4495_v58 = vsel %vm4493_vm5, %v4483_v15, 2102212464  ;;  %v4498_v24 = vsel %vm4490_vm4, %v4477_v29, %v4480_v40 }
 0x44b   : > { %8031 = vcosq.f32 %v4338_v38  ;;  %v4496_v32 = vsel %vm4492_vm6, %v4480_v40, %v4495_v58  ;;  %v4499_v61 = vsel %vm4493_vm5, %v4486_v47, 920167782  ;;  %v4502_v60 = vsel %vm4490_vm4, %v4480_v40, %v4483_v15 }
 0x44c   : > { %8033 = vsinq.f32 %v4338_v38  ;;  %v7461_v63 = vadd.s32 4294967294, %v4422_v12  ;;  %vm4346_vm8 = vcmp.eq.s32.totalorder %v12664_v27, 0  ;;  %v4410_v62 = vadd.s32 %v12600_v50, %v12620_v51 }
 0x44d   : > { %v4500_v36 = vsel %vm4492_vm6, %v4483_v15, %v4499_v61  ;;  %v4503_v13 = vsel %vm4493_vm5, %v4489_v42, 1326507024  ;;  %vm4573_vm9 = vcmp.gt.s32.totalorder %v4572_v25, 0  ;;  %vm4345_vm12 = vcmp.lt.s32.totalorder %v12664_v27, 2 }
 0x44e   : > { %vm7462_vm10 = vcmp.lt.s32.totalorder %v7461_v63, 0  ;;  %v4497_v8 = vsel %vm4491_vm7, %v4494_v9, %v4496_v32  ;;  %v4501_v26 = vsel %vm4491_vm7, %v4498_v24, %v4500_v36  ;;  %v4504_v23 = vsel %vm4492_vm6, %v4486_v47, %v4503_v13 }
 0x44f   : > { %vm4342_vm11 = vweird.f32 %v15403_v55  ;;  %v4425_v31 = vsel %vm7462_vm10, 0, %v7461_v63  ;;  %v4505_v39 = vsel %vm4491_vm7, %v4502_v60, %v4504_v23  ;;  %vm4356_vm13 = vcmp.lt.s32.totalorder %v15406_v19, 0 }
 0x450   : > { %v12700_v50 = vmul.u32.u64.low %v12666_v56, %v4501_v26  ;;  %v12701_v51 = vmul.u32.u64.high %v12666_v56, %v4501_v26, %v12700_v50  ;;  %v4426_v48 = vsub.s32 32, %v4425_v31  ;;  %v4427_v3 = vshll.u32 %v12660_v17, %v4425_v31 }
 0x451   : > { %v4430_v7 = vsub.s32 4294967266, %v4425_v31  ;;  %v4574_v54 = vsel %vm4573_vm9, %v4572_v25, 0  ;;  %vm4349_vm15 = vcmp.eq.s32.totalorder %v12664_v27, 2  ;;  %v4440_v14 = vsub.s32 4, %v12649_v52 }
 0x452   : > { %v12708_v34 = vmul.u32.u64.low %v12666_v56, %v4505_v39  ;;  %v12709_v18 = vmul.u32.u64.high %v12666_v56, %v4505_v39, %v12708_v34  ;;  %v4576_v1 = vand.u32 31, %v4574_v54  ;;  %v4428_v5 = vshrl.u32 %v4410_v62, %v4426_v48 }
 0x453   : > { %v4431_v57 = vadd.s32 127, %v4430_v7  ;;  %v4570_v30 = vor.u32 8388608, %v12670_v22  ;;  %v4513_v37 = vmul.u32 %v12666_v56, %v4497_v8  ;;  %v4516_v44 = vadd.s32 1, %v12701_v51 }
 0x454   : > { %v12715_v17 = vshrl.u32 %v4574_v54, 5  ;;  %v4577_v28 = vsub.s32 32, %v4576_v1  ;;  %vm12719_vm14 = vcmp.le.f32.partialorder %v4354_v45, 0.7853982  ;;  %v4429_v4 = vor.u32 %v4428_v5, %v4427_v3 }
 0x455   : > { %v8032_v6 = vpop.eup %8031  ;;  %v4432_v29 = vshll.u32 %v4431_v57, 23  ;;  %v4579_v40 = vshll.u32 %v15318_v46, %v4576_v1  ;;  %v4582_v22 = vshll.u32 %v15310_v10, %v4576_v1  ;;  %vm4515_vm0 = vc.u32 %v12709_v18, %v12700_v50 }
 0x456   : > { %v8034_v15 = vpop.eup %8033  ;;  %v4350_v56 = vxor.u32 2147483648, %v8032_v6  ;;  %v4585_v49 = vshll.u32 %v15311_v21, %v4576_v1  ;;  %v4588_v59 = vshll.u32 %v15312_v11, %v4576_v1  ;;  %v4436_v33 = vcvt.s32.f32 %v4429_v4 }
 0x457   : > { %v4347_v43 = vxor.u32 2147483648, %v8034_v15  ;;  %v4433_v45 = vor.u32 4788187, %v4432_v29  ;;  %v4517_v47 = vsel %vm4515_vm0, %v4516_v44, %v12701_v51  ;;  %v4580_v25 = vshrl.u32 %v15310_v10, %v4577_v28 }
 0x458   : > { %v4351_v38 = vsel %vm4349_vm15, %v4350_v56, %v8034_v15  ;;  %v4518_v42 = vadd.s32 %v4517_v47, %v4513_v37  ;;  %v4583_v12 = vshrl.u32 %v15311_v21, %v4577_v28  ;;  %v4586_v24 = vshrl.u32 %v15312_v11, %v4577_v28 }
 0x459   : > { %v4348_v9 = vsel %vm4346_vm8, %v8032_v6, %v4347_v43  ;;  %v4434_v58 = vand.u32 2147483647, %v4433_v45  ;;  %v4589_v63 = vshrl.u32 %v15313_v53, %v4577_v28  ;;  %v4441_v61 = vsel %vm4356_vm13, %v4440_v14, %v12649_v52  ;;  %v15415_v45 = vld [vmem:[#allocation28_spill] sm:$0xff] }
 0x45a   : > { %v4352_v32 = vsel %vm4345_vm12, %v4348_v9, %v4351_v38  ;;  %v4519_v60 = vadd.s32 536870912, %v4518_v42  ;;  %v4581_v62 = vor.u32 %v4580_v25, %v4579_v40  ;;  %v4584_v8 = vor.u32 %v4583_v12, %v4582_v22 }
 0x45b   : > { %v4353_v36 = vsel %vm4342_vm11, nan, %v4352_v32  ;;  %v4437_v13 = vmul.f32 %v4436_v33, %v4434_v58  ;;  %v4590_v26 = vor.u32 %v4589_v63, %v4588_v59  ;;  %v4591_v31 = vshll.u32 %v15313_v53, %v4576_v1 }
 0x45c   : > { %v4520_v23 = vshrl.u32 %v4519_v60, 30  ;;  %v4592_v39 = vshrl.u32 %v15314_v35, %v4577_v28  ;;  %vm4594_vm1 = vcmp.lt.s32.totalorder %v12715_v17, 1  ;;  %7198 = vst [vmem:[%s9727_s11 + $0x120] sm:$0xff] %v4353_v36  ;;  %v4587_v51 = vor.u32 %v4586_v24, %v4585_v49 }
 0x45d   : > { %v4438_v27 = vxor.u32 2147483648, %v4437_v13  ;;  %vm4597_vm2 = vcmp.lt.s32.totalorder %v12715_v17, 4  ;;  %v12750_v52 = vshll.u32 %v4570_v30, 8  ;;  %v4443_v55 = vsel %vm12719_vm14, 0, %v4441_v61 }
 0x45e   : > { %v4521_v48 = vshll.u32 %v4520_v23, 30  ;;  %vm4595_vm3 = vcmp.lt.s32.totalorder %v12715_v17, 2  ;;  %vm4596_vm4 = vcmp.lt.s32.totalorder %v12715_v17, 3  ;;  %v4593_v7 = vor.u32 %v4592_v39, %v4591_v31 }
 0x45f   : > { %v4439_v3 = vsel %vm4356_vm13, %v4438_v27, %v4437_v13  ;;  %v4602_v54 = vsel %vm4594_vm1, %v4581_v62, %v4584_v8  ;;  %v4603_v34 = vsel %vm4597_vm2, %v4590_v26, 920167782  ;;  %v4578_v57 = vshrl.u32 %v15318_v46, %v4577_v28 }
 0x460   : > { %v4442_v1 = vsel %vm12719_vm14, %v15406_v19, %v4439_v3  ;;  %v12765_v5 = vsub.s32 %v4518_v42, %v4521_v48  ;;  %v4447_v14 = vadd.s32 3, %v4443_v55  ;;  %v4599_v30 = vsel %vm4597_vm2, %v4587_v51, 2102212464 }
 0x461   : > { %8035 = vcosq.f32 %v4442_v1  ;;  %v4604_v37 = vsel %vm4596_vm4, %v4587_v51, %v4603_v34  ;;  %v4544_v6 = vsub.s32 4, %v4520_v23  ;;  %v4606_v4 = vsel %vm4594_vm1, %v4584_v8, %v4587_v51 }
 0x462   : > { %8037 = vsinq.f32 %v4442_v1  ;;  %v4524_v44 = vsub.s32 0, %v12765_v5  ;;  %v4605_v20 = vsel %vm4595_vm3, %v4602_v54, %v4604_v37  ;;  %v4607_v28 = vsel %vm4597_vm2, %v4593_v7, 1326507024  ;;  %v15418_v54 = vld [vmem:[#allocation33_spill] sm:$0xff] }
 0x463   : > { %v12780_v29 = vmul.u32.u64.low %v12750_v52, %v4605_v20  ;;  %v12781_v40 = vmul.u32.u64.high %v12750_v52, %v4605_v20, %v12780_v29  ;;  %v4598_v15 = vsel %vm4594_vm1, %v4578_v57, %v4581_v62  ;;  %v4600_v56 = vsel %vm4596_vm4, %v4584_v8, %v4599_v30 }
 0x464   : > { %v7464_v22 = vmin.u32 %v4524_v44, %v12765_v5  ;;  %v4608_v49 = vsel %vm4596_vm4, %v4590_v26, %v4607_v28  ;;  %v4448_v59 = vand.u32 3, %v4447_v14  ;;  %v4669_v33 = vand.u32 2139095040, %v15415_v45 }
 0x465   : > { %v4609_v43 = vsel %vm4595_vm3, %v4606_v4, %v4608_v49  ;;  %vm4446_vm5 = vweird.f32 %v15406_v19  ;;  %vm4460_vm7 = vcmp.lt.s32.totalorder %v15409_v2, 0  ;;  %v4601_v38 = vsel %vm4595_vm3, %v4598_v15, %v4600_v56 }
 0x466   : > { %v4526_v47 = vclz %v7464_v22  ;;  %v12799_v42 = vmul.u32.u64.low %v12750_v52, %v4609_v43  ;;  %v12800_v25 = vmul.u32.u64.high %v12750_v52, %v4609_v43, %v12799_v42  ;;  %v4670_v12 = vshrl.u32 %v4669_v33, 23 }
 0x467   : > { %vm12804_vm6 = vcmp.le.f32.partialorder %v4458_v0, 0.7853982  ;;  %v4545_v24 = vsel %vm4460_vm7, %v4544_v6, %v4520_v23  ;;  %v4666_v63 = vand.u32 2147483647, %v15415_v45  ;;  %vm4449_vm8 = vcmp.lt.s32.totalorder %v4448_v59, 2 }
 0x468   : > { %v7465_v58 = vadd.s32 4294967294, %v4526_v47  ;;  %vm4450_vm9 = vcmp.eq.s32.totalorder %v4448_v59, 0  ;;  %v4620_v17 = vadd.s32 1, %v12781_v40  ;;  %v7471_v32 = vadd.s32 4294967169, %v4670_v12 }
 0x469   : > { %vm4453_vm12 = vcmp.eq.s32.totalorder %v4448_v59, 2  ;;  %v4514_v61 = vadd.s32 %v12700_v50, %v12709_v18  ;;  %v4617_v0 = vmul.u32 %v12750_v52, %v4601_v38  ;;  %v4547_v36 = vsel %vm12804_vm6, 0, %v4545_v24 }
 0x46a   : > { %vm7466_vm10 = vcmp.lt.s32.totalorder %v7465_v58, 0  ;;  %vm4619_vm11 = vc.u32 %v12800_v25, %v12780_v29  ;;  %v4676_v13 = vadd.s32 1, %v7471_v32  ;;  %v4673_v18 = vand.u32 8388607, %v4666_v63 }
 0x46b   : > { %v8036_v60 = vpop.eup %8035  ;;  %v4529_v62 = vsel %vm7466_vm10, 0, %v7465_v58  ;;  %v4621_v50 = vsel %vm4619_vm11, %v4620_v17, %v12781_v40  ;;  %v4773_v34 = vand.u32 2139095040, %v15418_v54  ;;  %v4551_v37 = vadd.s32 3, %v4547_v36 }
 0x46c   : > { %v8038_v8 = vpop.eup %8037  ;;  %v4454_v26 = vxor.u32 2147483648, %v8036_v60  ;;  %v4530_v23 = vsub.s32 32, %v4529_v62  ;;  %v4531_v31 = vshll.u32 %v12765_v5, %v4529_v62  ;;  %v4534_v39 = vsub.s32 4294967266, %v4529_v62 }
 0x46d   : > { %v4451_v27 = vxor.u32 2147483648, %v8038_v8  ;;  %vm4677_vm13 = vcmp.gt.s32.totalorder %v4676_v13, 0  ;;  %v4622_v48 = vadd.s32 %v4621_v50, %v4617_v0  ;;  %v4674_v28 = vor.u32 8388608, %v4673_v18 }
 0x46e   : > { %v4455_v51 = vsel %vm4453_vm12, %v4454_v26, %v8038_v8  ;;  %v4532_v52 = vshrl.u32 %v4514_v61, %v4530_v23  ;;  %v4535_v55 = vadd.s32 127, %v4534_v39  ;;  %v4678_v7 = vsel %vm4677_vm13, %v4676_v13, 0 }
 0x46f   : > { %v4452_v3 = vsel %vm4450_vm9, %v8036_v60, %v4451_v27  ;;  %v4623_v14 = vadd.s32 536870912, %v4622_v48  ;;  %v4680_v44 = vand.u32 31, %v4678_v7  ;;  %v4679_v40 = vshrl.u32 %v4678_v7, 5 }
 0x470   : > { %v4456_v1 = vsel %vm4449_vm8, %v4452_v3, %v4455_v51  ;;  %v4533_v5 = vor.u32 %v4532_v52, %v4531_v31  ;;  %v4536_v57 = vshll.u32 %v4535_v55, 23  ;;  %v4770_v15 = vand.u32 2147483647, %v15418_v54 }
 0x471   : > { %v4457_v30 = vsel %vm4446_vm5, nan, %v4456_v1  ;;  %v12829_v4 = vshrl.u32 %v4623_v14, 30  ;;  %v4681_v22 = vsub.s32 32, %v4680_v44  ;;  %v4774_v56 = vshrl.u32 %v4773_v34, 23 }
 0x472   : > { %v4537_v6 = vor.u32 4788187, %v4536_v57  ;;  %v4540_v20 = vcvt.s32.f32 %v4533_v5  ;;  %7199 = vst [vmem:[%s9727_s11 + $0x128] sm:$0xff] %v4457_v30  ;;  %v4683_v43 = vshll.u32 %v15318_v46, %v4680_v44  ;;  %v4686_v19 = vshll.u32 %v15310_v10, %v4680_v44 }
 0x473   : > { %v4625_v59 = vshll.u32 %v12829_v4, 30  ;;  %v4684_v33 = vshrl.u32 %v15310_v10, %v4681_v22  ;;  %v4687_v47 = vshrl.u32 %v15311_v21, %v4681_v22  ;;  %v4689_v38 = vshll.u32 %v15311_v21, %v4680_v44 }
 0x474   : > { %v4538_v49 = vand.u32 2147483647, %v4537_v6  ;;  %v4690_v42 = vshrl.u32 %v15312_v11, %v4681_v22  ;;  %v4692_v24 = vshll.u32 %v15312_v11, %v4680_v44  ;;  %v4693_v17 = vshrl.u32 %v15313_v53, %v4681_v22 }
 0x475   : > { %v12840_v58 = vsub.s32 %v4622_v48, %v4625_v59  ;;  %v12844_v32 = vand.u32 3, %v4551_v37  ;;  %v12846_v61 = vshll.u32 %v4674_v28, 8  ;;  %v7475_v0 = vadd.s32 4294967169, %v4774_v56 }
 0x476   : > { %v4541_v12 = vmul.f32 %v4540_v20, %v4538_v49  ;;  %v12850_v60 = vand.u32 8388607, %v4770_v15  ;;  %v4682_v13 = vshrl.u32 %v15318_v46, %v4681_v22  ;;  %v4685_v8 = vor.u32 %v4684_v33, %v4683_v43 }
 0x477   : > { %v4628_v36 = vsub.s32 0, %v12840_v58  ;;  %v4688_v26 = vor.u32 %v4687_v47, %v4686_v19  ;;  %v4691_v23 = vor.u32 %v4690_v42, %v4689_v38  ;;  %v4695_v31 = vshll.u32 %v15313_v53, %v4680_v44 }
 0x478   : > { %v4542_v62 = vxor.u32 2147483648, %v4541_v12  ;;  %v4696_v39 = vshrl.u32 %v15314_v35, %v4681_v22  ;;  %v4694_v18 = vor.u32 %v4693_v17, %v4692_v24  ;;  %vm4698_vm15 = vcmp.lt.s32.totalorder %v4679_v40, 1 }
 0x479   : > { %v7468_v50 = vmin.u32 %v4628_v36, %v12840_v58  ;;  %vm4701_vm14 = vcmp.lt.s32.totalorder %v4679_v40, 4  ;;  %v4780_v55 = vadd.s32 1, %v7475_v0  ;;  %vm4699_vm0 = vcmp.lt.s32.totalorder %v4679_v40, 2 }
 0x47a   : > { %v4543_v27 = vsel %vm4460_vm7, %v4542_v62, %v4541_v12  ;;  %v4697_v52 = vor.u32 %v4696_v39, %v4695_v31  ;;  %vm4700_vm1 = vcmp.lt.s32.totalorder %v4679_v40, 3  ;;  %v4702_v3 = vsel %vm4698_vm15, %v4682_v13, %v4685_v8 }
 0x47b   : > { %v4546_v51 = vsel %vm12804_vm6, %v15409_v2, %v4543_v27  ;;  %v4630_v48 = vclz %v7468_v50  ;;  %v4703_v7 = vsel %vm4701_vm14, %v4691_v23, 2102212464  ;;  %v4706_v34 = vsel %vm4698_vm15, %v4685_v8, %v4688_v26 }
 0x47c   : > { %8039 = vcosq.f32 %v4546_v51  ;;  %v4704_v5 = vsel %vm4700_vm1, %v4688_v26, %v4703_v7  ;;  %v4707_v9 = vsel %vm4701_vm14, %v4694_v18, 920167782  ;;  %v4710_v57 = vsel %vm4698_vm15, %v4688_v26, %v4691_v23 }
 0x47d   : > { %8041 = vsinq.f32 %v4546_v51  ;;  %v7469_v1 = vadd.s32 4294967294, %v4630_v48  ;;  %vm4554_vm2 = vcmp.eq.s32.totalorder %v12844_v32, 0  ;;  %v4618_v14 = vadd.s32 %v12780_v29, %v12800_v25 }
 0x47e   : > { %v4708_v30 = vsel %vm4700_vm1, %v4691_v23, %v4707_v9  ;;  %v4711_v37 = vsel %vm4701_vm14, %v4697_v52, 1326507024  ;;  %vm4781_vm3 = vcmp.gt.s32.totalorder %v4780_v55, 0  ;;  %vm4553_vm4 = vcmp.lt.s32.totalorder %v12844_v32, 2 }
 0x47f   : > { %vm7470_vm5 = vcmp.lt.s32.totalorder %v7469_v1, 0  ;;  %v4705_v44 = vsel %vm4699_vm0, %v4702_v3, %v4704_v5  ;;  %v4709_v6 = vsel %vm4699_vm0, %v4706_v34, %v4708_v30  ;;  %v4712_v20 = vsel %vm4700_vm1, %v4694_v18, %v4711_v37 }
 0x480   : > { %vm4550_vm7 = vweird.f32 %v15409_v2  ;;  %v4633_v28 = vsel %vm7470_vm5, 0, %v7469_v1  ;;  %v4713_v22 = vsel %vm4699_vm0, %v4710_v57, %v4712_v20  ;;  %vm4564_vm6 = vcmp.lt.s32.totalorder %v15412_v41, 0 }
 0x481   : > { %v12880_v29 = vmul.u32.u64.low %v12846_v61, %v4709_v6  ;;  %v12881_v25 = vmul.u32.u64.high %v12846_v61, %v4709_v6, %v12880_v29  ;;  %v4634_v56 = vsub.s32 32, %v4633_v28  ;;  %v4635_v49 = vshll.u32 %v12840_v58, %v4633_v28 }
 0x482   : > { %v4638_v59 = vsub.s32 4294967266, %v4633_v28  ;;  %v4782_v43 = vsel %vm4781_vm3, %v4780_v55, 0  ;;  %vm4557_vm8 = vcmp.eq.s32.totalorder %v12844_v32, 2  ;;  %v4648_v42 = vsub.s32 4, %v12829_v4 }
 0x483   : > { %v12888_v19 = vmul.u32.u64.low %v12846_v61, %v4713_v22  ;;  %v12889_v33 = vmul.u32.u64.high %v12846_v61, %v4713_v22, %v12888_v19  ;;  %v4784_v40 = vand.u32 31, %v4782_v43  ;;  %v4636_v47 = vshrl.u32 %v4618_v14, %v4634_v56 }
 0x484   : > { %v4639_v38 = vadd.s32 127, %v4638_v59  ;;  %v4778_v12 = vor.u32 8388608, %v12850_v60  ;;  %v4721_v24 = vmul.u32 %v12846_v61, %v4705_v44  ;;  %v4724_v17 = vadd.s32 1, %v12881_v25 }
 0x485   : > { %v12895_v58 = vshrl.u32 %v4782_v43, 5  ;;  %v4785_v0 = vsub.s32 32, %v4784_v40  ;;  %vm12899_vm9 = vcmp.le.f32.partialorder %v4562_v16, 0.7853982  ;;  %v4637_v13 = vor.u32 %v4636_v47, %v4635_v49 }
 0x486   : > { %v8040_v62 = vpop.eup %8039  ;;  %v4640_v8 = vshll.u32 %v4639_v38, 23  ;;  %v4787_v26 = vshll.u32 %v15318_v46, %v4784_v40  ;;  %v4790_v60 = vshll.u32 %v15310_v10, %v4784_v40  ;;  %vm4723_vm12 = vc.u32 %v12889_v33, %v12880_v29 }
 0x487   : > { %v8042_v23 = vpop.eup %8041  ;;  %v4558_v61 = vxor.u32 2147483648, %v8040_v62  ;;  %v4793_v31 = vshll.u32 %v15311_v21, %v4784_v40  ;;  %v4796_v39 = vshll.u32 %v15312_v11, %v4784_v40  ;;  %v4644_v50 = vcvt.s32.f32 %v4637_v13 }
 0x488   : > { %v4555_v27 = vxor.u32 2147483648, %v8042_v23  ;;  %v4641_v16 = vor.u32 4788187, %v4640_v8  ;;  %v4725_v18 = vsel %vm4723_vm12, %v4724_v17, %v12881_v25  ;;  %v4788_v55 = vshrl.u32 %v15310_v10, %v4785_v0 }
 0x489   : > { %v4559_v51 = vsel %vm4557_vm8, %v4558_v61, %v8042_v23  ;;  %v4726_v52 = vadd.s32 %v4725_v18, %v4721_v24  ;;  %v4791_v48 = vshrl.u32 %v15311_v21, %v4785_v0  ;;  %v4794_v34 = vshrl.u32 %v15312_v11, %v4785_v0 }
 0x48a   : > { %v4556_v3 = vsel %vm4554_vm2, %v8040_v62, %v4555_v27  ;;  %v4642_v7 = vand.u32 2147483647, %v4641_v16  ;;  %v4797_v1 = vshrl.u32 %v15313_v53, %v4785_v0  ;;  %v4649_v9 = vsel %vm4564_vm6, %v4648_v42, %v12829_v4  ;;  %v15421_v16 = vld [vmem:[#allocation34_spill] sm:$0xff] }
 0x48b   : > { %v4560_v5 = vsel %vm4553_vm4, %v4556_v3, %v4559_v51  ;;  %v4727_v57 = vadd.s32 536870912, %v4726_v52  ;;  %v4789_v14 = vor.u32 %v4788_v55, %v4787_v26  ;;  %v4792_v44 = vor.u32 %v4791_v48, %v4790_v60 }
 0x48c   : > { %v4561_v30 = vsel %vm4550_vm7, nan, %v4560_v5  ;;  %v4645_v37 = vmul.f32 %v4644_v50, %v4642_v7  ;;  %v4798_v6 = vor.u32 %v4797_v1, %v4796_v39  ;;  %v4799_v28 = vshll.u32 %v15313_v53, %v4784_v40 }
 0x48d   : > { %v4728_v20 = vshrl.u32 %v4727_v57, 30  ;;  %v4800_v22 = vshrl.u32 %v15314_v35, %v4785_v0  ;;  %vm4802_vm10 = vcmp.lt.s32.totalorder %v12895_v58, 1  ;;  %7200 = vst [vmem:[%s9727_s11 + $0x130] sm:$0xff] %v4561_v30  ;;  %v4795_v25 = vor.u32 %v4794_v34, %v4793_v31 }
 0x48e   : > { %v4646_v32 = vxor.u32 2147483648, %v4645_v37  ;;  %vm4805_vm11 = vcmp.lt.s32.totalorder %v12895_v58, 4  ;;  %v12930_v4 = vshll.u32 %v4778_v12, 8  ;;  %v4651_v2 = vsel %vm12899_vm9, 0, %v4649_v9 }
 0x48f   : > { %v4729_v56 = vshll.u32 %v4728_v20, 30  ;;  %vm4803_vm13 = vcmp.lt.s32.totalorder %v12895_v58, 2  ;;  %vm4804_vm15 = vcmp.lt.s32.totalorder %v12895_v58, 3  ;;  %v4801_v59 = vor.u32 %v4800_v22, %v4799_v28 }
 0x490   : > { %v4647_v49 = vsel %vm4564_vm6, %v4646_v32, %v4645_v37  ;;  %v4810_v43 = vsel %vm4802_vm10, %v4789_v14, %v4792_v44  ;;  %v4811_v19 = vsel %vm4805_vm11, %v4798_v6, 920167782  ;;  %v4786_v38 = vshrl.u32 %v15318_v46, %v4785_v0 }
 0x491   : > { %v4650_v40 = vsel %vm12899_vm9, %v15412_v41, %v4647_v49  ;;  %v12945_v47 = vsub.s32 %v4726_v52, %v4729_v56  ;;  %v4655_v42 = vadd.s32 3, %v4651_v2  ;;  %v4807_v12 = vsel %vm4805_vm11, %v4795_v25, 2102212464 }
 0x492   : > { %8043 = vcosq.f32 %v4650_v40  ;;  %v4812_v24 = vsel %vm4804_vm15, %v4795_v25, %v4811_v19  ;;  %v4752_v62 = vsub.s32 4, %v4728_v20  ;;  %v4814_v13 = vsel %vm4802_vm10, %v4792_v44, %v4795_v25 }
 0x493   : > { %8045 = vsinq.f32 %v4650_v40  ;;  %v4732_v17 = vsub.s32 0, %v12945_v47  ;;  %v4813_v36 = vsel %vm4803_vm13, %v4810_v43, %v4812_v24  ;;  %v4815_v0 = vsel %vm4805_vm11, %v4801_v59, 1326507024  ;;  %v15424_v43 = vld [vmem:[#allocation35_spill] sm:$0xff] }
 0x494   : > { %v12960_v8 = vmul.u32.u64.low %v12930_v4, %v4813_v36  ;;  %v12961_v26 = vmul.u32.u64.high %v12930_v4, %v4813_v36, %v12960_v8  ;;  %v4806_v23 = vsel %vm4802_vm10, %v4786_v38, %v4789_v14  ;;  %v4808_v61 = vsel %vm4804_vm15, %v4792_v44, %v4807_v12 }
 0x495   : > { %v7472_v60 = vmin.u32 %v4732_v17, %v12945_v47  ;;  %v4816_v31 = vsel %vm4804_vm15, %v4798_v6, %v4815_v0  ;;  %v4656_v39 = vand.u32 3, %v4655_v42  ;;  %v4877_v50 = vand.u32 2139095040, %v15421_v16 }
 0x496   : > { %v4817_v27 = vsel %vm4803_vm13, %v4814_v13, %v4816_v31  ;;  %vm4654_vm14 = vweird.f32 %v15412_v41  ;;  %vm4668_vm0 = vcmp.lt.s32.totalorder %v15415_v45, 0  ;;  %v4809_v51 = vsel %vm4803_vm13, %v4806_v23, %v4808_v61 }
 0x497   : > { %v4734_v18 = vclz %v7472_v60  ;;  %v12979_v52 = vmul.u32.u64.low %v12930_v4, %v4817_v27  ;;  %v12980_v55 = vmul.u32.u64.high %v12930_v4, %v4817_v27, %v12979_v52  ;;  %v4878_v48 = vshrl.u32 %v4877_v50, 23 }
 0x498   : > { %vm12984_vm1 = vcmp.le.f32.partialorder %v4666_v63, 0.7853982  ;;  %v4753_v34 = vsel %vm4668_vm0, %v4752_v62, %v4728_v20  ;;  %v4874_v1 = vand.u32 2147483647, %v15421_v16  ;;  %vm4657_vm2 = vcmp.lt.s32.totalorder %v4656_v39, 2 }
 0x499   : > { %v7473_v7 = vadd.s32 4294967294, %v4734_v18  ;;  %vm4658_vm3 = vcmp.eq.s32.totalorder %v4656_v39, 0  ;;  %v4828_v58 = vadd.s32 1, %v12961_v26  ;;  %v7479_v5 = vadd.s32 4294967169, %v4878_v48 }
 0x49a   : > { %vm4661_vm4 = vcmp.eq.s32.totalorder %v4656_v39, 2  ;;  %v4722_v9 = vadd.s32 %v12880_v29, %v12889_v33  ;;  %v4825_v63 = vmul.u32 %v12930_v4, %v4809_v51  ;;  %v4755_v30 = vsel %vm12984_vm1, 0, %v4753_v34 }
 0x49b   : > { %vm7474_vm5 = vcmp.lt.s32.totalorder %v7473_v7, 0  ;;  %vm4827_vm7 = vc.u32 %v12980_v55, %v12960_v8  ;;  %v4884_v37 = vadd.s32 1, %v7479_v5  ;;  %v4881_v33 = vand.u32 8388607, %v4874_v1 }
 0x49c   : > { %v8044_v57 = vpop.eup %8043  ;;  %v4737_v14 = vsel %vm7474_vm5, 0, %v7473_v7  ;;  %v4829_v29 = vsel %vm4827_vm7, %v4828_v58, %v12961_v26  ;;  %v4981_v19 = vand.u32 2139095040, %v15424_v43  ;;  %v4759_v24 = vadd.s32 3, %v4755_v30 }
 0x49d   : > { %v8046_v44 = vpop.eup %8045  ;;  %v4662_v6 = vxor.u32 2147483648, %v8044_v57  ;;  %v4738_v20 = vsub.s32 32, %v4737_v14  ;;  %v4739_v28 = vshll.u32 %v12945_v47, %v4737_v14  ;;  %v4742_v22 = vsub.s32 4294967266, %v4737_v14 }
 0x49e   : > { %v4659_v32 = vxor.u32 2147483648, %v8046_v44  ;;  %vm4885_vm6 = vcmp.gt.s32.totalorder %v4884_v37, 0  ;;  %v4830_v56 = vadd.s32 %v4829_v29, %v4825_v63  ;;  %v4882_v0 = vor.u32 8388608, %v4881_v33 }
 0x49f   : > { %v4663_v25 = vsel %vm4661_vm4, %v4662_v6, %v8046_v44  ;;  %v4740_v4 = vshrl.u32 %v4722_v9, %v4738_v20  ;;  %v4743_v2 = vadd.s32 127, %v4742_v22  ;;  %v4886_v59 = vsel %vm4885_vm6, %v4884_v37, 0 }
 0x4a0   : > { %v4660_v49 = vsel %vm4658_vm3, %v8044_v57, %v4659_v32  ;;  %v4831_v42 = vadd.s32 536870912, %v4830_v56  ;;  %v4888_v17 = vand.u32 31, %v4886_v59  ;;  %v4887_v26 = vshrl.u32 %v4886_v59, 5 }
 0x4a1   : > { %v4664_v40 = vsel %vm4657_vm2, %v4660_v49, %v4663_v25  ;;  %v4741_v47 = vor.u32 %v4740_v4, %v4739_v28  ;;  %v4744_v38 = vshll.u32 %v4743_v2, 23  ;;  %v4978_v23 = vand.u32 2147483647, %v15424_v43 }
 0x4a2   : > { %v4665_v12 = vsel %vm4654_vm14, nan, %v4664_v40  ;;  %v13009_v13 = vshrl.u32 %v4831_v42, 30  ;;  %v4889_v60 = vsub.s32 32, %v4888_v17  ;;  %v4982_v61 = vshrl.u32 %v4981_v19, 23 }
 0x4a3   : > { %v4745_v62 = vor.u32 4788187, %v4744_v38  ;;  %v4748_v36 = vcvt.s32.f32 %v4741_v47  ;;  %7201 = vst [vmem:[%s9727_s11 + $0x138] sm:$0xff] %v4665_v12  ;;  %v4891_v27 = vshll.u32 %v15318_v46, %v4888_v17  ;;  %v4894_v41 = vshll.u32 %v15310_v10, %v4888_v17 }
 0x4a4   : > { %v4833_v39 = vshll.u32 %v13009_v13, 30  ;;  %v4892_v50 = vshrl.u32 %v15310_v10, %v4889_v60  ;;  %v4895_v18 = vshrl.u32 %v15311_v21, %v4889_v60  ;;  %v4897_v51 = vshll.u32 %v15311_v21, %v4888_v17 }
 0x4a5   : > { %v4746_v31 = vand.u32 2147483647, %v4745_v62  ;;  %v4898_v52 = vshrl.u32 %v15312_v11, %v4889_v60  ;;  %v4900_v34 = vshll.u32 %v15312_v11, %v4888_v17  ;;  %v4901_v58 = vshrl.u32 %v15313_v53, %v4889_v60 }
 0x4a6   : > { %v13020_v7 = vsub.s32 %v4830_v56, %v4833_v39  ;;  %v13024_v5 = vand.u32 3, %v4759_v24  ;;  %v13026_v9 = vshll.u32 %v4882_v0, 8  ;;  %v7483_v63 = vadd.s32 4294967169, %v4982_v61 }
 0x4a7   : > { %v4749_v48 = vmul.f32 %v4748_v36, %v4746_v31  ;;  %v13030_v57 = vand.u32 8388607, %v4978_v23  ;;  %v4890_v37 = vshrl.u32 %v15318_v46, %v4889_v60  ;;  %v4893_v44 = vor.u32 %v4892_v50, %v4891_v27 }
 0x4a8   : > { %v4836_v30 = vsub.s32 0, %v13020_v7  ;;  %v4896_v6 = vor.u32 %v4895_v18, %v4894_v41  ;;  %v4899_v20 = vor.u32 %v4898_v52, %v4897_v51  ;;  %v4903_v28 = vshll.u32 %v15313_v53, %v4888_v17 }
 0x4a9   : > { %v4750_v14 = vxor.u32 2147483648, %v4749_v48  ;;  %v4904_v22 = vshrl.u32 %v15314_v35, %v4889_v60  ;;  %v4902_v33 = vor.u32 %v4901_v58, %v4900_v34  ;;  %vm4906_vm8 = vcmp.lt.s32.totalorder %v4887_v26, 1 }
 0x4aa   : > { %v7476_v29 = vmin.u32 %v4836_v30, %v13020_v7  ;;  %vm4909_vm9 = vcmp.lt.s32.totalorder %v4887_v26, 4  ;;  %v4988_v2 = vadd.s32 1, %v7483_v63  ;;  %vm4907_vm12 = vcmp.lt.s32.totalorder %v4887_v26, 2 }
 0x4ab   : > { %v4751_v32 = vsel %vm4668_vm0, %v4750_v14, %v4749_v48  ;;  %v4905_v4 = vor.u32 %v4904_v22, %v4903_v28  ;;  %vm4908_vm10 = vcmp.lt.s32.totalorder %v4887_v26, 3  ;;  %v4910_v49 = vsel %vm4906_vm8, %v4890_v37, %v4893_v44 }
 0x4ac   : > { %v4754_v25 = vsel %vm12984_vm1, %v15415_v45, %v4751_v32  ;;  %v4838_v56 = vclz %v7476_v29  ;;  %v4911_v59 = vsel %vm4909_vm9, %v4899_v20, 2102212464  ;;  %v4914_v19 = vsel %vm4906_vm8, %v4893_v44, %v4896_v6 }
 0x4ad   : > { %8047 = vcosq.f32 %v4754_v25  ;;  %v4912_v47 = vsel %vm4908_vm10, %v4896_v6, %v4911_v59  ;;  %v4915_v3 = vsel %vm4909_vm9, %v4902_v33, 920167782  ;;  %v4918_v38 = vsel %vm4906_vm8, %v4896_v6, %v4899_v20 }
 0x4ae   : > { %8049 = vsinq.f32 %v4754_v25  ;;  %v7477_v40 = vadd.s32 4294967294, %v4838_v56  ;;  %vm4762_vm11 = vcmp.eq.s32.totalorder %v13024_v5, 0  ;;  %v4826_v42 = vadd.s32 %v12960_v8, %v12980_v55 }
 0x4af   : > { %v4916_v12 = vsel %vm4908_vm10, %v4899_v20, %v4915_v3  ;;  %v4919_v24 = vsel %vm4909_vm9, %v4905_v4, 1326507024  ;;  %vm4989_vm13 = vcmp.gt.s32.totalorder %v4988_v2, 0  ;;  %vm4761_vm15 = vcmp.lt.s32.totalorder %v13024_v5, 2 }
 0x4b0   : > { %vm7478_vm14 = vcmp.lt.s32.totalorder %v7477_v40, 0  ;;  %v4913_v17 = vsel %vm4907_vm12, %v4910_v49, %v4912_v47  ;;  %v4917_v62 = vsel %vm4907_vm12, %v4914_v19, %v4916_v12  ;;  %v4920_v36 = vsel %vm4908_vm10, %v4902_v33, %v4919_v24 }
 0x4b1   : > { %vm4758_vm0 = vweird.f32 %v15415_v45  ;;  %v4841_v0 = vsel %vm7478_vm14, 0, %v7477_v40  ;;  %v4921_v60 = vsel %vm4907_vm12, %v4918_v38, %v4920_v36  ;;  %vm4772_vm1 = vcmp.lt.s32.totalorder %v15418_v54, 0 }
 0x4b2   : > { %v13060_v8 = vmul.u32.u64.low %v13026_v9, %v4917_v62  ;;  %v13061_v55 = vmul.u32.u64.high %v13026_v9, %v4917_v62, %v13060_v8  ;;  %v4842_v61 = vsub.s32 32, %v4841_v0  ;;  %v4843_v31 = vshll.u32 %v13020_v7, %v4841_v0 }
 0x4b3   : > { %v4846_v39 = vsub.s32 4294967266, %v4841_v0  ;;  %v4990_v27 = vsel %vm4989_vm13, %v4988_v2, 0  ;;  %vm4765_vm2 = vcmp.eq.s32.totalorder %v13024_v5, 2  ;;  %v4856_v52 = vsub.s32 4, %v13009_v13 }
 0x4b4   : > { %v13068_v41 = vmul.u32.u64.low %v13026_v9, %v4921_v60  ;;  %v13069_v50 = vmul.u32.u64.high %v13026_v9, %v4921_v60, %v13068_v41  ;;  %v4992_v26 = vand.u32 31, %v4990_v27  ;;  %v4844_v18 = vshrl.u32 %v4826_v42, %v4842_v61 }
 0x4b5   : > { %v4847_v51 = vadd.s32 127, %v4846_v39  ;;  %v4986_v48 = vor.u32 8388608, %v13030_v57  ;;  %v4929_v34 = vmul.u32 %v13026_v9, %v4913_v17  ;;  %v4932_v58 = vadd.s32 1, %v13061_v55 }
 0x4b6   : > { %v13075_v7 = vshrl.u32 %v4990_v27, 5  ;;  %v4993_v63 = vsub.s32 32, %v4992_v26  ;;  %vm13079_vm3 = vcmp.le.f32.partialorder %v4770_v15, 0.7853982  ;;  %v4845_v37 = vor.u32 %v4844_v18, %v4843_v31 }
 0x4b7   : > { %v8048_v14 = vpop.eup %8047  ;;  %v4848_v44 = vshll.u32 %v4847_v51, 23  ;;  %v4995_v6 = vshll.u32 %v15318_v46, %v4992_v26  ;;  %v4998_v57 = vshll.u32 %v15310_v10, %v4992_v26  ;;  %vm4931_vm4 = vc.u32 %v13069_v50, %v13060_v8 }
 0x4b8   : > { %v8050_v20 = vpop.eup %8049  ;;  %v4766_v9 = vxor.u32 2147483648, %v8048_v14  ;;  %v5001_v28 = vshll.u32 %v15311_v21, %v4992_v26  ;;  %v5004_v22 = vshll.u32 %v15312_v11, %v4992_v26  ;;  %v4852_v29 = vcvt.s32.f32 %v4845_v37 }
 0x4b9   : > { %v4763_v32 = vxor.u32 2147483648, %v8050_v20  ;;  %v4849_v15 = vor.u32 4788187, %v4848_v44  ;;  %v4933_v33 = vsel %vm4931_vm4, %v4932_v58, %v13061_v55  ;;  %v4996_v2 = vshrl.u32 %v15310_v10, %v4993_v63 }
 0x4ba   : > { %v4767_v25 = vsel %vm4765_vm2, %v4766_v9, %v8050_v20  ;;  %v4934_v4 = vadd.s32 %v4933_v33, %v4929_v34  ;;  %v4999_v56 = vshrl.u32 %v15311_v21, %v4993_v63  ;;  %v5002_v19 = vshrl.u32 %v15312_v11, %v4993_v63 }
 0x4bb   : > { %v4764_v49 = vsel %vm4762_vm11, %v8048_v14, %v4763_v32  ;;  %v4850_v59 = vand.u32 2147483647, %v4849_v15  ;;  %v5005_v40 = vshrl.u32 %v15313_v53, %v4993_v63  ;;  %v4857_v3 = vsel %vm4772_vm1, %v4856_v52, %v13009_v13  ;;  %v15427_v15 = vld [vmem:[#allocation36_spill] sm:$0xff] }
 0x4bc   : > { %v4768_v47 = vsel %vm4761_vm15, %v4764_v49, %v4767_v25  ;;  %v4935_v38 = vadd.s32 536870912, %v4934_v4  ;;  %v4997_v42 = vor.u32 %v4996_v2, %v4995_v6  ;;  %v5000_v17 = vor.u32 %v4999_v56, %v4998_v57 }
 0x4bd   : > { %v4769_v12 = vsel %vm4758_vm0, nan, %v4768_v47  ;;  %v4853_v24 = vmul.f32 %v4852_v29, %v4850_v59  ;;  %v5006_v62 = vor.u32 %v5005_v40, %v5004_v22  ;;  %v5007_v0 = vshll.u32 %v15313_v53, %v4992_v26 }
 0x4be   : > { %v4936_v36 = vshrl.u32 %v4935_v38, 30  ;;  %v5008_v60 = vshrl.u32 %v15314_v35, %v4993_v63  ;;  %vm5010_vm5 = vcmp.lt.s32.totalorder %v13075_v7, 1  ;;  %7202 = vst [vmem:[%s9727_s11 + $0x140] sm:$0xff] %v4769_v12  ;;  %v5003_v55 = vor.u32 %v5002_v19, %v5001_v28 }
 0x4bf   : > { %v4854_v5 = vxor.u32 2147483648, %v4853_v24  ;;  %vm5013_vm7 = vcmp.lt.s32.totalorder %v13075_v7, 4  ;;  %v13110_v13 = vshll.u32 %v4986_v48, 8  ;;  %v4859_v45 = vsel %vm13079_vm3, 0, %v4857_v3 }
 0x4c0   : > { %v4937_v61 = vshll.u32 %v4936_v36, 30  ;;  %vm5011_vm6 = vcmp.lt.s32.totalorder %v13075_v7, 2  ;;  %vm5012_vm8 = vcmp.lt.s32.totalorder %v13075_v7, 3  ;;  %v5009_v39 = vor.u32 %v5008_v60, %v5007_v0 }
 0x4c1   : > { %v4855_v31 = vsel %vm4772_vm1, %v4854_v5, %v4853_v24  ;;  %v5018_v27 = vsel %vm5010_vm5, %v4997_v42, %v5000_v17  ;;  %v5019_v41 = vsel %vm5013_vm7, %v5006_v62, 920167782  ;;  %v4994_v51 = vshrl.u32 %v15318_v46, %v4993_v63 }
 0x4c2   : > { %v4858_v26 = vsel %vm13079_vm3, %v15418_v54, %v4855_v31  ;;  %v13125_v18 = vsub.s32 %v4934_v4, %v4937_v61  ;;  %v4863_v52 = vadd.s32 3, %v4859_v45  ;;  %v5015_v48 = vsel %vm5013_vm7, %v5003_v55, 2102212464 }
 0x4c3   : > { %8051 = vcosq.f32 %v4858_v26  ;;  %v5020_v34 = vsel %vm5012_vm8, %v5003_v55, %v5019_v41  ;;  %v4960_v14 = vsub.s32 4, %v4936_v36  ;;  %v5022_v37 = vsel %vm5010_vm5, %v5000_v17, %v5003_v55 }
 0x4c4   : > { %8053 = vsinq.f32 %v4858_v26  ;;  %v4940_v58 = vsub.s32 0, %v13125_v18  ;;  %v5021_v30 = vsel %vm5011_vm6, %v5018_v27, %v5020_v34  ;;  %v5023_v63 = vsel %vm5013_vm7, %v5009_v39, 1326507024  ;;  %v15430_v27 = vld [vmem:[#allocation29_spill] sm:$0xff] }
 0x4c5   : > { %v13140_v44 = vmul.u32.u64.low %v13110_v13, %v5021_v30  ;;  %v13141_v6 = vmul.u32.u64.high %v13110_v13, %v5021_v30, %v13140_v44  ;;  %v5014_v20 = vsel %vm5010_vm5, %v4994_v51, %v4997_v42  ;;  %v5016_v9 = vsel %vm5012_vm8, %v5000_v17, %v5015_v48 }
 0x4c6   : > { %v7480_v57 = vmin.u32 %v4940_v58, %v13125_v18  ;;  %v5024_v28 = vsel %vm5012_vm8, %v5006_v62, %v5023_v63  ;;  %v4864_v22 = vand.u32 3, %v4863_v52  ;;  %v5085_v29 = vand.u32 2139095040, %v15427_v15 }
 0x4c7   : > { %v5025_v32 = vsel %vm5011_vm6, %v5022_v37, %v5024_v28  ;;  %vm4862_vm9 = vweird.f32 %v15418_v54  ;;  %vm4876_vm12 = vcmp.lt.s32.totalorder %v15421_v16, 0  ;;  %v5017_v25 = vsel %vm5011_vm6, %v5014_v20, %v5016_v9 }
 0x4c8   : > { %v4942_v33 = vclz %v7480_v57  ;;  %v13159_v4 = vmul.u32.u64.low %v13110_v13, %v5025_v32  ;;  %v13160_v2 = vmul.u32.u64.high %v13110_v13, %v5025_v32, %v13159_v4  ;;  %v5086_v56 = vshrl.u32 %v5085_v29, 23 }
 0x4c9   : > { %vm13164_vm10 = vcmp.le.f32.partialorder %v4874_v1, 0.7853982  ;;  %v4961_v19 = vsel %vm4876_vm12, %v4960_v14, %v4936_v36  ;;  %v5082_v40 = vand.u32 2147483647, %v15427_v15  ;;  %vm4865_vm11 = vcmp.lt.s32.totalorder %v4864_v22, 2 }
 0x4ca   : > { %v7481_v59 = vadd.s32 4294967294, %v4942_v33  ;;  %vm4866_vm13 = vcmp.eq.s32.totalorder %v4864_v22, 0  ;;  %v5036_v7 = vadd.s32 1, %v13141_v6  ;;  %v7487_v47 = vadd.s32 4294967169, %v5086_v56 }
 0x4cb   : > { %vm4869_vm15 = vcmp.eq.s32.totalorder %v4864_v22, 2  ;;  %v4930_v3 = vadd.s32 %v13060_v8, %v13069_v50  ;;  %v5033_v1 = vmul.u32 %v13110_v13, %v5017_v25  ;;  %v4963_v12 = vsel %vm13164_vm10, 0, %v4961_v19 }
 0x4cc   : > { %vm7482_vm14 = vcmp.lt.s32.totalorder %v7481_v59, 0  ;;  %vm5035_vm0 = vc.u32 %v13160_v2, %v13140_v44  ;;  %v5092_v24 = vadd.s32 1, %v7487_v47  ;;  %v5089_v50 = vand.u32 8388607, %v5082_v40 }
 0x4cd   : > { %v8052_v38 = vpop.eup %8051  ;;  %v4945_v42 = vsel %vm7482_vm14, 0, %v7481_v59  ;;  %v5037_v8 = vsel %vm5035_vm0, %v5036_v7, %v13141_v6  ;;  %v5189_v41 = vand.u32 2139095040, %v15430_v27  ;;  %v4967_v34 = vadd.s32 3, %v4963_v12 }
 0x4ce   : > { %v8054_v17 = vpop.eup %8053  ;;  %v4870_v62 = vxor.u32 2147483648, %v8052_v38  ;;  %v4946_v36 = vsub.s32 32, %v4945_v42  ;;  %v4947_v0 = vshll.u32 %v13125_v18, %v4945_v42  ;;  %v4950_v60 = vsub.s32 4294967266, %v4945_v42 }
 0x4cf   : > { %v4867_v5 = vxor.u32 2147483648, %v8054_v17  ;;  %vm5093_vm1 = vcmp.gt.s32.totalorder %v5092_v24, 0  ;;  %v5038_v61 = vadd.s32 %v5037_v8, %v5033_v1  ;;  %v5090_v63 = vor.u32 8388608, %v5089_v50 }
 0x4d0   : > { %v4871_v55 = vsel %vm4869_vm15, %v4870_v62, %v8054_v17  ;;  %v4948_v13 = vshrl.u32 %v4930_v3, %v4946_v36  ;;  %v4951_v45 = vadd.s32 127, %v4950_v60  ;;  %v5094_v39 = vsel %vm5093_vm1, %v5092_v24, 0 }
 0x4d1   : > { %v4868_v31 = vsel %vm4866_vm13, %v8052_v38, %v4867_v5  ;;  %v5039_v52 = vadd.s32 536870912, %v5038_v61  ;;  %v5096_v58 = vand.u32 31, %v5094_v39  ;;  %v5095_v6 = vshrl.u32 %v5094_v39, 5 }
 0x4d2   : > { %v4872_v26 = vsel %vm4865_vm11, %v4868_v31, %v4871_v55  ;;  %v4949_v18 = vor.u32 %v4948_v13, %v4947_v0  ;;  %v4952_v51 = vshll.u32 %v4951_v45, 23  ;;  %v5186_v20 = vand.u32 2147483647, %v15430_v27 }
 0x4d3   : > { %v4873_v48 = vsel %vm4862_vm9, nan, %v4872_v26  ;;  %v13189_v37 = vshrl.u32 %v5039_v52, 30  ;;  %v5097_v57 = vsub.s32 32, %v5096_v58  ;;  %v5190_v9 = vshrl.u32 %v5189_v41, 23 }
 0x4d4   : > { %v4953_v14 = vor.u32 4788187, %v4952_v51  ;;  %v4956_v30 = vcvt.s32.f32 %v4949_v18  ;;  %7203 = vst [vmem:[%s9727_s11 + $0x148] sm:$0xff] %v4873_v48  ;;  %v5099_v32 = vshll.u32 %v15318_v46, %v5096_v58  ;;  %v5102_v54 = vshll.u32 %v15310_v10, %v5096_v58 }
 0x4d5   : > { %v5041_v22 = vshll.u32 %v13189_v37, 30  ;;  %v5100_v29 = vshrl.u32 %v15310_v10, %v5097_v57  ;;  %v5103_v33 = vshrl.u32 %v15311_v21, %v5097_v57  ;;  %v5105_v25 = vshll.u32 %v15311_v21, %v5096_v58 }
 0x4d6   : > { %v4954_v28 = vand.u32 2147483647, %v4953_v14  ;;  %v5106_v4 = vshrl.u32 %v15312_v11, %v5097_v57  ;;  %v5108_v19 = vshll.u32 %v15312_v11, %v5096_v58  ;;  %v5109_v7 = vshrl.u32 %v15313_v53, %v5097_v57 }
 0x4d7   : > { %v13200_v59 = vsub.s32 %v5038_v61, %v5041_v22  ;;  %v13204_v47 = vand.u32 3, %v4967_v34  ;;  %v13206_v3 = vshll.u32 %v5090_v63, 8  ;;  %v7491_v1 = vadd.s32 4294967169, %v5190_v9 }
 0x4d8   : > { %v4957_v56 = vmul.f32 %v4956_v30, %v4954_v28  ;;  %v13210_v38 = vand.u32 8388607, %v5186_v20  ;;  %v5098_v24 = vshrl.u32 %v15318_v46, %v5097_v57  ;;  %v5101_v17 = vor.u32 %v5100_v29, %v5099_v32 }
 0x4d9   : > { %v5044_v12 = vsub.s32 0, %v13200_v59  ;;  %v5104_v62 = vor.u32 %v5103_v33, %v5102_v54  ;;  %v5107_v36 = vor.u32 %v5106_v4, %v5105_v25  ;;  %v5111_v0 = vshll.u32 %v15313_v53, %v5096_v58 }
 0x4da   : > { %v4958_v42 = vxor.u32 2147483648, %v4957_v56  ;;  %v5112_v60 = vshrl.u32 %v15314_v35, %v5097_v57  ;;  %v5110_v50 = vor.u32 %v5109_v7, %v5108_v19  ;;  %vm5114_vm2 = vcmp.lt.s32.totalorder %v5095_v6, 1 }
 0x4db   : > { %v7484_v8 = vmin.u32 %v5044_v12, %v13200_v59  ;;  %vm5117_vm3 = vcmp.lt.s32.totalorder %v5095_v6, 4  ;;  %v5196_v45 = vadd.s32 1, %v7491_v1  ;;  %vm5115_vm4 = vcmp.lt.s32.totalorder %v5095_v6, 2 }
 0x4dc   : > { %v4959_v5 = vsel %vm4876_vm12, %v4958_v42, %v4957_v56  ;;  %v5113_v13 = vor.u32 %v5112_v60, %v5111_v0  ;;  %vm5116_vm5 = vcmp.lt.s32.totalorder %v5095_v6, 3  ;;  %v5118_v31 = vsel %vm5114_vm2, %v5098_v24, %v5101_v17 }
 0x4dd   : > { %v4962_v55 = vsel %vm13164_vm10, %v15421_v16, %v4959_v5  ;;  %v5046_v61 = vclz %v7484_v8  ;;  %v5119_v39 = vsel %vm5117_vm3, %v5107_v36, 2102212464  ;;  %v5122_v41 = vsel %vm5114_vm2, %v5101_v17, %v5104_v62 }
 0x4de   : > { %8055 = vcosq.f32 %v4962_v55  ;;  %v5120_v18 = vsel %vm5116_vm5, %v5104_v62, %v5119_v39  ;;  %v5123_v49 = vsel %vm5117_vm3, %v5110_v50, 920167782  ;;  %v5126_v51 = vsel %vm5114_vm2, %v5104_v62, %v5107_v36 }
 0x4df   : > { %8057 = vsinq.f32 %v4962_v55  ;;  %v7485_v26 = vadd.s32 4294967294, %v5046_v61  ;;  %vm4970_vm7 = vcmp.eq.s32.totalorder %v13204_v47, 0  ;;  %v5034_v52 = vadd.s32 %v13140_v44, %v13160_v2 }
 0x4e0   : > { %v5124_v48 = vsel %vm5116_vm5, %v5107_v36, %v5123_v49  ;;  %v5127_v34 = vsel %vm5117_vm3, %v5113_v13, 1326507024  ;;  %vm5197_vm6 = vcmp.gt.s32.totalorder %v5196_v45, 0  ;;  %vm4969_vm8 = vcmp.lt.s32.totalorder %v13204_v47, 2 }
 0x4e1   : > { %vm7486_vm9 = vcmp.lt.s32.totalorder %v7485_v26, 0  ;;  %v5121_v58 = vsel %vm5115_vm4, %v5118_v31, %v5120_v18  ;;  %v5125_v14 = vsel %vm5115_vm4, %v5122_v41, %v5124_v48  ;;  %v5128_v30 = vsel %vm5116_vm5, %v5110_v50, %v5127_v34 }
 0x4e2   : > { %vm4966_vm12 = vweird.f32 %v15421_v16  ;;  %v5049_v63 = vsel %vm7486_vm9, 0, %v7485_v26  ;;  %v5129_v57 = vsel %vm5115_vm4, %v5126_v51, %v5128_v30  ;;  %vm4980_vm10 = vcmp.lt.s32.totalorder %v15424_v43, 0 }
 0x4e3   : > { %v13240_v44 = vmul.u32.u64.low %v13206_v3, %v5125_v14  ;;  %v13241_v2 = vmul.u32.u64.high %v13206_v3, %v5125_v14, %v13240_v44  ;;  %v5050_v9 = vsub.s32 32, %v5049_v63  ;;  %v5051_v28 = vshll.u32 %v13200_v59, %v5049_v63 }
 0x4e4   : > { %v5054_v22 = vsub.s32 4294967266, %v5049_v63  ;;  %v5198_v32 = vsel %vm5197_vm6, %v5196_v45, 0  ;;  %vm4973_vm11 = vcmp.eq.s32.totalorder %v13204_v47, 2  ;;  %v5064_v4 = vsub.s32 4, %v13189_v37 }
 0x4e5   : > { %v13248_v54 = vmul.u32.u64.low %v13206_v3, %v5129_v57  ;;  %v13249_v29 = vmul.u32.u64.high %v13206_v3, %v5129_v57, %v13248_v54  ;;  %v5200_v6 = vand.u32 31, %v5198_v32  ;;  %v5052_v33 = vshrl.u32 %v5034_v52, %v5050_v9 }
 0x4e6   : > { %v5055_v25 = vadd.s32 127, %v5054_v22  ;;  %v5194_v56 = vor.u32 8388608, %v13210_v38  ;;  %v5137_v19 = vmul.u32 %v13206_v3, %v5121_v58  ;;  %v5140_v7 = vadd.s32 1, %v13241_v2 }
 0x4e7   : > { %v13255_v59 = vshrl.u32 %v5198_v32, 5  ;;  %v5201_v1 = vsub.s32 32, %v5200_v6  ;;  %vm13259_vm13 = vcmp.le.f32.partialorder %v4978_v23, 0.7853982  ;;  %v5053_v24 = vor.u32 %v5052_v33, %v5051_v28 }
 0x4e8   : > { %v8056_v42 = vpop.eup %8055  ;;  %v5056_v17 = vshll.u32 %v5055_v25, 23  ;;  %v5203_v62 = vshll.u32 %v15318_v46, %v5200_v6  ;;  %v5206_v38 = vshll.u32 %v15310_v10, %v5200_v6  ;;  %vm5139_vm15 = vc.u32 %v13249_v29, %v13240_v44 }
 0x4e9   : > { %v8058_v36 = vpop.eup %8057  ;;  %v4974_v3 = vxor.u32 2147483648, %v8056_v42  ;;  %v5209_v0 = vshll.u32 %v15311_v21, %v5200_v6  ;;  %v5212_v60 = vshll.u32 %v15312_v11, %v5200_v6  ;;  %v5060_v8 = vcvt.s32.f32 %v5053_v24 }
 0x4ea   : > { %v4971_v5 = vxor.u32 2147483648, %v8058_v36  ;;  %v5057_v23 = vor.u32 4788187, %v5056_v17  ;;  %v5141_v50 = vsel %vm5139_vm15, %v5140_v7, %v13241_v2  ;;  %v5204_v45 = vshrl.u32 %v15310_v10, %v5201_v1 }
 0x4eb   : > { %v4975_v55 = vsel %vm4973_vm11, %v4974_v3, %v8058_v36  ;;  %v5142_v13 = vadd.s32 %v5141_v50, %v5137_v19  ;;  %v5207_v61 = vshrl.u32 %v15311_v21, %v5201_v1  ;;  %v5210_v41 = vshrl.u32 %v15312_v11, %v5201_v1 }
 0x4ec   : > { %v4972_v31 = vsel %vm4970_vm7, %v8056_v42, %v4971_v5  ;;  %v5058_v39 = vand.u32 2147483647, %v5057_v23  ;;  %v5213_v26 = vshrl.u32 %v15313_v53, %v5201_v1  ;;  %v5065_v49 = vsel %vm4980_vm10, %v5064_v4, %v13189_v37  ;;  %v15433_v23 = vld [vmem:[#allocation30_spill] sm:$0xff] }
 0x4ed   : > { %v4976_v18 = vsel %vm4969_vm8, %v4972_v31, %v4975_v55  ;;  %v5143_v51 = vadd.s32 536870912, %v5142_v13  ;;  %v5205_v52 = vor.u32 %v5204_v45, %v5203_v62  ;;  %v5208_v58 = vor.u32 %v5207_v61, %v5206_v38 }
 0x4ee   : > { %v4977_v48 = vsel %vm4966_vm12, nan, %v4976_v18  ;;  %v5061_v34 = vmul.f32 %v5060_v8, %v5058_v39  ;;  %v5214_v14 = vor.u32 %v5213_v26, %v5212_v60  ;;  %v5215_v63 = vshll.u32 %v15313_v53, %v5200_v6 }
 0x4ef   : > { %v5144_v30 = vshrl.u32 %v5143_v51, 30  ;;  %v5216_v57 = vshrl.u32 %v15314_v35, %v5201_v1  ;;  %vm5218_vm14 = vcmp.lt.s32.totalorder %v13255_v59, 1  ;;  %7204 = vst [vmem:[%s9727_s11 + $0x150] sm:$0xff] %v4977_v48  ;;  %v5211_v2 = vor.u32 %v5210_v41, %v5209_v0 }
 0x4f0   : > { %v5062_v47 = vxor.u32 2147483648, %v5061_v34  ;;  %vm5221_vm0 = vcmp.lt.s32.totalorder %v13255_v59, 4  ;;  %v13290_v37 = vshll.u32 %v5194_v56, 8  ;;  %v5067_v16 = vsel %vm13259_vm13, 0, %v5065_v49 }
 0x4f1   : > { %v5145_v9 = vshll.u32 %v5144_v30, 30  ;;  %vm5219_vm1 = vcmp.lt.s32.totalorder %v13255_v59, 2  ;;  %vm5220_vm2 = vcmp.lt.s32.totalorder %v13255_v59, 3  ;;  %v5217_v22 = vor.u32 %v5216_v57, %v5215_v63 }
 0x4f2   : > { %v5063_v28 = vsel %vm4980_vm10, %v5062_v47, %v5061_v34  ;;  %v5226_v32 = vsel %vm5218_vm14, %v5205_v52, %v5208_v58  ;;  %v5227_v54 = vsel %vm5221_vm0, %v5214_v14, 920167782  ;;  %v5202_v25 = vshrl.u32 %v15318_v46, %v5201_v1 }
 0x4f3   : > { %v5066_v6 = vsel %vm13259_vm13, %v15424_v43, %v5063_v28  ;;  %v13305_v33 = vsub.s32 %v5142_v13, %v5145_v9  ;;  %v5071_v4 = vadd.s32 3, %v5067_v16  ;;  %v5223_v56 = vsel %vm5221_vm0, %v5211_v2, 2102212464 }
 0x4f4   : > { %8059 = vcosq.f32 %v5066_v6  ;;  %v5228_v19 = vsel %vm5220_vm2, %v5211_v2, %v5227_v54  ;;  %v5168_v42 = vsub.s32 4, %v5144_v30  ;;  %v5230_v24 = vsel %vm5218_vm14, %v5208_v58, %v5211_v2 }
 0x4f5   : > { %8061 = vsinq.f32 %v5066_v6  ;;  %v5148_v7 = vsub.s32 0, %v13305_v33  ;;  %v5229_v12 = vsel %vm5219_vm1, %v5226_v32, %v5228_v19  ;;  %v5231_v1 = vsel %vm5221_vm0, %v5217_v22, 1326507024  ;;  %v15436_v32 = vld [vmem:[#allocation12_spill] sm:$0xff] }
 0x4f6   : > { %v13320_v17 = vmul.u32.u64.low %v13290_v37, %v5229_v12  ;;  %v13321_v62 = vmul.u32.u64.high %v13290_v37, %v5229_v12, %v13320_v17  ;;  %v5222_v36 = vsel %vm5218_vm14, %v5202_v25, %v5205_v52  ;;  %v5224_v3 = vsel %vm5220_vm2, %v5208_v58, %v5223_v56 }
 0x4f7   : > { %v7488_v38 = vmin.u32 %v5148_v7, %v13305_v33  ;;  %v5232_v0 = vsel %vm5220_vm2, %v5214_v14, %v5231_v1  ;;  %v5072_v60 = vand.u32 3, %v5071_v4  ;;  %v5293_v8 = vand.u32 2139095040, %v15433_v23 }
 0x4f8   : > { %v5233_v5 = vsel %vm5219_vm1, %v5230_v24, %v5232_v0  ;;  %vm5070_vm3 = vweird.f32 %v15424_v43  ;;  %vm5084_vm4 = vcmp.lt.s32.totalorder %v15427_v15, 0  ;;  %v5225_v55 = vsel %vm5219_vm1, %v5222_v36, %v5224_v3 }
 0x4f9   : > { %v5150_v50 = vclz %v7488_v38  ;;  %v13339_v13 = vmul.u32.u64.low %v13290_v37, %v5233_v5  ;;  %v13340_v45 = vmul.u32.u64.high %v13290_v37, %v5233_v5, %v13339_v13  ;;  %v5294_v61 = vshrl.u32 %v5293_v8, 23 }
 0x4fa   : > { %vm13344_vm5 = vcmp.le.f32.partialorder %v5082_v40, 0.7853982  ;;  %v5169_v41 = vsel %vm5084_vm4, %v5168_v42, %v5144_v30  ;;  %v5290_v26 = vand.u32 2147483647, %v15433_v23  ;;  %vm5073_vm7 = vcmp.lt.s32.totalorder %v5072_v60, 2 }
 0x4fb   : > { %v7489_v39 = vadd.s32 4294967294, %v5150_v50  ;;  %vm5074_vm6 = vcmp.eq.s32.totalorder %v5072_v60, 0  ;;  %v5244_v59 = vadd.s32 1, %v13321_v62  ;;  %v7495_v18 = vadd.s32 4294967169, %v5294_v61 }
 0x4fc   : > { %vm5077_vm8 = vcmp.eq.s32.totalorder %v5072_v60, 2  ;;  %v5138_v49 = vadd.s32 %v13240_v44, %v13249_v29  ;;  %v5241_v40 = vmul.u32 %v13290_v37, %v5225_v55  ;;  %v5171_v48 = vsel %vm13344_vm5, 0, %v5169_v41 }
 0x4fd   : > { %vm7490_vm9 = vcmp.lt.s32.totalorder %v7489_v39, 0  ;;  %vm5243_vm12 = vc.u32 %v13340_v45, %v13320_v17  ;;  %v5300_v34 = vadd.s32 1, %v7495_v18  ;;  %v5297_v29 = vand.u32 8388607, %v5290_v26 }
 0x4fe   : > { %v8060_v51 = vpop.eup %8059  ;;  %v5153_v52 = vsel %vm7490_vm9, 0, %v7489_v39  ;;  %v5245_v44 = vsel %vm5243_vm12, %v5244_v59, %v13321_v62  ;;  %v5397_v54 = vand.u32 2139095040, %v15436_v32  ;;  %v5175_v19 = vadd.s32 3, %v5171_v48 }
 0x4ff   : > { %v8062_v58 = vpop.eup %8061  ;;  %v5078_v14 = vxor.u32 2147483648, %v8060_v51  ;;  %v5154_v30 = vsub.s32 32, %v5153_v52  ;;  %v5155_v63 = vshll.u32 %v13305_v33, %v5153_v52  ;;  %v5158_v57 = vsub.s32 4294967266, %v5153_v52 }
 0x500   : > { %v5075_v47 = vxor.u32 2147483648, %v8062_v58  ;;  %vm5301_vm10 = vcmp.gt.s32.totalorder %v5300_v34, 0  ;;  %v5246_v9 = vadd.s32 %v5245_v44, %v5241_v40  ;;  %v5298_v1 = vor.u32 8388608, %v5297_v29 }
 0x501   : > { %v5079_v2 = vsel %vm5077_vm8, %v5078_v14, %v8062_v58  ;;  %v5156_v37 = vshrl.u32 %v5138_v49, %v5154_v30  ;;  %v5159_v16 = vadd.s32 127, %v5158_v57  ;;  %v5302_v22 = vsel %vm5301_vm10, %v5300_v34, 0 }
 0x502   : > { %v5076_v28 = vsel %vm5074_vm6, %v8060_v51, %v5075_v47  ;;  %v5247_v4 = vadd.s32 536870912, %v5246_v9  ;;  %v5304_v7 = vand.u32 31, %v5302_v22  ;;  %v5303_v62 = vshrl.u32 %v5302_v22, 5 }
 0x503   : > { %v5080_v6 = vsel %vm5073_vm7, %v5076_v28, %v5079_v2  ;;  %v5157_v33 = vor.u32 %v5156_v37, %v5155_v63  ;;  %v5160_v25 = vshll.u32 %v5159_v16, 23  ;;  %v5394_v36 = vand.u32 2147483647, %v15436_v32 }
 0x504   : > { %v5081_v56 = vsel %vm5070_vm3, nan, %v5080_v6  ;;  %v13369_v24 = vshrl.u32 %v5247_v4, 30  ;;  %v5305_v38 = vsub.s32 32, %v5304_v7  ;;  %v5398_v3 = vshrl.u32 %v5397_v54, 23 }
 0x505   : > { %v5161_v42 = vor.u32 4788187, %v5160_v25  ;;  %v5164_v12 = vcvt.s32.f32 %v5157_v33  ;;  %7205 = vst [vmem:[%s9727_s11 + $0x158] sm:$0xff] %v5081_v56  ;;  %v5307_v5 = vshll.u32 %v15318_v46, %v5304_v7  ;;  %v5310_v43 = vshll.u32 %v15310_v10, %v5304_v7 }
 0x506   : > { %v5249_v60 = vshll.u32 %v13369_v24, 30  ;;  %v5308_v8 = vshrl.u32 %v15310_v10, %v5305_v38  ;;  %v5311_v50 = vshrl.u32 %v15311_v21, %v5305_v38  ;;  %v5313_v55 = vshll.u32 %v15311_v21, %v5304_v7 }
 0x507   : > { %v5162_v0 = vand.u32 2147483647, %v5161_v42  ;;  %v5314_v13 = vshrl.u32 %v15312_v11, %v5305_v38  ;;  %v5316_v41 = vshll.u32 %v15312_v11, %v5304_v7  ;;  %v5317_v59 = vshrl.u32 %v15313_v53, %v5305_v38 }
 0x508   : > { %v13380_v39 = vsub.s32 %v5246_v9, %v5249_v60  ;;  %v13384_v18 = vand.u32 3, %v5175_v19  ;;  %v13386_v49 = vshll.u32 %v5298_v1, 8  ;;  %v7499_v40 = vadd.s32 4294967169, %v5398_v3 }
 0x509   : > { %v5165_v61 = vmul.f32 %v5164_v12, %v5162_v0  ;;  %v13390_v51 = vand.u32 8388607, %v5394_v36  ;;  %v5306_v34 = vshrl.u32 %v15318_v46, %v5305_v38  ;;  %v5309_v58 = vor.u32 %v5308_v8, %v5307_v5 }
 0x50a   : > { %v5252_v48 = vsub.s32 0, %v13380_v39  ;;  %v5312_v14 = vor.u32 %v5311_v50, %v5310_v43  ;;  %v5315_v30 = vor.u32 %v5314_v13, %v5313_v55  ;;  %v5319_v63 = vshll.u32 %v15313_v53, %v5304_v7 }
 0x50b   : > { %v5166_v52 = vxor.u32 2147483648, %v5165_v61  ;;  %v5320_v57 = vshrl.u32 %v15314_v35, %v5305_v38  ;;  %v5318_v29 = vor.u32 %v5317_v59, %v5316_v41  ;;  %vm5322_vm11 = vcmp.lt.s32.totalorder %v5303_v62, 1 }
 0x50c   : > { %v7492_v44 = vmin.u32 %v5252_v48, %v13380_v39  ;;  %vm5325_vm13 = vcmp.lt.s32.totalorder %v5303_v62, 4  ;;  %v5404_v16 = vadd.s32 1, %v7499_v40  ;;  %vm5323_vm15 = vcmp.lt.s32.totalorder %v5303_v62, 2 }
 0x50d   : > { %v5167_v47 = vsel %vm5084_vm4, %v5166_v52, %v5165_v61  ;;  %v5321_v37 = vor.u32 %v5320_v57, %v5319_v63  ;;  %vm5324_vm14 = vcmp.lt.s32.totalorder %v5303_v62, 3  ;;  %v5326_v28 = vsel %vm5322_vm11, %v5306_v34, %v5309_v58 }
 0x50e   : > { %v5170_v2 = vsel %vm13344_vm5, %v15427_v15, %v5167_v47  ;;  %v5254_v9 = vclz %v7492_v44  ;;  %v5327_v22 = vsel %vm5325_vm13, %v5315_v30, 2102212464  ;;  %v5330_v54 = vsel %vm5322_vm11, %v5309_v58, %v5312_v14 }
 0x50f   : > { %8063 = vcosq.f32 %v5170_v2  ;;  %v5328_v33 = vsel %vm5324_vm14, %v5312_v14, %v5327_v22  ;;  %v5331_v31 = vsel %vm5325_vm13, %v5318_v29, 920167782  ;;  %v5334_v25 = vsel %vm5322_vm11, %v5312_v14, %v5315_v30 }
 0x510   : > { %8065 = vsinq.f32 %v5170_v2  ;;  %v7493_v6 = vadd.s32 4294967294, %v5254_v9  ;;  %vm5178_vm0 = vcmp.eq.s32.totalorder %v13384_v18, 0  ;;  %v5242_v4 = vadd.s32 %v13320_v17, %v13340_v45 }
 0x511   : > { %v5332_v56 = vsel %vm5324_vm14, %v5315_v30, %v5331_v31  ;;  %v5335_v19 = vsel %vm5325_vm13, %v5321_v37, 1326507024  ;;  %vm5405_vm1 = vcmp.gt.s32.totalorder %v5404_v16, 0  ;;  %vm5177_vm2 = vcmp.lt.s32.totalorder %v13384_v18, 2 }
 0x512   : > { %vm7494_vm3 = vcmp.lt.s32.totalorder %v7493_v6, 0  ;;  %v5329_v7 = vsel %vm5323_vm15, %v5326_v28, %v5328_v33  ;;  %v5333_v42 = vsel %vm5323_vm15, %v5330_v54, %v5332_v56  ;;  %v5336_v12 = vsel %vm5324_vm14, %v5318_v29, %v5335_v19 }
 0x513   : > { %vm5174_vm4 = vweird.f32 %v15427_v15  ;;  %v5257_v1 = vsel %vm7494_vm3, 0, %v7493_v6  ;;  %v5337_v38 = vsel %vm5323_vm15, %v5334_v25, %v5336_v12  ;;  %vm5188_vm5 = vcmp.lt.s32.totalorder %v15430_v27, 0 }
 0x514   : > { %v13420_v17 = vmul.u32.u64.low %v13386_v49, %v5333_v42  ;;  %v13421_v45 = vmul.u32.u64.high %v13386_v49, %v5333_v42, %v13420_v17  ;;  %v5258_v3 = vsub.s32 32, %v5257_v1  ;;  %v5259_v0 = vshll.u32 %v13380_v39, %v5257_v1 }
 0x515   : > { %v5262_v60 = vsub.s32 4294967266, %v5257_v1  ;;  %v5406_v5 = vsel %vm5405_vm1, %v5404_v16, 0  ;;  %vm5181_vm7 = vcmp.eq.s32.totalorder %v13384_v18, 2  ;;  %v5272_v13 = vsub.s32 4, %v13369_v24 }
 0x516   : > { %v13428_v43 = vmul.u32.u64.low %v13386_v49, %v5337_v38  ;;  %v13429_v8 = vmul.u32.u64.high %v13386_v49, %v5337_v38, %v13428_v43  ;;  %v5408_v62 = vand.u32 31, %v5406_v5  ;;  %v5260_v50 = vshrl.u32 %v5242_v4, %v5258_v3 }
 0x517   : > { %v5263_v55 = vadd.s32 127, %v5262_v60  ;;  %v5402_v61 = vor.u32 8388608, %v13390_v51  ;;  %v5345_v41 = vmul.u32 %v13386_v49, %v5329_v7  ;;  %v5348_v59 = vadd.s32 1, %v13421_v45 }
 0x518   : > { %v13435_v39 = vshrl.u32 %v5406_v5, 5  ;;  %v5409_v40 = vsub.s32 32, %v5408_v62  ;;  %vm13439_vm6 = vcmp.le.f32.partialorder %v5186_v20, 0.7853982  ;;  %v5261_v34 = vor.u32 %v5260_v50, %v5259_v0 }
 0x519   : > { %v8064_v52 = vpop.eup %8063  ;;  %v5264_v58 = vshll.u32 %v5263_v55, 23  ;;  %v5411_v14 = vshll.u32 %v15318_v46, %v5408_v62  ;;  %v5414_v51 = vshll.u32 %v15310_v10, %v5408_v62  ;;  %vm5347_vm8 = vc.u32 %v13429_v8, %v13420_v17 }
 0x51a   : > { %v8066_v30 = vpop.eup %8065  ;;  %v5182_v49 = vxor.u32 2147483648, %v8064_v52  ;;  %v5417_v63 = vshll.u32 %v15311_v21, %v5408_v62  ;;  %v5420_v57 = vshll.u32 %v15312_v11, %v5408_v62  ;;  %v5268_v44 = vcvt.s32.f32 %v5261_v34 }
 0x51b   : > { %v5179_v47 = vxor.u32 2147483648, %v8066_v30  ;;  %v5265_v20 = vor.u32 4788187, %v5264_v58  ;;  %v5349_v29 = vsel %vm5347_vm8, %v5348_v59, %v13421_v45  ;;  %v5412_v16 = vshrl.u32 %v15310_v10, %v5409_v40 }
 0x51c   : > { %v5183_v2 = vsel %vm5181_vm7, %v5182_v49, %v8066_v30  ;;  %v5350_v37 = vadd.s32 %v5349_v29, %v5345_v41  ;;  %v5415_v9 = vshrl.u32 %v15311_v21, %v5409_v40  ;;  %v5418_v54 = vshrl.u32 %v15312_v11, %v5409_v40 }
 0x51d   : > { %v5180_v28 = vsel %vm5178_vm0, %v8064_v52, %v5179_v47  ;;  %v5266_v22 = vand.u32 2147483647, %v5265_v20  ;;  %v5421_v6 = vshrl.u32 %v15313_v53, %v5409_v40  ;;  %v5273_v31 = vsel %vm5188_vm5, %v5272_v13, %v13369_v24  ;;  %v15439_v20 = vld [vmem:[#allocation37_spill] sm:$0xff] }
 0x51e   : > { %v5184_v33 = vsel %vm5177_vm2, %v5180_v28, %v5183_v2  ;;  %v5351_v25 = vadd.s32 536870912, %v5350_v37  ;;  %v5413_v4 = vor.u32 %v5412_v16, %v5411_v14  ;;  %v5416_v7 = vor.u32 %v5415_v9, %v5414_v51 }
 0x51f   : > { %v5185_v56 = vsel %vm5174_vm4, nan, %v5184_v33  ;;  %v5269_v19 = vmul.f32 %v5268_v44, %v5266_v22  ;;  %v5422_v42 = vor.u32 %v5421_v6, %v5420_v57  ;;  %v5423_v1 = vshll.u32 %v15313_v53, %v5408_v62 }
 0x520   : > { %v5352_v12 = vshrl.u32 %v5351_v25, 30  ;;  %v5424_v38 = vshrl.u32 %v15314_v35, %v5409_v40  ;;  %vm5426_vm9 = vcmp.lt.s32.totalorder %v13435_v39, 1  ;;  %7206 = vst [vmem:[%s9727_s11 + $0x160] sm:$0xff] %v5185_v56  ;;  %v5419_v45 = vor.u32 %v5418_v54, %v5417_v63 }
 0x521   : > { %v5270_v18 = vxor.u32 2147483648, %v5269_v19  ;;  %vm5429_vm12 = vcmp.lt.s32.totalorder %v13435_v39, 4  ;;  %v13470_v24 = vshll.u32 %v5402_v61, 8  ;;  %v5275_v15 = vsel %vm13439_vm6, 0, %v5273_v31 }
 0x522   : > { %v5353_v3 = vshll.u32 %v5352_v12, 30  ;;  %vm5427_vm10 = vcmp.lt.s32.totalorder %v13435_v39, 2  ;;  %vm5428_vm11 = vcmp.lt.s32.totalorder %v13435_v39, 3  ;;  %v5425_v60 = vor.u32 %v5424_v38, %v5423_v1 }
 0x523   : > { %v5271_v0 = vsel %vm5188_vm5, %v5270_v18, %v5269_v19  ;;  %v5434_v5 = vsel %vm5426_vm9, %v5413_v4, %v5416_v7  ;;  %v5435_v43 = vsel %vm5429_vm12, %v5422_v42, 920167782  ;;  %v5410_v55 = vshrl.u32 %v15318_v46, %v5409_v40 }
 0x524   : > { %v5274_v62 = vsel %vm13439_vm6, %v15430_v27, %v5271_v0  ;;  %v13485_v50 = vsub.s32 %v5350_v37, %v5353_v3  ;;  %v5279_v13 = vadd.s32 3, %v5275_v15  ;;  %v5431_v61 = vsel %vm5429_vm12, %v5419_v45, 2102212464 }
 0x525   : > { %8067 = vcosq.f32 %v5274_v62  ;;  %v5436_v41 = vsel %vm5428_vm11, %v5419_v45, %v5435_v43  ;;  %v5376_v52 = vsub.s32 4, %v5352_v12  ;;  %v5438_v34 = vsel %vm5426_vm9, %v5416_v7, %v5419_v45 }
 0x526   : > { %8069 = vsinq.f32 %v5274_v62  ;;  %v5356_v59 = vsub.s32 0, %v13485_v50  ;;  %v5437_v48 = vsel %vm5427_vm10, %v5434_v5, %v5436_v41  ;;  %v5439_v40 = vsel %vm5429_vm12, %v5425_v60, 1326507024  ;;  %v15442_v5 = vld [vmem:[#allocation38_spill] sm:$0xff] }
 0x527   : > { %v13500_v58 = vmul.u32.u64.low %v13470_v24, %v5437_v48  ;;  %v13501_v14 = vmul.u32.u64.high %v13470_v24, %v5437_v48, %v13500_v58  ;;  %v5430_v30 = vsel %vm5426_vm9, %v5410_v55, %v5413_v4  ;;  %v5432_v49 = vsel %vm5428_vm11, %v5416_v7, %v5431_v61 }
 0x528   : > { %v7496_v51 = vmin.u32 %v5356_v59, %v13485_v50  ;;  %v5440_v63 = vsel %vm5428_vm11, %v5422_v42, %v5439_v40  ;;  %v5280_v57 = vand.u32 3, %v5279_v13  ;;  %v5501_v44 = vand.u32 2139095040, %v15439_v20 }
 0x529   : > { %v5441_v47 = vsel %vm5427_vm10, %v5438_v34, %v5440_v63  ;;  %vm5278_vm13 = vweird.f32 %v15430_v27  ;;  %vm5292_vm15 = vcmp.lt.s32.totalorder %v15433_v23, 0  ;;  %v5433_v2 = vsel %vm5427_vm10, %v5430_v30, %v5432_v49 }
 0x52a   : > { %v5358_v29 = vclz %v7496_v51  ;;  %v13519_v37 = vmul.u32.u64.low %v13470_v24, %v5441_v47  ;;  %v13520_v16 = vmul.u32.u64.high %v13470_v24, %v5441_v47, %v13519_v37  ;;  %v5502_v9 = vshrl.u32 %v5501_v44, 23 }
 0x52b   : > { %vm13524_vm14 = vcmp.le.f32.partialorder %v5290_v26, 0.7853982  ;;  %v5377_v54 = vsel %vm5292_vm15, %v5376_v52, %v5352_v12  ;;  %v5498_v6 = vand.u32 2147483647, %v15439_v20  ;;  %vm5281_vm0 = vcmp.lt.s32.totalorder %v5280_v57, 2 }
 0x52c   : > { %v7497_v22 = vadd.s32 4294967294, %v5358_v29  ;;  %vm5282_vm1 = vcmp.eq.s32.totalorder %v5280_v57, 0  ;;  %v5452_v39 = vadd.s32 1, %v13501_v14  ;;  %v7503_v33 = vadd.s32 4294967169, %v5502_v9 }
 0x52d   : > { %vm5285_vm2 = vcmp.eq.s32.totalorder %v5280_v57, 2  ;;  %v5346_v31 = vadd.s32 %v13420_v17, %v13429_v8  ;;  %v5449_v26 = vmul.u32 %v13470_v24, %v5433_v2  ;;  %v5379_v56 = vsel %vm13524_vm14, 0, %v5377_v54 }
 0x52e   : > { %vm7498_vm3 = vcmp.lt.s32.totalorder %v7497_v22, 0  ;;  %vm5451_vm4 = vc.u32 %v13520_v16, %v13500_v58  ;;  %v5508_v19 = vadd.s32 1, %v7503_v33  ;;  %v5505_v8 = vand.u32 8388607, %v5498_v6 }
 0x52f   : > { %v8068_v25 = vpop.eup %8067  ;;  %v5361_v4 = vsel %vm7498_vm3, 0, %v7497_v22  ;;  %v5453_v17 = vsel %vm5451_vm4, %v5452_v39, %v13501_v14  ;;  %v5605_v43 = vand.u32 2139095040, %v15442_v5  ;;  %v5383_v41 = vadd.s32 3, %v5379_v56 }
 0x530   : > { %v8070_v7 = vpop.eup %8069  ;;  %v5286_v42 = vxor.u32 2147483648, %v8068_v25  ;;  %v5362_v12 = vsub.s32 32, %v5361_v4  ;;  %v5363_v1 = vshll.u32 %v13485_v50, %v5361_v4  ;;  %v5366_v38 = vsub.s32 4294967266, %v5361_v4 }
 0x531   : > { %v5283_v18 = vxor.u32 2147483648, %v8070_v7  ;;  %vm5509_vm5 = vcmp.gt.s32.totalorder %v5508_v19, 0  ;;  %v5454_v3 = vadd.s32 %v5453_v17, %v5449_v26  ;;  %v5506_v40 = vor.u32 8388608, %v5505_v8 }
 0x532   : > { %v5287_v45 = vsel %vm5285_vm2, %v5286_v42, %v8070_v7  ;;  %v5364_v24 = vshrl.u32 %v5346_v31, %v5362_v12  ;;  %v5367_v15 = vadd.s32 127, %v5366_v38  ;;  %v5510_v60 = vsel %vm5509_vm5, %v5508_v19, 0 }
 0x533   : > { %v5284_v0 = vsel %vm5282_vm1, %v8068_v25, %v5283_v18  ;;  %v5455_v13 = vadd.s32 536870912, %v5454_v3  ;;  %v5512_v59 = vand.u32 31, %v5510_v60  ;;  %v5511_v14 = vshrl.u32 %v5510_v60, 5 }
 0x534   : > { %v5288_v62 = vsel %vm5281_vm0, %v5284_v0, %v5287_v45  ;;  %v5365_v50 = vor.u32 %v5364_v24, %v5363_v1  ;;  %v5368_v55 = vshll.u32 %v5367_v15, 23  ;;  %v5602_v30 = vand.u32 2147483647, %v15442_v5 }
 0x535   : > { %v5289_v61 = vsel %vm5278_vm13, nan, %v5288_v62  ;;  %v13549_v34 = vshrl.u32 %v5455_v13, 30  ;;  %v5513_v51 = vsub.s32 32, %v5512_v59  ;;  %v5606_v49 = vshrl.u32 %v5605_v43, 23 }
 0x536   : > { %v5369_v52 = vor.u32 4788187, %v5368_v55  ;;  %v5372_v48 = vcvt.s32.f32 %v5365_v50  ;;  %7207 = vst [vmem:[%s9727_s11 + $0x168] sm:$0xff] %v5289_v61  ;;  %v5515_v47 = vshll.u32 %v15318_v46, %v5512_v59  ;;  %v5518_v27 = vshll.u32 %v15310_v10, %v5512_v59 }
 0x537   : > { %v5457_v57 = vshll.u32 %v13549_v34, 30  ;;  %v5516_v44 = vshrl.u32 %v15310_v10, %v5513_v51  ;;  %v5519_v29 = vshrl.u32 %v15311_v21, %v5513_v51  ;;  %v5521_v2 = vshll.u32 %v15311_v21, %v5512_v59 }
 0x538   : > { %v5370_v63 = vand.u32 2147483647, %v5369_v52  ;;  %v5522_v37 = vshrl.u32 %v15312_v11, %v5513_v51  ;;  %v5524_v54 = vshll.u32 %v15312_v11, %v5512_v59  ;;  %v5525_v39 = vshrl.u32 %v15313_v53, %v5513_v51 }
 0x539   : > { %v13560_v22 = vsub.s32 %v5454_v3, %v5457_v57  ;;  %v13564_v33 = vand.u32 3, %v5383_v41  ;;  %v13566_v31 = vshll.u32 %v5506_v40, 8  ;;  %v7507_v26 = vadd.s32 4294967169, %v5606_v49 }
 0x53a   : > { %v5373_v9 = vmul.f32 %v5372_v48, %v5370_v63  ;;  %v13570_v25 = vand.u32 8388607, %v5602_v30  ;;  %v5514_v19 = vshrl.u32 %v15318_v46, %v5513_v51  ;;  %v5517_v7 = vor.u32 %v5516_v44, %v5515_v47 }
 0x53b   : > { %v5460_v56 = vsub.s32 0, %v13560_v22  ;;  %v5520_v42 = vor.u32 %v5519_v29, %v5518_v27  ;;  %v5523_v12 = vor.u32 %v5522_v37, %v5521_v2  ;;  %v5527_v1 = vshll.u32 %v15313_v53, %v5512_v59 }
 0x53c   : > { %v5374_v4 = vxor.u32 2147483648, %v5373_v9  ;;  %v5528_v38 = vshrl.u32 %v15314_v35, %v5513_v51  ;;  %v5526_v8 = vor.u32 %v5525_v39, %v5524_v54  ;;  %vm5530_vm7 = vcmp.lt.s32.totalorder %v5511_v14, 1 }
 0x53d   : > { %v7500_v17 = vmin.u32 %v5460_v56, %v13560_v22  ;;  %vm5533_vm6 = vcmp.lt.s32.totalorder %v5511_v14, 4  ;;  %v5612_v15 = vadd.s32 1, %v7507_v26  ;;  %vm5531_vm8 = vcmp.lt.s32.totalorder %v5511_v14, 2 }
 0x53e   : > { %v5375_v18 = vsel %vm5292_vm15, %v5374_v4, %v5373_v9  ;;  %v5529_v24 = vor.u32 %v5528_v38, %v5527_v1  ;;  %vm5532_vm9 = vcmp.lt.s32.totalorder %v5511_v14, 3  ;;  %v5534_v0 = vsel %vm5530_vm7, %v5514_v19, %v5517_v7 }
 0x53f   : > { %v5378_v45 = vsel %vm13524_vm14, %v15433_v23, %v5375_v18  ;;  %v5462_v3 = vclz %v7500_v17  ;;  %v5535_v60 = vsel %vm5533_vm6, %v5523_v12, 2102212464  ;;  %v5538_v43 = vsel %vm5530_vm7, %v5517_v7, %v5520_v42 }
 0x540   : > { %8071 = vcosq.f32 %v5378_v45  ;;  %v5536_v50 = vsel %vm5532_vm9, %v5520_v42, %v5535_v60  ;;  %v5539_v28 = vsel %vm5533_vm6, %v5526_v8, 920167782  ;;  %v5542_v55 = vsel %vm5530_vm7, %v5520_v42, %v5523_v12 }
 0x541   : > { %8073 = vsinq.f32 %v5378_v45  ;;  %v7501_v62 = vadd.s32 4294967294, %v5462_v3  ;;  %vm5386_vm12 = vcmp.eq.s32.totalorder %v13564_v33, 0  ;;  %v5450_v13 = vadd.s32 %v13500_v58, %v13520_v16 }
 0x542   : > { %v5540_v61 = vsel %vm5532_vm9, %v5523_v12, %v5539_v28  ;;  %v5543_v41 = vsel %vm5533_vm6, %v5529_v24, 1326507024  ;;  %vm5613_vm10 = vcmp.gt.s32.totalorder %v5612_v15, 0  ;;  %vm5385_vm11 = vcmp.lt.s32.totalorder %v13564_v33, 2 }
 0x543   : > { %vm7502_vm13 = vcmp.lt.s32.totalorder %v7501_v62, 0  ;;  %v5537_v59 = vsel %vm5531_vm8, %v5534_v0, %v5536_v50  ;;  %v5541_v52 = vsel %vm5531_vm8, %v5538_v43, %v5540_v61  ;;  %v5544_v48 = vsel %vm5532_vm9, %v5526_v8, %v5543_v41 }
 0x544   : > { %vm5382_vm15 = vweird.f32 %v15433_v23  ;;  %v5465_v40 = vsel %vm7502_vm13, 0, %v7501_v62  ;;  %v5545_v51 = vsel %vm5531_vm8, %v5542_v55, %v5544_v48  ;;  %vm5396_vm14 = vcmp.lt.s32.totalorder %v15436_v32, 0 }
 0x545   : > { %v13600_v58 = vmul.u32.u64.low %v13566_v31, %v5541_v52  ;;  %v13601_v16 = vmul.u32.u64.high %v13566_v31, %v5541_v52, %v13600_v58  ;;  %v5466_v49 = vsub.s32 32, %v5465_v40  ;;  %v5467_v63 = vshll.u32 %v13560_v22, %v5465_v40 }
 0x546   : > { %v5470_v57 = vsub.s32 4294967266, %v5465_v40  ;;  %v5614_v47 = vsel %vm5613_vm10, %v5612_v15, 0  ;;  %vm5389_vm0 = vcmp.eq.s32.totalorder %v13564_v33, 2  ;;  %v5480_v37 = vsub.s32 4, %v13549_v34 }
 0x547   : > { %v13608_v27 = vmul.u32.u64.low %v13566_v31, %v5545_v51  ;;  %v13609_v44 = vmul.u32.u64.high %v13566_v31, %v5545_v51, %v13608_v27  ;;  %v5616_v14 = vand.u32 31, %v5614_v47  ;;  %v5468_v29 = vshrl.u32 %v5450_v13, %v5466_v49 }
 0x548   : > { %v5471_v2 = vadd.s32 127, %v5470_v57  ;;  %v5610_v9 = vor.u32 8388608, %v13570_v25  ;;  %v5553_v54 = vmul.u32 %v13566_v31, %v5537_v59  ;;  %v5556_v39 = vadd.s32 1, %v13601_v16 }
 0x549   : > { %v13615_v22 = vshrl.u32 %v5614_v47, 5  ;;  %v5617_v26 = vsub.s32 32, %v5616_v14  ;;  %vm13619_vm1 = vcmp.le.f32.partialorder %v5394_v36, 0.7853982  ;;  %v5469_v19 = vor.u32 %v5468_v29, %v5467_v63 }
 0x54a   : > { %v8072_v4 = vpop.eup %8071  ;;  %v5472_v7 = vshll.u32 %v5471_v2, 23  ;;  %v5619_v42 = vshll.u32 %v15318_v46, %v5616_v14  ;;  %v5622_v25 = vshll.u32 %v15310_v10, %v5616_v14  ;;  %vm5555_vm2 = vc.u32 %v13609_v44, %v13600_v58 }
 0x54b   : > { %v8074_v12 = vpop.eup %8073  ;;  %v5390_v31 = vxor.u32 2147483648, %v8072_v4  ;;  %v5625_v1 = vshll.u32 %v15311_v21, %v5616_v14  ;;  %v5628_v38 = vshll.u32 %v15312_v11, %v5616_v14  ;;  %v5476_v17 = vcvt.s32.f32 %v5469_v19 }
 0x54c   : > { %v5387_v18 = vxor.u32 2147483648, %v8074_v12  ;;  %v5473_v36 = vor.u32 4788187, %v5472_v7  ;;  %v5557_v8 = vsel %vm5555_vm2, %v5556_v39, %v13601_v16  ;;  %v5620_v15 = vshrl.u32 %v15310_v10, %v5617_v26 }
 0x54d   : > { %v5391_v45 = vsel %vm5389_vm0, %v5390_v31, %v8074_v12  ;;  %v5558_v24 = vadd.s32 %v5557_v8, %v5553_v54  ;;  %v5623_v3 = vshrl.u32 %v15311_v21, %v5617_v26  ;;  %v5626_v43 = vshrl.u32 %v15312_v11, %v5617_v26 }
 0x54e   : > { %v5388_v0 = vsel %vm5386_vm12, %v8072_v4, %v5387_v18  ;;  %v5474_v60 = vand.u32 2147483647, %v5473_v36  ;;  %v5629_v62 = vshrl.u32 %v15313_v53, %v5617_v26  ;;  %v5481_v28 = vsel %vm5396_vm14, %v5480_v37, %v13549_v34  ;;  %v15445_v36 = vld [vmem:[#allocation39_spill] sm:$0xff] }
 0x54f   : > { %v5392_v50 = vsel %vm5385_vm11, %v5388_v0, %v5391_v45  ;;  %v5559_v55 = vadd.s32 536870912, %v5558_v24  ;;  %v5621_v13 = vor.u32 %v5620_v15, %v5619_v42  ;;  %v5624_v59 = vor.u32 %v5623_v3, %v5622_v25 }
 0x550   : > { %v5393_v61 = vsel %vm5382_vm15, nan, %v5392_v50  ;;  %v5477_v41 = vmul.f32 %v5476_v17, %v5474_v60  ;;  %v5630_v52 = vor.u32 %v5629_v62, %v5628_v38  ;;  %v5631_v40 = vshll.u32 %v15313_v53, %v5616_v14 }
 0x551   : > { %v5560_v48 = vshrl.u32 %v5559_v55, 30  ;;  %v5632_v51 = vshrl.u32 %v15314_v35, %v5617_v26  ;;  %vm5634_vm3 = vcmp.lt.s32.totalorder %v13615_v22, 1  ;;  %7208 = vst [vmem:[%s9727_s11 + $0x170] sm:$0xff] %v5393_v61  ;;  %v5627_v16 = vor.u32 %v5626_v43, %v5625_v1 }
 0x552   : > { %v5478_v33 = vxor.u32 2147483648, %v5477_v41  ;;  %vm5637_vm4 = vcmp.lt.s32.totalorder %v13615_v22, 4  ;;  %v13650_v34 = vshll.u32 %v5610_v9, 8  ;;  %v5483_v23 = vsel %vm13619_vm1, 0, %v5481_v28 }
 0x553   : > { %v5561_v49 = vshll.u32 %v5560_v48, 30  ;;  %vm5635_vm5 = vcmp.lt.s32.totalorder %v13615_v22, 2  ;;  %vm5636_vm7 = vcmp.lt.s32.totalorder %v13615_v22, 3  ;;  %v5633_v57 = vor.u32 %v5632_v51, %v5631_v40 }
 0x554   : > { %v5479_v63 = vsel %vm5396_vm14, %v5478_v33, %v5477_v41  ;;  %v5642_v47 = vsel %vm5634_vm3, %v5621_v13, %v5624_v59  ;;  %v5643_v27 = vsel %vm5637_vm4, %v5630_v52, 920167782  ;;  %v5618_v2 = vshrl.u32 %v15318_v46, %v5617_v26 }
 0x555   : > { %v5482_v14 = vsel %vm13619_vm1, %v15436_v32, %v5479_v63  ;;  %v13665_v29 = vsub.s32 %v5558_v24, %v5561_v49  ;;  %v5487_v37 = vadd.s32 3, %v5483_v23  ;;  %v5639_v9 = vsel %vm5637_vm4, %v5627_v16, 2102212464 }
 0x556   : > { %8075 = vcosq.f32 %v5482_v14  ;;  %v5644_v54 = vsel %vm5636_vm7, %v5627_v16, %v5643_v27  ;;  %v5584_v4 = vsub.s32 4, %v5560_v48  ;;  %v5646_v19 = vsel %vm5634_vm3, %v5624_v59, %v5627_v16 }
 0x557   : > { %8077 = vsinq.f32 %v5482_v14  ;;  %v5564_v39 = vsub.s32 0, %v13665_v29  ;;  %v5645_v56 = vsel %vm5635_vm5, %v5642_v47, %v5644_v54  ;;  %v5647_v26 = vsel %vm5637_vm4, %v5633_v57, 1326507024  ;;  %v15448_v47 = vld [vmem:[#allocation40_spill] sm:$0xff] }
 0x558   : > { %v13680_v7 = vmul.u32.u64.low %v13650_v34, %v5645_v56  ;;  %v13681_v42 = vmul.u32.u64.high %v13650_v34, %v5645_v56, %v13680_v7  ;;  %v5638_v12 = vsel %vm5634_vm3, %v5618_v2, %v5621_v13  ;;  %v5640_v31 = vsel %vm5636_vm7, %v5624_v59, %v5639_v9 }
 0x559   : > { %v7504_v25 = vmin.u32 %v5564_v39, %v13665_v29  ;;  %v5648_v1 = vsel %vm5636_vm7, %v5630_v52, %v5647_v26  ;;  %v5488_v38 = vand.u32 3, %v5487_v37  ;;  %v5709_v17 = vand.u32 2139095040, %v15445_v36 }
 0x55a   : > { %v5649_v18 = vsel %vm5635_vm5, %v5646_v19, %v5648_v1  ;;  %vm5486_vm6 = vweird.f32 %v15436_v32  ;;  %vm5500_vm8 = vcmp.lt.s32.totalorder %v15439_v20, 0  ;;  %v5641_v45 = vsel %vm5635_vm5, %v5638_v12, %v5640_v31 }
 0x55b   : > { %v5566_v8 = vclz %v7504_v25  ;;  %v13699_v24 = vmul.u32.u64.low %v13650_v34, %v5649_v18  ;;  %v13700_v15 = vmul.u32.u64.high %v13650_v34, %v5649_v18, %v13699_v24  ;;  %v5710_v3 = vshrl.u32 %v5709_v17, 23 }
 0x55c   : > { %vm13704_vm9 = vcmp.le.f32.partialorder %v5498_v6, 0.7853982  ;;  %v5585_v43 = vsel %vm5500_vm8, %v5584_v4, %v5560_v48  ;;  %v5706_v62 = vand.u32 2147483647, %v15445_v36  ;;  %vm5489_vm12 = vcmp.lt.s32.totalorder %v5488_v38, 2 }
 0x55d   : > { %v7505_v60 = vadd.s32 4294967294, %v5566_v8  ;;  %vm5490_vm10 = vcmp.eq.s32.totalorder %v5488_v38, 0  ;;  %v5660_v22 = vadd.s32 1, %v13681_v42  ;;  %v7511_v50 = vadd.s32 4294967169, %v5710_v3 }
 0x55e   : > { %vm5493_vm11 = vcmp.eq.s32.totalorder %v5488_v38, 2  ;;  %v5554_v28 = vadd.s32 %v13600_v58, %v13609_v44  ;;  %v5657_v6 = vmul.u32 %v13650_v34, %v5641_v45  ;;  %v5587_v61 = vsel %vm13704_vm9, 0, %v5585_v43 }
 0x55f   : > { %vm7506_vm13 = vcmp.lt.s32.totalorder %v7505_v60, 0  ;;  %vm5659_vm15 = vc.u32 %v13700_v15, %v13680_v7  ;;  %v5716_v41 = vadd.s32 1, %v7511_v50  ;;  %v5713_v44 = vand.u32 8388607, %v5706_v62 }
 0x560   : > { %v8076_v55 = vpop.eup %8075  ;;  %v5569_v13 = vsel %vm7506_vm13, 0, %v7505_v60  ;;  %v5661_v58 = vsel %vm5659_vm15, %v5660_v22, %v13681_v42  ;;  %v5813_v27 = vand.u32 2139095040, %v15448_v47  ;;  %v5591_v54 = vadd.s32 3, %v5587_v61 }
 0x561   : > { %v8078_v59 = vpop.eup %8077  ;;  %v5494_v52 = vxor.u32 2147483648, %v8076_v55  ;;  %v5570_v48 = vsub.s32 32, %v5569_v13  ;;  %v5571_v40 = vshll.u32 %v13665_v29, %v5569_v13  ;;  %v5574_v51 = vsub.s32 4294967266, %v5569_v13 }
 0x562   : > { %v5491_v33 = vxor.u32 2147483648, %v8078_v59  ;;  %vm5717_vm14 = vcmp.gt.s32.totalorder %v5716_v41, 0  ;;  %v5662_v49 = vadd.s32 %v5661_v58, %v5657_v6  ;;  %v5714_v26 = vor.u32 8388608, %v5713_v44 }
 0x563   : > { %v5495_v16 = vsel %vm5493_vm11, %v5494_v52, %v8078_v59  ;;  %v5572_v34 = vshrl.u32 %v5554_v28, %v5570_v48  ;;  %v5575_v23 = vadd.s32 127, %v5574_v51  ;;  %v5718_v57 = vsel %vm5717_vm14, %v5716_v41, 0 }
 0x564   : > { %v5492_v63 = vsel %vm5490_vm10, %v8076_v55, %v5491_v33  ;;  %v5663_v37 = vadd.s32 536870912, %v5662_v49  ;;  %v5720_v39 = vand.u32 31, %v5718_v57  ;;  %v5719_v42 = vshrl.u32 %v5718_v57, 5 }
 0x565   : > { %v5496_v14 = vsel %vm5489_vm12, %v5492_v63, %v5495_v16  ;;  %v5573_v29 = vor.u32 %v5572_v34, %v5571_v40  ;;  %v5576_v2 = vshll.u32 %v5575_v23, 23  ;;  %v5810_v12 = vand.u32 2147483647, %v15448_v47 }
 0x566   : > { %v5497_v9 = vsel %vm5486_vm6, nan, %v5496_v14  ;;  %v13729_v19 = vshrl.u32 %v5663_v37, 30  ;;  %v5721_v25 = vsub.s32 32, %v5720_v39  ;;  %v5814_v31 = vshrl.u32 %v5813_v27, 23 }
 0x567   : > { %v5577_v4 = vor.u32 4788187, %v5576_v2  ;;  %v5580_v56 = vcvt.s32.f32 %v5573_v29  ;;  %7209 = vst [vmem:[%s9727_s11 + $0x178] sm:$0xff] %v5497_v9  ;;  %v5723_v18 = vshll.u32 %v15318_v46, %v5720_v39  ;;  %v5726_v32 = vshll.u32 %v15310_v10, %v5720_v39 }
 0x568   : > { %v5665_v38 = vshll.u32 %v13729_v19, 30  ;;  %v5724_v17 = vshrl.u32 %v15310_v10, %v5721_v25  ;;  %v5727_v8 = vshrl.u32 %v15311_v21, %v5721_v25  ;;  %v5729_v45 = vshll.u32 %v15311_v21, %v5720_v39 }
 0x569   : > { %v5578_v1 = vand.u32 2147483647, %v5577_v4  ;;  %v5730_v24 = vshrl.u32 %v15312_v11, %v5721_v25  ;;  %v5732_v43 = vshll.u32 %v15312_v11, %v5720_v39  ;;  %v5733_v22 = vshrl.u32 %v15313_v53, %v5721_v25 }
 0x56a   : > { %v13740_v60 = vsub.s32 %v5662_v49, %v5665_v38  ;;  %v13744_v50 = vand.u32 3, %v5591_v54  ;;  %v13746_v28 = vshll.u32 %v5714_v26, 8  ;;  %v7515_v6 = vadd.s32 4294967169, %v5814_v31 }
 0x56b   : > { %v5581_v3 = vmul.f32 %v5580_v56, %v5578_v1  ;;  %v13750_v55 = vand.u32 8388607, %v5810_v12  ;;  %v5722_v41 = vshrl.u32 %v15318_v46, %v5721_v25  ;;  %v5725_v59 = vor.u32 %v5724_v17, %v5723_v18 }
 0x56c   : > { %v5668_v61 = vsub.s32 0, %v13740_v60  ;;  %v5728_v52 = vor.u32 %v5727_v8, %v5726_v32  ;;  %v5731_v48 = vor.u32 %v5730_v24, %v5729_v45  ;;  %v5735_v40 = vshll.u32 %v15313_v53, %v5720_v39 }
 0x56d   : > { %v5582_v13 = vxor.u32 2147483648, %v5581_v3  ;;  %v5736_v51 = vshrl.u32 %v15314_v35, %v5721_v25  ;;  %v5734_v44 = vor.u32 %v5733_v22, %v5732_v43  ;;  %vm5738_vm0 = vcmp.lt.s32.totalorder %v5719_v42, 1 }
 0x56e   : > { %v7508_v58 = vmin.u32 %v5668_v61, %v13740_v60  ;;  %vm5741_vm1 = vcmp.lt.s32.totalorder %v5719_v42, 4  ;;  %v5820_v23 = vadd.s32 1, %v7515_v6  ;;  %vm5739_vm2 = vcmp.lt.s32.totalorder %v5719_v42, 2 }
 0x56f   : > { %v5583_v33 = vsel %vm5500_vm8, %v5582_v13, %v5581_v3  ;;  %v5737_v34 = vor.u32 %v5736_v51, %v5735_v40  ;;  %vm5740_vm3 = vcmp.lt.s32.totalorder %v5719_v42, 3  ;;  %v5742_v63 = vsel %vm5738_vm0, %v5722_v41, %v5725_v59 }
 0x570   : > { %v5586_v16 = vsel %vm13704_vm9, %v15439_v20, %v5583_v33  ;;  %v5670_v49 = vclz %v7508_v58  ;;  %v5743_v57 = vsel %vm5741_vm1, %v5731_v48, 2102212464  ;;  %v5746_v27 = vsel %vm5738_vm0, %v5725_v59, %v5728_v52 }
 0x571   : > { %8079 = vcosq.f32 %v5586_v16  ;;  %v5744_v29 = vsel %vm5740_vm3, %v5728_v52, %v5743_v57  ;;  %v5747_v0 = vsel %vm5741_vm1, %v5734_v44, 920167782  ;;  %v5750_v2 = vsel %vm5738_vm0, %v5728_v52, %v5731_v48 }
 0x572   : > { %8081 = vsinq.f32 %v5586_v16  ;;  %v7509_v14 = vadd.s32 4294967294, %v5670_v49  ;;  %vm5594_vm4 = vcmp.eq.s32.totalorder %v13744_v50, 0  ;;  %v5658_v37 = vadd.s32 %v13680_v7, %v13700_v15 }
 0x573   : > { %v5748_v9 = vsel %vm5740_vm3, %v5731_v48, %v5747_v0  ;;  %v5751_v54 = vsel %vm5741_vm1, %v5737_v34, 1326507024  ;;  %vm5821_vm5 = vcmp.gt.s32.totalorder %v5820_v23, 0  ;;  %vm5593_vm7 = vcmp.lt.s32.totalorder %v13744_v50, 2 }
 0x574   : > { %vm7510_vm6 = vcmp.lt.s32.totalorder %v7509_v14, 0  ;;  %v5745_v39 = vsel %vm5739_vm2, %v5742_v63, %v5744_v29  ;;  %v5749_v4 = vsel %vm5739_vm2, %v5746_v27, %v5748_v9  ;;  %v5752_v56 = vsel %vm5740_vm3, %v5734_v44, %v5751_v54 }
 0x575   : > { %vm5590_vm8 = vweird.f32 %v15439_v20  ;;  %v5673_v26 = vsel %vm7510_vm6, 0, %v7509_v14  ;;  %v5753_v25 = vsel %vm5739_vm2, %v5750_v2, %v5752_v56  ;;  %vm5604_vm9 = vcmp.lt.s32.totalorder %v15442_v5, 0 }
 0x576   : > { %v13780_v7 = vmul.u32.u64.low %v13746_v28, %v5749_v4  ;;  %v13781_v15 = vmul.u32.u64.high %v13746_v28, %v5749_v4, %v13780_v7  ;;  %v5674_v31 = vsub.s32 32, %v5673_v26  ;;  %v5675_v1 = vshll.u32 %v13740_v60, %v5673_v26 }
 0x577   : > { %v5678_v38 = vsub.s32 4294967266, %v5673_v26  ;;  %v5822_v18 = vsel %vm5821_vm5, %v5820_v23, 0  ;;  %vm5597_vm12 = vcmp.eq.s32.totalorder %v13744_v50, 2  ;;  %v5688_v24 = vsub.s32 4, %v13729_v19 }
 0x578   : > { %v13788_v32 = vmul.u32.u64.low %v13746_v28, %v5753_v25  ;;  %v13789_v17 = vmul.u32.u64.high %v13746_v28, %v5753_v25, %v13788_v32  ;;  %v5824_v42 = vand.u32 31, %v5822_v18  ;;  %v5676_v8 = vshrl.u32 %v5658_v37, %v5674_v31 }
 0x579   : > { %v5679_v45 = vadd.s32 127, %v5678_v38  ;;  %v5818_v3 = vor.u32 8388608, %v13750_v55  ;;  %v5761_v43 = vmul.u32 %v13746_v28, %v5745_v39  ;;  %v5764_v22 = vadd.s32 1, %v13781_v15 }
 0x57a   : > { %v13795_v60 = vshrl.u32 %v5822_v18, 5  ;;  %v5825_v6 = vsub.s32 32, %v5824_v42  ;;  %vm13799_vm10 = vcmp.le.f32.partialorder %v5602_v30, 0.7853982  ;;  %v5677_v41 = vor.u32 %v5676_v8, %v5675_v1 }
 0x57b   : > { %v8080_v13 = vpop.eup %8079  ;;  %v5680_v59 = vshll.u32 %v5679_v45, 23  ;;  %v5827_v52 = vshll.u32 %v15318_v46, %v5824_v42  ;;  %v5830_v55 = vshll.u32 %v15310_v10, %v5824_v42  ;;  %vm5763_vm11 = vc.u32 %v13789_v17, %v13780_v7 }
 0x57c   : > { %v8082_v48 = vpop.eup %8081  ;;  %v5598_v28 = vxor.u32 2147483648, %v8080_v13  ;;  %v5833_v40 = vshll.u32 %v15311_v21, %v5824_v42  ;;  %v5836_v51 = vshll.u32 %v15312_v11, %v5824_v42  ;;  %v5684_v58 = vcvt.s32.f32 %v5677_v41 }
 0x57d   : > { %v5595_v33 = vxor.u32 2147483648, %v8082_v48  ;;  %v5681_v30 = vor.u32 4788187, %v5680_v59  ;;  %v5765_v44 = vsel %vm5763_vm11, %v5764_v22, %v13781_v15  ;;  %v5828_v23 = vshrl.u32 %v15310_v10, %v5825_v6 }
 0x57e   : > { %v5599_v16 = vsel %vm5597_vm12, %v5598_v28, %v8082_v48  ;;  %v5766_v34 = vadd.s32 %v5765_v44, %v5761_v43  ;;  %v5831_v49 = vshrl.u32 %v15311_v21, %v5825_v6  ;;  %v5834_v27 = vshrl.u32 %v15312_v11, %v5825_v6 }
 0x57f   : > { %v5596_v63 = vsel %vm5594_vm4, %v8080_v13, %v5595_v33  ;;  %v5682_v57 = vand.u32 2147483647, %v5681_v30  ;;  %v5837_v14 = vshrl.u32 %v15313_v53, %v5825_v6  ;;  %v5689_v0 = vsel %vm5604_vm9, %v5688_v24, %v13729_v19  ;;  %v15451_v30 = vld [vmem:[#allocation41_spill] sm:$0xff] }
 0x580   : > { %v5600_v29 = vsel %vm5593_vm7, %v5596_v63, %v5599_v16  ;;  %v5767_v2 = vadd.s32 536870912, %v5766_v34  ;;  %v5829_v37 = vor.u32 %v5828_v23, %v5827_v52  ;;  %v5832_v39 = vor.u32 %v5831_v49, %v5830_v55 }
 0x581   : > { %v5601_v9 = vsel %vm5590_vm8, nan, %v5600_v29  ;;  %v5685_v54 = vmul.f32 %v5684_v58, %v5682_v57  ;;  %v5838_v4 = vor.u32 %v5837_v14, %v5836_v51  ;;  %v5839_v26 = vshll.u32 %v15313_v53, %v5824_v42 }
 0x582   : > { %v5768_v56 = vshrl.u32 %v5767_v2, 30  ;;  %v5840_v25 = vshrl.u32 %v15314_v35, %v5825_v6  ;;  %vm5842_vm13 = vcmp.lt.s32.totalorder %v13795_v60, 1  ;;  %7210 = vst [vmem:[%s9727_s11 + $0x180] sm:$0xff] %v5601_v9  ;;  %v5835_v15 = vor.u32 %v5834_v27, %v5833_v40 }
 0x583   : > { %v5686_v50 = vxor.u32 2147483648, %v5685_v54  ;;  %vm5845_vm15 = vcmp.lt.s32.totalorder %v13795_v60, 4  ;;  %v13830_v19 = vshll.u32 %v5818_v3, 8  ;;  %v5691_v20 = vsel %vm13799_vm10, 0, %v5689_v0 }
 0x584   : > { %v5769_v31 = vshll.u32 %v5768_v56, 30  ;;  %vm5843_vm14 = vcmp.lt.s32.totalorder %v13795_v60, 2  ;;  %vm5844_vm0 = vcmp.lt.s32.totalorder %v13795_v60, 3  ;;  %v5841_v38 = vor.u32 %v5840_v25, %v5839_v26 }
 0x585   : > { %v5687_v1 = vsel %vm5604_vm9, %v5686_v50, %v5685_v54  ;;  %v5850_v18 = vsel %vm5842_vm13, %v5829_v37, %v5832_v39  ;;  %v5851_v32 = vsel %vm5845_vm15, %v5838_v4, 920167782  ;;  %v5826_v45 = vshrl.u32 %v15318_v46, %v5825_v6 }
 0x586   : > { %v5690_v42 = vsel %vm13799_vm10, %v15442_v5, %v5687_v1  ;;  %v13845_v8 = vsub.s32 %v5766_v34, %v5769_v31  ;;  %v5695_v24 = vadd.s32 3, %v5691_v20  ;;  %v5847_v3 = vsel %vm5845_vm15, %v5835_v15, 2102212464 }
 0x587   : > { %8083 = vcosq.f32 %v5690_v42  ;;  %v5852_v43 = vsel %vm5844_vm0, %v5835_v15, %v5851_v32  ;;  %v5792_v13 = vsub.s32 4, %v5768_v56  ;;  %v5854_v41 = vsel %vm5842_vm13, %v5832_v39, %v5835_v15 }
 0x588   : > { %8085 = vsinq.f32 %v5690_v42  ;;  %v5772_v22 = vsub.s32 0, %v13845_v8  ;;  %v5853_v61 = vsel %vm5843_vm14, %v5850_v18, %v5852_v43  ;;  %v5855_v6 = vsel %vm5845_vm15, %v5841_v38, 1326507024  ;;  %v15454_v18 = vld [vmem:[#allocation42_spill] sm:$0xff] }
 0x589   : > { %v13860_v59 = vmul.u32.u64.low %v13830_v19, %v5853_v61  ;;  %v13861_v52 = vmul.u32.u64.high %v13830_v19, %v5853_v61, %v13860_v59  ;;  %v5846_v48 = vsel %vm5842_vm13, %v5826_v45, %v5829_v37  ;;  %v5848_v28 = vsel %vm5844_vm0, %v5832_v39, %v5847_v3 }
 0x58a   : > { %v7512_v55 = vmin.u32 %v5772_v22, %v13845_v8  ;;  %v5856_v40 = vsel %vm5844_vm0, %v5838_v4, %v5855_v6  ;;  %v5696_v51 = vand.u32 3, %v5695_v24  ;;  %v5917_v58 = vand.u32 2139095040, %v15451_v30 }
 0x58b   : > { %v5857_v33 = vsel %vm5843_vm14, %v5854_v41, %v5856_v40  ;;  %vm5694_vm1 = vweird.f32 %v15442_v5  ;;  %vm5708_vm2 = vcmp.lt.s32.totalorder %v15445_v36, 0  ;;  %v5849_v16 = vsel %vm5843_vm14, %v5846_v48, %v5848_v28 }
 0x58c   : > { %v5774_v44 = vclz %v7512_v55  ;;  %v13879_v34 = vmul.u32.u64.low %v13830_v19, %v5857_v33  ;;  %v13880_v23 = vmul.u32.u64.high %v13830_v19, %v5857_v33, %v13879_v34  ;;  %v5918_v49 = vshrl.u32 %v5917_v58, 23 }
 0x58d   : > { %vm13884_vm3 = vcmp.le.f32.partialorder %v5706_v62, 0.7853982  ;;  %v5793_v27 = vsel %vm5708_vm2, %v5792_v13, %v5768_v56  ;;  %v5914_v14 = vand.u32 2147483647, %v15451_v30  ;;  %vm5697_vm4 = vcmp.lt.s32.totalorder %v5696_v51, 2 }
 0x58e   : > { %v7513_v57 = vadd.s32 4294967294, %v5774_v44  ;;  %vm5698_vm5 = vcmp.eq.s32.totalorder %v5696_v51, 0  ;;  %v5868_v60 = vadd.s32 1, %v13861_v52  ;;  %v7519_v29 = vadd.s32 4294967169, %v5918_v49 }
 0x58f   : > { %vm5701_vm7 = vcmp.eq.s32.totalorder %v5696_v51, 2  ;;  %v5762_v0 = vadd.s32 %v13780_v7, %v13789_v17  ;;  %v5865_v62 = vmul.u32 %v13830_v19, %v5849_v16  ;;  %v5795_v9 = vsel %vm13884_vm3, 0, %v5793_v27 }
 0x590   : > { %vm7514_vm6 = vcmp.lt.s32.totalorder %v7513_v57, 0  ;;  %vm5867_vm8 = vc.u32 %v13880_v23, %v13860_v59  ;;  %v5924_v54 = vadd.s32 1, %v7519_v29  ;;  %v5921_v17 = vand.u32 8388607, %v5914_v14 }
 0x591   : > { %v8084_v2 = vpop.eup %8083  ;;  %v5777_v37 = vsel %vm7514_vm6, 0, %v7513_v57  ;;  %v5869_v7 = vsel %vm5867_vm8, %v5868_v60, %v13861_v52  ;;  %v6021_v32 = vand.u32 2139095040, %v15454_v18  ;;  %v5799_v43 = vadd.s32 3, %v5795_v9 }
 0x592   : > { %v8086_v39 = vpop.eup %8085  ;;  %v5702_v4 = vxor.u32 2147483648, %v8084_v2  ;;  %v5778_v56 = vsub.s32 32, %v5777_v37  ;;  %v5779_v26 = vshll.u32 %v13845_v8, %v5777_v37  ;;  %v5782_v25 = vsub.s32 4294967266, %v5777_v37 }
 0x593   : > { %v5699_v50 = vxor.u32 2147483648, %v8086_v39  ;;  %vm5925_vm9 = vcmp.gt.s32.totalorder %v5924_v54, 0  ;;  %v5870_v31 = vadd.s32 %v5869_v7, %v5865_v62  ;;  %v5922_v6 = vor.u32 8388608, %v5921_v17 }
 0x594   : > { %v5703_v15 = vsel %vm5701_vm7, %v5702_v4, %v8086_v39  ;;  %v5780_v19 = vshrl.u32 %v5762_v0, %v5778_v56  ;;  %v5783_v20 = vadd.s32 127, %v5782_v25  ;;  %v5926_v38 = vsel %vm5925_vm9, %v5924_v54, 0 }
 0x595   : > { %v5700_v1 = vsel %vm5698_vm5, %v8084_v2, %v5699_v50  ;;  %v5871_v24 = vadd.s32 536870912, %v5870_v31  ;;  %v5928_v22 = vand.u32 31, %v5926_v38  ;;  %v5927_v52 = vshrl.u32 %v5926_v38, 5 }
 0x596   : > { %v5704_v42 = vsel %vm5697_vm4, %v5700_v1, %v5703_v15  ;;  %v5781_v8 = vor.u32 %v5780_v19, %v5779_v26  ;;  %v5784_v45 = vshll.u32 %v5783_v20, 23  ;;  %v6018_v48 = vand.u32 2147483647, %v15454_v18 }
 0x597   : > { %v5705_v3 = vsel %vm5694_vm1, nan, %v5704_v42  ;;  %v13909_v41 = vshrl.u32 %v5871_v24, 30  ;;  %v5929_v55 = vsub.s32 32, %v5928_v22  ;;  %v6022_v28 = vshrl.u32 %v6021_v32, 23 }
 0x598   : > { %v5785_v13 = vor.u32 4788187, %v5784_v45  ;;  %v5788_v61 = vcvt.s32.f32 %v5781_v8  ;;  %7211 = vst [vmem:[%s9727_s11 + $0x188] sm:$0xff] %v5705_v3  ;;  %v5931_v33 = vshll.u32 %v15318_v46, %v5928_v22  ;;  %v5934_v5 = vshll.u32 %v15310_v10, %v5928_v22 }
 0x599   : > { %v5873_v51 = vshll.u32 %v13909_v41, 30  ;;  %v5932_v58 = vshrl.u32 %v15310_v10, %v5929_v55  ;;  %v5935_v44 = vshrl.u32 %v15311_v21, %v5929_v55  ;;  %v5937_v16 = vshll.u32 %v15311_v21, %v5928_v22 }
 0x59a   : > { %v5786_v40 = vand.u32 2147483647, %v5785_v13  ;;  %v5938_v34 = vshrl.u32 %v15312_v11, %v5929_v55  ;;  %v5940_v27 = vshll.u32 %v15312_v11, %v5928_v22  ;;  %v5941_v60 = vshrl.u32 %v15313_v53, %v5929_v55 }
 0x59b   : > { %v13920_v57 = vsub.s32 %v5870_v31, %v5873_v51  ;;  %v13924_v29 = vand.u32 3, %v5799_v43  ;;  %v13926_v0 = vshll.u32 %v5922_v6, 8  ;;  %v7523_v62 = vadd.s32 4294967169, %v6022_v28 }
 0x59c   : > { %v5789_v49 = vmul.f32 %v5788_v61, %v5786_v40  ;;  %v13930_v2 = vand.u32 8388607, %v6018_v48  ;;  %v5930_v54 = vshrl.u32 %v15318_v46, %v5929_v55  ;;  %v5933_v39 = vor.u32 %v5932_v58, %v5931_v33 }
 0x59d   : > { %v5876_v9 = vsub.s32 0, %v13920_v57  ;;  %v5936_v4 = vor.u32 %v5935_v44, %v5934_v5  ;;  %v5939_v56 = vor.u32 %v5938_v34, %v5937_v16  ;;  %v5943_v26 = vshll.u32 %v15313_v53, %v5928_v22 }
 0x59e   : > { %v5790_v37 = vxor.u32 2147483648, %v5789_v49  ;;  %v5944_v25 = vshrl.u32 %v15314_v35, %v5929_v55  ;;  %v5942_v17 = vor.u32 %v5941_v60, %v5940_v27  ;;  %vm5946_vm12 = vcmp.lt.s32.totalorder %v5927_v52, 1 }
 0x59f   : > { %v7516_v7 = vmin.u32 %v5876_v9, %v13920_v57  ;;  %vm5949_vm10 = vcmp.lt.s32.totalorder %v5927_v52, 4  ;;  %v6028_v20 = vadd.s32 1, %v7523_v62  ;;  %vm5947_vm11 = vcmp.lt.s32.totalorder %v5927_v52, 2 }
 0x5a0   : > { %v5791_v50 = vsel %vm5708_vm2, %v5790_v37, %v5789_v49  ;;  %v5945_v19 = vor.u32 %v5944_v25, %v5943_v26  ;;  %vm5948_vm13 = vcmp.lt.s32.totalorder %v5927_v52, 3  ;;  %v5950_v1 = vsel %vm5946_vm12, %v5930_v54, %v5933_v39 }
 0x5a1   : > { %v5794_v15 = vsel %vm13884_vm3, %v15445_v36, %v5791_v50  ;;  %v5878_v31 = vclz %v7516_v7  ;;  %v5951_v38 = vsel %vm5949_vm10, %v5939_v56, 2102212464  ;;  %v5954_v32 = vsel %vm5946_vm12, %v5933_v39, %v5936_v4 }
 0x5a2   : > { %8087 = vcosq.f32 %v5794_v15  ;;  %v5952_v8 = vsel %vm5948_vm13, %v5936_v4, %v5951_v38  ;;  %v5955_v63 = vsel %vm5949_vm10, %v5942_v17, 920167782  ;;  %v5958_v45 = vsel %vm5946_vm12, %v5936_v4, %v5939_v56 }
 0x5a3   : > { %8089 = vsinq.f32 %v5794_v15  ;;  %v7517_v42 = vadd.s32 4294967294, %v5878_v31  ;;  %vm5802_vm15 = vcmp.eq.s32.totalorder %v13924_v29, 0  ;;  %v5866_v24 = vadd.s32 %v13860_v59, %v13880_v23 }
 0x5a4   : > { %v5956_v3 = vsel %vm5948_vm13, %v5939_v56, %v5955_v63  ;;  %v5959_v43 = vsel %vm5949_vm10, %v5945_v19, 1326507024  ;;  %vm6029_vm14 = vcmp.gt.s32.totalorder %v6028_v20, 0  ;;  %vm5801_vm0 = vcmp.lt.s32.totalorder %v13924_v29, 2 }
 0x5a5   : > { %vm7518_vm1 = vcmp.lt.s32.totalorder %v7517_v42, 0  ;;  %v5953_v22 = vsel %vm5947_vm11, %v5950_v1, %v5952_v8  ;;  %v5957_v13 = vsel %vm5947_vm11, %v5954_v32, %v5956_v3  ;;  %v5960_v61 = vsel %vm5948_vm13, %v5942_v17, %v5959_v43 }
 0x5a6   : > { %vm5798_vm2 = vweird.f32 %v15445_v36  ;;  %v5881_v6 = vsel %vm7518_vm1, 0, %v7517_v42  ;;  %v5961_v55 = vsel %vm5947_vm11, %v5958_v45, %v5960_v61  ;;  %vm5812_vm3 = vcmp.lt.s32.totalorder %v15448_v47, 0 }
 0x5a7   : > { %v13960_v59 = vmul.u32.u64.low %v13926_v0, %v5957_v13  ;;  %v13961_v23 = vmul.u32.u64.high %v13926_v0, %v5957_v13, %v13960_v59  ;;  %v5882_v28 = vsub.s32 32, %v5881_v6  ;;  %v5883_v40 = vshll.u32 %v13920_v57, %v5881_v6 }
 0x5a8   : > { %v5886_v51 = vsub.s32 4294967266, %v5881_v6  ;;  %v6030_v33 = vsel %vm6029_vm14, %v6028_v20, 0  ;;  %vm5805_vm4 = vcmp.eq.s32.totalorder %v13924_v29, 2  ;;  %v5896_v34 = vsub.s32 4, %v13909_v41 }
 0x5a9   : > { %v13968_v5 = vmul.u32.u64.low %v13926_v0, %v5961_v55  ;;  %v13969_v58 = vmul.u32.u64.high %v13926_v0, %v5961_v55, %v13968_v5  ;;  %v6032_v52 = vand.u32 31, %v6030_v33  ;;  %v5884_v44 = vshrl.u32 %v5866_v24, %v5882_v28 }
 0x5aa   : > { %v5887_v16 = vadd.s32 127, %v5886_v51  ;;  %v6026_v49 = vor.u32 8388608, %v13930_v2  ;;  %v5969_v27 = vmul.u32 %v13926_v0, %v5953_v22  ;;  %v5972_v60 = vadd.s32 1, %v13961_v23 }
 0x5ab   : > { %v13975_v57 = vshrl.u32 %v6030_v33, 5  ;;  %v6033_v62 = vsub.s32 32, %v6032_v52  ;;  %vm13979_vm5 = vcmp.le.f32.partialorder %v5810_v12, 0.7853982  ;;  %v5885_v54 = vor.u32 %v5884_v44, %v5883_v40 }
 0x5ac   : > { %v8088_v37 = vpop.eup %8087  ;;  %v5888_v39 = vshll.u32 %v5887_v16, 23  ;;  %v6035_v4 = vshll.u32 %v15318_v46, %v6032_v52  ;;  %v6038_v2 = vshll.u32 %v15310_v10, %v6032_v52  ;;  %vm5971_vm7 = vc.u32 %v13969_v58, %v13960_v59 }
 0x5ad   : > { %v8090_v56 = vpop.eup %8089  ;;  %v5806_v0 = vxor.u32 2147483648, %v8088_v37  ;;  %v6041_v26 = vshll.u32 %v15311_v21, %v6032_v52  ;;  %v6044_v25 = vshll.u32 %v15312_v11, %v6032_v52  ;;  %v5892_v7 = vcvt.s32.f32 %v5885_v54 }
 0x5ae   : > { %v5803_v50 = vxor.u32 2147483648, %v8090_v56  ;;  %v5889_v12 = vor.u32 4788187, %v5888_v39  ;;  %v5973_v17 = vsel %vm5971_vm7, %v5972_v60, %v13961_v23  ;;  %v6036_v20 = vshrl.u32 %v15310_v10, %v6033_v62 }
 0x5af   : > { %v5807_v15 = vsel %vm5805_vm4, %v5806_v0, %v8090_v56  ;;  %v5974_v19 = vadd.s32 %v5973_v17, %v5969_v27  ;;  %v6039_v31 = vshrl.u32 %v15311_v21, %v6033_v62  ;;  %v6042_v32 = vshrl.u32 %v15312_v11, %v6033_v62 }
 0x5b0   : > { %v5804_v1 = vsel %vm5802_vm15, %v8088_v37, %v5803_v50  ;;  %v5890_v38 = vand.u32 2147483647, %v5889_v12  ;;  %v6045_v42 = vshrl.u32 %v15313_v53, %v6033_v62  ;;  %v5897_v63 = vsel %vm5812_vm3, %v5896_v34, %v13909_v41  ;;  %v15457_v12 = vld [vmem:[#allocation43_spill] sm:$0xff] }
 0x5b1   : > { %v5808_v8 = vsel %vm5801_vm0, %v5804_v1, %v5807_v15  ;;  %v5975_v45 = vadd.s32 536870912, %v5974_v19  ;;  %v6037_v24 = vor.u32 %v6036_v20, %v6035_v4  ;;  %v6040_v22 = vor.u32 %v6039_v31, %v6038_v2 }
 0x5b2   : > { %v5809_v3 = vsel %vm5798_vm2, nan, %v5808_v8  ;;  %v5893_v43 = vmul.f32 %v5892_v7, %v5890_v38  ;;  %v6046_v13 = vor.u32 %v6045_v42, %v6044_v25  ;;  %v6047_v6 = vshll.u32 %v15313_v53, %v6032_v52 }
 0x5b3   : > { %v5976_v61 = vshrl.u32 %v5975_v45, 30  ;;  %v6048_v55 = vshrl.u32 %v15314_v35, %v6033_v62  ;;  %vm6050_vm6 = vcmp.lt.s32.totalorder %v13975_v57, 1  ;;  %7212 = vst [vmem:[%s9727_s11 + $0x190] sm:$0xff] %v5809_v3  ;;  %v6043_v23 = vor.u32 %v6042_v32, %v6041_v26 }
 0x5b4   : > { %v5894_v29 = vxor.u32 2147483648, %v5893_v43  ;;  %vm6053_vm8 = vcmp.lt.s32.totalorder %v13975_v57, 4  ;;  %v14010_v41 = vshll.u32 %v6026_v49, 8  ;;  %v5899_v36 = vsel %vm13979_vm5, 0, %v5897_v63 }
 0x5b5   : > { %v5977_v28 = vshll.u32 %v5976_v61, 30  ;;  %vm6051_vm9 = vcmp.lt.s32.totalorder %v13975_v57, 2  ;;  %vm6052_vm12 = vcmp.lt.s32.totalorder %v13975_v57, 3  ;;  %v6049_v51 = vor.u32 %v6048_v55, %v6047_v6 }
 0x5b6   : > { %v5895_v40 = vsel %vm5812_vm3, %v5894_v29, %v5893_v43  ;;  %v6058_v33 = vsel %vm6050_vm6, %v6037_v24, %v6040_v22  ;;  %v6059_v5 = vsel %vm6053_vm8, %v6046_v13, 920167782  ;;  %v6034_v16 = vshrl.u32 %v15318_v46, %v6033_v62 }
 0x5b7   : > { %v5898_v52 = vsel %vm13979_vm5, %v15448_v47, %v5895_v40  ;;  %v14025_v44 = vsub.s32 %v5974_v19, %v5977_v28  ;;  %v5903_v34 = vadd.s32 3, %v5899_v36  ;;  %v6055_v49 = vsel %vm6053_vm8, %v6043_v23, 2102212464 }
 0x5b8   : > { %8091 = vcosq.f32 %v5898_v52  ;;  %v6060_v27 = vsel %vm6052_vm12, %v6043_v23, %v6059_v5  ;;  %v6000_v37 = vsub.s32 4, %v5976_v61  ;;  %v6062_v54 = vsel %vm6050_vm6, %v6040_v22, %v6043_v23 }
 0x5b9   : > { %8093 = vsinq.f32 %v5898_v52  ;;  %v5980_v60 = vsub.s32 0, %v14025_v44  ;;  %v6061_v9 = vsel %vm6051_vm9, %v6058_v33, %v6060_v27  ;;  %v6063_v62 = vsel %vm6053_vm8, %v6049_v51, 1326507024  ;;  %v15460_v33 = vld [vmem:[#allocation44_spill] sm:$0xff] }
 0x5ba   : > { %v14040_v39 = vmul.u32.u64.low %v14010_v41, %v6061_v9  ;;  %v14041_v4 = vmul.u32.u64.high %v14010_v41, %v6061_v9, %v14040_v39  ;;  %v6054_v56 = vsel %vm6050_vm6, %v6034_v16, %v6037_v24  ;;  %v6056_v0 = vsel %vm6052_vm12, %v6040_v22, %v6055_v49 }
 0x5bb   : > { %v7520_v2 = vmin.u32 %v5980_v60, %v14025_v44  ;;  %v6064_v26 = vsel %vm6052_vm12, %v6046_v13, %v6063_v62  ;;  %v5904_v25 = vand.u32 3, %v5903_v34  ;;  %v6125_v7 = vand.u32 2139095040, %v15457_v12 }
 0x5bc   : > { %v6065_v50 = vsel %vm6051_vm9, %v6062_v54, %v6064_v26  ;;  %vm5902_vm10 = vweird.f32 %v15448_v47  ;;  %vm5916_vm11 = vcmp.lt.s32.totalorder %v15451_v30, 0  ;;  %v6057_v15 = vsel %vm6051_vm9, %v6054_v56, %v6056_v0 }
 0x5bd   : > { %v5982_v17 = vclz %v7520_v2  ;;  %v14059_v19 = vmul.u32.u64.low %v14010_v41, %v6065_v50  ;;  %v14060_v20 = vmul.u32.u64.high %v14010_v41, %v6065_v50, %v14059_v19  ;;  %v6126_v31 = vshrl.u32 %v6125_v7, 23 }
 0x5be   : > { %vm14064_vm13 = vcmp.le.f32.partialorder %v5914_v14, 0.7853982  ;;  %v6001_v32 = vsel %vm5916_vm11, %v6000_v37, %v5976_v61  ;;  %v6122_v42 = vand.u32 2147483647, %v15457_v12  ;;  %vm5905_vm15 = vcmp.lt.s32.totalorder %v5904_v25, 2 }
 0x5bf   : > { %v7521_v38 = vadd.s32 4294967294, %v5982_v17  ;;  %vm5906_vm14 = vcmp.eq.s32.totalorder %v5904_v25, 0  ;;  %v6076_v57 = vadd.s32 1, %v14041_v4  ;;  %v7527_v8 = vadd.s32 4294967169, %v6126_v31 }
 0x5c0   : > { %vm5909_vm0 = vcmp.eq.s32.totalorder %v5904_v25, 2  ;;  %v5970_v63 = vadd.s32 %v13960_v59, %v13969_v58  ;;  %v6073_v14 = vmul.u32 %v14010_v41, %v6057_v15  ;;  %v6003_v3 = vsel %vm14064_vm13, 0, %v6001_v32 }
 0x5c1   : > { %vm7522_vm1 = vcmp.lt.s32.totalorder %v7521_v38, 0  ;;  %vm6075_vm2 = vc.u32 %v14060_v20, %v14040_v39  ;;  %v6132_v43 = vadd.s32 1, %v7527_v8  ;;  %v6129_v58 = vand.u32 8388607, %v6122_v42 }
 0x5c2   : > { %v8092_v45 = vpop.eup %8091  ;;  %v5985_v24 = vsel %vm7522_vm1, 0, %v7521_v38  ;;  %v6077_v59 = vsel %vm6075_vm2, %v6076_v57, %v14041_v4  ;;  %v6229_v5 = vand.u32 2139095040, %v15460_v33  ;;  %v6007_v27 = vadd.s32 3, %v6003_v3 }
 0x5c3   : > { %v8094_v22 = vpop.eup %8093  ;;  %v5910_v13 = vxor.u32 2147483648, %v8092_v45  ;;  %v5986_v61 = vsub.s32 32, %v5985_v24  ;;  %v5987_v6 = vshll.u32 %v14025_v44, %v5985_v24  ;;  %v5990_v55 = vsub.s32 4294967266, %v5985_v24 }
 0x5c4   : > { %v5907_v29 = vxor.u32 2147483648, %v8094_v22  ;;  %vm6133_vm3 = vcmp.gt.s32.totalorder %v6132_v43, 0  ;;  %v6078_v28 = vadd.s32 %v6077_v59, %v6073_v14  ;;  %v6130_v62 = vor.u32 8388608, %v6129_v58 }
 0x5c5   : > { %v5911_v23 = vsel %vm5909_vm0, %v5910_v13, %v8094_v22  ;;  %v5988_v41 = vshrl.u32 %v5970_v63, %v5986_v61  ;;  %v5991_v36 = vadd.s32 127, %v5990_v55  ;;  %v6134_v51 = vsel %vm6133_vm3, %v6132_v43, 0 }
 0x5c6   : > { %v5908_v40 = vsel %vm5906_vm14, %v8092_v45, %v5907_v29  ;;  %v6079_v34 = vadd.s32 536870912, %v6078_v28  ;;  %v6136_v60 = vand.u32 31, %v6134_v51  ;;  %v6135_v4 = vshrl.u32 %v6134_v51, 5 }
 0x5c7   : > { %v5912_v52 = vsel %vm5905_vm15, %v5908_v40, %v5911_v23  ;;  %v5989_v44 = vor.u32 %v5988_v41, %v5987_v6  ;;  %v5992_v16 = vshll.u32 %v5991_v36, 23  ;;  %v6226_v56 = vand.u32 2147483647, %v15460_v33 }
 0x5c8   : > { %v5913_v49 = vsel %vm5902_vm10, nan, %v5912_v52  ;;  %v14089_v54 = vshrl.u32 %v6079_v34, 30  ;;  %v6137_v2 = vsub.s32 32, %v6136_v60  ;;  %v6230_v0 = vshrl.u32 %v6229_v5, 23 }
 0x5c9   : > { %v5993_v37 = vor.u32 4788187, %v5992_v16  ;;  %v5996_v9 = vcvt.s32.f32 %v5989_v44  ;;  %7213 = vst [vmem:[%s9727_s11 + $0x198] sm:$0xff] %v5913_v49  ;;  %v6139_v50 = vshll.u32 %v15318_v46, %v6136_v60  ;;  %v6142_v47 = vshll.u32 %v15310_v10, %v6136_v60 }
 0x5ca   : > { %v6081_v25 = vshll.u32 %v14089_v54, 30  ;;  %v6140_v7 = vshrl.u32 %v15310_v10, %v6137_v2  ;;  %v6143_v17 = vshrl.u32 %v15311_v21, %v6137_v2  ;;  %v6145_v15 = vshll.u32 %v15311_v21, %v6136_v60 }
 0x5cb   : > { %v5994_v26 = vand.u32 2147483647, %v5993_v37  ;;  %v6146_v19 = vshrl.u32 %v15312_v11, %v6137_v2  ;;  %v6148_v32 = vshll.u32 %v15312_v11, %v6136_v60  ;;  %v6149_v57 = vshrl.u32 %v15313_v53, %v6137_v2 }
 0x5cc   : > { %v14100_v38 = vsub.s32 %v6078_v28, %v6081_v25  ;;  %v14104_v8 = vand.u32 3, %v6007_v27  ;;  %v14106_v63 = vshll.u32 %v6130_v62, 8  ;;  %v7531_v14 = vadd.s32 4294967169, %v6230_v0 }
 0x5cd   : > { %v5997_v31 = vmul.f32 %v5996_v9, %v5994_v26  ;;  %v14110_v45 = vand.u32 8388607, %v6226_v56  ;;  %v6138_v43 = vshrl.u32 %v15318_v46, %v6137_v2  ;;  %v6141_v22 = vor.u32 %v6140_v7, %v6139_v50 }
 0x5ce   : > { %v6084_v3 = vsub.s32 0, %v14100_v38  ;;  %v6144_v13 = vor.u32 %v6143_v17, %v6142_v47  ;;  %v6147_v61 = vor.u32 %v6146_v19, %v6145_v15  ;;  %v6151_v6 = vshll.u32 %v15313_v53, %v6136_v60 }
 0x5cf   : > { %v5998_v24 = vxor.u32 2147483648, %v5997_v31  ;;  %v6152_v55 = vshrl.u32 %v15314_v35, %v6137_v2  ;;  %v6150_v58 = vor.u32 %v6149_v57, %v6148_v32  ;;  %vm6154_vm4 = vcmp.lt.s32.totalorder %v6135_v4, 1 }
 0x5d0   : > { %v7524_v59 = vmin.u32 %v6084_v3, %v14100_v38  ;;  %vm6157_vm5 = vcmp.lt.s32.totalorder %v6135_v4, 4  ;;  %v6236_v36 = vadd.s32 1, %v7531_v14  ;;  %vm6155_vm7 = vcmp.lt.s32.totalorder %v6135_v4, 2 }
 0x5d1   : > { %v5999_v29 = vsel %vm5916_vm11, %v5998_v24, %v5997_v31  ;;  %v6153_v41 = vor.u32 %v6152_v55, %v6151_v6  ;;  %vm6156_vm6 = vcmp.lt.s32.totalorder %v6135_v4, 3  ;;  %v6158_v40 = vsel %vm6154_vm4, %v6138_v43, %v6141_v22 }
 0x5d2   : > { %v6002_v23 = vsel %vm14064_vm13, %v15451_v30, %v5999_v29  ;;  %v6086_v28 = vclz %v7524_v59  ;;  %v6159_v51 = vsel %vm6157_vm5, %v6147_v61, 2102212464  ;;  %v6162_v5 = vsel %vm6154_vm4, %v6141_v22, %v6144_v13 }
 0x5d3   : > { %8095 = vcosq.f32 %v6002_v23  ;;  %v6160_v44 = vsel %vm6156_vm6, %v6144_v13, %v6159_v51  ;;  %v6163_v1 = vsel %vm6157_vm5, %v6150_v58, 920167782  ;;  %v6166_v16 = vsel %vm6154_vm4, %v6144_v13, %v6147_v61 }
 0x5d4   : > { %8097 = vsinq.f32 %v6002_v23  ;;  %v7525_v52 = vadd.s32 4294967294, %v6086_v28  ;;  %vm6010_vm8 = vcmp.eq.s32.totalorder %v14104_v8, 0  ;;  %v6074_v34 = vadd.s32 %v14040_v39, %v14060_v20 }
 0x5d5   : > { %v6164_v49 = vsel %vm6156_vm6, %v6147_v61, %v6163_v1  ;;  %v6167_v27 = vsel %vm6157_vm5, %v6153_v41, 1326507024  ;;  %vm6237_vm9 = vcmp.gt.s32.totalorder %v6236_v36, 0  ;;  %vm6009_vm12 = vcmp.lt.s32.totalorder %v14104_v8, 2 }
 0x5d6   : > { %vm7526_vm10 = vcmp.lt.s32.totalorder %v7525_v52, 0  ;;  %v6161_v60 = vsel %vm6155_vm7, %v6158_v40, %v6160_v44  ;;  %v6165_v37 = vsel %vm6155_vm7, %v6162_v5, %v6164_v49  ;;  %v6168_v9 = vsel %vm6156_vm6, %v6150_v58, %v6167_v27 }
 0x5d7   : > { %vm6006_vm11 = vweird.f32 %v15451_v30  ;;  %v6089_v62 = vsel %vm7526_vm10, 0, %v7525_v52  ;;  %v6169_v2 = vsel %vm6155_vm7, %v6166_v16, %v6168_v9  ;;  %vm6020_vm13 = vcmp.lt.s32.totalorder %v15454_v18, 0 }
 0x5d8   : > { %v14140_v39 = vmul.u32.u64.low %v14106_v63, %v6165_v37  ;;  %v14141_v20 = vmul.u32.u64.high %v14106_v63, %v6165_v37, %v14140_v39  ;;  %v6090_v0 = vsub.s32 32, %v6089_v62  ;;  %v6091_v26 = vshll.u32 %v14100_v38, %v6089_v62 }
 0x5d9   : > { %v6094_v25 = vsub.s32 4294967266, %v6089_v62  ;;  %v6238_v50 = vsel %vm6237_vm9, %v6236_v36, 0  ;;  %vm6013_vm15 = vcmp.eq.s32.totalorder %v14104_v8, 2  ;;  %v6104_v19 = vsub.s32 4, %v14089_v54 }
 0x5da   : > { %v14148_v47 = vmul.u32.u64.low %v14106_v63, %v6169_v2  ;;  %v14149_v7 = vmul.u32.u64.high %v14106_v63, %v6169_v2, %v14148_v47  ;;  %v6240_v4 = vand.u32 31, %v6238_v50  ;;  %v6092_v17 = vshrl.u32 %v6074_v34, %v6090_v0 }
 0x5db   : > { %v6095_v15 = vadd.s32 127, %v6094_v25  ;;  %v6234_v31 = vor.u32 8388608, %v14110_v45  ;;  %v6177_v32 = vmul.u32 %v14106_v63, %v6161_v60  ;;  %v6180_v57 = vadd.s32 1, %v14141_v20 }
 0x5dc   : > { %v14155_v38 = vshrl.u32 %v6238_v50, 5  ;;  %v6241_v14 = vsub.s32 32, %v6240_v4  ;;  %vm14159_vm14 = vcmp.le.f32.partialorder %v6018_v48, 0.7853982  ;;  %v6093_v43 = vor.u32 %v6092_v17, %v6091_v26 }
 0x5dd   : > { %v8096_v24 = vpop.eup %8095  ;;  %v6096_v22 = vshll.u32 %v6095_v15, 23  ;;  %v6243_v13 = vshll.u32 %v15318_v46, %v6240_v4  ;;  %v6246_v45 = vshll.u32 %v15310_v10, %v6240_v4  ;;  %vm6179_vm0 = vc.u32 %v14149_v7, %v14140_v39 }
 0x5de   : > { %v8098_v61 = vpop.eup %8097  ;;  %v6014_v63 = vxor.u32 2147483648, %v8096_v24  ;;  %v6249_v6 = vshll.u32 %v15311_v21, %v6240_v4  ;;  %v6252_v55 = vshll.u32 %v15312_v11, %v6240_v4  ;;  %v6100_v59 = vcvt.s32.f32 %v6093_v43 }
 0x5df   : > { %v6011_v29 = vxor.u32 2147483648, %v8098_v61  ;;  %v6097_v48 = vor.u32 4788187, %v6096_v22  ;;  %v6181_v58 = vsel %vm6179_vm0, %v6180_v57, %v14141_v20  ;;  %v6244_v36 = vshrl.u32 %v15310_v10, %v6241_v14 }
 0x5e0   : > { %v6015_v23 = vsel %vm6013_vm15, %v6014_v63, %v8098_v61  ;;  %v6182_v41 = vadd.s32 %v6181_v58, %v6177_v32  ;;  %v6247_v28 = vshrl.u32 %v15311_v21, %v6241_v14  ;;  %v6250_v5 = vshrl.u32 %v15312_v11, %v6241_v14 }
 0x5e1   : > { %v6012_v40 = vsel %vm6010_vm8, %v8096_v24, %v6011_v29  ;;  %v6098_v51 = vand.u32 2147483647, %v6097_v48  ;;  %v6253_v52 = vshrl.u32 %v15313_v53, %v6241_v14  ;;  %v6105_v1 = vsel %vm6020_vm13, %v6104_v19, %v14089_v54  ;;  %v15463_v48 = vld [vmem:[#allocation45_spill] sm:$0xff] }
 0x5e2   : > { %v6016_v44 = vsel %vm6009_vm12, %v6012_v40, %v6015_v23  ;;  %v6183_v16 = vadd.s32 536870912, %v6182_v41  ;;  %v6245_v34 = vor.u32 %v6244_v36, %v6243_v13  ;;  %v6248_v60 = vor.u32 %v6247_v28, %v6246_v45 }
 0x5e3   : > { %v6017_v49 = vsel %vm6006_vm11, nan, %v6016_v44  ;;  %v6101_v27 = vmul.f32 %v6100_v59, %v6098_v51  ;;  %v6254_v37 = vor.u32 %v6253_v52, %v6252_v55  ;;  %v6255_v62 = vshll.u32 %v15313_v53, %v6240_v4 }
 0x5e4   : > { %v6184_v9 = vshrl.u32 %v6183_v16, 30  ;;  %v6256_v2 = vshrl.u32 %v15314_v35, %v6241_v14  ;;  %vm6258_vm1 = vcmp.lt.s32.totalorder %v14155_v38, 1  ;;  %7214 = vst [vmem:[%s9727_s11 + $0x1a0] sm:$0xff] %v6017_v49  ;;  %v6251_v20 = vor.u32 %v6250_v5, %v6249_v6 }
 0x5e5   : > { %v6102_v8 = vxor.u32 2147483648, %v6101_v27  ;;  %vm6261_vm2 = vcmp.lt.s32.totalorder %v14155_v38, 4  ;;  %v14190_v54 = vshll.u32 %v6234_v31, 8  ;;  %v6107_v30 = vsel %vm14159_vm14, 0, %v6105_v1 }
 0x5e6   : > { %v6185_v0 = vshll.u32 %v6184_v9, 30  ;;  %vm6259_vm3 = vcmp.lt.s32.totalorder %v14155_v38, 2  ;;  %vm6260_vm4 = vcmp.lt.s32.totalorder %v14155_v38, 3  ;;  %v6257_v25 = vor.u32 %v6256_v2, %v6255_v62 }
 0x5e7   : > { %v6103_v26 = vsel %vm6020_vm13, %v6102_v8, %v6101_v27  ;;  %v6266_v50 = vsel %vm6258_vm1, %v6245_v34, %v6248_v60  ;;  %v6267_v47 = vsel %vm6261_vm2, %v6254_v37, 920167782  ;;  %v6242_v15 = vshrl.u32 %v15318_v46, %v6241_v14 }
 0x5e8   : > { %v6106_v4 = vsel %vm14159_vm14, %v15454_v18, %v6103_v26  ;;  %v14205_v17 = vsub.s32 %v6182_v41, %v6185_v0  ;;  %v6111_v19 = vadd.s32 3, %v6107_v30  ;;  %v6263_v31 = vsel %vm6261_vm2, %v6251_v20, 2102212464 }
 0x5e9   : > { %8099 = vcosq.f32 %v6106_v4  ;;  %v6268_v32 = vsel %vm6260_vm4, %v6251_v20, %v6267_v47  ;;  %v6208_v24 = vsub.s32 4, %v6184_v9  ;;  %v6270_v43 = vsel %vm6258_vm1, %v6248_v60, %v6251_v20 }
 0x5ea   : > { %8101 = vsinq.f32 %v6106_v4  ;;  %v6188_v57 = vsub.s32 0, %v14205_v17  ;;  %v6269_v3 = vsel %vm6259_vm3, %v6266_v50, %v6268_v32  ;;  %v6271_v14 = vsel %vm6261_vm2, %v6257_v25, 1326507024  ;;  %v15466_v50 = vld [vmem:[#allocation46_spill] sm:$0xff] }
 0x5eb   : > { %v14220_v22 = vmul.u32.u64.low %v14190_v54, %v6269_v3  ;;  %v14221_v13 = vmul.u32.u64.high %v14190_v54, %v6269_v3, %v14220_v22  ;;  %v6262_v61 = vsel %vm6258_vm1, %v6242_v15, %v6245_v34  ;;  %v6264_v63 = vsel %vm6260_vm4, %v6248_v60, %v6263_v31 }
 0x5ec   : > { %v7528_v45 = vmin.u32 %v6188_v57, %v14205_v17  ;;  %v6272_v6 = vsel %vm6260_vm4, %v6254_v37, %v6271_v14  ;;  %v6112_v55 = vand.u32 3, %v6111_v19  ;;  %v6333_v59 = vand.u32 2139095040, %v15463_v48 }
 0x5ed   : > { %v6273_v29 = vsel %vm6259_vm3, %v6270_v43, %v6272_v6  ;;  %vm6110_vm5 = vweird.f32 %v15454_v18  ;;  %vm6124_vm7 = vcmp.lt.s32.totalorder %v15457_v12, 0  ;;  %v6265_v23 = vsel %vm6259_vm3, %v6262_v61, %v6264_v63 }
 0x5ee   : > { %v6190_v58 = vclz %v7528_v45  ;;  %v14239_v41 = vmul.u32.u64.low %v14190_v54, %v6273_v29  ;;  %v14240_v36 = vmul.u32.u64.high %v14190_v54, %v6273_v29, %v14239_v41  ;;  %v6334_v28 = vshrl.u32 %v6333_v59, 23 }
 0x5ef   : > { %vm14244_vm6 = vcmp.le.f32.partialorder %v6122_v42, 0.7853982  ;;  %v6209_v5 = vsel %vm6124_vm7, %v6208_v24, %v6184_v9  ;;  %v6330_v52 = vand.u32 2147483647, %v15463_v48  ;;  %vm6113_vm8 = vcmp.lt.s32.totalorder %v6112_v55, 2 }
 0x5f0   : > { %v7529_v51 = vadd.s32 4294967294, %v6190_v58  ;;  %vm6114_vm9 = vcmp.eq.s32.totalorder %v6112_v55, 0  ;;  %v6284_v38 = vadd.s32 1, %v14221_v13  ;;  %v7535_v44 = vadd.s32 4294967169, %v6334_v28 }
 0x5f1   : > { %vm6117_vm12 = vcmp.eq.s32.totalorder %v6112_v55, 2  ;;  %v6178_v1 = vadd.s32 %v14140_v39, %v14149_v7  ;;  %v6281_v42 = vmul.u32 %v14190_v54, %v6265_v23  ;;  %v6211_v49 = vsel %vm14244_vm6, 0, %v6209_v5 }
 0x5f2   : > { %vm7530_vm10 = vcmp.lt.s32.totalorder %v7529_v51, 0  ;;  %vm6283_vm11 = vc.u32 %v14240_v36, %v14220_v22  ;;  %v6340_v27 = vadd.s32 1, %v7535_v44  ;;  %v6337_v7 = vand.u32 8388607, %v6330_v52 }
 0x5f3   : > { %v8100_v16 = vpop.eup %8099  ;;  %v6193_v34 = vsel %vm7530_vm10, 0, %v7529_v51  ;;  %v6285_v39 = vsel %vm6283_vm11, %v6284_v38, %v14221_v13  ;;  %v6437_v47 = vand.u32 2139095040, %v15466_v50  ;;  %v6215_v32 = vadd.s32 3, %v6211_v49 }
 0x5f4   : > { %v8102_v60 = vpop.eup %8101  ;;  %v6118_v37 = vxor.u32 2147483648, %v8100_v16  ;;  %v6194_v9 = vsub.s32 32, %v6193_v34  ;;  %v6195_v62 = vshll.u32 %v14205_v17, %v6193_v34  ;;  %v6198_v2 = vsub.s32 4294967266, %v6193_v34 }
 0x5f5   : > { %v6115_v8 = vxor.u32 2147483648, %v8102_v60  ;;  %vm6341_vm13 = vcmp.gt.s32.totalorder %v6340_v27, 0  ;;  %v6286_v0 = vadd.s32 %v6285_v39, %v6281_v42  ;;  %v6338_v14 = vor.u32 8388608, %v6337_v7 }
 0x5f6   : > { %v6119_v20 = vsel %vm6117_vm12, %v6118_v37, %v8102_v60  ;;  %v6196_v54 = vshrl.u32 %v6178_v1, %v6194_v9  ;;  %v6199_v30 = vadd.s32 127, %v6198_v2  ;;  %v6342_v25 = vsel %vm6341_vm13, %v6340_v27, 0 }
 0x5f7   : > { %v6116_v26 = vsel %vm6114_vm9, %v8100_v16, %v6115_v8  ;;  %v6287_v19 = vadd.s32 536870912, %v6286_v0  ;;  %v6344_v57 = vand.u32 31, %v6342_v25  ;;  %v6343_v13 = vshrl.u32 %v6342_v25, 5 }
 0x5f8   : > { %v6120_v4 = vsel %vm6113_vm8, %v6116_v26, %v6119_v20  ;;  %v6197_v17 = vor.u32 %v6196_v54, %v6195_v62  ;;  %v6200_v15 = vshll.u32 %v6199_v30, 23  ;;  %v6434_v61 = vand.u32 2147483647, %v15466_v50 }
 0x5f9   : > { %v6121_v31 = vsel %vm6110_vm5, nan, %v6120_v4  ;;  %v14269_v43 = vshrl.u32 %v6287_v19, 30  ;;  %v6345_v45 = vsub.s32 32, %v6344_v57  ;;  %v6438_v63 = vshrl.u32 %v6437_v47, 23 }
 0x5fa   : > { %v6201_v24 = vor.u32 4788187, %v6200_v15  ;;  %v6204_v3 = vcvt.s32.f32 %v6197_v17  ;;  %7215 = vst [vmem:[%s9727_s11 + $0x1a8] sm:$0xff] %v6121_v31  ;;  %v6347_v29 = vshll.u32 %v15318_v46, %v6344_v57  ;;  %v6350_v18 = vshll.u32 %v15310_v10, %v6344_v57 }
 0x5fb   : > { %v6289_v55 = vshll.u32 %v14269_v43, 30  ;;  %v6348_v59 = vshrl.u32 %v15310_v10, %v6345_v45  ;;  %v6351_v58 = vshrl.u32 %v15311_v21, %v6345_v45  ;;  %v6353_v23 = vshll.u32 %v15311_v21, %v6344_v57 }
 0x5fc   : > { %v6202_v6 = vand.u32 2147483647, %v6201_v24  ;;  %v6354_v41 = vshrl.u32 %v15312_v11, %v6345_v45  ;;  %v6356_v5 = vshll.u32 %v15312_v11, %v6344_v57  ;;  %v6357_v38 = vshrl.u32 %v15313_v53, %v6345_v45 }
 0x5fd   : > { %v14280_v51 = vsub.s32 %v6286_v0, %v6289_v55  ;;  %v14284_v44 = vand.u32 3, %v6215_v32  ;;  %v14286_v1 = vshll.u32 %v6338_v14, 8  ;;  %v7539_v42 = vadd.s32 4294967169, %v6438_v63 }
 0x5fe   : > { %v6205_v28 = vmul.f32 %v6204_v3, %v6202_v6  ;;  %v14290_v16 = vand.u32 8388607, %v6434_v61  ;;  %v6346_v27 = vshrl.u32 %v15318_v46, %v6345_v45  ;;  %v6349_v60 = vor.u32 %v6348_v59, %v6347_v29 }
 0x5ff   : > { %v6292_v49 = vsub.s32 0, %v14280_v51  ;;  %v6352_v37 = vor.u32 %v6351_v58, %v6350_v18  ;;  %v6355_v9 = vor.u32 %v6354_v41, %v6353_v23  ;;  %v6359_v62 = vshll.u32 %v15313_v53, %v6344_v57 }
 0x600   : > { %v6206_v34 = vxor.u32 2147483648, %v6205_v28  ;;  %v6360_v2 = vshrl.u32 %v15314_v35, %v6345_v45  ;;  %v6358_v7 = vor.u32 %v6357_v38, %v6356_v5  ;;  %vm6362_vm15 = vcmp.lt.s32.totalorder %v6343_v13, 1 }
 0x601   : > { %v7532_v39 = vmin.u32 %v6292_v49, %v14280_v51  ;;  %vm6365_vm14 = vcmp.lt.s32.totalorder %v6343_v13, 4  ;;  %v6444_v30 = vadd.s32 1, %v7539_v42  ;;  %vm6363_vm0 = vcmp.lt.s32.totalorder %v6343_v13, 2 }
 0x602   : > { %v6207_v8 = vsel %vm6124_vm7, %v6206_v34, %v6205_v28  ;;  %v6361_v54 = vor.u32 %v6360_v2, %v6359_v62  ;;  %vm6364_vm1 = vcmp.lt.s32.totalorder %v6343_v13, 3  ;;  %v6366_v26 = vsel %vm6362_vm15, %v6346_v27, %v6349_v60 }
 0x603   : > { %v6210_v20 = vsel %vm14244_vm6, %v15457_v12, %v6207_v8  ;;  %v6294_v0 = vclz %v7532_v39  ;;  %v6367_v25 = vsel %vm6365_vm14, %v6355_v9, 2102212464  ;;  %v6370_v47 = vsel %vm6362_vm15, %v6349_v60, %v6352_v37 }
 0x604   : > { %8103 = vcosq.f32 %v6210_v20  ;;  %v6368_v17 = vsel %vm6364_vm1, %v6352_v37, %v6367_v25  ;;  %v6371_v40 = vsel %vm6365_vm14, %v6358_v7, 920167782  ;;  %v6374_v15 = vsel %vm6362_vm15, %v6352_v37, %v6355_v9 }
 0x605   : > { %8105 = vsinq.f32 %v6210_v20  ;;  %v7533_v4 = vadd.s32 4294967294, %v6294_v0  ;;  %vm6218_vm2 = vcmp.eq.s32.totalorder %v14284_v44, 0  ;;  %v6282_v19 = vadd.s32 %v14220_v22, %v14240_v36 }
 0x606   : > { %v6372_v31 = vsel %vm6364_vm1, %v6355_v9, %v6371_v40  ;;  %v6375_v32 = vsel %vm6365_vm14, %v6361_v54, 1326507024  ;;  %vm6445_vm3 = vcmp.gt.s32.totalorder %v6444_v30, 0  ;;  %vm6217_vm4 = vcmp.lt.s32.totalorder %v14284_v44, 2 }
 0x607   : > { %vm7534_vm5 = vcmp.lt.s32.totalorder %v7533_v4, 0  ;;  %v6369_v57 = vsel %vm6363_vm0, %v6366_v26, %v6368_v17  ;;  %v6373_v24 = vsel %vm6363_vm0, %v6370_v47, %v6372_v31  ;;  %v6376_v3 = vsel %vm6364_vm1, %v6358_v7, %v6375_v32 }
 0x608   : > { %vm6214_vm7 = vweird.f32 %v15457_v12  ;;  %v6297_v14 = vsel %vm7534_vm5, 0, %v7533_v4  ;;  %v6377_v45 = vsel %vm6363_vm0, %v6374_v15, %v6376_v3  ;;  %vm6228_vm6 = vcmp.lt.s32.totalorder %v15460_v33, 0 }
 0x609   : > { %v14320_v22 = vmul.u32.u64.low %v14286_v1, %v6373_v24  ;;  %v14321_v36 = vmul.u32.u64.high %v14286_v1, %v6373_v24, %v14320_v22  ;;  %v6298_v63 = vsub.s32 32, %v6297_v14  ;;  %v6299_v6 = vshll.u32 %v14280_v51, %v6297_v14 }
 0x60a   : > { %v6302_v55 = vsub.s32 4294967266, %v6297_v14  ;;  %v6446_v29 = vsel %vm6445_vm3, %v6444_v30, 0  ;;  %vm6221_vm8 = vcmp.eq.s32.totalorder %v14284_v44, 2  ;;  %v6312_v41 = vsub.s32 4, %v14269_v43 }
 0x60b   : > { %v14328_v18 = vmul.u32.u64.low %v14286_v1, %v6377_v45  ;;  %v14329_v59 = vmul.u32.u64.high %v14286_v1, %v6377_v45, %v14328_v18  ;;  %v6448_v13 = vand.u32 31, %v6446_v29  ;;  %v6300_v58 = vshrl.u32 %v6282_v19, %v6298_v63 }
 0x60c   : > { %v6303_v23 = vadd.s32 127, %v6302_v55  ;;  %v6442_v28 = vor.u32 8388608, %v14290_v16  ;;  %v6385_v5 = vmul.u32 %v14286_v1, %v6369_v57  ;;  %v6388_v38 = vadd.s32 1, %v14321_v36 }
 0x60d   : > { %v14335_v51 = vshrl.u32 %v6446_v29, 5  ;;  %v6449_v42 = vsub.s32 32, %v6448_v13  ;;  %vm14339_vm9 = vcmp.le.f32.partialorder %v6226_v56, 0.7853982  ;;  %v6301_v27 = vor.u32 %v6300_v58, %v6299_v6 }
 0x60e   : > { %v8104_v34 = vpop.eup %8103  ;;  %v6304_v60 = vshll.u32 %v6303_v23, 23  ;;  %v6451_v37 = vshll.u32 %v15318_v46, %v6448_v13  ;;  %v6454_v16 = vshll.u32 %v15310_v10, %v6448_v13  ;;  %vm6387_vm12 = vc.u32 %v14329_v59, %v14320_v22 }
 0x60f   : > { %v8106_v9 = vpop.eup %8105  ;;  %v6222_v1 = vxor.u32 2147483648, %v8104_v34  ;;  %v6457_v62 = vshll.u32 %v15311_v21, %v6448_v13  ;;  %v6460_v2 = vshll.u32 %v15312_v11, %v6448_v13  ;;  %v6308_v39 = vcvt.s32.f32 %v6301_v27 }
 0x610   : > { %v6219_v8 = vxor.u32 2147483648, %v8106_v9  ;;  %v6305_v56 = vor.u32 4788187, %v6304_v60  ;;  %v6389_v7 = vsel %vm6387_vm12, %v6388_v38, %v14321_v36  ;;  %v6452_v30 = vshrl.u32 %v15310_v10, %v6449_v42 }
 0x611   : > { %v6223_v20 = vsel %vm6221_vm8, %v6222_v1, %v8106_v9  ;;  %v6390_v54 = vadd.s32 %v6389_v7, %v6385_v5  ;;  %v6455_v0 = vshrl.u32 %v15311_v21, %v6449_v42  ;;  %v6458_v47 = vshrl.u32 %v15312_v11, %v6449_v42 }
 0x612   : > { %v6220_v26 = vsel %vm6218_vm2, %v8104_v34, %v6219_v8  ;;  %v6306_v25 = vand.u32 2147483647, %v6305_v56  ;;  %v6461_v4 = vshrl.u32 %v15313_v53, %v6449_v42  ;;  %v6313_v40 = vsel %vm6228_vm6, %v6312_v41, %v14269_v43  ;;  %v15469_v56 = vld [vmem:[#allocation13_spill] sm:$0xff] }
 0x613   : > { %v6224_v17 = vsel %vm6217_vm4, %v6220_v26, %v6223_v20  ;;  %v6391_v15 = vadd.s32 536870912, %v6390_v54  ;;  %v6453_v19 = vor.u32 %v6452_v30, %v6451_v37  ;;  %v6456_v57 = vor.u32 %v6455_v0, %v6454_v16 }
 0x614   : > { %v6225_v31 = vsel %vm6214_vm7, nan, %v6224_v17  ;;  %v6309_v32 = vmul.f32 %v6308_v39, %v6306_v25  ;;  %v6462_v24 = vor.u32 %v6461_v4, %v6460_v2  ;;  %v6463_v14 = vshll.u32 %v15313_v53, %v6448_v13 }
 0x615   : > { %v6392_v3 = vshrl.u32 %v6391_v15, 30  ;;  %v6464_v45 = vshrl.u32 %v15314_v35, %v6449_v42  ;;  %vm6466_vm10 = vcmp.lt.s32.totalorder %v14335_v51, 1  ;;  %7216 = vst [vmem:[%s9727_s11 + $0x1b0] sm:$0xff] %v6225_v31  ;;  %v6459_v36 = vor.u32 %v6458_v47, %v6457_v62 }
 0x616   : > { %v6310_v44 = vxor.u32 2147483648, %v6309_v32  ;;  %vm6469_vm11 = vcmp.lt.s32.totalorder %v14335_v51, 4  ;;  %v14370_v43 = vshll.u32 %v6442_v28, 8  ;;  %v6315_v12 = vsel %vm14339_vm9, 0, %v6313_v40 }
 0x617   : > { %v6393_v63 = vshll.u32 %v6392_v3, 30  ;;  %vm6467_vm13 = vcmp.lt.s32.totalorder %v14335_v51, 2  ;;  %vm6468_vm15 = vcmp.lt.s32.totalorder %v14335_v51, 3  ;;  %v6465_v55 = vor.u32 %v6464_v45, %v6463_v14 }
 0x618   : > { %v6311_v6 = vsel %vm6228_vm6, %v6310_v44, %v6309_v32  ;;  %v6474_v29 = vsel %vm6466_vm10, %v6453_v19, %v6456_v57  ;;  %v6475_v18 = vsel %vm6469_vm11, %v6462_v24, 920167782  ;;  %v6450_v23 = vshrl.u32 %v15318_v46, %v6449_v42 }
 0x619   : > { %v6314_v13 = vsel %vm14339_vm9, %v15460_v33, %v6311_v6  ;;  %v14385_v58 = vsub.s32 %v6390_v54, %v6393_v63  ;;  %v6319_v41 = vadd.s32 3, %v6315_v12  ;;  %v6471_v28 = vsel %vm6469_vm11, %v6459_v36, 2102212464 }
 0x61a   : > { %8107 = vcosq.f32 %v6314_v13  ;;  %v6476_v5 = vsel %vm6468_vm15, %v6459_v36, %v6475_v18  ;;  %v6416_v34 = vsub.s32 4, %v6392_v3  ;;  %v6478_v27 = vsel %vm6466_vm10, %v6456_v57, %v6459_v36 }
 0x61b   : > { %8109 = vsinq.f32 %v6314_v13  ;;  %v6396_v38 = vsub.s32 0, %v14385_v58  ;;  %v6477_v49 = vsel %vm6467_vm13, %v6474_v29, %v6476_v5  ;;  %v6479_v42 = vsel %vm6469_vm11, %v6465_v55, 1326507024  ;;  %v15472_v29 = vld [vmem:[#allocation14_spill] sm:$0xff] }
 0x61c   : > { %v14400_v60 = vmul.u32.u64.low %v14370_v43, %v6477_v49  ;;  %v14401_v37 = vmul.u32.u64.high %v14370_v43, %v6477_v49, %v14400_v60  ;;  %v6470_v9 = vsel %vm6466_vm10, %v6450_v23, %v6453_v19  ;;  %v6472_v1 = vsel %vm6468_vm15, %v6456_v57, %v6471_v28 }
 0x61d   : > { %v7536_v16 = vmin.u32 %v6396_v38, %v14385_v58  ;;  %v6480_v62 = vsel %vm6468_vm15, %v6462_v24, %v6479_v42  ;;  %v6320_v2 = vand.u32 3, %v6319_v41  ;;  %v6541_v39 = vand.u32 2139095040, %v15469_v56 }
 0x61e   : > { %v6481_v8 = vsel %vm6467_vm13, %v6478_v27, %v6480_v62  ;;  %vm6318_vm14 = vweird.f32 %v15460_v33  ;;  %vm6332_vm0 = vcmp.lt.s32.totalorder %v15463_v48, 0  ;;  %v6473_v20 = vsel %vm6467_vm13, %v6470_v9, %v6472_v1 }
 0x61f   : > { %v6398_v7 = vclz %v7536_v16  ;;  %v14419_v54 = vmul.u32.u64.low %v14370_v43, %v6481_v8  ;;  %v14420_v30 = vmul.u32.u64.high %v14370_v43, %v6481_v8, %v14419_v54  ;;  %v6542_v0 = vshrl.u32 %v6541_v39, 23 }
 0x620   : > { %vm14424_vm1 = vcmp.le.f32.partialorder %v6330_v52, 0.7853982  ;;  %v6417_v47 = vsel %vm6332_vm0, %v6416_v34, %v6392_v3  ;;  %v6538_v4 = vand.u32 2147483647, %v15469_v56  ;;  %vm6321_vm2 = vcmp.lt.s32.totalorder %v6320_v2, 2 }
 0x621   : > { %v7537_v25 = vadd.s32 4294967294, %v6398_v7  ;;  %vm6322_vm3 = vcmp.eq.s32.totalorder %v6320_v2, 0  ;;  %v6492_v51 = vadd.s32 1, %v14401_v37  ;;  %v7543_v17 = vadd.s32 4294967169, %v6542_v0 }
 0x622   : > { %vm6325_vm4 = vcmp.eq.s32.totalorder %v6320_v2, 2  ;;  %v6386_v40 = vadd.s32 %v14320_v22, %v14329_v59  ;;  %v6489_v52 = vmul.u32 %v14370_v43, %v6473_v20  ;;  %v6419_v31 = vsel %vm14424_vm1, 0, %v6417_v47 }
 0x623   : > { %vm7538_vm5 = vcmp.lt.s32.totalorder %v7537_v25, 0  ;;  %vm6491_vm7 = vc.u32 %v14420_v30, %v14400_v60  ;;  %v6548_v32 = vadd.s32 1, %v7543_v17  ;;  %v6545_v59 = vand.u32 8388607, %v6538_v4 }
 0x624   : > { %v8108_v15 = vpop.eup %8107  ;;  %v6401_v19 = vsel %vm7538_vm5, 0, %v7537_v25  ;;  %v6493_v22 = vsel %vm6491_vm7, %v6492_v51, %v14401_v37  ;;  %v6645_v18 = vand.u32 2139095040, %v15472_v29  ;;  %v6423_v5 = vadd.s32 3, %v6419_v31 }
 0x625   : > { %v8110_v57 = vpop.eup %8109  ;;  %v6326_v24 = vxor.u32 2147483648, %v8108_v15  ;;  %v6402_v3 = vsub.s32 32, %v6401_v19  ;;  %v6403_v14 = vshll.u32 %v14385_v58, %v6401_v19  ;;  %v6406_v45 = vsub.s32 4294967266, %v6401_v19 }
 0x626   : > { %v6323_v44 = vxor.u32 2147483648, %v8110_v57  ;;  %vm6549_vm6 = vcmp.gt.s32.totalorder %v6548_v32, 0  ;;  %v6494_v63 = vadd.s32 %v6493_v22, %v6489_v52  ;;  %v6546_v42 = vor.u32 8388608, %v6545_v59 }
 0x627   : > { %v6327_v36 = vsel %vm6325_vm4, %v6326_v24, %v8110_v57  ;;  %v6404_v43 = vshrl.u32 %v6386_v40, %v6402_v3  ;;  %v6407_v12 = vadd.s32 127, %v6406_v45  ;;  %v6550_v55 = vsel %vm6549_vm6, %v6548_v32, 0 }
 0x628   : > { %v6324_v6 = vsel %vm6322_vm3, %v8108_v15, %v6323_v44  ;;  %v6495_v41 = vadd.s32 536870912, %v6494_v63  ;;  %v6552_v38 = vand.u32 31, %v6550_v55  ;;  %v6551_v37 = vshrl.u32 %v6550_v55, 5 }
 0x629   : > { %v6328_v13 = vsel %vm6321_vm2, %v6324_v6, %v6327_v36  ;;  %v6405_v58 = vor.u32 %v6404_v43, %v6403_v14  ;;  %v6408_v23 = vshll.u32 %v6407_v12, 23  ;;  %v6642_v9 = vand.u32 2147483647, %v15472_v29 }
 0x62a   : > { %v6329_v28 = vsel %vm6318_vm14, nan, %v6328_v13  ;;  %v14449_v27 = vshrl.u32 %v6495_v41, 30  ;;  %v6553_v16 = vsub.s32 32, %v6552_v38  ;;  %v6646_v1 = vshrl.u32 %v6645_v18, 23 }
 0x62b   : > { %v6409_v34 = vor.u32 4788187, %v6408_v23  ;;  %v6412_v49 = vcvt.s32.f32 %v6405_v58  ;;  %7217 = vst [vmem:[%s9727_s11 + $0x1b8] sm:$0xff] %v6329_v28  ;;  %v6555_v8 = vshll.u32 %v15318_v46, %v6552_v38  ;;  %v6558_v33 = vshll.u32 %v15310_v10, %v6552_v38 }
 0x62c   : > { %v6497_v2 = vshll.u32 %v14449_v27, 30  ;;  %v6556_v39 = vshrl.u32 %v15310_v10, %v6553_v16  ;;  %v6559_v7 = vshrl.u32 %v15311_v21, %v6553_v16  ;;  %v6561_v20 = vshll.u32 %v15311_v21, %v6552_v38 }
 0x62d   : > { %v6410_v62 = vand.u32 2147483647, %v6409_v34  ;;  %v6562_v54 = vshrl.u32 %v15312_v11, %v6553_v16  ;;  %v6564_v47 = vshll.u32 %v15312_v11, %v6552_v38  ;;  %v6565_v51 = vshrl.u32 %v15313_v53, %v6553_v16 }
 0x62e   : > { %v14460_v25 = vsub.s32 %v6494_v63, %v6497_v2  ;;  %v14464_v17 = vand.u32 3, %v6423_v5  ;;  %v14466_v40 = vshll.u32 %v6546_v42, 8  ;;  %v7547_v52 = vadd.s32 4294967169, %v6646_v1 }
 0x62f   : > { %v6413_v0 = vmul.f32 %v6412_v49, %v6410_v62  ;;  %v14470_v15 = vand.u32 8388607, %v6642_v9  ;;  %v6554_v32 = vshrl.u32 %v15318_v46, %v6553_v16  ;;  %v6557_v57 = vor.u32 %v6556_v39, %v6555_v8 }
 0x630   : > { %v6500_v31 = vsub.s32 0, %v14460_v25  ;;  %v6560_v24 = vor.u32 %v6559_v7, %v6558_v33  ;;  %v6563_v3 = vor.u32 %v6562_v54, %v6561_v20  ;;  %v6567_v14 = vshll.u32 %v15313_v53, %v6552_v38 }
 0x631   : > { %v6414_v19 = vxor.u32 2147483648, %v6413_v0  ;;  %v6568_v45 = vshrl.u32 %v15314_v35, %v6553_v16  ;;  %v6566_v59 = vor.u32 %v6565_v51, %v6564_v47  ;;  %vm6570_vm8 = vcmp.lt.s32.totalorder %v6551_v37, 1 }
 0x632   : > { %v7540_v22 = vmin.u32 %v6500_v31, %v14460_v25  ;;  %vm6573_vm9 = vcmp.lt.s32.totalorder %v6551_v37, 4  ;;  %v6652_v12 = vadd.s32 1, %v7547_v52  ;;  %vm6571_vm12 = vcmp.lt.s32.totalorder %v6551_v37, 2 }
 0x633   : > { %v6415_v44 = vsel %vm6332_vm0, %v6414_v19, %v6413_v0  ;;  %v6569_v43 = vor.u32 %v6568_v45, %v6567_v14  ;;  %vm6572_vm10 = vcmp.lt.s32.totalorder %v6551_v37, 3  ;;  %v6574_v6 = vsel %vm6570_vm8, %v6554_v32, %v6557_v57 }
 0x634   : > { %v6418_v36 = vsel %vm14424_vm1, %v15463_v48, %v6415_v44  ;;  %v6502_v63 = vclz %v7540_v22  ;;  %v6575_v55 = vsel %vm6573_vm9, %v6563_v3, 2102212464  ;;  %v6578_v18 = vsel %vm6570_vm8, %v6557_v57, %v6560_v24 }
 0x635   : > { %8111 = vcosq.f32 %v6418_v36  ;;  %v6576_v58 = vsel %vm6572_vm10, %v6560_v24, %v6575_v55  ;;  %v6579_v26 = vsel %vm6573_vm9, %v6566_v59, 920167782  ;;  %v6582_v23 = vsel %vm6570_vm8, %v6560_v24, %v6563_v3 }
 0x636   : > { %8113 = vsinq.f32 %v6418_v36  ;;  %v7541_v13 = vadd.s32 4294967294, %v6502_v63  ;;  %vm6426_vm11 = vcmp.eq.s32.totalorder %v14464_v17, 0  ;;  %v6490_v41 = vadd.s32 %v14400_v60, %v14420_v30 }
 0x637   : > { %v6580_v28 = vsel %vm6572_vm10, %v6563_v3, %v6579_v26  ;;  %v6583_v5 = vsel %vm6573_vm9, %v6569_v43, 1326507024  ;;  %vm6653_vm13 = vcmp.gt.s32.totalorder %v6652_v12, 0  ;;  %vm6425_vm15 = vcmp.lt.s32.totalorder %v14464_v17, 2 }
 0x638   : > { %vm7542_vm14 = vcmp.lt.s32.totalorder %v7541_v13, 0  ;;  %v6577_v38 = vsel %vm6571_vm12, %v6574_v6, %v6576_v58  ;;  %v6581_v34 = vsel %vm6571_vm12, %v6578_v18, %v6580_v28  ;;  %v6584_v49 = vsel %vm6572_vm10, %v6566_v59, %v6583_v5 }
 0x639   : > { %vm6422_vm0 = vweird.f32 %v15463_v48  ;;  %v6505_v42 = vsel %vm7542_vm14, 0, %v7541_v13  ;;  %v6585_v16 = vsel %vm6571_vm12, %v6582_v23, %v6584_v49  ;;  %vm6436_vm1 = vcmp.lt.s32.totalorder %v15466_v50, 0 }
 0x63a   : > { %v14500_v60 = vmul.u32.u64.low %v14466_v40, %v6581_v34  ;;  %v14501_v30 = vmul.u32.u64.high %v14466_v40, %v6581_v34, %v14500_v60  ;;  %v6506_v1 = vsub.s32 32, %v6505_v42  ;;  %v6507_v62 = vshll.u32 %v14460_v25, %v6505_v42 }
 0x63b   : > { %v6510_v2 = vsub.s32 4294967266, %v6505_v42  ;;  %v6654_v8 = vsel %vm6653_vm13, %v6652_v12, 0  ;;  %vm6429_vm2 = vcmp.eq.s32.totalorder %v14464_v17, 2  ;;  %v6520_v54 = vsub.s32 4, %v14449_v27 }
 0x63c   : > { %v14508_v33 = vmul.u32.u64.low %v14466_v40, %v6585_v16  ;;  %v14509_v39 = vmul.u32.u64.high %v14466_v40, %v6585_v16, %v14508_v33  ;;  %v6656_v37 = vand.u32 31, %v6654_v8  ;;  %v6508_v7 = vshrl.u32 %v6490_v41, %v6506_v1 }
 0x63d   : > { %v6511_v20 = vadd.s32 127, %v6510_v2  ;;  %v6650_v0 = vor.u32 8388608, %v14470_v15  ;;  %v6593_v47 = vmul.u32 %v14466_v40, %v6577_v38  ;;  %v6596_v51 = vadd.s32 1, %v14501_v30 }
 0x63e   : > { %v14515_v25 = vshrl.u32 %v6654_v8, 5  ;;  %v6657_v52 = vsub.s32 32, %v6656_v37  ;;  %vm14519_vm3 = vcmp.le.f32.partialorder %v6434_v61, 0.7853982  ;;  %v6509_v32 = vor.u32 %v6508_v7, %v6507_v62 }
 0x63f   : > { %v8112_v19 = vpop.eup %8111  ;;  %v6512_v57 = vshll.u32 %v6511_v20, 23  ;;  %v6659_v24 = vshll.u32 %v15318_v46, %v6656_v37  ;;  %v6662_v15 = vshll.u32 %v15310_v10, %v6656_v37  ;;  %vm6595_vm4 = vc.u32 %v14509_v39, %v14500_v60 }
 0x640   : > { %v8114_v3 = vpop.eup %8113  ;;  %v6430_v40 = vxor.u32 2147483648, %v8112_v19  ;;  %v6665_v14 = vshll.u32 %v15311_v21, %v6656_v37  ;;  %v6668_v45 = vshll.u32 %v15312_v11, %v6656_v37  ;;  %v6516_v22 = vcvt.s32.f32 %v6509_v32 }
 0x641   : > { %v6427_v44 = vxor.u32 2147483648, %v8114_v3  ;;  %v6513_v61 = vor.u32 4788187, %v6512_v57  ;;  %v6597_v59 = vsel %vm6595_vm4, %v6596_v51, %v14501_v30  ;;  %v6660_v12 = vshrl.u32 %v15310_v10, %v6657_v52 }
 0x642   : > { %v6431_v36 = vsel %vm6429_vm2, %v6430_v40, %v8114_v3  ;;  %v6598_v43 = vadd.s32 %v6597_v59, %v6593_v47  ;;  %v6663_v63 = vshrl.u32 %v15311_v21, %v6657_v52  ;;  %v6666_v18 = vshrl.u32 %v15312_v11, %v6657_v52 }
 0x643   : > { %v6428_v6 = vsel %vm6426_vm11, %v8112_v19, %v6427_v44  ;;  %v6514_v55 = vand.u32 2147483647, %v6513_v61  ;;  %v6669_v13 = vshrl.u32 %v15313_v53, %v6657_v52  ;;  %v6521_v26 = vsel %vm6436_vm1, %v6520_v54, %v14449_v27  ;;  %v15475_v61 = vld [vmem:[#allocation47_spill] sm:$0xff] }
 0x644   : > { %v6432_v58 = vsel %vm6425_vm15, %v6428_v6, %v6431_v36  ;;  %v6599_v23 = vadd.s32 536870912, %v6598_v43  ;;  %v6661_v41 = vor.u32 %v6660_v12, %v6659_v24  ;;  %v6664_v38 = vor.u32 %v6663_v63, %v6662_v15 }
 0x645   : > { %v6433_v28 = vsel %vm6422_vm0, nan, %v6432_v58  ;;  %v6517_v5 = vmul.f32 %v6516_v22, %v6514_v55  ;;  %v6670_v34 = vor.u32 %v6669_v13, %v6668_v45  ;;  %v6671_v42 = vshll.u32 %v15313_v53, %v6656_v37 }
 0x646   : > { %v6600_v49 = vshrl.u32 %v6599_v23, 30  ;;  %v6672_v16 = vshrl.u32 %v15314_v35, %v6657_v52  ;;  %vm6674_vm5 = vcmp.lt.s32.totalorder %v14515_v25, 1  ;;  %7218 = vst [vmem:[%s9727_s11 + $0x1c0] sm:$0xff] %v6433_v28  ;;  %v6667_v30 = vor.u32 %v6666_v18, %v6665_v14 }
 0x647   : > { %v6518_v17 = vxor.u32 2147483648, %v6517_v5  ;;  %vm6677_vm7 = vcmp.lt.s32.totalorder %v14515_v25, 4  ;;  %v14550_v27 = vshll.u32 %v6650_v0, 8  ;;  %v6523_v48 = vsel %vm14519_vm3, 0, %v6521_v26 }
 0x648   : > { %v6601_v1 = vshll.u32 %v6600_v49, 30  ;;  %vm6675_vm6 = vcmp.lt.s32.totalorder %v14515_v25, 2  ;;  %vm6676_vm8 = vcmp.lt.s32.totalorder %v14515_v25, 3  ;;  %v6673_v2 = vor.u32 %v6672_v16, %v6671_v42 }
 0x649   : > { %v6519_v62 = vsel %vm6436_vm1, %v6518_v17, %v6517_v5  ;;  %v6682_v8 = vsel %vm6674_vm5, %v6661_v41, %v6664_v38  ;;  %v6683_v33 = vsel %vm6677_vm7, %v6670_v34, 920167782  ;;  %v6658_v20 = vshrl.u32 %v15318_v46, %v6657_v52 }
 0x64a   : > { %v6522_v37 = vsel %vm14519_vm3, %v15466_v50, %v6519_v62  ;;  %v14565_v7 = vsub.s32 %v6598_v43, %v6601_v1  ;;  %v6527_v54 = vadd.s32 3, %v6523_v48  ;;  %v6679_v0 = vsel %vm6677_vm7, %v6667_v30, 2102212464 }
 0x64b   : > { %8115 = vcosq.f32 %v6522_v37  ;;  %v6684_v47 = vsel %vm6676_vm8, %v6667_v30, %v6683_v33  ;;  %v6624_v19 = vsub.s32 4, %v6600_v49  ;;  %v6686_v32 = vsel %vm6674_vm5, %v6664_v38, %v6667_v30 }
 0x64c   : > { %8117 = vsinq.f32 %v6522_v37  ;;  %v6604_v51 = vsub.s32 0, %v14565_v7  ;;  %v6685_v31 = vsel %vm6675_vm6, %v6682_v8, %v6684_v47  ;;  %v6687_v52 = vsel %vm6677_vm7, %v6673_v2, 1326507024  ;;  %v15478_v8 = vld [vmem:[#allocation48_spill] sm:$0xff] }
 0x64d   : > { %v14580_v57 = vmul.u32.u64.low %v14550_v27, %v6685_v31  ;;  %v14581_v24 = vmul.u32.u64.high %v14550_v27, %v6685_v31, %v14580_v57  ;;  %v6678_v3 = vsel %vm6674_vm5, %v6658_v20, %v6661_v41  ;;  %v6680_v40 = vsel %vm6676_vm8, %v6664_v38, %v6679_v0 }
 0x64e   : > { %v7544_v15 = vmin.u32 %v6604_v51, %v14565_v7  ;;  %v6688_v14 = vsel %vm6676_vm8, %v6670_v34, %v6687_v52  ;;  %v6528_v45 = vand.u32 3, %v6527_v54  ;;  %v6749_v22 = vand.u32 2139095040, %v15475_v61 }
 0x64f   : > { %v6689_v44 = vsel %vm6675_vm6, %v6686_v32, %v6688_v14  ;;  %vm6526_vm9 = vweird.f32 %v15466_v50  ;;  %vm6540_vm12 = vcmp.lt.s32.totalorder %v15469_v56, 0  ;;  %v6681_v36 = vsel %vm6675_vm6, %v6678_v3, %v6680_v40 }
 0x650   : > { %v6606_v59 = vclz %v7544_v15  ;;  %v14599_v43 = vmul.u32.u64.low %v14550_v27, %v6689_v44  ;;  %v14600_v12 = vmul.u32.u64.high %v14550_v27, %v6689_v44, %v14599_v43  ;;  %v6750_v63 = vshrl.u32 %v6749_v22, 23 }
 0x651   : > { %vm14604_vm10 = vcmp.le.f32.partialorder %v6538_v4, 0.7853982  ;;  %v6625_v18 = vsel %vm6540_vm12, %v6624_v19, %v6600_v49  ;;  %v6746_v13 = vand.u32 2147483647, %v15475_v61  ;;  %vm6529_vm11 = vcmp.lt.s32.totalorder %v6528_v45, 2 }
 0x652   : > { %v7545_v55 = vadd.s32 4294967294, %v6606_v59  ;;  %vm6530_vm13 = vcmp.eq.s32.totalorder %v6528_v45, 0  ;;  %v6700_v25 = vadd.s32 1, %v14581_v24  ;;  %v7551_v58 = vadd.s32 4294967169, %v6750_v63 }
 0x653   : > { %vm6533_vm15 = vcmp.eq.s32.totalorder %v6528_v45, 2  ;;  %v6594_v26 = vadd.s32 %v14500_v60, %v14509_v39  ;;  %v6697_v4 = vmul.u32 %v14550_v27, %v6681_v36  ;;  %v6627_v28 = vsel %vm14604_vm10, 0, %v6625_v18 }
 0x654   : > { %vm7546_vm14 = vcmp.lt.s32.totalorder %v7545_v55, 0  ;;  %vm6699_vm0 = vc.u32 %v14600_v12, %v14580_v57  ;;  %v6756_v5 = vadd.s32 1, %v7551_v58  ;;  %v6753_v39 = vand.u32 8388607, %v6746_v13 }
 0x655   : > { %v8116_v23 = vpop.eup %8115  ;;  %v6609_v41 = vsel %vm7546_vm14, 0, %v7545_v55  ;;  %v6701_v60 = vsel %vm6699_vm0, %v6700_v25, %v14581_v24  ;;  %v6853_v33 = vand.u32 2139095040, %v15478_v8  ;;  %v6631_v47 = vadd.s32 3, %v6627_v28 }
 0x656   : > { %v8118_v38 = vpop.eup %8117  ;;  %v6534_v34 = vxor.u32 2147483648, %v8116_v23  ;;  %v6610_v49 = vsub.s32 32, %v6609_v41  ;;  %v6611_v42 = vshll.u32 %v14565_v7, %v6609_v41  ;;  %v6614_v16 = vsub.s32 4294967266, %v6609_v41 }
 0x657   : > { %v6531_v17 = vxor.u32 2147483648, %v8118_v38  ;;  %vm6757_vm1 = vcmp.gt.s32.totalorder %v6756_v5, 0  ;;  %v6702_v1 = vadd.s32 %v6701_v60, %v6697_v4  ;;  %v6754_v52 = vor.u32 8388608, %v6753_v39 }
 0x658   : > { %v6535_v30 = vsel %vm6533_vm15, %v6534_v34, %v8118_v38  ;;  %v6612_v27 = vshrl.u32 %v6594_v26, %v6610_v49  ;;  %v6615_v48 = vadd.s32 127, %v6614_v16  ;;  %v6758_v2 = vsel %vm6757_vm1, %v6756_v5, 0 }
 0x659   : > { %v6532_v62 = vsel %vm6530_vm13, %v8116_v23, %v6531_v17  ;;  %v6703_v54 = vadd.s32 536870912, %v6702_v1  ;;  %v6760_v51 = vand.u32 31, %v6758_v2  ;;  %v6759_v24 = vshrl.u32 %v6758_v2, 5 }
 0x65a   : > { %v6536_v37 = vsel %vm6529_vm11, %v6532_v62, %v6535_v30  ;;  %v6613_v7 = vor.u32 %v6612_v27, %v6611_v42  ;;  %v6616_v20 = vshll.u32 %v6615_v48, 23  ;;  %v6850_v3 = vand.u32 2147483647, %v15478_v8 }
 0x65b   : > { %v6537_v0 = vsel %vm6526_vm9, nan, %v6536_v37  ;;  %v14629_v32 = vshrl.u32 %v6703_v54, 30  ;;  %v6761_v15 = vsub.s32 32, %v6760_v51  ;;  %v6854_v40 = vshrl.u32 %v6853_v33, 23 }
 0x65c   : > { %v6617_v19 = vor.u32 4788187, %v6616_v20  ;;  %v6620_v31 = vcvt.s32.f32 %v6613_v7  ;;  %7219 = vst [vmem:[%s9727_s11 + $0x1c8] sm:$0xff] %v6537_v0  ;;  %v6763_v44 = vshll.u32 %v15318_v46, %v6760_v51  ;;  %v6766_v50 = vshll.u32 %v15310_v10, %v6760_v51 }
 0x65d   : > { %v6705_v45 = vshll.u32 %v14629_v32, 30  ;;  %v6764_v22 = vshrl.u32 %v15310_v10, %v6761_v15  ;;  %v6767_v59 = vshrl.u32 %v15311_v21, %v6761_v15  ;;  %v6769_v36 = vshll.u32 %v15311_v21, %v6760_v51 }
 0x65e   : > { %v6618_v14 = vand.u32 2147483647, %v6617_v19  ;;  %v6770_v43 = vshrl.u32 %v15312_v11, %v6761_v15  ;;  %v6772_v18 = vshll.u32 %v15312_v11, %v6760_v51  ;;  %v6773_v25 = vshrl.u32 %v15313_v53, %v6761_v15 }
 0x65f   : > { %v14640_v55 = vsub.s32 %v6702_v1, %v6705_v45  ;;  %v14644_v58 = vand.u32 3, %v6631_v47  ;;  %v14646_v26 = vshll.u32 %v6754_v52, 8  ;;  %v7555_v4 = vadd.s32 4294967169, %v6854_v40 }
 0x660   : > { %v6621_v63 = vmul.f32 %v6620_v31, %v6618_v14  ;;  %v14650_v23 = vand.u32 8388607, %v6850_v3  ;;  %v6762_v5 = vshrl.u32 %v15318_v46, %v6761_v15  ;;  %v6765_v38 = vor.u32 %v6764_v22, %v6763_v44 }
 0x661   : > { %v6708_v28 = vsub.s32 0, %v14640_v55  ;;  %v6768_v34 = vor.u32 %v6767_v59, %v6766_v50  ;;  %v6771_v49 = vor.u32 %v6770_v43, %v6769_v36  ;;  %v6775_v42 = vshll.u32 %v15313_v53, %v6760_v51 }
 0x662   : > { %v6622_v41 = vxor.u32 2147483648, %v6621_v63  ;;  %v6776_v16 = vshrl.u32 %v15314_v35, %v6761_v15  ;;  %v6774_v39 = vor.u32 %v6773_v25, %v6772_v18  ;;  %vm6778_vm2 = vcmp.lt.s32.totalorder %v6759_v24, 1 }
 0x663   : > { %v7548_v60 = vmin.u32 %v6708_v28, %v14640_v55  ;;  %vm6781_vm3 = vcmp.lt.s32.totalorder %v6759_v24, 4  ;;  %v6860_v48 = vadd.s32 1, %v7555_v4  ;;  %vm6779_vm4 = vcmp.lt.s32.totalorder %v6759_v24, 2 }
 0x664   : > { %v6623_v17 = vsel %vm6540_vm12, %v6622_v41, %v6621_v63  ;;  %v6777_v27 = vor.u32 %v6776_v16, %v6775_v42  ;;  %vm6780_vm5 = vcmp.lt.s32.totalorder %v6759_v24, 3  ;;  %v6782_v62 = vsel %vm6778_vm2, %v6762_v5, %v6765_v38 }
 0x665   : > { %v6626_v30 = vsel %vm14604_vm10, %v15469_v56, %v6623_v17  ;;  %v6710_v1 = vclz %v7548_v60  ;;  %v6783_v2 = vsel %vm6781_vm3, %v6771_v49, 2102212464  ;;  %v6786_v33 = vsel %vm6778_vm2, %v6765_v38, %v6768_v34 }
 0x666   : > { %8119 = vcosq.f32 %v6626_v30  ;;  %v6784_v7 = vsel %vm6780_vm5, %v6768_v34, %v6783_v2  ;;  %v6787_v6 = vsel %vm6781_vm3, %v6774_v39, 920167782  ;;  %v6790_v20 = vsel %vm6778_vm2, %v6768_v34, %v6771_v49 }
 0x667   : > { %8121 = vsinq.f32 %v6626_v30  ;;  %v7549_v37 = vadd.s32 4294967294, %v6710_v1  ;;  %vm6634_vm7 = vcmp.eq.s32.totalorder %v14644_v58, 0  ;;  %v6698_v54 = vadd.s32 %v14580_v57, %v14600_v12 }
 0x668   : > { %v6788_v0 = vsel %vm6780_vm5, %v6771_v49, %v6787_v6  ;;  %v6791_v47 = vsel %vm6781_vm3, %v6777_v27, 1326507024  ;;  %vm6861_vm6 = vcmp.gt.s32.totalorder %v6860_v48, 0  ;;  %vm6633_vm8 = vcmp.lt.s32.totalorder %v14644_v58, 2 }
 0x669   : > { %vm7550_vm9 = vcmp.lt.s32.totalorder %v7549_v37, 0  ;;  %v6785_v51 = vsel %vm6779_vm4, %v6782_v62, %v6784_v7  ;;  %v6789_v19 = vsel %vm6779_vm4, %v6786_v33, %v6788_v0  ;;  %v6792_v31 = vsel %vm6780_vm5, %v6774_v39, %v6791_v47 }
 0x66a   : > { %vm6630_vm12 = vweird.f32 %v15469_v56  ;;  %v6713_v52 = vsel %vm7550_vm9, 0, %v7549_v37  ;;  %v6793_v15 = vsel %vm6779_vm4, %v6790_v20, %v6792_v31  ;;  %vm6644_vm10 = vcmp.lt.s32.totalorder %v15472_v29, 0 }
 0x66b   : > { %v14680_v57 = vmul.u32.u64.low %v14646_v26, %v6789_v19  ;;  %v14681_v12 = vmul.u32.u64.high %v14646_v26, %v6789_v19, %v14680_v57  ;;  %v6714_v40 = vsub.s32 32, %v6713_v52  ;;  %v6715_v14 = vshll.u32 %v14640_v55, %v6713_v52 }
 0x66c   : > { %v6718_v45 = vsub.s32 4294967266, %v6713_v52  ;;  %v6862_v44 = vsel %vm6861_vm6, %v6860_v48, 0  ;;  %vm6637_vm11 = vcmp.eq.s32.totalorder %v14644_v58, 2  ;;  %v6728_v43 = vsub.s32 4, %v14629_v32 }
 0x66d   : > { %v14688_v50 = vmul.u32.u64.low %v14646_v26, %v6793_v15  ;;  %v14689_v22 = vmul.u32.u64.high %v14646_v26, %v6793_v15, %v14688_v50  ;;  %v6864_v24 = vand.u32 31, %v6862_v44  ;;  %v6716_v59 = vshrl.u32 %v6698_v54, %v6714_v40 }
 0x66e   : > { %v6719_v36 = vadd.s32 127, %v6718_v45  ;;  %v6858_v63 = vor.u32 8388608, %v14650_v23  ;;  %v6801_v18 = vmul.u32 %v14646_v26, %v6785_v51  ;;  %v6804_v25 = vadd.s32 1, %v14681_v12 }
 0x66f   : > { %v14695_v55 = vshrl.u32 %v6862_v44, 5  ;;  %v6865_v4 = vsub.s32 32, %v6864_v24  ;;  %vm14699_vm13 = vcmp.le.f32.partialorder %v6642_v9, 0.7853982  ;;  %v6717_v5 = vor.u32 %v6716_v59, %v6715_v14 }
 0x670   : > { %v8120_v41 = vpop.eup %8119  ;;  %v6720_v38 = vshll.u32 %v6719_v36, 23  ;;  %v6867_v34 = vshll.u32 %v15318_v46, %v6864_v24  ;;  %v6870_v23 = vshll.u32 %v15310_v10, %v6864_v24  ;;  %vm6803_vm15 = vc.u32 %v14689_v22, %v14680_v57 }
 0x671   : > { %v8122_v49 = vpop.eup %8121  ;;  %v6638_v26 = vxor.u32 2147483648, %v8120_v41  ;;  %v6873_v42 = vshll.u32 %v15311_v21, %v6864_v24  ;;  %v6876_v16 = vshll.u32 %v15312_v11, %v6864_v24  ;;  %v6724_v60 = vcvt.s32.f32 %v6717_v5 }
 0x672   : > { %v6635_v17 = vxor.u32 2147483648, %v8122_v49  ;;  %v6721_v9 = vor.u32 4788187, %v6720_v38  ;;  %v6805_v39 = vsel %vm6803_vm15, %v6804_v25, %v14681_v12  ;;  %v6868_v48 = vshrl.u32 %v15310_v10, %v6865_v4 }
 0x673   : > { %v6639_v30 = vsel %vm6637_vm11, %v6638_v26, %v8122_v49  ;;  %v6806_v27 = vadd.s32 %v6805_v39, %v6801_v18  ;;  %v6871_v1 = vshrl.u32 %v15311_v21, %v6865_v4  ;;  %v6874_v33 = vshrl.u32 %v15312_v11, %v6865_v4 }
 0x674   : > { %v6636_v62 = vsel %vm6634_vm7, %v8120_v41, %v6635_v17  ;;  %v6722_v2 = vand.u32 2147483647, %v6721_v9  ;;  %v6877_v37 = vshrl.u32 %v15313_v53, %v6865_v4  ;;  %v6729_v6 = vsel %vm6644_vm10, %v6728_v43, %v14629_v32  ;;  %v15481_v9 = vld [vmem:[#allocation49_spill] sm:$0xff] }
 0x675   : > { %v6640_v7 = vsel %vm6633_vm8, %v6636_v62, %v6639_v30  ;;  %v6807_v20 = vadd.s32 536870912, %v6806_v27  ;;  %v6869_v54 = vor.u32 %v6868_v48, %v6867_v34  ;;  %v6872_v51 = vor.u32 %v6871_v1, %v6870_v23 }
 0x676   : > { %v6641_v0 = vsel %vm6630_vm12, nan, %v6640_v7  ;;  %v6725_v47 = vmul.f32 %v6724_v60, %v6722_v2  ;;  %v6878_v19 = vor.u32 %v6877_v37, %v6876_v16  ;;  %v6879_v52 = vshll.u32 %v15313_v53, %v6864_v24 }
 0x677   : > { %v6808_v31 = vshrl.u32 %v6807_v20, 30  ;;  %v6880_v15 = vshrl.u32 %v15314_v35, %v6865_v4  ;;  %vm6882_vm14 = vcmp.lt.s32.totalorder %v14695_v55, 1  ;;  %7220 = vst [vmem:[%s9727_s11 + $0x1d0] sm:$0xff] %v6641_v0  ;;  %v6875_v12 = vor.u32 %v6874_v33, %v6873_v42 }
 0x678   : > { %v6726_v58 = vxor.u32 2147483648, %v6725_v47  ;;  %vm6885_vm0 = vcmp.lt.s32.totalorder %v14695_v55, 4  ;;  %v14730_v32 = vshll.u32 %v6858_v63, 8  ;;  %v6731_v56 = vsel %vm14699_vm13, 0, %v6729_v6 }
 0x679   : > { %v6809_v40 = vshll.u32 %v6808_v31, 30  ;;  %vm6883_vm1 = vcmp.lt.s32.totalorder %v14695_v55, 2  ;;  %vm6884_vm2 = vcmp.lt.s32.totalorder %v14695_v55, 3  ;;  %v6881_v45 = vor.u32 %v6880_v15, %v6879_v52 }
 0x67a   : > { %v6727_v14 = vsel %vm6644_vm10, %v6726_v58, %v6725_v47  ;;  %v6890_v44 = vsel %vm6882_vm14, %v6869_v54, %v6872_v51  ;;  %v6891_v50 = vsel %vm6885_vm0, %v6878_v19, 920167782  ;;  %v6866_v36 = vshrl.u32 %v15318_v46, %v6865_v4 }
 0x67b   : > { %v6730_v24 = vsel %vm14699_vm13, %v15472_v29, %v6727_v14  ;;  %v14745_v59 = vsub.s32 %v6806_v27, %v6809_v40  ;;  %v6735_v43 = vadd.s32 3, %v6731_v56  ;;  %v6887_v63 = vsel %vm6885_vm0, %v6875_v12, 2102212464 }
 0x67c   : > { %8123 = vcosq.f32 %v6730_v24  ;;  %v6892_v18 = vsel %vm6884_vm2, %v6875_v12, %v6891_v50  ;;  %v6832_v41 = vsub.s32 4, %v6808_v31  ;;  %v6894_v5 = vsel %vm6882_vm14, %v6872_v51, %v6875_v12 }
 0x67d   : > { %8125 = vsinq.f32 %v6730_v24  ;;  %v6812_v25 = vsub.s32 0, %v14745_v59  ;;  %v6893_v28 = vsel %vm6883_vm1, %v6890_v44, %v6892_v18  ;;  %v6895_v4 = vsel %vm6885_vm0, %v6881_v45, 1326507024  ;;  %v15484_v44 = vld [vmem:[#allocation50_spill] sm:$0xff] }
 0x67e   : > { %v14760_v38 = vmul.u32.u64.low %v14730_v32, %v6893_v28  ;;  %v14761_v34 = vmul.u32.u64.high %v14730_v32, %v6893_v28, %v14760_v38  ;;  %v6886_v49 = vsel %vm6882_vm14, %v6866_v36, %v6869_v54  ;;  %v6888_v26 = vsel %vm6884_vm2, %v6872_v51, %v6887_v63 }
 0x67f   : > { %v7552_v23 = vmin.u32 %v6812_v25, %v14745_v59  ;;  %v6896_v42 = vsel %vm6884_vm2, %v6878_v19, %v6895_v4  ;;  %v6736_v16 = vand.u32 3, %v6735_v43  ;;  %v6957_v60 = vand.u32 2139095040, %v15481_v9 }
 0x680   : > { %v6897_v17 = vsel %vm6883_vm1, %v6894_v5, %v6896_v42  ;;  %vm6734_vm3 = vweird.f32 %v15472_v29  ;;  %vm6748_vm4 = vcmp.lt.s32.totalorder %v15475_v61, 0  ;;  %v6889_v30 = vsel %vm6883_vm1, %v6886_v49, %v6888_v26 }
 0x681   : > { %v6814_v39 = vclz %v7552_v23  ;;  %v14779_v27 = vmul.u32.u64.low %v14730_v32, %v6897_v17  ;;  %v14780_v48 = vmul.u32.u64.high %v14730_v32, %v6897_v17, %v14779_v27  ;;  %v6958_v1 = vshrl.u32 %v6957_v60, 23 }
 0x682   : > { %vm14784_vm5 = vcmp.le.f32.partialorder %v6746_v13, 0.7853982  ;;  %v6833_v33 = vsel %vm6748_vm4, %v6832_v41, %v6808_v31  ;;  %v6954_v37 = vand.u32 2147483647, %v15481_v9  ;;  %vm6737_vm7 = vcmp.lt.s32.totalorder %v6736_v16, 2 }
 0x683   : > { %v7553_v2 = vadd.s32 4294967294, %v6814_v39  ;;  %vm6738_vm6 = vcmp.eq.s32.totalorder %v6736_v16, 0  ;;  %v6908_v55 = vadd.s32 1, %v14761_v34  ;;  %v7559_v7 = vadd.s32 4294967169, %v6958_v1 }
 0x684   : > { %vm6741_vm8 = vcmp.eq.s32.totalorder %v6736_v16, 2  ;;  %v6802_v6 = vadd.s32 %v14680_v57, %v14689_v22  ;;  %v6905_v13 = vmul.u32 %v14730_v32, %v6889_v30  ;;  %v6835_v0 = vsel %vm14784_vm5, 0, %v6833_v33 }
 0x685   : > { %vm7554_vm9 = vcmp.lt.s32.totalorder %v7553_v2, 0  ;;  %vm6907_vm12 = vc.u32 %v14780_v48, %v14760_v38  ;;  %v6964_v47 = vadd.s32 1, %v7559_v7  ;;  %v6961_v22 = vand.u32 8388607, %v6954_v37 }
 0x686   : > { %v8124_v20 = vpop.eup %8123  ;;  %v6817_v54 = vsel %vm7554_vm9, 0, %v7553_v2  ;;  %v6909_v57 = vsel %vm6907_vm12, %v6908_v55, %v14761_v34  ;;  %v7061_v50 = vand.u32 2139095040, %v15484_v44  ;;  %v6839_v18 = vadd.s32 3, %v6835_v0 }
 0x687   : > { %v8126_v51 = vpop.eup %8125  ;;  %v6742_v19 = vxor.u32 2147483648, %v8124_v20  ;;  %v6818_v31 = vsub.s32 32, %v6817_v54  ;;  %v6819_v52 = vshll.u32 %v14745_v59, %v6817_v54  ;;  %v6822_v15 = vsub.s32 4294967266, %v6817_v54 }
 0x688   : > { %v6739_v58 = vxor.u32 2147483648, %v8126_v51  ;;  %vm6965_vm10 = vcmp.gt.s32.totalorder %v6964_v47, 0  ;;  %v6910_v40 = vadd.s32 %v6909_v57, %v6905_v13  ;;  %v6962_v4 = vor.u32 8388608, %v6961_v22 }
 0x689   : > { %v6743_v12 = vsel %vm6741_vm8, %v6742_v19, %v8126_v51  ;;  %v6820_v32 = vshrl.u32 %v6802_v6, %v6818_v31  ;;  %v6823_v56 = vadd.s32 127, %v6822_v15  ;;  %v6966_v45 = vsel %vm6965_vm10, %v6964_v47, 0 }
 0x68a   : > { %v6740_v14 = vsel %vm6738_vm6, %v8124_v20, %v6739_v58  ;;  %v6911_v43 = vadd.s32 536870912, %v6910_v40  ;;  %v6968_v25 = vand.u32 31, %v6966_v45  ;;  %v6967_v34 = vshrl.u32 %v6966_v45, 5 }
 0x68b   : > { %v6744_v24 = vsel %vm6737_vm7, %v6740_v14, %v6743_v12  ;;  %v6821_v59 = vor.u32 %v6820_v32, %v6819_v52  ;;  %v6824_v36 = vshll.u32 %v6823_v56, 23  ;;  %v7058_v49 = vand.u32 2147483647, %v15484_v44 }
 0x68c   : > { %v6745_v63 = vsel %vm6734_vm3, nan, %v6744_v24  ;;  %v14809_v5 = vshrl.u32 %v6911_v43, 30  ;;  %v6969_v23 = vsub.s32 32, %v6968_v25  ;;  %v7062_v26 = vshrl.u32 %v7061_v50, 23 }
 0x68d   : > { %v6825_v41 = vor.u32 4788187, %v6824_v36  ;;  %v6828_v28 = vcvt.s32.f32 %v6821_v59  ;;  %7221 = vst [vmem:[%s9727_s11 + $0x1d8] sm:$0xff] %v6745_v63  ;;  %v6971_v17 = vshll.u32 %v15318_v46, %v6968_v25  ;;  %v6974_v29 = vshll.u32 %v15310_v10, %v6968_v25 }
 0x68e   : > { %v6913_v16 = vshll.u32 %v14809_v5, 30  ;;  %v6972_v60 = vshrl.u32 %v15310_v10, %v6969_v23  ;;  %v6975_v39 = vshrl.u32 %v15311_v21, %v6969_v23  ;;  %v6977_v30 = vshll.u32 %v15311_v21, %v6968_v25 }
 0x68f   : > { %v6826_v42 = vand.u32 2147483647, %v6825_v41  ;;  %v6978_v27 = vshrl.u32 %v15312_v11, %v6969_v23  ;;  %v6980_v33 = vshll.u32 %v15312_v11, %v6968_v25  ;;  %v6981_v55 = vshrl.u32 %v15313_v53, %v6969_v23 }
 0x690   : > { %v14820_v2 = vsub.s32 %v6910_v40, %v6913_v16  ;;  %v14824_v7 = vand.u32 3, %v6839_v18  ;;  %v14826_v6 = vshll.u32 %v6962_v4, 8  ;;  %v7563_v13 = vadd.s32 4294967169, %v7062_v26 }
 0x691   : > { %v6829_v1 = vmul.f32 %v6828_v28, %v6826_v42  ;;  %v14830_v20 = vand.u32 8388607, %v7058_v49  ;;  %v6970_v47 = vshrl.u32 %v15318_v46, %v6969_v23  ;;  %v6973_v51 = vor.u32 %v6972_v60, %v6971_v17 }
 0x692   : > { %v6916_v0 = vsub.s32 0, %v14820_v2  ;;  %v6976_v19 = vor.u32 %v6975_v39, %v6974_v29  ;;  %v6979_v31 = vor.u32 %v6978_v27, %v6977_v30  ;;  %v6983_v52 = vshll.u32 %v15313_v53, %v6968_v25 }
 0x693   : > { %v6830_v54 = vxor.u32 2147483648, %v6829_v1  ;;  %v6984_v15 = vshrl.u32 %v15314_v35, %v6969_v23  ;;  %v6982_v22 = vor.u32 %v6981_v55, %v6980_v33  ;;  %vm6986_vm11 = vcmp.lt.s32.totalorder %v6967_v34, 1 }
 0x694   : > { %v7556_v57 = vmin.u32 %v6916_v0, %v14820_v2  ;;  %vm6989_vm13 = vcmp.lt.s32.totalorder %v6967_v34, 4  ;;  %v7068_v56 = vadd.s32 1, %v7563_v13  ;;  %vm6987_vm15 = vcmp.lt.s32.totalorder %v6967_v34, 2 }
 0x695   : > { %v6831_v58 = vsel %vm6748_vm4, %v6830_v54, %v6829_v1  ;;  %v6985_v32 = vor.u32 %v6984_v15, %v6983_v52  ;;  %vm6988_vm14 = vcmp.lt.s32.totalorder %v6967_v34, 3  ;;  %v6990_v14 = vsel %vm6986_vm11, %v6970_v47, %v6973_v51 }
 0x696   : > { %v6834_v12 = vsel %vm14784_vm5, %v15475_v61, %v6831_v58  ;;  %v6918_v40 = vclz %v7556_v57  ;;  %v6991_v45 = vsel %vm6989_vm13, %v6979_v31, 2102212464  ;;  %v6994_v50 = vsel %vm6986_vm11, %v6973_v51, %v6976_v19 }
 0x697   : > { %8127 = vcosq.f32 %v6834_v12  ;;  %v6992_v59 = vsel %vm6988_vm14, %v6976_v19, %v6991_v45  ;;  %v6995_v62 = vsel %vm6989_vm13, %v6982_v22, 920167782  ;;  %v6998_v36 = vsel %vm6986_vm11, %v6976_v19, %v6979_v31 }
 0x698   : > { %8129 = vsinq.f32 %v6834_v12  ;;  %v7557_v24 = vadd.s32 4294967294, %v6918_v40  ;;  %vm6842_vm0 = vcmp.eq.s32.totalorder %v14824_v7, 0  ;;  %v6906_v43 = vadd.s32 %v14760_v38, %v14780_v48 }
 0x699   : > { %v6996_v63 = vsel %vm6988_vm14, %v6979_v31, %v6995_v62  ;;  %v6999_v18 = vsel %vm6989_vm13, %v6985_v32, 1326507024  ;;  %vm7069_vm1 = vcmp.gt.s32.totalorder %v7068_v56, 0  ;;  %vm6841_vm2 = vcmp.lt.s32.totalorder %v14824_v7, 2 }
 0x69a   : > { %vm7558_vm3 = vcmp.lt.s32.totalorder %v7557_v24, 0  ;;  %v6993_v25 = vsel %vm6987_vm15, %v6990_v14, %v6992_v59  ;;  %v6997_v41 = vsel %vm6987_vm15, %v6994_v50, %v6996_v63  ;;  %v7000_v28 = vsel %vm6988_vm14, %v6982_v22, %v6999_v18 }
 0x69b   : > { %vm6838_vm4 = vweird.f32 %v15475_v61  ;;  %v6921_v4 = vsel %vm7558_vm3, 0, %v7557_v24  ;;  %v7001_v23 = vsel %vm6987_vm15, %v6998_v36, %v7000_v28  ;;  %vm6852_vm5 = vcmp.lt.s32.totalorder %v15478_v8, 0 }
 0x69c   : > { %v14860_v38 = vmul.u32.u64.low %v14826_v6, %v6997_v41  ;;  %v14861_v48 = vmul.u32.u64.high %v14826_v6, %v6997_v41, %v14860_v38  ;;  %v6922_v26 = vsub.s32 32, %v6921_v4  ;;  %v6923_v42 = vshll.u32 %v14820_v2, %v6921_v4 }
 0x69d   : > { %v6926_v16 = vsub.s32 4294967266, %v6921_v4  ;;  %v7070_v17 = vsel %vm7069_vm1, %v7068_v56, 0  ;;  %vm6845_vm7 = vcmp.eq.s32.totalorder %v14824_v7, 2  ;;  %v6936_v27 = vsub.s32 4, %v14809_v5 }
 0x69e   : > { %v14868_v29 = vmul.u32.u64.low %v14826_v6, %v7001_v23  ;;  %v14869_v60 = vmul.u32.u64.high %v14826_v6, %v7001_v23, %v14868_v29  ;;  %v7072_v34 = vand.u32 31, %v7070_v17  ;;  %v6924_v39 = vshrl.u32 %v6906_v43, %v6922_v26 }
 0x69f   : > { %v6927_v30 = vadd.s32 127, %v6926_v16  ;;  %v7066_v1 = vor.u32 8388608, %v14830_v20  ;;  %v7009_v33 = vmul.u32 %v14826_v6, %v6993_v25  ;;  %v7012_v55 = vadd.s32 1, %v14861_v48 }
 0x6a0   : > { %v14875_v2 = vshrl.u32 %v7070_v17, 5  ;;  %v7073_v13 = vsub.s32 32, %v7072_v34  ;;  %vm14879_vm6 = vcmp.le.f32.partialorder %v6850_v3, 0.7853982  ;;  %v6925_v47 = vor.u32 %v6924_v39, %v6923_v42 }
 0x6a1   : > { %v8128_v54 = vpop.eup %8127  ;;  %v6928_v51 = vshll.u32 %v6927_v30, 23  ;;  %v7075_v19 = vshll.u32 %v15318_v46, %v7072_v34  ;;  %v7078_v20 = vshll.u32 %v15310_v10, %v7072_v34  ;;  %vm7011_vm8 = vc.u32 %v14869_v60, %v14860_v38 }
 0x6a2   : > { %v8130_v31 = vpop.eup %8129  ;;  %v6846_v6 = vxor.u32 2147483648, %v8128_v54  ;;  %v7081_v52 = vshll.u32 %v15311_v21, %v7072_v34  ;;  %v7084_v15 = vshll.u32 %v15312_v11, %v7072_v34  ;;  %v6932_v57 = vcvt.s32.f32 %v6925_v47 }
 0x6a3   : > { %v6843_v58 = vxor.u32 2147483648, %v8130_v31  ;;  %v6929_v3 = vor.u32 4788187, %v6928_v51  ;;  %v7013_v22 = vsel %vm7011_vm8, %v7012_v55, %v14861_v48  ;;  %v7076_v56 = vshrl.u32 %v15310_v10, %v7073_v13 }
 0x6a4   : > { %v6847_v12 = vsel %vm6845_vm7, %v6846_v6, %v8130_v31  ;;  %v7014_v32 = vadd.s32 %v7013_v22, %v7009_v33  ;;  %v7079_v40 = vshrl.u32 %v15311_v21, %v7073_v13  ;;  %v7082_v50 = vshrl.u32 %v15312_v11, %v7073_v13 }
 0x6a5   : > { %v6844_v14 = vsel %vm6842_vm0, %v8128_v54, %v6843_v58  ;;  %v6930_v45 = vand.u32 2147483647, %v6929_v3  ;;  %v7085_v24 = vshrl.u32 %v15313_v53, %v7073_v13  ;;  %v6937_v62 = vsel %vm6852_vm5, %v6936_v27, %v14809_v5 }
 0x6a6   : > { %v6848_v59 = vsel %vm6841_vm2, %v6844_v14, %v6847_v12  ;;  %v7015_v36 = vadd.s32 536870912, %v7014_v32  ;;  %v7077_v10 = vor.u32 %v7076_v56, %v7075_v19  ;;  %v7080_v63 = vor.u32 %v7079_v40, %v7078_v20 }
 0x6a7   : > { %v6849_v21 = vsel %vm6838_vm4, nan, %v6848_v59  ;;  %v6933_v43 = vmul.f32 %v6932_v57, %v6930_v45  ;;  %v7086_v18 = vor.u32 %v7085_v24, %v7084_v15  ;;  %v7087_v11 = vshll.u32 %v15313_v53, %v7072_v34 }
 0x6a8   : > { %v14905_v25 = vshrl.u32 %v7015_v36, 30  ;;  %v7088_v41 = vshrl.u32 %v15314_v35, %v7073_v13  ;;  %vm7090_vm9 = vcmp.lt.s32.totalorder %v14875_v2, 1  ;;  %7222 = vst [vmem:[%s9727_s11 + $0x1e0] sm:$0xff] %v6849_v21  ;;  %v7083_v28 = vor.u32 %v7082_v50, %v7081_v52 }
 0x6a9   : > { %v6934_v7 = vxor.u32 2147483648, %v6933_v43  ;;  %vm7093_vm12 = vcmp.lt.s32.totalorder %v14875_v2, 4  ;;  %v7106_v5 = vshll.u32 %v7066_v1, 8  ;;  %v6939_v61 = vsel %vm14879_vm6, 0, %v6937_v62 }
 0x6aa   : > { %v7017_v4 = vshll.u32 %v14905_v25, 30  ;;  %vm7091_vm10 = vcmp.lt.s32.totalorder %v14875_v2, 2  ;;  %vm7092_vm11 = vcmp.lt.s32.totalorder %v14875_v2, 3  ;;  %v7089_v35 = vor.u32 %v7088_v41, %v7087_v11 }
 0x6ab   : > { %v6935_v53 = vsel %vm6852_vm5, %v6934_v7, %v6933_v43  ;;  %v7098_v23 = vsel %vm7090_vm9, %v7077_v10, %v7080_v63  ;;  %v7099_v48 = vsel %vm7093_vm12, %v7086_v18, 920167782  ;;  %v7074_v16 = vshrl.u32 %v15318_v46, %v7073_v13 }
 0x6ac   : > { %v6938_v26 = vsel %vm14879_vm6, %v15478_v8, %v6935_v53  ;;  %v7018_v42 = vsub.s32 %v7014_v32, %v7017_v4  ;;  %v7095_v17 = vsel %vm7093_vm12, %v7083_v28, 2102212464  ;;  %v7100_v29 = vsel %vm7092_vm11, %v7083_v28, %v7099_v48 }
 0x6ad   : > { %8131 = vcosq.f32 %v6938_v26  ;;  %v6943_v34 = vadd.s32 3, %v6939_v61  ;;  %v7101_v30 = vsel %vm7091_vm10, %v7098_v23, %v7100_v29  ;;  %v7102_v27 = vsel %vm7090_vm9, %v7080_v63, %v7083_v28 }
 0x6ae   : > { %8133 = vsinq.f32 %v6938_v26  ;;  %v7020_v39 = vsub.s32 0, %v7018_v42  ;;  %v7103_v1 = vsel %vm7093_vm12, %v7089_v35, 1326507024  ;;  %v7094_v13 = vsel %vm7090_vm9, %v7074_v16, %v7077_v10 }
 0x6af   : > { %v14937_v46 = vmul.u32.u64.low %v7106_v5, %v7101_v30  ;;  %v14938_v33 = vmul.u32.u64.high %v7106_v5, %v7101_v30, %v14937_v46  ;;  %v7096_v54 = vsel %vm7092_vm11, %v7080_v63, %v7095_v17  ;;  %v7104_v0 = vsel %vm7092_vm11, %v7086_v18, %v7103_v1 }
 0x6b0   : > { %v7560_v55 = vmin.u32 %v7020_v39, %v7018_v42  ;;  %v7105_v47 = vsel %vm7091_vm10, %v7102_v27, %v7104_v0  ;;  %v6944_v19 = vand.u32 3, %v6943_v34  ;;  %v7097_v20 = vsel %vm7091_vm10, %v7094_v13, %v7096_v54 }
 0x6b1   : > { %v14951_v31 = vmul.u32.u64.low %v7106_v5, %v7105_v47  ;;  %v14952_v6 = vmul.u32.u64.high %v7106_v5, %v7105_v47, %v14951_v31  ;;  %v7116_v15 = vadd.s32 1, %v14938_v33  ;;  %v7010_v58 = vadd.s32 %v14860_v38, %v14869_v60 }
 0x6b2   : > { %v7022_v51 = vclz %v7560_v55  ;;  %v7113_v3 = vmul.u32 %v7106_v5, %v7097_v20  ;;  %vm6946_vm15 = vcmp.eq.s32.totalorder %v6944_v19, 0  ;;  %vm6949_vm14 = vcmp.eq.s32.totalorder %v6944_v19, 2 }
 0x6b3   : > { %vm7115_vm0 = vc.u32 %v14952_v6, %v14937_v46  ;;  %vm6942_vm1 = vweird.f32 %v15478_v8  ;;  %vm6945_vm2 = vcmp.lt.s32.totalorder %v6944_v19, 2  ;;  %v7040_v41 = vsub.s32 4, %v14905_v25 }
 0x6b4   : > { %v7561_v52 = vadd.s32 4294967294, %v7022_v51  ;;  %v7117_v38 = vsel %vm7115_vm0, %v7116_v15, %v14938_v33  ;;  %vm6956_vm3 = vcmp.lt.s32.totalorder %v15481_v9, 0  ;;  %vm6955_vm4 = vcmp.le.f32.partialorder %v6954_v37, 0.7853982 }
 0x6b5   : > { %v7118_v24 = vadd.s32 %v7117_v38, %v7113_v3  ;;  %v7041_v4 = vsel %vm6956_vm3, %v7040_v41, %v14905_v25  ;;  %v7114_v29 = vadd.s32 %v14937_v46, %v14952_v6  ;;  %vm7046_vm9 = vweird.f32 %v15481_v9 }
 0x6b6   : > { %vm7562_vm13 = vcmp.lt.s32.totalorder %v7561_v52, 0  ;;  %v7043_v26 = vsel %vm6955_vm4, 0, %v7041_v4  ;;  %vm7060_vm12 = vcmp.lt.s32.totalorder %v15484_v44, 0  ;;  %vm7059_vm10 = vcmp.le.f32.partialorder %v7058_v49, 0.7853982 }
 0x6b7   : > { %v8132_v57 = vpop.eup %8131  ;;  %v7025_v22 = vsel %vm7562_vm13, 0, %v7561_v52  ;;  %v7119_v21 = vadd.s32 536870912, %v7118_v24  ;;  %v7047_v16 = vadd.s32 3, %v7043_v26 }
 0x6b8   : > { %v8134_v2 = vpop.eup %8133  ;;  %v6950_v12 = vxor.u32 2147483648, %v8132_v57  ;;  %v7026_v32 = vsub.s32 32, %v7025_v22  ;;  %v7027_v56 = vshll.u32 %v7018_v42, %v7025_v22  ;;  %v7030_v40 = vsub.s32 4294967266, %v7025_v22 }
 0x6b9   : > { %v6947_v14 = vxor.u32 2147483648, %v8134_v2  ;;  %v7120_v11 = vshrl.u32 %v7119_v21, 30  ;;  %v7048_v37 = vand.u32 3, %v7047_v16 }
 0x6ba   : > { %v6951_v60 = vsel %vm6949_vm14, %v6950_v12, %v8134_v2  ;;  %v7028_v45 = vshrl.u32 %v7010_v58, %v7026_v32  ;;  %v7031_v50 = vadd.s32 127, %v7030_v40  ;;  %vm7150_vm14 = vweird.f32 %v15484_v44 }
 0x6bb   : > { %v6948_v59 = vsel %vm6946_vm15, %v8132_v57, %v6947_v14  ;;  %v7121_v7 = vshll.u32 %v7120_v11, 30  ;;  %vm7053_vm7 = vcmp.eq.s32.totalorder %v7048_v37, 2  ;;  %vm7050_vm6 = vcmp.eq.s32.totalorder %v7048_v37, 0 }
 0x6bc   : > { %v6952_v62 = vsel %vm6945_vm2, %v6948_v59, %v6951_v60  ;;  %v7029_v36 = vor.u32 %v7028_v45, %v7027_v56  ;;  %v7032_v10 = vshll.u32 %v7031_v50, 23  ;;  %vm7049_vm8 = vcmp.lt.s32.totalorder %v7048_v37, 2 }
 0x6bd   : > { %v6953_v43 = vsel %vm6942_vm1, nan, %v6952_v62  ;;  %v7122_v5 = vsub.s32 %v7118_v24, %v7121_v7  ;;  %v7144_v6 = vsub.s32 4, %v7120_v11 }
 0x6be   : > { %v7033_v63 = vor.u32 4788187, %v7032_v10  ;;  %v7036_v18 = vcvt.s32.f32 %v7029_v36  ;;  %7223 = vst [vmem:[%s9727_s11 + $0x1e8] sm:$0xff] %v6953_v43 }
 0x6bf   : > { %v7124_v53 = vsub.s32 0, %v7122_v5  ;;  %v7145_v57 = vsel %vm7060_vm12, %v7144_v6, %v7120_v11 }
 0x6c0   : > { %v7034_v8 = vand.u32 2147483647, %v7033_v63  ;;  %v7147_v2 = vsel %vm7059_vm10, 0, %v7145_v57 }
 0x6c1   : > { %v7564_v23 = vmin.u32 %v7124_v53, %v7122_v5  ;;  %v7151_v12 = vadd.s32 3, %v7147_v2 }
 0x6c2   : > { %v7037_v28 = vmul.f32 %v7036_v18, %v7034_v8 }
 0x6c3   : > { %v7126_v42 = vclz %v7564_v23  ;;  %v7152_v32 = vand.u32 3, %v7151_v12 }
 0x6c4   : > { %v7038_v61 = vxor.u32 2147483648, %v7037_v28 }
 0x6c5   : > { %v7565_v17 = vadd.s32 4294967294, %v7126_v42  ;;  %vm7157_vm11 = vcmp.eq.s32.totalorder %v7152_v32, 2  ;;  %vm7154_vm13 = vcmp.eq.s32.totalorder %v7152_v32, 0  ;;  %vm7153_vm15 = vcmp.lt.s32.totalorder %v7152_v32, 2 }
 0x6c6   : > { %v7039_v35 = vsel %vm6956_vm3, %v7038_v61, %v7037_v28 }
 0x6c7   : > { %v7042_v48 = vsel %vm6955_vm4, %v15481_v9, %v7039_v35  ;;  %vm7566_vm5 = vcmp.lt.s32.totalorder %v7565_v17, 0 }
 0x6c8   : > { %8135 = vcosq.f32 %v7042_v48  ;;  %v7129_v34 = vsel %vm7566_vm5, 0, %v7565_v17 }
 0x6c9   : > { %8137 = vsinq.f32 %v7042_v48  ;;  %v7130_v39 = vsub.s32 32, %v7129_v34  ;;  %v7131_v30 = vshll.u32 %v7122_v5, %v7129_v34  ;;  %v7134_v25 = vsub.s32 4294967266, %v7129_v34 }
 0x6cb   : > { %v7132_v27 = vshrl.u32 %v7114_v29, %v7130_v39  ;;  %v7135_v1 = vadd.s32 127, %v7134_v25 }
 0x6cd   : > { %v7133_v55 = vor.u32 %v7132_v27, %v7131_v30  ;;  %v7136_v13 = vshll.u32 %v7135_v1, 23 }
 0x6cf   : > { %v7137_v51 = vor.u32 4788187, %v7136_v13  ;;  %v7140_v46 = vcvt.s32.f32 %v7133_v55 }
 0x6d1   : > { %v7138_v31 = vand.u32 2147483647, %v7137_v51 }
 0x6d2   : > { %v8136_v33 = vpop.eup %8135 }
 0x6d3   : > { %v8138_v54 = vpop.eup %8137  ;;  %v7054_v0 = vxor.u32 2147483648, %v8136_v33  ;;  %v7141_v58 = vmul.f32 %v7140_v46, %v7138_v31 }
 0x6d4   : > { %v7051_v47 = vxor.u32 2147483648, %v8138_v54 }
 0x6d5   : > { %v7055_v19 = vsel %vm7053_vm7, %v7054_v0, %v8138_v54  ;;  %v7142_v3 = vxor.u32 2147483648, %v7141_v58 }
 0x6d6   : > { %v7052_v20 = vsel %vm7050_vm6, %v8136_v33, %v7051_v47 }
 0x6d7   : > { %v7056_v52 = vsel %vm7049_vm8, %v7052_v20, %v7055_v19  ;;  %v7143_v22 = vsel %vm7060_vm12, %v7142_v3, %v7141_v58 }
 0x6d8   : > { %v7057_v15 = vsel %vm7046_vm9, nan, %v7056_v52  ;;  %v7146_v9 = vsel %vm7059_vm10, %v15484_v44, %v7143_v22 }
 0x6d9   : > { %7224 = vst [vmem:[%s9727_s11 + $0x1f0] sm:$0xff] %v7057_v15  ;;  %8139 = vcosq.f32 %v7146_v9 }
 0x6da   : > { %8141 = vsinq.f32 %v7146_v9 }
 0x6e3   : > { %v8140_v56 = vpop.eup %8139 }
 0x6e4   : > { %v8142_v40 = vpop.eup %8141  ;;  %v7158_v14 = vxor.u32 2147483648, %v8140_v56 }
 0x6e5   : > { %v7155_v49 = vxor.u32 2147483648, %v8142_v40 }
 0x6e6   : > { %v7159_v38 = vsel %vm7157_vm11, %v7158_v14, %v8142_v40 }
 0x6e7   : > { %v7156_v60 = vsel %vm7154_vm13, %v8140_v56, %v7155_v49 }
 0x6e8   : > { %v7160_v45 = vsel %vm7153_vm15, %v7156_v60, %v7159_v38 }
 0x6e9   : > { %v7161_v50 = vsel %vm7150_vm14, nan, %v7160_v45 }
 0x6ea   : > { %7225 = vst [vmem:[%s9727_s11 + $0x1f8] sm:$0xff] %v7161_v50 }
 0x6eb   : > { %8184 = shalt.err (!%p8181_p4)
}
 0x6ec   : > { %s8185_s25 = scalar_lea.hbm %s14983_s20, 8192  ;;  %s8189_s28 = scalar_lea.hbm %s15032_s1, 16384 }
 0x6ed   : > { %p8186_p7 = scmp.ne.s32.totalorder %s14983_s20, %s8185_s25  ;;  %p8190_p13 = scmp.lt.u32.totalorder %s14983_s20, %s15032_s1 }
 0x6ee   : > { %p8191_p1 = scmp.lt.u32.totalorder %s8189_s28, %s8185_s25  ;;  %p8193_p5 = scmp.lt.u32.totalorder %s8185_s25, %s14983_s20 }
 0x6ef   : > { %p8187_p8 = pnand %p8186_p7, %p15487_p6 }
 0x6f0   : > { %p8192_p0 = por %p8191_p1, %p8190_p13 }
 0x6f1   : > { %p8188_p11 = pneg %p8187_p8 }
 0x6f2   : > { %p8194_p9 = por %p8193_p5, %p8192_p0 }
 0x6f4   : > { %p8195_p10 = pnand %p8194_p9, %p8188_p11 }
 0x6f6   : > { %8198 = shalt.err (!%p8195_p10)
}
 0x6f7   : > { %s8247_s2 = smov 128   ;;  %s8248_s3 = smov 8  }
 0x6f8   : > { %7833 = dma.vmem_to_hbm [thread:$0]  (%p15487_p6), %s14985_s14, 8192, %s14983_s20, %s14990_s10, %s8247_s2, %s8247_s2, %s8248_s3  }
 0x6f9 PF: > { %p7845_p12 = scmp.ge.s32.totalorder %s8237_s9, 2  ;;  %s7255_s4 = sand.u32 1, %s8225_s6  }
 0x6fa   : > { %p15488_p2 = scmp.ne.s32.totalorder %s15115_s17, 0  ;;  %s7256_s5 = scalar_lea.sflag [#allocation4], %s7255_s4 }
 0x6fc   : > { %p7840_p3 = pnand %p7845_p12, %p15488_p2 }
 0x6fe   : > { %8220 = dma.done.wait (!%p7840_p3), %s7256_s5, 8192  }
 0x6ff   : > { %8222 = vsyncadd (!%p7840_p3), %s7256_s5, 4294959104  ;;  %p12_p4 = scmp.ge.s32.totalorder %s8284_s12, 4   ;;  %s15489_s6 = smov %s8229_s7 }
 0x700   : > { %s15490_s7 = smov %s8233_s8  ;;  %s15491_s8 = smov %s8295_s15 }
 0x701   : > { %s15492_s9 = smov %s8284_s12  ;;  %14 = sbr.rel (!%p12_p4) target bundleno = 4 (0x4), region = 61 }
 0x708   :  { %7261 = vsyncpa [#allocation3], 1 }
 0x709   :  { %7263 = vsyncpa [#allocation3 + $0x1], 1 }
 0x70a   :  { %7264 = vsyncpa [#allocation4], 1 }
 0x70b   :  { %7266 = vsyncpa [#allocation4 + $0x1], 1 }

</bundles_post_ra>
